<compile_context>
chip_gen: v5e
topology: v5e:2x2
jax: 0.10.0
libtpu: 0.0.40
codegen_flags: <defaults>
</compile_context>

<pallas_src>
import jax
import jax.numpy as jnp
from jax.experimental import pallas as pl
from jax.experimental.pallas import tpu as pltpu


# --------------------------------------------------------------------------------------
# Graph Laplacian with self loops (parameter-setup glue, plain JAX)
# --------------------------------------------------------------------------------------
def calculate_laplacian_with_self_loop(adj):
    adj = adj.astype(jnp.float32)
    n = adj.shape[0]
    a = adj + jnp.eye(n, dtype=jnp.float32)
    deg = jnp.sum(a, axis=1)
    d_inv_sqrt = jnp.diag(deg ** -0.5)
    return d_inv_sqrt @ a @ d_inv_sqrt


def _round_up(x, m):
    return ((x + m - 1) // m) * m


# --------------------------------------------------------------------------------------
# Pallas kernel: one batch tile per grid step; x-side graph convolutions precomputed for
# all timesteps before the (unrolled) recurrence; hidden state carried channel-major
# (BT, Hp, Np) in f32.
# --------------------------------------------------------------------------------------
def _tgcn_kernel(x_ref, lruT_ref, lT_ref, w1_ref, w2_ref,
                 pwr_ref, pwu_ref, pwc_ref, pbr_ref, pbu_ref, pbc_ref,
                 mr_ref, mu_ref,
                 h_out_ref,
                 xr_s, xu_s, xc_s):
    S, BT, Hp, Np = xr_s.shape
    f32 = jnp.float32
    cdt = lruT_ref.dtype                       # MXU operand dtype (f32 or bf16)

    # ---- loop-invariant operands, read / broadcast once (hoisted) --------------------
    lruT = lruT_ref[...]                       # (Np, 2Np)        [Lr^T | Lu^T]
    lT = lT_ref[...]                           # (Np, Np)         L^T
    w1 = w1_ref[...]                           # (BT*2Hp, BT*Hp)  block-diag [W1e^T; W1o^T]
    w2 = w2_ref[...]                           # (BT*Hp,  BT*Hp)  block-diag W2^T
    mask_r = jnp.broadcast_to(mr_ref[...] > 0.5, (BT, Hp, Np))
    mask_u = jnp.broadcast_to(mu_ref[...] > 0.5, (BT, Hp, Np))

    # ---- hoist x-side graph convolutions out of the recurrence -----------------------
    # x2 rows are (s*BT + b); one big matmul per Laplacian group, good MXU occupancy.
    x2 = x_ref[0]                                                      # (S*BT, Np)
    xl_ru = jnp.dot(x2, lruT, preferred_element_type=f32)              # (S*BT, 2Np)
    xl_c = jnp.dot(x2, lT, preferred_element_type=f32)                 # (S*BT, Np)
    xlr = xl_ru[:, :Np][:, None, :]                                    # (S*BT, 1, Np)
    xlu = xl_ru[:, Np:][:, None, :]
    xlc = xl_c[:, None, :]
    xr_s[...] = (xlr * pwr_ref[...][None] + pbr_ref[...][None]).reshape(S, BT, Hp, Np)
    xu_s[...] = (xlu * pwu_ref[...][None] + pbu_ref[...][None]).reshape(S, BT, Hp, Np)
    xc_s[...] = (xlc * pwc_ref[...][None] + pbc_ref[...][None]).reshape(S, BT, Hp, Np)

    # ---- recurrence: 4 dense MXU matmuls + EUP/VPU elementwise per timestep ----------
    def cell(t, h):                            # h: (BT, Hp, Np) f32, h[b, k, n] = h3[b, n, k]
        hmm = h.astype(cdt).reshape(BT * Hp, Np)
        hl = jnp.dot(hmm, lruT, preferred_element_type=f32)            # (BT*Hp, 2Np)
        mm = jnp.dot(w1, hl.astype(cdt), preferred_element_type=f32)   # (BT*2Hp, 2Np)
        mm = mm.reshape(BT, 2 * Hp, 2 * Np)
        mm_re = mm[:, :Hp, :Np]                # even W1-column half applied to Lr-mixed h
        mm_ro = mm[:, Hp:, :Np]                # odd  W1-column half applied to Lr-mixed h
        mm_ue = mm[:, :Hp, Np:]                # even half, Lu-mixed h
        mm_uo = mm[:, Hp:, Np:]                # odd  half, Lu-mixed h

        # lane-parity select reproduces torch.chunk on the flat (B, N*2H) gate tensor
        r = jax.nn.sigmoid(jnp.where(mask_r, mm_ro, mm_re) + xr_s[t])
        u = jax.nn.sigmoid(jnp.where(mask_u, mm_uo, mm_ue) + xu_s[t])

        rh = (r * h).astype(cdt).reshape(BT * Hp, Np)
        rhl = jnp.dot(rh, lT, preferred_element_type=f32)              # (BT*Hp, Np)
        mm_c = jnp.dot(w2, rhl.astype(cdt), preferred_element_type=f32)
        c = jnp.tanh(mm_c.reshape(BT, Hp, Np) + xc_s[t])

        return u * h + (1.0 - u) * c

    h0 = jnp.zeros((BT, Hp, Np), f32)
    h_out_ref[...] = jax.lax.fori_loop(0, S, cell, h0, unroll=True)


# --------------------------------------------------------------------------------------
# Wrapper: builds padded structured operands and drives the (parallel) batch-tile grid
# --------------------------------------------------------------------------------------
def tgcn_forward_pallas(inputs, adj, w1, b1, w2, b2, hidden_dim,
                        batch_tile=None, mxu_dtype=jnp.float32):
    f32 = jnp.float32
    inputs = inputs.astype(f32)
    w1 = w1.astype(f32)
    b1 = b1.astype(f32)
    w2 = w2.astype(f32)
    b2 = b2.astype(f32)

    B, S, N = inputs.shape
    H = hidden_dim
    Np = _round_up(N, 128)          # node axis -> lanes, 128-aligned
    Hp = _round_up(H, 8)            # channel axis -> sublanes, 8-aligned

    if batch_tile is None:
        BT = max(1, -(-B // 2))                 # grid >= 2 when B >= 2 (v7x both TCs)
        BT = min(BT, max(1, 512 // Hp))         # keep block-diag contraction dim modest
    else:
        BT = max(1, int(batch_tile))
    Bp = _round_up(B, BT)
    n_bt = Bp // BT

    L = calculate_laplacian_with_self_loop(adj)               # (N, N)

    # torch.chunk on the flat (B, N*2H) gate tensor:
    #   r[b, n, k] = g1[b, n//2,       (n%2)*H + k]
    #   u[b, n, k] = g1[b, (N+n)//2, ((N+n)%2)*H + k]
    # -> row-duplicated Laplacians + per-lane parity select between the two W1 column halves.
    n_idx = jnp.arange(N)
    Lr = L[n_idx // 2]
    Lu = L[(N + n_idx) // 2]
    par_r = n_idx % 2
    par_u = (N + n_idx) % 2

    def pad2(m, rows, cols):        # zero-fill padding is load-bearing for the lane invariant
        out = jnp.zeros((rows, cols), f32)
        return out.at[:m.shape[0], :m.shape[1]].set(m.astype(f32))

    lruT = jnp.concatenate([pad2(Lr.T, Np, Np), pad2(Lu.T, Np, Np)], axis=1)   # (Np, 2Np)
    lT = pad2(L.T, Np, Np)                                                     # (Np, Np)

    # Block-diagonal per-batch-tile channel weights: one dense MXU push applies the stacked
    # [W1e^T; W1o^T] (resp. W2^T) to every batch element of the tile at once.
    w1stackT = jnp.concatenate([pad2(w1[1:, :H].T, Hp, Hp),
                                pad2(w1[1:, H:].T, Hp, Hp)], axis=0)           # (2Hp, Hp)
    w2T = pad2(w2[1:, :].T, Hp, Hp)                                            # (Hp, Hp)
    eye_bt = jnp.eye(BT, dtype=f32)
    wbig1 = jnp.kron(eye_bt, w1stackT)        # (BT*2Hp, BT*Hp), block-diagonal
    wbig2 = jnp.kron(eye_bt, w2T)             # (BT*Hp,  BT*Hp)

    # per-(channel, node) input-row weight / bias planes with the chunk parity pre-selected
    o_idx = jnp.arange(H)
    col_r = par_r[None, :] * H + o_idx[:, None]            # (H, N)
    col_u = par_u[None, :] * H + o_idx[:, None]
    pwr = pad2(w1[0][col_r], Hp, Np)
    pwu = pad2(w1[0][col_u], Hp, Np)
    pwc = pad2(jnp.broadcast_to(w2[0][:, None], (H, N)), Hp, Np)
    pbr = pad2(b1[col_r], Hp, Np)
    pbu = pad2(b1[col_u], Hp, Np)
    pbc = pad2(jnp.broadcast_to(b2[:, None], (H, N)), Hp, Np)
    mr = pad2(jnp.broadcast_to(par_r[None, :].astype(f32), (H, N)), Hp, Np)
    mu = pad2(jnp.broadcast_to(par_u[None, :].astype(f32), (H, N)), Hp, Np)

    # sequence input, sublane-dense per batch tile: x_arr[i, s*BT + b, :N] = inputs[i*BT+b, s, :]
    x_sb = jnp.transpose(inputs, (1, 0, 2))                                    # (S, B, N)
    x_sb = jnp.zeros((S, Bp, N), f32).at[:, :B, :].set(x_sb)                   # (S, Bp, N)
    x_arr = jnp.transpose(x_sb.reshape(S, n_bt, BT, N), (1, 0, 2, 3)).reshape(n_bt, S * BT, N)
    x_arr = jnp.zeros((n_bt, S * BT, Np), f32).at[:, :, :N].set(x_arr)

    # MXU operands (Laplacians, channel weights, x) in the requested matmul dtype;
    # elementwise planes / masks / carried state stay f32.
    lruT = lruT.astype(mxu_dtype)
    lT = lT.astype(mxu_dtype)
    wbig1 = wbig1.astype(mxu_dtype)
    wbig2 = wbig2.astype(mxu_dtype)
    x_arr = x_arr.astype(mxu_dtype)

    const2 = lambda i: (0, 0)

    out = pl.pallas_call(
        _tgcn_kernel,
        out_shape=jax.ShapeDtypeStruct((Bp, Hp, Np), f32),
        grid=(n_bt,),
        in_specs=[
            pl.BlockSpec((1, S * BT, Np), lambda i: (i, 0, 0)),   # x sequence (per batch tile)
            pl.BlockSpec((Np, 2 * Np), const2),                   # [Lr^T | Lu^T]
            pl.BlockSpec((Np, Np), const2),                       # L^T
            pl.BlockSpec((BT * 2 * Hp, BT * Hp), const2),         # block-diag [W1e^T; W1o^T]
            pl.BlockSpec((BT * Hp, BT * Hp), const2),             # block-diag W2^T
            pl.BlockSpec((Hp, Np), const2),                       # pwr
            pl.BlockSpec((Hp, Np), const2),                       # pwu
            pl.BlockSpec((Hp, Np), const2),                       # pwc
            pl.BlockSpec((Hp, Np), const2),                       # pbr
            pl.BlockSpec((Hp, Np), const2),                       # pbu
            pl.BlockSpec((Hp, Np), const2),                       # pbc
            pl.BlockSpec((Hp, Np), const2),                       # parity mask r
            pl.BlockSpec((Hp, Np), const2),                       # parity mask u
        ],
        out_specs=pl.BlockSpec((BT, Hp, Np), lambda i: (i, 0, 0)),
        scratch_shapes=[pltpu.VMEM((S, BT, Hp, Np), f32),         # precomputed x-term (r gate)
                        pltpu.VMEM((S, BT, Hp, Np), f32),         # precomputed x-term (u gate)
                        pltpu.VMEM((S, BT, Hp, Np), f32)],        # precomputed x-term (cand.)
        compiler_params=pltpu.CompilerParams(
            dimension_semantics=("parallel",),
            vmem_limit_bytes=32 * 1024 * 1024,
        ),
    )(x_arr, lruT, lT, wbig1, wbig2, pwr, pwu, pwc, pbr, pbu, pbc, mr, mu)

    # kernel output is channel-major (B, H, N); the module output is (B, N, H)
    return jnp.transpose(out[:B, :H, :N], (0, 2, 1))


# --------------------------------------------------------------------------------------
# Pure-JAX reference mirroring the PyTorch module exactly (for verification)
# --------------------------------------------------------------------------------------
def tgcn_forward_ref(inputs, adj, w1, b1, w2, b2, hidden_dim):
    B, S, N = inputs.shape
    H = hidden_dim
    L = calculate_laplacian_with_self_loop(adj)

    def graph_conv(x, h_flat, W, bias, out_dim):
        inp = x.reshape(B, N, 1)
        hs = h_flat.reshape(B, N, H)
        cat = jnp.concatenate([inp, hs], axis=2)                   # (B, N, H+1)
        cat = jnp.transpose(cat, (1, 2, 0)).reshape(N, (H + 1) * B)
        a = L @ cat
        a = a.reshape(N, H + 1, B)
        a = jnp.transpose(a, (2, 0, 1)).reshape(B * N, H + 1)
        out = a @ W + bias
        return out.reshape(B, N * out_dim)

    h = jnp.zeros((B, N * H), jnp.float32)
    out = None
    for i in range(S):
        x = inputs[:, i, :]
        conc = jax.nn.sigmoid(graph_conv(x, h, w1, b1, 2 * H))
        r, u = conc[:, : N * H], conc[:, N * H:]
        c = jnp.tanh(graph_conv(x, r * h, w2, b2, H))
        h = u * h + (1.0 - u) * c
        out = h.reshape(B, N, H)
    return out


def _xavier_uniform(key, shape):
    fan_in, fan_out = shape
    bound = (6.0 / (fan_in + fan_out)) ** 0.5
    return jax.random.uniform(key, shape, jnp.float32, -bound, bound)


if __name__ == "__main__":
    B, S, N, H = 4, 6, 16, 32   # batch, seq_len, num_nodes, hidden_dim

    key = jax.random.PRNGKey(0)
    k_adj, k_x, k_w1, k_w2 = jax.random.split(key, 4)

    adj = (jax.random.uniform(k_adj, (N, N)) < 0.4).astype(jnp.float32)
    adj = jnp.maximum(adj, adj.T)                                  # symmetric adjacency
    inputs = jax.random.normal(k_x, (B, S, N), jnp.float32)

    # TGCNGraphConvolution params: weights (num_gru_units+1, output_dim), biases const
    w1 = _xavier_uniform(k_w1, (H + 1, 2 * H))   # graph_conv1, bias init 1.0
    b1 = jnp.full((2 * H,), 1.0, jnp.float32)
    w2 = _xavier_uniform(k_w2, (H + 1, H))       # graph_conv2, bias init 0.0
    b2 = jnp.zeros((H,), jnp.float32)

    ref = jax.block_until_ready(tgcn_forward_ref(inputs, adj, w1, b1, w2, b2, H))

    # full-precision path (default): bit-close to the reference
    out = jax.block_until_ready(tgcn_forward_pallas(inputs, adj, w1, b1, w2, b2, H))
    assert out.shape == (B, N, H), out.shape
    max_err = float(jnp.max(jnp.abs(out - ref)))
    assert jnp.allclose(out, ref, atol=2e-4, rtol=2e-4), max_err

    # bf16-at-the-MXU path (v6e/v7x throughput + VMEM); f32 accumulation & carried state
    out_bf16 = jax.block_until_ready(
        tgcn_forward_pallas(inputs, adj, w1, b1, w2, b2, H, mxu_dtype=jnp.bfloat16))
    max_err_bf16 = float(jnp.max(jnp.abs(out_bf16 - ref)))
    assert max_err_bf16 < 5e-2, max_err_bf16

    print("KERNEL_OK")
</pallas_src>

<mosaic_0001>
module attributes {stable_mosaic.version = 11 : i64} {
  func.func @_tgcn_kernel(%arg0: i32, %arg1: memref<1x12x128xf32, #tpu.memory_space<vmem>>, %arg2: memref<128x256xf32, #tpu.memory_space<vmem>>, %arg3: memref<128x128xf32, #tpu.memory_space<vmem>>, %arg4: memref<128x64xf32, #tpu.memory_space<vmem>>, %arg5: memref<64x64xf32, #tpu.memory_space<vmem>>, %arg6: memref<32x128xf32, #tpu.memory_space<vmem>>, %arg7: memref<32x128xf32, #tpu.memory_space<vmem>>, %arg8: memref<32x128xf32, #tpu.memory_space<vmem>>, %arg9: memref<32x128xf32, #tpu.memory_space<vmem>>, %arg10: memref<32x128xf32, #tpu.memory_space<vmem>>, %arg11: memref<32x128xf32, #tpu.memory_space<vmem>>, %arg12: memref<32x128xf32, #tpu.memory_space<vmem>>, %arg13: memref<32x128xf32, #tpu.memory_space<vmem>>, %arg14: memref<2x32x128xf32, #tpu.memory_space<vmem>>, %arg15: memref<6x2x32x128xf32, #tpu.memory_space<vmem>>, %arg16: memref<6x2x32x128xf32, #tpu.memory_space<vmem>>, %arg17: memref<6x2x32x128xf32, #tpu.memory_space<vmem>>) attributes {dimension_semantics = [#tpu.dimension_semantics<parallel>], iteration_bounds = array<i64: 2>, scalar_prefetch = 0 : i64, scratch_operands = 3 : i64, tpu.core_type = #tpu.core_type<tc>, window_params = [{transform_indices = @transform_0, window_bounds = array<i64: 1, 12, 128>}, {pipeline_mode = #tpu.pipeline_mode<synchronous>, transform_indices = @transform_1, window_bounds = array<i64: 128, 256>}, {pipeline_mode = #tpu.pipeline_mode<synchronous>, transform_indices = @transform_2, window_bounds = array<i64: 128, 128>}, {pipeline_mode = #tpu.pipeline_mode<synchronous>, transform_indices = @transform_3, window_bounds = array<i64: 128, 64>}, {pipeline_mode = #tpu.pipeline_mode<synchronous>, transform_indices = @transform_4, window_bounds = array<i64: 64, 64>}, {pipeline_mode = #tpu.pipeline_mode<synchronous>, transform_indices = @transform_5, window_bounds = array<i64: 32, 128>}, {pipeline_mode = #tpu.pipeline_mode<synchronous>, transform_indices = @transform_6, window_bounds = array<i64: 32, 128>}, {pipeline_mode = #tpu.pipeline_mode<synchronous>, transform_indices = @transform_7, window_bounds = array<i64: 32, 128>}, {pipeline_mode = #tpu.pipeline_mode<synchronous>, transform_indices = @transform_8, window_bounds = array<i64: 32, 128>}, {pipeline_mode = #tpu.pipeline_mode<synchronous>, transform_indices = @transform_9, window_bounds = array<i64: 32, 128>}, {pipeline_mode = #tpu.pipeline_mode<synchronous>, transform_indices = @transform_10, window_bounds = array<i64: 32, 128>}, {pipeline_mode = #tpu.pipeline_mode<synchronous>, transform_indices = @transform_11, window_bounds = array<i64: 32, 128>}, {pipeline_mode = #tpu.pipeline_mode<synchronous>, transform_indices = @transform_12, window_bounds = array<i64: 32, 128>}, {transform_indices = @transform_13, window_bounds = array<i64: 2, 32, 128>}]} {
    %c0 = arith.constant 0 : index
    %c0_0 = arith.constant 0 : index
    %0 = vector.load %arg2[%c0, %c0_0] : memref<128x256xf32, #tpu.memory_space<vmem>>, vector<128x256xf32>
    %c0_1 = arith.constant 0 : index
    %c0_2 = arith.constant 0 : index
    %1 = vector.load %arg3[%c0_1, %c0_2] : memref<128x128xf32, #tpu.memory_space<vmem>>, vector<128x128xf32>
    %c0_3 = arith.constant 0 : index
    %c0_4 = arith.constant 0 : index
    %2 = vector.load %arg4[%c0_3, %c0_4] : memref<128x64xf32, #tpu.memory_space<vmem>>, vector<128x64xf32>
    %c0_5 = arith.constant 0 : index
    %c0_6 = arith.constant 0 : index
    %3 = vector.load %arg5[%c0_5, %c0_6] : memref<64x64xf32, #tpu.memory_space<vmem>>, vector<64x64xf32>
    %c0_7 = arith.constant 0 : index
    %c0_8 = arith.constant 0 : index
    %4 = vector.load %arg12[%c0_7, %c0_8] : memref<32x128xf32, #tpu.memory_space<vmem>>, vector<32x128xf32>
    %cst = arith.constant 5.000000e-01 : f32
    %5 = vector.broadcast %cst : f32 to vector<32x128xf32>
    %6 = arith.cmpf ogt, %4, %5 : vector<32x128xf32>
    %7 = vector.shape_cast %6 : vector<32x128xi1> to vector<1x32x128xi1>
    %8 = vector.broadcast %7 : vector<1x32x128xi1> to vector<2x32x128xi1>
    %c0_9 = arith.constant 0 : index
    %c0_10 = arith.constant 0 : index
    %9 = vector.load %arg13[%c0_9, %c0_10] : memref<32x128xf32, #tpu.memory_space<vmem>>, vector<32x128xf32>
    %cst_11 = arith.constant 5.000000e-01 : f32
    %10 = vector.broadcast %cst_11 : f32 to vector<32x128xf32>
    %11 = arith.cmpf ogt, %9, %10 : vector<32x128xf32>
    %12 = vector.shape_cast %11 : vector<32x128xi1> to vector<1x32x128xi1>
    %13 = vector.broadcast %12 : vector<1x32x128xi1> to vector<2x32x128xi1>
    %c0_12 = arith.constant 0 : index
    %c0_13 = arith.constant 0 : index
    %c0_14 = arith.constant 0 : index
    %14 = vector.load %arg1[%c0_12, %c0_13, %c0_14] : memref<1x12x128xf32, #tpu.memory_space<vmem>>, vector<1x12x128xf32>
    %15 = vector.shape_cast %14 : vector<1x12x128xf32> to vector<12x128xf32>
    %cst_15 = arith.constant dense<0.000000e+00> : vector<12x256xf32>
    %16 = tpu.matmul %15, %0, %cst_15 {dimension_numbers = #tpu.dot_dimension_numbers<[1], [0], [0], [1], [0, 0, 1, 1], [], []>} : vector<12x128xf32>, vector<128x256xf32>, vector<12x256xf32> -> vector<12x256xf32>
    %cst_16 = arith.constant dense<0.000000e+00> : vector<12x128xf32>
    %17 = tpu.matmul %15, %1, %cst_16 {dimension_numbers = #tpu.dot_dimension_numbers<[1], [0], [0], [1], [0, 0, 1, 1], [], []>} : vector<12x128xf32>, vector<128x128xf32>, vector<12x128xf32> -> vector<12x128xf32>
    %18 = vector.extract_strided_slice %16 {offsets = [0, 0], sizes = [12, 128], strides = [1, 1]} : vector<12x256xf32> to vector<12x128xf32>
    %19 = vector.shape_cast %18 : vector<12x128xf32> to vector<12x1x128xf32>
    %20 = vector.extract_strided_slice %16 {offsets = [0, 128], sizes = [12, 128], strides = [1, 1]} : vector<12x256xf32> to vector<12x128xf32>
    %21 = vector.shape_cast %20 : vector<12x128xf32> to vector<12x1x128xf32>
    %22 = vector.shape_cast %17 : vector<12x128xf32> to vector<12x1x128xf32>
    %c0_17 = arith.constant 0 : index
    %c0_18 = arith.constant 0 : index
    %23 = vector.load %arg6[%c0_17, %c0_18] : memref<32x128xf32, #tpu.memory_space<vmem>>, vector<32x128xf32>
    %24 = vector.shape_cast %23 : vector<32x128xf32> to vector<1x32x128xf32>
    %25 = vector.broadcast %19 : vector<12x1x128xf32> to vector<12x32x128xf32>
    %26 = vector.broadcast %24 : vector<1x32x128xf32> to vector<12x32x128xf32>
    %27 = arith.mulf %25, %26 : vector<12x32x128xf32>
    %c0_19 = arith.constant 0 : index
    %c0_20 = arith.constant 0 : index
    %28 = vector.load %arg9[%c0_19, %c0_20] : memref<32x128xf32, #tpu.memory_space<vmem>>, vector<32x128xf32>
    %29 = vector.shape_cast %28 : vector<32x128xf32> to vector<1x32x128xf32>
    %30 = vector.broadcast %29 : vector<1x32x128xf32> to vector<12x32x128xf32>
    %31 = arith.addf %27, %30 : vector<12x32x128xf32>
    %32 = vector.shape_cast %31 : vector<12x32x128xf32> to vector<6x2x32x128xf32>
    %c0_21 = arith.constant 0 : index
    %c0_22 = arith.constant 0 : index
    %c0_23 = arith.constant 0 : index
    %c0_24 = arith.constant 0 : index
    %33 = vector.load %arg15[%c0_21, %c0_22, %c0_23, %c0_24] : memref<6x2x32x128xf32, #tpu.memory_space<vmem>>, vector<6x2x32x128xf32>
    tpu.vector_store %arg15[%c0_21, %c0_22, %c0_23, %c0_24], %32 {strides = array<i32>} : memref<6x2x32x128xf32, #tpu.memory_space<vmem>>, vector<6x2x32x128xf32>,
    %c0_25 = arith.constant 0 : index
    %c0_26 = arith.constant 0 : index
    %34 = vector.load %arg7[%c0_25, %c0_26] : memref<32x128xf32, #tpu.memory_space<vmem>>, vector<32x128xf32>
    %35 = vector.shape_cast %34 : vector<32x128xf32> to vector<1x32x128xf32>
    %36 = vector.broadcast %21 : vector<12x1x128xf32> to vector<12x32x128xf32>
    %37 = vector.broadcast %35 : vector<1x32x128xf32> to vector<12x32x128xf32>
    %38 = arith.mulf %36, %37 : vector<12x32x128xf32>
    %c0_27 = arith.constant 0 : index
    %c0_28 = arith.constant 0 : index
    %39 = vector.load %arg10[%c0_27, %c0_28] : memref<32x128xf32, #tpu.memory_space<vmem>>, vector<32x128xf32>
    %40 = vector.shape_cast %39 : vector<32x128xf32> to vector<1x32x128xf32>
    %41 = vector.broadcast %40 : vector<1x32x128xf32> to vector<12x32x128xf32>
    %42 = arith.addf %38, %41 : vector<12x32x128xf32>
    %43 = vector.shape_cast %42 : vector<12x32x128xf32> to vector<6x2x32x128xf32>
    %c0_29 = arith.constant 0 : index
    %c0_30 = arith.constant 0 : index
    %c0_31 = arith.constant 0 : index
    %c0_32 = arith.constant 0 : index
    %44 = vector.load %arg16[%c0_29, %c0_30, %c0_31, %c0_32] : memref<6x2x32x128xf32, #tpu.memory_space<vmem>>, vector<6x2x32x128xf32>
    tpu.vector_store %arg16[%c0_29, %c0_30, %c0_31, %c0_32], %43 {strides = array<i32>} : memref<6x2x32x128xf32, #tpu.memory_space<vmem>>, vector<6x2x32x128xf32>,
    %c0_33 = arith.constant 0 : index
    %c0_34 = arith.constant 0 : index
    %45 = vector.load %arg8[%c0_33, %c0_34] : memref<32x128xf32, #tpu.memory_space<vmem>>, vector<32x128xf32>
    %46 = vector.shape_cast %45 : vector<32x128xf32> to vector<1x32x128xf32>
    %47 = vector.broadcast %22 : vector<12x1x128xf32> to vector<12x32x128xf32>
    %48 = vector.broadcast %46 : vector<1x32x128xf32> to vector<12x32x128xf32>
    %49 = arith.mulf %47, %48 : vector<12x32x128xf32>
    %c0_35 = arith.constant 0 : index
    %c0_36 = arith.constant 0 : index
    %50 = vector.load %arg11[%c0_35, %c0_36] : memref<32x128xf32, #tpu.memory_space<vmem>>, vector<32x128xf32>
    %51 = vector.shape_cast %50 : vector<32x128xf32> to vector<1x32x128xf32>
    %52 = vector.broadcast %51 : vector<1x32x128xf32> to vector<12x32x128xf32>
    %53 = arith.addf %49, %52 : vector<12x32x128xf32>
    %54 = vector.shape_cast %53 : vector<12x32x128xf32> to vector<6x2x32x128xf32>
    %c0_37 = arith.constant 0 : index
    %c0_38 = arith.constant 0 : index
    %c0_39 = arith.constant 0 : index
    %c0_40 = arith.constant 0 : index
    %55 = vector.load %arg17[%c0_37, %c0_38, %c0_39, %c0_40] : memref<6x2x32x128xf32, #tpu.memory_space<vmem>>, vector<6x2x32x128xf32>
    tpu.vector_store %arg17[%c0_37, %c0_38, %c0_39, %c0_40], %54 {strides = array<i32>} : memref<6x2x32x128xf32, #tpu.memory_space<vmem>>, vector<6x2x32x128xf32>,
    %cst_41 = arith.constant 0.000000e+00 : f32
    %56 = vector.broadcast %cst_41 : f32 to vector<2x32x128xf32>
    %c0_i32 = arith.constant 0 : i32
    %57 = vector.shape_cast %56 : vector<2x32x128xf32> to vector<64x128xf32>
    %cst_42 = arith.constant dense<0.000000e+00> : vector<64x256xf32>
    %58 = tpu.matmul %57, %0, %cst_42 {dimension_numbers = #tpu.dot_dimension_numbers<[1], [0], [0], [1], [0, 0, 1, 1], [], []>} : vector<64x128xf32>, vector<128x256xf32>, vector<64x256xf32> -> vector<64x256xf32>
    %cst_43 = arith.constant dense<0.000000e+00> : vector<128x256xf32>
    %59 = tpu.matmul %2, %58, %cst_43 {dimension_numbers = #tpu.dot_dimension_numbers<[1], [0], [0], [1], [0, 0, 1, 1], [], []>} : vector<128x64xf32>, vector<64x256xf32>, vector<128x256xf32> -> vector<128x256xf32>
    %60 = vector.shape_cast %59 : vector<128x256xf32> to vector<2x64x256xf32>
    %61 = vector.extract_strided_slice %60 {offsets = [0, 0, 0], sizes = [2, 32, 128], strides = [1, 1, 1]} : vector<2x64x256xf32> to vector<2x32x128xf32>
    %62 = vector.extract_strided_slice %60 {offsets = [0, 32, 0], sizes = [2, 32, 128], strides = [1, 1, 1]} : vector<2x64x256xf32> to vector<2x32x128xf32>
    %63 = vector.extract_strided_slice %60 {offsets = [0, 0, 128], sizes = [2, 32, 128], strides = [1, 1, 1]} : vector<2x64x256xf32> to vector<2x32x128xf32>
    %64 = vector.extract_strided_slice %60 {offsets = [0, 32, 128], sizes = [2, 32, 128], strides = [1, 1, 1]} : vector<2x64x256xf32> to vector<2x32x128xf32>
    %65 = arith.select %8, %62, %61 : vector<2x32x128xi1>, vector<2x32x128xf32>
    %66 = arith.index_cast %c0_i32 : i32 to index
    %c0_44 = arith.constant 0 : index
    %c0_45 = arith.constant 0 : index
    %c0_46 = arith.constant 0 : index
    %67 = vector.load %arg15[%66, %c0_44, %c0_45, %c0_46] : memref<6x2x32x128xf32, #tpu.memory_space<vmem>>, vector<1x2x32x128xf32>
    %68 = vector.shape_cast %67 : vector<1x2x32x128xf32> to vector<2x32x128xf32>
    %69 = arith.addf %65, %68 : vector<2x32x128xf32>
    %70 = arith.negf %69 : vector<2x32x128xf32>
    %71 = math.exp %70 : vector<2x32x128xf32>
    %cst_47 = arith.constant 1.000000e+00 : f32
    %72 = vector.broadcast %cst_47 : f32 to vector<2x32x128xf32>
    %73 = arith.addf %72, %71 : vector<2x32x128xf32>
    %74 = arith.divf %72, %73 : vector<2x32x128xf32>
    %75 = arith.select %13, %64, %63 : vector<2x32x128xi1>, vector<2x32x128xf32>
    %76 = arith.index_cast %c0_i32 : i32 to index
    %c0_48 = arith.constant 0 : index
    %c0_49 = arith.constant 0 : index
    %c0_50 = arith.constant 0 : index
    %77 = vector.load %arg16[%76, %c0_48, %c0_49, %c0_50] : memref<6x2x32x128xf32, #tpu.memory_space<vmem>>, vector<1x2x32x128xf32>
    %78 = vector.shape_cast %77 : vector<1x2x32x128xf32> to vector<2x32x128xf32>
    %79 = arith.addf %75, %78 : vector<2x32x128xf32>
    %80 = arith.negf %79 : vector<2x32x128xf32>
    %81 = math.exp %80 : vector<2x32x128xf32>
    %cst_51 = arith.constant 1.000000e+00 : f32
    %82 = vector.broadcast %cst_51 : f32 to vector<2x32x128xf32>
    %83 = arith.addf %82, %81 : vector<2x32x128xf32>
    %84 = arith.divf %82, %83 : vector<2x32x128xf32>
    %85 = arith.mulf %74, %56 : vector<2x32x128xf32>
    %86 = vector.shape_cast %85 : vector<2x32x128xf32> to vector<64x128xf32>
    %cst_52 = arith.constant dense<0.000000e+00> : vector<64x128xf32>
    %87 = tpu.matmul %86, %1, %cst_52 {dimension_numbers = #tpu.dot_dimension_numbers<[1], [0], [0], [1], [0, 0, 1, 1], [], []>} : vector<64x128xf32>, vector<128x128xf32>, vector<64x128xf32> -> vector<64x128xf32>
    %cst_53 = arith.constant dense<0.000000e+00> : vector<64x128xf32>
    %88 = tpu.matmul %3, %87, %cst_53 {dimension_numbers = #tpu.dot_dimension_numbers<[1], [0], [0], [1], [0, 0, 1, 1], [], []>} : vector<64x64xf32>, vector<64x128xf32>, vector<64x128xf32> -> vector<64x128xf32>
    %89 = vector.shape_cast %88 : vector<64x128xf32> to vector<2x32x128xf32>
    %90 = arith.index_cast %c0_i32 : i32 to index
    %c0_54 = arith.constant 0 : index
    %c0_55 = arith.constant 0 : index
    %c0_56 = arith.constant 0 : index
    %91 = vector.load %arg17[%90, %c0_54, %c0_55, %c0_56] : memref<6x2x32x128xf32, #tpu.memory_space<vmem>>, vector<1x2x32x128xf32>
    %92 = vector.shape_cast %91 : vector<1x2x32x128xf32> to vector<2x32x128xf32>
    %93 = arith.addf %89, %92 : vector<2x32x128xf32>
    %94 = math.tanh %93 : vector<2x32x128xf32>
    %95 = arith.mulf %84, %56 : vector<2x32x128xf32>
    %cst_57 = arith.constant 1.000000e+00 : f32
    %96 = vector.broadcast %cst_57 : f32 to vector<2x32x128xf32>
    %97 = arith.subf %96, %84 : vector<2x32x128xf32>
    %98 = arith.mulf %97, %94 : vector<2x32x128xf32>
    %99 = arith.addf %95, %98 : vector<2x32x128xf32>
    %c1_i32 = arith.constant 1 : i32
    %100 = vector.shape_cast %99 : vector<2x32x128xf32> to vector<64x128xf32>
    %cst_58 = arith.constant dense<0.000000e+00> : vector<64x256xf32>
    %101 = tpu.matmul %100, %0, %cst_58 {dimension_numbers = #tpu.dot_dimension_numbers<[1], [0], [0], [1], [0, 0, 1, 1], [], []>} : vector<64x128xf32>, vector<128x256xf32>, vector<64x256xf32> -> vector<64x256xf32>
    %cst_59 = arith.constant dense<0.000000e+00> : vector<128x256xf32>
    %102 = tpu.matmul %2, %101, %cst_59 {dimension_numbers = #tpu.dot_dimension_numbers<[1], [0], [0], [1], [0, 0, 1, 1], [], []>} : vector<128x64xf32>, vector<64x256xf32>, vector<128x256xf32> -> vector<128x256xf32>
    %103 = vector.shape_cast %102 : vector<128x256xf32> to vector<2x64x256xf32>
    %104 = vector.extract_strided_slice %103 {offsets = [0, 0, 0], sizes = [2, 32, 128], strides = [1, 1, 1]} : vector<2x64x256xf32> to vector<2x32x128xf32>
    %105 = vector.extract_strided_slice %103 {offsets = [0, 32, 0], sizes = [2, 32, 128], strides = [1, 1, 1]} : vector<2x64x256xf32> to vector<2x32x128xf32>
    %106 = vector.extract_strided_slice %103 {offsets = [0, 0, 128], sizes = [2, 32, 128], strides = [1, 1, 1]} : vector<2x64x256xf32> to vector<2x32x128xf32>
    %107 = vector.extract_strided_slice %103 {offsets = [0, 32, 128], sizes = [2, 32, 128], strides = [1, 1, 1]} : vector<2x64x256xf32> to vector<2x32x128xf32>
    %108 = arith.select %8, %105, %104 : vector<2x32x128xi1>, vector<2x32x128xf32>
    %109 = arith.index_cast %c1_i32 : i32 to index
    %c0_60 = arith.constant 0 : index
    %c0_61 = arith.constant 0 : index
    %c0_62 = arith.constant 0 : index
    %110 = vector.load %arg15[%109, %c0_60, %c0_61, %c0_62] : memref<6x2x32x128xf32, #tpu.memory_space<vmem>>, vector<1x2x32x128xf32>
    %111 = vector.shape_cast %110 : vector<1x2x32x128xf32> to vector<2x32x128xf32>
    %112 = arith.addf %108, %111 : vector<2x32x128xf32>
    %113 = arith.negf %112 : vector<2x32x128xf32>
    %114 = math.exp %113 : vector<2x32x128xf32>
    %cst_63 = arith.constant 1.000000e+00 : f32
    %115 = vector.broadcast %cst_63 : f32 to vector<2x32x128xf32>
    %116 = arith.addf %115, %114 : vector<2x32x128xf32>
    %117 = arith.divf %115, %116 : vector<2x32x128xf32>
    %118 = arith.select %13, %107, %106 : vector<2x32x128xi1>, vector<2x32x128xf32>
    %119 = arith.index_cast %c1_i32 : i32 to index
    %c0_64 = arith.constant 0 : index
    %c0_65 = arith.constant 0 : index
    %c0_66 = arith.constant 0 : index
    %120 = vector.load %arg16[%119, %c0_64, %c0_65, %c0_66] : memref<6x2x32x128xf32, #tpu.memory_space<vmem>>, vector<1x2x32x128xf32>
    %121 = vector.shape_cast %120 : vector<1x2x32x128xf32> to vector<2x32x128xf32>
    %122 = arith.addf %118, %121 : vector<2x32x128xf32>
    %123 = arith.negf %122 : vector<2x32x128xf32>
    %124 = math.exp %123 : vector<2x32x128xf32>
    %cst_67 = arith.constant 1.000000e+00 : f32
    %125 = vector.broadcast %cst_67 : f32 to vector<2x32x128xf32>
    %126 = arith.addf %125, %124 : vector<2x32x128xf32>
    %127 = arith.divf %125, %126 : vector<2x32x128xf32>
    %128 = arith.mulf %117, %99 : vector<2x32x128xf32>
    %129 = vector.shape_cast %128 : vector<2x32x128xf32> to vector<64x128xf32>
    %cst_68 = arith.constant dense<0.000000e+00> : vector<64x128xf32>
    %130 = tpu.matmul %129, %1, %cst_68 {dimension_numbers = #tpu.dot_dimension_numbers<[1], [0], [0], [1], [0, 0, 1, 1], [], []>} : vector<64x128xf32>, vector<128x128xf32>, vector<64x128xf32> -> vector<64x128xf32>
    %cst_69 = arith.constant dense<0.000000e+00> : vector<64x128xf32>
    %131 = tpu.matmul %3, %130, %cst_69 {dimension_numbers = #tpu.dot_dimension_numbers<[1], [0], [0], [1], [0, 0, 1, 1], [], []>} : vector<64x64xf32>, vector<64x128xf32>, vector<64x128xf32> -> vector<64x128xf32>
    %132 = vector.shape_cast %131 : vector<64x128xf32> to vector<2x32x128xf32>
    %133 = arith.index_cast %c1_i32 : i32 to index
    %c0_70 = arith.constant 0 : index
    %c0_71 = arith.constant 0 : index
    %c0_72 = arith.constant 0 : index
    %134 = vector.load %arg17[%133, %c0_70, %c0_71, %c0_72] : memref<6x2x32x128xf32, #tpu.memory_space<vmem>>, vector<1x2x32x128xf32>
    %135 = vector.shape_cast %134 : vector<1x2x32x128xf32> to vector<2x32x128xf32>
    %136 = arith.addf %132, %135 : vector<2x32x128xf32>
    %137 = math.tanh %136 : vector<2x32x128xf32>
    %138 = arith.mulf %127, %99 : vector<2x32x128xf32>
    %cst_73 = arith.constant 1.000000e+00 : f32
    %139 = vector.broadcast %cst_73 : f32 to vector<2x32x128xf32>
    %140 = arith.subf %139, %127 : vector<2x32x128xf32>
    %141 = arith.mulf %140, %137 : vector<2x32x128xf32>
    %142 = arith.addf %138, %141 : vector<2x32x128xf32>
    %c2_i32 = arith.constant 2 : i32
    %143 = vector.shape_cast %142 : vector<2x32x128xf32> to vector<64x128xf32>
    %cst_74 = arith.constant dense<0.000000e+00> : vector<64x256xf32>
    %144 = tpu.matmul %143, %0, %cst_74 {dimension_numbers = #tpu.dot_dimension_numbers<[1], [0], [0], [1], [0, 0, 1, 1], [], []>} : vector<64x128xf32>, vector<128x256xf32>, vector<64x256xf32> -> vector<64x256xf32>
    %cst_75 = arith.constant dense<0.000000e+00> : vector<128x256xf32>
    %145 = tpu.matmul %2, %144, %cst_75 {dimension_numbers = #tpu.dot_dimension_numbers<[1], [0], [0], [1], [0, 0, 1, 1], [], []>} : vector<128x64xf32>, vector<64x256xf32>, vector<128x256xf32> -> vector<128x256xf32>
    %146 = vector.shape_cast %145 : vector<128x256xf32> to vector<2x64x256xf32>
    %147 = vector.extract_strided_slice %146 {offsets = [0, 0, 0], sizes = [2, 32, 128], strides = [1, 1, 1]} : vector<2x64x256xf32> to vector<2x32x128xf32>
    %148 = vector.extract_strided_slice %146 {offsets = [0, 32, 0], sizes = [2, 32, 128], strides = [1, 1, 1]} : vector<2x64x256xf32> to vector<2x32x128xf32>
    %149 = vector.extract_strided_slice %146 {offsets = [0, 0, 128], sizes = [2, 32, 128], strides = [1, 1, 1]} : vector<2x64x256xf32> to vector<2x32x128xf32>
    %150 = vector.extract_strided_slice %146 {offsets = [0, 32, 128], sizes = [2, 32, 128], strides = [1, 1, 1]} : vector<2x64x256xf32> to vector<2x32x128xf32>
    %151 = arith.select %8, %148, %147 : vector<2x32x128xi1>, vector<2x32x128xf32>
    %152 = arith.index_cast %c2_i32 : i32 to index
    %c0_76 = arith.constant 0 : index
    %c0_77 = arith.constant 0 : index
    %c0_78 = arith.constant 0 : index
    %153 = vector.load %arg15[%152, %c0_76, %c0_77, %c0_78] : memref<6x2x32x128xf32, #tpu.memory_space<vmem>>, vector<1x2x32x128xf32>
    %154 = vector.shape_cast %153 : vector<1x2x32x128xf32> to vector<2x32x128xf32>
    %155 = arith.addf %151, %154 : vector<2x32x128xf32>
    %156 = arith.negf %155 : vector<2x32x128xf32>
    %157 = math.exp %156 : vector<2x32x128xf32>
    %cst_79 = arith.constant 1.000000e+00 : f32
    %158 = vector.broadcast %cst_79 : f32 to vector<2x32x128xf32>
    %159 = arith.addf %158, %157 : vector<2x32x128xf32>
    %160 = arith.divf %158, %159 : vector<2x32x128xf32>
    %161 = arith.select %13, %150, %149 : vector<2x32x128xi1>, vector<2x32x128xf32>
    %162 = arith.index_cast %c2_i32 : i32 to index
    %c0_80 = arith.constant 0 : index
    %c0_81 = arith.constant 0 : index
    %c0_82 = arith.constant 0 : index
    %163 = vector.load %arg16[%162, %c0_80, %c0_81, %c0_82] : memref<6x2x32x128xf32, #tpu.memory_space<vmem>>, vector<1x2x32x128xf32>
    %164 = vector.shape_cast %163 : vector<1x2x32x128xf32> to vector<2x32x128xf32>
    %165 = arith.addf %161, %164 : vector<2x32x128xf32>
    %166 = arith.negf %165 : vector<2x32x128xf32>
    %167 = math.exp %166 : vector<2x32x128xf32>
    %cst_83 = arith.constant 1.000000e+00 : f32
    %168 = vector.broadcast %cst_83 : f32 to vector<2x32x128xf32>
    %169 = arith.addf %168, %167 : vector<2x32x128xf32>
    %170 = arith.divf %168, %169 : vector<2x32x128xf32>
    %171 = arith.mulf %160, %142 : vector<2x32x128xf32>
    %172 = vector.shape_cast %171 : vector<2x32x128xf32> to vector<64x128xf32>
    %cst_84 = arith.constant dense<0.000000e+00> : vector<64x128xf32>
    %173 = tpu.matmul %172, %1, %cst_84 {dimension_numbers = #tpu.dot_dimension_numbers<[1], [0], [0], [1], [0, 0, 1, 1], [], []>} : vector<64x128xf32>, vector<128x128xf32>, vector<64x128xf32> -> vector<64x128xf32>
    %cst_85 = arith.constant dense<0.000000e+00> : vector<64x128xf32>
    %174 = tpu.matmul %3, %173, %cst_85 {dimension_numbers = #tpu.dot_dimension_numbers<[1], [0], [0], [1], [0, 0, 1, 1], [], []>} : vector<64x64xf32>, vector<64x128xf32>, vector<64x128xf32> -> vector<64x128xf32>
    %175 = vector.shape_cast %174 : vector<64x128xf32> to vector<2x32x128xf32>
    %176 = arith.index_cast %c2_i32 : i32 to index
    %c0_86 = arith.constant 0 : index
    %c0_87 = arith.constant 0 : index
    %c0_88 = arith.constant 0 : index
    %177 = vector.load %arg17[%176, %c0_86, %c0_87, %c0_88] : memref<6x2x32x128xf32, #tpu.memory_space<vmem>>, vector<1x2x32x128xf32>
    %178 = vector.shape_cast %177 : vector<1x2x32x128xf32> to vector<2x32x128xf32>
    %179 = arith.addf %175, %178 : vector<2x32x128xf32>
    %180 = math.tanh %179 : vector<2x32x128xf32>
    %181 = arith.mulf %170, %142 : vector<2x32x128xf32>
    %cst_89 = arith.constant 1.000000e+00 : f32
    %182 = vector.broadcast %cst_89 : f32 to vector<2x32x128xf32>
    %183 = arith.subf %182, %170 : vector<2x32x128xf32>
    %184 = arith.mulf %183, %180 : vector<2x32x128xf32>
    %185 = arith.addf %181, %184 : vector<2x32x128xf32>
    %c3_i32 = arith.constant 3 : i32
    %186 = vector.shape_cast %185 : vector<2x32x128xf32> to vector<64x128xf32>
    %cst_90 = arith.constant dense<0.000000e+00> : vector<64x256xf32>
    %187 = tpu.matmul %186, %0, %cst_90 {dimension_numbers = #tpu.dot_dimension_numbers<[1], [0], [0], [1], [0, 0, 1, 1], [], []>} : vector<64x128xf32>, vector<128x256xf32>, vector<64x256xf32> -> vector<64x256xf32>
    %cst_91 = arith.constant dense<0.000000e+00> : vector<128x256xf32>
    %188 = tpu.matmul %2, %187, %cst_91 {dimension_numbers = #tpu.dot_dimension_numbers<[1], [0], [0], [1], [0, 0, 1, 1], [], []>} : vector<128x64xf32>, vector<64x256xf32>, vector<128x256xf32> -> vector<128x256xf32>
    %189 = vector.shape_cast %188 : vector<128x256xf32> to vector<2x64x256xf32>
    %190 = vector.extract_strided_slice %189 {offsets = [0, 0, 0], sizes = [2, 32, 128], strides = [1, 1, 1]} : vector<2x64x256xf32> to vector<2x32x128xf32>
    %191 = vector.extract_strided_slice %189 {offsets = [0, 32, 0], sizes = [2, 32, 128], strides = [1, 1, 1]} : vector<2x64x256xf32> to vector<2x32x128xf32>
    %192 = vector.extract_strided_slice %189 {offsets = [0, 0, 128], sizes = [2, 32, 128], strides = [1, 1, 1]} : vector<2x64x256xf32> to vector<2x32x128xf32>
    %193 = vector.extract_strided_slice %189 {offsets = [0, 32, 128], sizes = [2, 32, 128], strides = [1, 1, 1]} : vector<2x64x256xf32> to vector<2x32x128xf32>
    %194 = arith.select %8, %191, %190 : vector<2x32x128xi1>, vector<2x32x128xf32>
    %195 = arith.index_cast %c3_i32 : i32 to index
    %c0_92 = arith.constant 0 : index
    %c0_93 = arith.constant 0 : index
    %c0_94 = arith.constant 0 : index
    %196 = vector.load %arg15[%195, %c0_92, %c0_93, %c0_94] : memref<6x2x32x128xf32, #tpu.memory_space<vmem>>, vector<1x2x32x128xf32>
    %197 = vector.shape_cast %196 : vector<1x2x32x128xf32> to vector<2x32x128xf32>
    %198 = arith.addf %194, %197 : vector<2x32x128xf32>
    %199 = arith.negf %198 : vector<2x32x128xf32>
    %200 = math.exp %199 : vector<2x32x128xf32>
    %cst_95 = arith.constant 1.000000e+00 : f32
    %201 = vector.broadcast %cst_95 : f32 to vector<2x32x128xf32>
    %202 = arith.addf %201, %200 : vector<2x32x128xf32>
    %203 = arith.divf %201, %202 : vector<2x32x128xf32>
    %204 = arith.select %13, %193, %192 : vector<2x32x128xi1>, vector<2x32x128xf32>
    %205 = arith.index_cast %c3_i32 : i32 to index
    %c0_96 = arith.constant 0 : index
    %c0_97 = arith.constant 0 : index
    %c0_98 = arith.constant 0 : index
    %206 = vector.load %arg16[%205, %c0_96, %c0_97, %c0_98] : memref<6x2x32x128xf32, #tpu.memory_space<vmem>>, vector<1x2x32x128xf32>
    %207 = vector.shape_cast %206 : vector<1x2x32x128xf32> to vector<2x32x128xf32>
    %208 = arith.addf %204, %207 : vector<2x32x128xf32>
    %209 = arith.negf %208 : vector<2x32x128xf32>
    %210 = math.exp %209 : vector<2x32x128xf32>
    %cst_99 = arith.constant 1.000000e+00 : f32
    %211 = vector.broadcast %cst_99 : f32 to vector<2x32x128xf32>
    %212 = arith.addf %211, %210 : vector<2x32x128xf32>
    %213 = arith.divf %211, %212 : vector<2x32x128xf32>
    %214 = arith.mulf %203, %185 : vector<2x32x128xf32>
    %215 = vector.shape_cast %214 : vector<2x32x128xf32> to vector<64x128xf32>
    %cst_100 = arith.constant dense<0.000000e+00> : vector<64x128xf32>
    %216 = tpu.matmul %215, %1, %cst_100 {dimension_numbers = #tpu.dot_dimension_numbers<[1], [0], [0], [1], [0, 0, 1, 1], [], []>} : vector<64x128xf32>, vector<128x128xf32>, vector<64x128xf32> -> vector<64x128xf32>
    %cst_101 = arith.constant dense<0.000000e+00> : vector<64x128xf32>
    %217 = tpu.matmul %3, %216, %cst_101 {dimension_numbers = #tpu.dot_dimension_numbers<[1], [0], [0], [1], [0, 0, 1, 1], [], []>} : vector<64x64xf32>, vector<64x128xf32>, vector<64x128xf32> -> vector<64x128xf32>
    %218 = vector.shape_cast %217 : vector<64x128xf32> to vector<2x32x128xf32>
    %219 = arith.index_cast %c3_i32 : i32 to index
    %c0_102 = arith.constant 0 : index
    %c0_103 = arith.constant 0 : index
    %c0_104 = arith.constant 0 : index
    %220 = vector.load %arg17[%219, %c0_102, %c0_103, %c0_104] : memref<6x2x32x128xf32, #tpu.memory_space<vmem>>, vector<1x2x32x128xf32>
    %221 = vector.shape_cast %220 : vector<1x2x32x128xf32> to vector<2x32x128xf32>
    %222 = arith.addf %218, %221 : vector<2x32x128xf32>
    %223 = math.tanh %222 : vector<2x32x128xf32>
    %224 = arith.mulf %213, %185 : vector<2x32x128xf32>
    %cst_105 = arith.constant 1.000000e+00 : f32
    %225 = vector.broadcast %cst_105 : f32 to vector<2x32x128xf32>
    %226 = arith.subf %225, %213 : vector<2x32x128xf32>
    %227 = arith.mulf %226, %223 : vector<2x32x128xf32>
    %228 = arith.addf %224, %227 : vector<2x32x128xf32>
    %c4_i32 = arith.constant 4 : i32
    %229 = vector.shape_cast %228 : vector<2x32x128xf32> to vector<64x128xf32>
    %cst_106 = arith.constant dense<0.000000e+00> : vector<64x256xf32>
    %230 = tpu.matmul %229, %0, %cst_106 {dimension_numbers = #tpu.dot_dimension_numbers<[1], [0], [0], [1], [0, 0, 1, 1], [], []>} : vector<64x128xf32>, vector<128x256xf32>, vector<64x256xf32> -> vector<64x256xf32>
    %cst_107 = arith.constant dense<0.000000e+00> : vector<128x256xf32>
    %231 = tpu.matmul %2, %230, %cst_107 {dimension_numbers = #tpu.dot_dimension_numbers<[1], [0], [0], [1], [0, 0, 1, 1], [], []>} : vector<128x64xf32>, vector<64x256xf32>, vector<128x256xf32> -> vector<128x256xf32>
    %232 = vector.shape_cast %231 : vector<128x256xf32> to vector<2x64x256xf32>
    %233 = vector.extract_strided_slice %232 {offsets = [0, 0, 0], sizes = [2, 32, 128], strides = [1, 1, 1]} : vector<2x64x256xf32> to vector<2x32x128xf32>
    %234 = vector.extract_strided_slice %232 {offsets = [0, 32, 0], sizes = [2, 32, 128], strides = [1, 1, 1]} : vector<2x64x256xf32> to vector<2x32x128xf32>
    %235 = vector.extract_strided_slice %232 {offsets = [0, 0, 128], sizes = [2, 32, 128], strides = [1, 1, 1]} : vector<2x64x256xf32> to vector<2x32x128xf32>
    %236 = vector.extract_strided_slice %232 {offsets = [0, 32, 128], sizes = [2, 32, 128], strides = [1, 1, 1]} : vector<2x64x256xf32> to vector<2x32x128xf32>
    %237 = arith.select %8, %234, %233 : vector<2x32x128xi1>, vector<2x32x128xf32>
    %238 = arith.index_cast %c4_i32 : i32 to index
    %c0_108 = arith.constant 0 : index
    %c0_109 = arith.constant 0 : index
    %c0_110 = arith.constant 0 : index
    %239 = vector.load %arg15[%238, %c0_108, %c0_109, %c0_110] : memref<6x2x32x128xf32, #tpu.memory_space<vmem>>, vector<1x2x32x128xf32>
    %240 = vector.shape_cast %239 : vector<1x2x32x128xf32> to vector<2x32x128xf32>
    %241 = arith.addf %237, %240 : vector<2x32x128xf32>
    %242 = arith.negf %241 : vector<2x32x128xf32>
    %243 = math.exp %242 : vector<2x32x128xf32>
    %cst_111 = arith.constant 1.000000e+00 : f32
    %244 = vector.broadcast %cst_111 : f32 to vector<2x32x128xf32>
    %245 = arith.addf %244, %243 : vector<2x32x128xf32>
    %246 = arith.divf %244, %245 : vector<2x32x128xf32>
    %247 = arith.select %13, %236, %235 : vector<2x32x128xi1>, vector<2x32x128xf32>
    %248 = arith.index_cast %c4_i32 : i32 to index
    %c0_112 = arith.constant 0 : index
    %c0_113 = arith.constant 0 : index
    %c0_114 = arith.constant 0 : index
    %249 = vector.load %arg16[%248, %c0_112, %c0_113, %c0_114] : memref<6x2x32x128xf32, #tpu.memory_space<vmem>>, vector<1x2x32x128xf32>
    %250 = vector.shape_cast %249 : vector<1x2x32x128xf32> to vector<2x32x128xf32>
    %251 = arith.addf %247, %250 : vector<2x32x128xf32>
    %252 = arith.negf %251 : vector<2x32x128xf32>
    %253 = math.exp %252 : vector<2x32x128xf32>
    %cst_115 = arith.constant 1.000000e+00 : f32
    %254 = vector.broadcast %cst_115 : f32 to vector<2x32x128xf32>
    %255 = arith.addf %254, %253 : vector<2x32x128xf32>
    %256 = arith.divf %254, %255 : vector<2x32x128xf32>
    %257 = arith.mulf %246, %228 : vector<2x32x128xf32>
    %258 = vector.shape_cast %257 : vector<2x32x128xf32> to vector<64x128xf32>
    %cst_116 = arith.constant dense<0.000000e+00> : vector<64x128xf32>
    %259 = tpu.matmul %258, %1, %cst_116 {dimension_numbers = #tpu.dot_dimension_numbers<[1], [0], [0], [1], [0, 0, 1, 1], [], []>} : vector<64x128xf32>, vector<128x128xf32>, vector<64x128xf32> -> vector<64x128xf32>
    %cst_117 = arith.constant dense<0.000000e+00> : vector<64x128xf32>
    %260 = tpu.matmul %3, %259, %cst_117 {dimension_numbers = #tpu.dot_dimension_numbers<[1], [0], [0], [1], [0, 0, 1, 1], [], []>} : vector<64x64xf32>, vector<64x128xf32>, vector<64x128xf32> -> vector<64x128xf32>
    %261 = vector.shape_cast %260 : vector<64x128xf32> to vector<2x32x128xf32>
    %262 = arith.index_cast %c4_i32 : i32 to index
    %c0_118 = arith.constant 0 : index
    %c0_119 = arith.constant 0 : index
    %c0_120 = arith.constant 0 : index
    %263 = vector.load %arg17[%262, %c0_118, %c0_119, %c0_120] : memref<6x2x32x128xf32, #tpu.memory_space<vmem>>, vector<1x2x32x128xf32>
    %264 = vector.shape_cast %263 : vector<1x2x32x128xf32> to vector<2x32x128xf32>
    %265 = arith.addf %261, %264 : vector<2x32x128xf32>
    %266 = math.tanh %265 : vector<2x32x128xf32>
    %267 = arith.mulf %256, %228 : vector<2x32x128xf32>
    %cst_121 = arith.constant 1.000000e+00 : f32
    %268 = vector.broadcast %cst_121 : f32 to vector<2x32x128xf32>
    %269 = arith.subf %268, %256 : vector<2x32x128xf32>
    %270 = arith.mulf %269, %266 : vector<2x32x128xf32>
    %271 = arith.addf %267, %270 : vector<2x32x128xf32>
    %c5_i32 = arith.constant 5 : i32
    %272 = vector.shape_cast %271 : vector<2x32x128xf32> to vector<64x128xf32>
    %cst_122 = arith.constant dense<0.000000e+00> : vector<64x256xf32>
    %273 = tpu.matmul %272, %0, %cst_122 {dimension_numbers = #tpu.dot_dimension_numbers<[1], [0], [0], [1], [0, 0, 1, 1], [], []>} : vector<64x128xf32>, vector<128x256xf32>, vector<64x256xf32> -> vector<64x256xf32>
    %cst_123 = arith.constant dense<0.000000e+00> : vector<128x256xf32>
    %274 = tpu.matmul %2, %273, %cst_123 {dimension_numbers = #tpu.dot_dimension_numbers<[1], [0], [0], [1], [0, 0, 1, 1], [], []>} : vector<128x64xf32>, vector<64x256xf32>, vector<128x256xf32> -> vector<128x256xf32>
    %275 = vector.shape_cast %274 : vector<128x256xf32> to vector<2x64x256xf32>
    %276 = vector.extract_strided_slice %275 {offsets = [0, 0, 0], sizes = [2, 32, 128], strides = [1, 1, 1]} : vector<2x64x256xf32> to vector<2x32x128xf32>
    %277 = vector.extract_strided_slice %275 {offsets = [0, 32, 0], sizes = [2, 32, 128], strides = [1, 1, 1]} : vector<2x64x256xf32> to vector<2x32x128xf32>
    %278 = vector.extract_strided_slice %275 {offsets = [0, 0, 128], sizes = [2, 32, 128], strides = [1, 1, 1]} : vector<2x64x256xf32> to vector<2x32x128xf32>
    %279 = vector.extract_strided_slice %275 {offsets = [0, 32, 128], sizes = [2, 32, 128], strides = [1, 1, 1]} : vector<2x64x256xf32> to vector<2x32x128xf32>
    %280 = arith.select %8, %277, %276 : vector<2x32x128xi1>, vector<2x32x128xf32>
    %281 = arith.index_cast %c5_i32 : i32 to index
    %c0_124 = arith.constant 0 : index
    %c0_125 = arith.constant 0 : index
    %c0_126 = arith.constant 0 : index
    %282 = vector.load %arg15[%281, %c0_124, %c0_125, %c0_126] : memref<6x2x32x128xf32, #tpu.memory_space<vmem>>, vector<1x2x32x128xf32>
    %283 = vector.shape_cast %282 : vector<1x2x32x128xf32> to vector<2x32x128xf32>
    %284 = arith.addf %280, %283 : vector<2x32x128xf32>
    %285 = arith.negf %284 : vector<2x32x128xf32>
    %286 = math.exp %285 : vector<2x32x128xf32>
    %cst_127 = arith.constant 1.000000e+00 : f32
    %287 = vector.broadcast %cst_127 : f32 to vector<2x32x128xf32>
    %288 = arith.addf %287, %286 : vector<2x32x128xf32>
    %289 = arith.divf %287, %288 : vector<2x32x128xf32>
    %290 = arith.select %13, %279, %278 : vector<2x32x128xi1>, vector<2x32x128xf32>
    %291 = arith.index_cast %c5_i32 : i32 to index
    %c0_128 = arith.constant 0 : index
    %c0_129 = arith.constant 0 : index
    %c0_130 = arith.constant 0 : index
    %292 = vector.load %arg16[%291, %c0_128, %c0_129, %c0_130] : memref<6x2x32x128xf32, #tpu.memory_space<vmem>>, vector<1x2x32x128xf32>
    %293 = vector.shape_cast %292 : vector<1x2x32x128xf32> to vector<2x32x128xf32>
    %294 = arith.addf %290, %293 : vector<2x32x128xf32>
    %295 = arith.negf %294 : vector<2x32x128xf32>
    %296 = math.exp %295 : vector<2x32x128xf32>
    %cst_131 = arith.constant 1.000000e+00 : f32
    %297 = vector.broadcast %cst_131 : f32 to vector<2x32x128xf32>
    %298 = arith.addf %297, %296 : vector<2x32x128xf32>
    %299 = arith.divf %297, %298 : vector<2x32x128xf32>
    %300 = arith.mulf %289, %271 : vector<2x32x128xf32>
    %301 = vector.shape_cast %300 : vector<2x32x128xf32> to vector<64x128xf32>
    %cst_132 = arith.constant dense<0.000000e+00> : vector<64x128xf32>
    %302 = tpu.matmul %301, %1, %cst_132 {dimension_numbers = #tpu.dot_dimension_numbers<[1], [0], [0], [1], [0, 0, 1, 1], [], []>} : vector<64x128xf32>, vector<128x128xf32>, vector<64x128xf32> -> vector<64x128xf32>
    %cst_133 = arith.constant dense<0.000000e+00> : vector<64x128xf32>
    %303 = tpu.matmul %3, %302, %cst_133 {dimension_numbers = #tpu.dot_dimension_numbers<[1], [0], [0], [1], [0, 0, 1, 1], [], []>} : vector<64x64xf32>, vector<64x128xf32>, vector<64x128xf32> -> vector<64x128xf32>
    %304 = vector.shape_cast %303 : vector<64x128xf32> to vector<2x32x128xf32>
    %305 = arith.index_cast %c5_i32 : i32 to index
    %c0_134 = arith.constant 0 : index
    %c0_135 = arith.constant 0 : index
    %c0_136 = arith.constant 0 : index
    %306 = vector.load %arg17[%305, %c0_134, %c0_135, %c0_136] : memref<6x2x32x128xf32, #tpu.memory_space<vmem>>, vector<1x2x32x128xf32>
    %307 = vector.shape_cast %306 : vector<1x2x32x128xf32> to vector<2x32x128xf32>
    %308 = arith.addf %304, %307 : vector<2x32x128xf32>
    %309 = math.tanh %308 : vector<2x32x128xf32>
    %310 = arith.mulf %299, %271 : vector<2x32x128xf32>
    %cst_137 = arith.constant 1.000000e+00 : f32
    %311 = vector.broadcast %cst_137 : f32 to vector<2x32x128xf32>
    %312 = arith.subf %311, %299 : vector<2x32x128xf32>
    %313 = arith.mulf %312, %309 : vector<2x32x128xf32>
    %314 = arith.addf %310, %313 : vector<2x32x128xf32>
    %c6_i32 = arith.constant 6 : i32
    %c0_138 = arith.constant 0 : index
    %c0_139 = arith.constant 0 : index
    %c0_140 = arith.constant 0 : index
    %315 = vector.load %arg14[%c0_138, %c0_139, %c0_140] : memref<2x32x128xf32, #tpu.memory_space<vmem>>, vector<2x32x128xf32>
    tpu.vector_store %arg14[%c0_138, %c0_139, %c0_140], %314 {strides = array<i32>} : memref<2x32x128xf32, #tpu.memory_space<vmem>>, vector<2x32x128xf32>,
    return
  }
  func.func @transform_0(%arg0: i32) -> (i32, i32, i32) {
    %c0_i32 = arith.constant 0 : i32
    %c0_i32_0 = arith.constant 0 : i32
    %c0_i32_1 = arith.constant 0 : i32
    return %arg0, %c0_i32, %c0_i32_0 : i32, i32, i32
  }
  func.func @transform_1(%arg0: i32) -> (i32, i32) {
    %c0_i32 = arith.constant 0 : i32
    %c0_i32_0 = arith.constant 0 : i32
    %c0_i32_1 = arith.constant 0 : i32
    return %c0_i32, %c0_i32_0 : i32, i32
  }
  func.func @transform_2(%arg0: i32) -> (i32, i32) {
    %c0_i32 = arith.constant 0 : i32
    %c0_i32_0 = arith.constant 0 : i32
    %c0_i32_1 = arith.constant 0 : i32
    return %c0_i32, %c0_i32_0 : i32, i32
  }
  func.func @transform_3(%arg0: i32) -> (i32, i32) {
    %c0_i32 = arith.constant 0 : i32
    %c0_i32_0 = arith.constant 0 : i32
    %c0_i32_1 = arith.constant 0 : i32
    return %c0_i32, %c0_i32_0 : i32, i32
  }
  func.func @transform_4(%arg0: i32) -> (i32, i32) {
    %c0_i32 = arith.constant 0 : i32
    %c0_i32_0 = arith.constant 0 : i32
    %c0_i32_1 = arith.constant 0 : i32
    return %c0_i32, %c0_i32_0 : i32, i32
  }
  func.func @transform_5(%arg0: i32) -> (i32, i32) {
    %c0_i32 = arith.constant 0 : i32
    %c0_i32_0 = arith.constant 0 : i32
    %c0_i32_1 = arith.constant 0 : i32
    return %c0_i32, %c0_i32_0 : i32, i32
  }
  func.func @transform_6(%arg0: i32) -> (i32, i32) {
    %c0_i32 = arith.constant 0 : i32
    %c0_i32_0 = arith.constant 0 : i32
    %c0_i32_1 = arith.constant 0 : i32
    return %c0_i32, %c0_i32_0 : i32, i32
  }
  func.func @transform_7(%arg0: i32) -> (i32, i32) {
    %c0_i32 = arith.constant 0 : i32
    %c0_i32_0 = arith.constant 0 : i32
    %c0_i32_1 = arith.constant 0 : i32
    return %c0_i32, %c0_i32_0 : i32, i32
  }
  func.func @transform_8(%arg0: i32) -> (i32, i32) {
    %c0_i32 = arith.constant 0 : i32
    %c0_i32_0 = arith.constant 0 : i32
    %c0_i32_1 = arith.constant 0 : i32
    return %c0_i32, %c0_i32_0 : i32, i32
  }
  func.func @transform_9(%arg0: i32) -> (i32, i32) {
    %c0_i32 = arith.constant 0 : i32
    %c0_i32_0 = arith.constant 0 : i32
    %c0_i32_1 = arith.constant 0 : i32
    return %c0_i32, %c0_i32_0 : i32, i32
  }
  func.func @transform_10(%arg0: i32) -> (i32, i32) {
    %c0_i32 = arith.constant 0 : i32
    %c0_i32_0 = arith.constant 0 : i32
    %c0_i32_1 = arith.constant 0 : i32
    return %c0_i32, %c0_i32_0 : i32, i32
  }
  func.func @transform_11(%arg0: i32) -> (i32, i32) {
    %c0_i32 = arith.constant 0 : i32
    %c0_i32_0 = arith.constant 0 : i32
    %c0_i32_1 = arith.constant 0 : i32
    return %c0_i32, %c0_i32_0 : i32, i32
  }
  func.func @transform_12(%arg0: i32) -> (i32, i32) {
    %c0_i32 = arith.constant 0 : i32
    %c0_i32_0 = arith.constant 0 : i32
    %c0_i32_1 = arith.constant 0 : i32
    return %c0_i32, %c0_i32_0 : i32, i32
  }
  func.func @transform_13(%arg0: i32) -> (i32, i32, i32) {
    %c0_i32 = arith.constant 0 : i32
    %c0_i32_0 = arith.constant 0 : i32
    %c0_i32_1 = arith.constant 0 : i32
    return %arg0, %c0_i32, %c0_i32_0 : i32, i32, i32
  }
}

</mosaic_0001>

<bundles_post_ra>
// kernel: tpu_custom_call.1
= control target key start
LH: loop header
LB: loop body
LE: loop exit
PB: predicated region body
PF: predicated region fallthrough
CT: control target
= control target key end

     0   :  { %s10970_s0 = inlined_call_operand.vmem [shape: f32[2,12,128], index: 0, kind: input, shape index: {}]   ;;  %s10971_s1 = inlined_call_operand.hbm [shape: f32[128,256], index: 1, kind: input, shape index: {}]   ;;  %s10972_s2 = inlined_call_operand.vmem [shape: f32[128,128], index: 2, kind: input, shape index: {}]   ;;  %s10973_s3 = inlined_call_operand.vmem [shape: f32[128,64], index: 3, kind: input, shape index: {}]   ;;  %s10974_s4 = inlined_call_operand.vmem [shape: f32[64,64], index: 4, kind: input, shape index: {}]   ;;  %s10975_s5 = inlined_call_operand.vmem [shape: f32[32,128], index: 5, kind: input, shape index: {}]   ;;  %s10976_s6 = inlined_call_operand.hbm [shape: f32[32,128], index: 6, kind: input, shape index: {}]   ;;  %s10977_s7 = inlined_call_operand.hbm [shape: f32[32,128], index: 7, kind: input, shape index: {}]   ;;  %s10978_s8 = inlined_call_operand.hbm [shape: f32[32,128], index: 8, kind: input, shape index: {}]   ;;  %s10979_s9 = inlined_call_operand.vmem [shape: f32[32,128], index: 9, kind: input, shape index: {}]   ;;  %s10980_s10 = inlined_call_operand.hbm [shape: f32[32,128], index: 10, kind: input, shape index: {}]   ;;  %s10981_s11 = inlined_call_operand.hbm [shape: f32[32,128], index: 11, kind: input, shape index: {}]   ;;  %s10982_s12 = inlined_call_operand.hbm [shape: f32[32,128], index: 12, kind: input, shape index: {}]   ;;  %s10983_s13 = inlined_call_operand.hbm [shape: f32[4,32,128], index: 13, kind: output, shape index: {}]  }
   0x1   :  { %10992 = sst [smem:[#allocation97_spill]] %s10971_s1 }
   0x2   :  { %10993 = sst [smem:[#allocation98_spill]] %s10976_s6 }
   0x3   :  { %10994 = sst [smem:[#allocation99_spill]] %s10978_s8 }
   0x4   :  { %10995 = sst [smem:[#allocation100_spill]] %s10981_s11 }
   0x5   :  { %18 = vsyncpa [#allocation6], 0 }
   0x6   :  { %19 = vsyncpa [#allocation9], 0 }
   0x7   :  { %20 = vsyncpa [#allocation12], 0 }
   0x8   :  { %21 = vsyncpa [#allocation15], 0 }
   0x9   :  { %22 = vsyncpa [#allocation7], 0 }
   0xa   :  { %24 = vsyncpa [#allocation7 + $0x1], 0  ;;  %s7496_s25 = smov 0   ;;  %s7498_s26 = smov 0  }
   0xb   :  { %s7500_s27 = smov 0   ;;  %s7502_s28 = smov 0  }
   0xc LB: > { %10996 = sst [smem:[#allocation23_spill]] %s7398_s25  ;;  %s7517_s29 = sadd.s32 4294967295, %s7410_s28   ;;  %s7410_s28 = sphi %s7502_s28, %s11193_s28   ;;  %s7406_s27 = sphi %s7500_s27, %s11195_s27   ;;  %s7402_s26 = sphi %s7498_s26, %s11197_s26   ;;  %s7398_s25 = sphi %s7496_s25, %s11196_s25  }
   0xd   : > { %10997 = sst [smem:[#allocation24_spill]] %s7406_s27  ;;  %s5799_s30 = sadd.s32 4294967294, %s7410_s28  }
   0xe   : > { %10998 = sst [smem:[#allocation25_spill]] %s7410_s28  ;;  %s7521_s14 = sadd.s32 1, %s7410_s28  }
   0xf   : > { %10999 = sst [smem:[#allocation26_spill]] %s7521_s14  ;;  %s315_s15 = sadd.s32 1, %s7406_s27 }
  0x10   : > { %s312_s16 = ssub.s32 %s7410_s28, %s7521_s14  ;;  %p325_p0 = scmp.ne.s32.totalorder %s7406_s27, %s7402_s26 }
  0x11   : > { %p313_p1 = scmp.eq.s32.totalorder %s312_s16, 0  ;;  %p326_p2 = scmp.eq.s32.totalorder %s7517_s29, 1 }
  0x12   : > { %p331_p3 = scmp.ne.s32.totalorder %s7402_s26, %s7398_s25  ;;  %p332_p4 = scmp.eq.s32.totalorder %s5799_s30, 1 }
  0x13   : > { %s7532_s17 = scalar_select %p313_p1, %s7406_s27, %s315_s15  }
  0x14   : > { %p7534_p5 = por %p326_p2, %p325_p0  ;;  %p7538_p6 = por %p332_p4, %p331_p3 }
  0x15   : > { %11000 = sst [smem:[#allocation27_spill]] %s7532_s17  ;;  %p5800_p7 = scmp.ge.s32.totalorder %s7410_s28, 1 }
  0x16   : > { %s11002_s19 = scalar_select %p7538_p6, 1, 0 }
  0x17   : > { %p339_p8 = scmp.lt.s32.totalorder %s7410_s28, 3  ;;  %p6221_p9 = scmp.eq.s32.totalorder %s7517_s29, 0 }
  0x18   : > { %11003 = sst [smem:[#allocation28_spill]] %s11002_s19  ;;  %s7412_s24 = smov [#allocation8]  }
  0x19   : > { %p7545_p10 = pnand %p5800_p7, %p339_p8  ;;  %s11005_s6 = sld [smem:[#allocation98_spill]] }
  0x1a   : > { %s378_s30 = sshll.u32 %s7412_s24, 4  ;;  %s11007_s8 = sld [smem:[#allocation99_spill]]  ;;  %s379_s30 = int_to_ptr.vmem [resolvable:$true] %s378_s30 }
  0x1b   : > { %p6195_p11 = pneg %p7545_p10  ;;  %s7413_s21 = smov 128  }
  0x1c   : > { %s7414_s22 = smov 8   ;;  %s7415_s24 = smov [#allocation11]  }
  0x1d   : > { %p7556_p12 = pnand %p6221_p9, %p6195_p11  ;;  %s11008_s11 = sld [smem:[#allocation100_spill]] }
  0x1e   : > { %s11009_s1 = sld [smem:[#allocation97_spill]]  ;;  %s7416_s28 = smov [#allocation14]  }
  0x1f   : > { %s376_s23 = sshll.u32 %s11005_s6, 4  ;;  %s406_s6 = sshll.u32 %s7415_s24, 4  ;;  %s377_s23 = int_to_ptr.hbm [resolvable:$true] %s376_s23  ;;  %s407_s6 = int_to_ptr.vmem [resolvable:$true] %s406_s6 }
  0x20   : > { %s404_s27 = sshll.u32 %s11007_s8, 4  ;;  %s7417_s14 = smov [#allocation5]   ;;  %s405_s27 = int_to_ptr.hbm [resolvable:$true] %s404_s27 }
  0x21   : > { %6201 = dma.hbm_to_vmem [thread:$0]  (!%p7556_p12), %s377_s23, 512, %s379_s30, [#allocation9], %s7413_s21, %s7413_s21, %s7414_s22  }
  0x22   : > { %6207 = dma.hbm_to_vmem [thread:$0]  (!%p7556_p12), %s405_s27, 512, %s407_s6, [#allocation12], %s7413_s21, %s7413_s21, %s7414_s22  }
  0x23   : > { %s435_s25 = sshll.u32 %s11008_s11, 4  ;;  %s437_s23 = sshll.u32 %s7416_s28, 4  ;;  %s436_s25 = int_to_ptr.hbm [resolvable:$true] %s435_s25  ;;  %s438_s23 = int_to_ptr.vmem [resolvable:$true] %s437_s23 }
  0x24   : > { %s350_s8 = sshll.u32 %s11009_s1, 4  ;;  %s352_s19 = sshll.u32 %s7417_s14, 4  ;;  %s351_s8 = int_to_ptr.hbm [resolvable:$true] %s350_s8  ;;  %s353_s19 = int_to_ptr.vmem [resolvable:$true] %s352_s19 }
  0x25   : > { %6213 = dma.hbm_to_vmem [thread:$0]  (!%p7556_p12), %s436_s25, 512, %s438_s23, [#allocation15], %s7413_s21, %s7413_s21, %s7414_s22  }
  0x26   : > { %s7418_s30 = smov 256   ;;  %s7419_s6 = smov 16  }
  0x27   : > { %6198 = dma.hbm_to_vmem [thread:$0]  (!%p7556_p12), %s351_s8, 4096, %s353_s19, [#allocation6], %s7418_s30, %s7418_s30, %s7419_s6  }
  0x28   : > { %s390_s28 = sshll.u32 %s10977_s7, 4  ;;  %s7420_s17 = smov [#allocation10]   ;;  %s391_s28 = int_to_ptr.hbm [resolvable:$true] %s390_s28 }
  0x29   : > { %s392_s16 = sshll.u32 %s7420_s17, 4  ;;  %s421_s25 = sshll.u32 %s10980_s10, 4  ;;  %s393_s16 = int_to_ptr.vmem [resolvable:$true] %s392_s16  ;;  %s422_s25 = int_to_ptr.hbm [resolvable:$true] %s421_s25 }
  0x2a   : > { %6204 = dma.hbm_to_vmem [thread:$0]  (!%p7556_p12), %s391_s28, 512, %s393_s16, [#allocation9], %s7413_s21, %s7413_s21, %s7414_s22  }
  0x2b   : > { %s7421_s8 = smov [#allocation13]   ;;  %s449_s30 = sshll.u32 %s10982_s12, 4  ;;  %s450_s30 = int_to_ptr.hbm [resolvable:$true] %s449_s30 }
  0x2c   : > { %s423_s23 = sshll.u32 %s7421_s8, 4  ;;  %s7422_s1 = smov [#allocation16]   ;;  %s424_s23 = int_to_ptr.vmem [resolvable:$true] %s423_s23 }
  0x2d   : > { %6210 = dma.hbm_to_vmem [thread:$0]  (!%p7556_p12), %s422_s25, 512, %s424_s23, [#allocation12], %s7413_s21, %s7413_s21, %s7414_s22  }
  0x2e   : > { %s451_s11 = sshll.u32 %s7422_s1, 4  ;;  %475 = sbr.rel (%p7545_p10) target bundleno = 4788 (0x12b4), region = 72  ;;  %s452_s11 = int_to_ptr.vmem [resolvable:$true] %s451_s11 }
  0x2f   : > { %6216 = dma.hbm_to_vmem [thread:$0]  (!%p7556_p12), %s450_s30, 512, %s452_s11, [#allocation15], %s7413_s21, %s7413_s21, %s7414_s22  }
  0x33   : > { %7377 = dma.done.wait (%p6221_p9), [#allocation6], 4096  }
  0x34   : > { %7379 = vsyncadd (%p6221_p9), [#allocation6], 4294963200 }
  0x35   : > { %7381 = dma.done.wait (%p6221_p9), [#allocation9], 1024  }
  0x36   : > { %7383 = vsyncadd (%p6221_p9), [#allocation9], 4294966272 }
  0x37   : > { %7385 = dma.done.wait (%p6221_p9), [#allocation12], 1024  }
  0x38   : > { %7387 = vsyncadd (%p6221_p9), [#allocation12], 4294966272 }
  0x39   : > { %7389 = dma.done.wait (%p6221_p9), [#allocation15], 1024  }
  0x3a   : > { %7391 = vsyncadd (%p6221_p9), [#allocation15], 4294966272  ;;  %v7628_v0 = vld [vmem:[#allocation5 + $0xf0] sm:$0xff]  ;;  %v7630_v1 = vld [vmem:[#allocation5 + $0xe0] sm:$0xff]  ;;  %p550_p13 = scmp.lt.s32.totalorder %s7517_s29, 1  ;;  %v7423_v30 = vmov 0.0  }
  0x3b   : > { %662 = vmatpush.msra.mxu0 %v7628_v0  ;;  %1295 = vmatpush.msra.mxu3 %v7628_v0  ;;  %v7634_v2 = vld [vmem:[#allocation5 + $0xd0] sm:$0xff]  ;;  %v7638_v3 = vld [vmem:[#allocation5 + $0xc0] sm:$0xff]  ;;  %v7642_v4 = vld [vmem:[#allocation5 + $0xf8] sm:$0xff]  ;;  %vm1377_vm0 = vcmask 523264   ;;  %s547_s14 = sand.u32 1, %s7402_s26   ;;  %s6164_s1 = sshll.u32 %s7517_s29, 6 }
  0x3c   : > { %v7644_v5 = vld [vmem:[#allocation5 + $0xb0] sm:$0xff]  ;;  %685 = vmatpush.msra.mxu1 %v7642_v4  ;;  %v7649_v6 = vld [vmem:[#allocation5 + $0xe8] sm:$0xff]  ;;  %v7651_v7 = vld [vmem:[#allocation5 + $0xa0] sm:$0xff]  ;;  %s551_s20 = scalar_select %p550_p13, %s7517_s29, 1 }
  0x3d   : > { %663 = vmatpush.msra.mxu0 %v7630_v1  ;;  %1296 = vmatpush.msra.mxu3 %v7630_v1  ;;  %v7656_v8 = vld [vmem:[#allocation5 + $0xd8] sm:$0xff]  ;;  %v7658_v9 = vld [vmem:[#allocation5 + $0x90] sm:$0xff]  ;;  %v7663_v10 = vld [vmem:[#allocation5 + $0xc8] sm:$0xff]  ;;  %s5817_s19 = sshll.u32 %s547_s14, 6  ;;  %s5652_s29 = scalar_lea.sflag [#allocation7], %s547_s14 }
  0x3e   : > { %686 = vmatpush.msra.mxu1 %v7649_v6  ;;  %v7665_v11 = vld [vmem:[#allocation5 + $0x80] sm:$0xff]  ;;  %v7670_v12 = vld [vmem:[#allocation5 + $0xb8] sm:$0xff]  ;;  %v7672_v13 = vld [vmem:[#allocation5 + $0x70] sm:$0xff]  ;;  %s6162_s15 = sshll.u32 %s551_s20, 4  ;;  %s10856_s30 = scalar_lea.vmem [#allocation17], %s5817_s19 }
  0x3f   : > { %664 = vmatpush.msra.mxu0 %v7634_v2  ;;  %1297 = vmatpush.msra.mxu3 %v7634_v2  ;;  %v7677_v14 = vld [vmem:[#allocation5 + $0xa8] sm:$0xff]  ;;  %v7679_v15 = vld [vmem:[#allocation5 + $0x60] sm:$0xff]  ;;  %v7685_v16 = vld [vmem:[#allocation5 + $0x98] sm:$0xff]  ;;  %s554_s6 = scalar_lea.vmem %s10970_s0, %s6162_s15  ;;  %s5664_s15 = scalar_lea.hbm %s10983_s13, %s6164_s1 }
  0x40   : > { %687 = vmatpush.msra.mxu1 %v7656_v8  ;;  %v7687_v17 = vld [vmem:[#allocation5 + $0x50] sm:$0xff]  ;;  %v7692_v18 = vld [vmem:[#allocation5 + $0x88] sm:$0xff]  ;;  %v7694_v19 = vld [vmem:[#allocation5 + $0x40] sm:$0xff]  ;;  %s5665_s21 = sshll.u32 %s10856_s30, 4  ;;  %s5667_s22 = sshll.u32 %s5664_s15, 4  ;;  %s5666_s21 = int_to_ptr.vmem [resolvable:$true] %s5665_s21  ;;  %s5668_s22 = int_to_ptr.hbm [resolvable:$true] %s5667_s22 }
  0x41   : > { %665 = vmatpush.msra.mxu0 %v7638_v3  ;;  %1298 = vmatpush.msra.mxu3 %v7638_v3  ;;  %v7700_v20 = vld [vmem:[#allocation5 + $0x78] sm:$0xff]  ;;  %v7702_v21 = vld [vmem:[#allocation5 + $0x30] sm:$0xff]  ;;  %v7707_v22 = vld [vmem:[#allocation5 + $0x68] sm:$0xff]  ;;  %s7352_s17 = scalar_lea.hbm %s10983_s13, 128 }
  0x42   : > { %688 = vmatpush.msra.mxu1 %v7663_v10  ;;  %v7709_v23 = vld [vmem:[#allocation5 + $0x20] sm:$0xff]  ;;  %v7714_v24 = vld [vmem:[#allocation5 + $0x58] sm:$0xff]  ;;  %v7716_v25 = vld [vmem:[#allocation5 + $0x10] sm:$0xff] }
  0x43   : > { %666 = vmatpush.msra.mxu0 %v7644_v5  ;;  %1299 = vmatpush.msra.mxu3 %v7644_v5  ;;  %v7724_v26 = vld [vmem:[#allocation5 + $0x48] sm:$0xff]  ;;  %v7726_v27 = vld [vmem:[#allocation5] sm:$0xff]  ;;  %v7731_v28 = vld [vmem:[#allocation5 + $0x38] sm:$0xff] }
  0x44   : > { %689 = vmatpush.msra.mxu1 %v7670_v12  ;;  %v7733_v29 = vld [vmem:[%s554_s6] sm:$0xff]  ;;  %v7739_v31 = vld [vmem:[#allocation5 + $0x28] sm:$0xff]  ;;  %v7744_v32 = vld [vmem:[#allocation5 + $0x18] sm:$0xff] }
  0x45   : > { %667 = vmatpush.msra.mxu0 %v7651_v7  ;;  %1300 = vmatpush.msra.mxu3 %v7651_v7  ;;  %v7748_v33 = vld [vmem:[#allocation5 + $0x8] sm:$0xff]  ;;  %v7782_v40 = vld [vmem:[%s10972_s2 + $0x78] sm:$0xff]  ;;  %v7787_v41 = vld [vmem:[%s10972_s2 + $0x70] sm:$0xff] }
  0x46   : > { %690 = vmatpush.msra.mxu1 %v7677_v14  ;;  %v7752_v34 = vld [vmem:[%s554_s6 + $0x8] sm:$0xf]  ;;  %708 = vmatpush.msra.mxu2 %v7782_v40  ;;  %v7801_v43 = vld [vmem:[%s10972_s2 + $0x60] sm:$0xff]  ;;  %v7812_v46 = vld [vmem:[%s10972_s2 + $0x58] sm:$0xff]  ;;  %s7346_s6 = sshra.s32 %s5668_s22, 4  ;;  %s7347_s6 = int_to_ptr.hbm [resolvable:$true] %s7346_s6 }
  0x47   : > { %668 = vmatpush.msra.mxu0 %v7658_v9  ;;  %1301 = vmatpush.msra.mxu3 %v7658_v9  ;;  %v7794_v42 = vld [vmem:[%s10972_s2 + $0x68] sm:$0xff]  ;;  %v7819_v47 = vld [vmem:[%s10972_s2 + $0x50] sm:$0xff]  ;;  %v7833_v49 = vld [vmem:[%s10972_s2 + $0x40] sm:$0xff]  ;;  %s7348_s27 = scalar_lea.hbm %s7347_s6, 64  ;;  %p7353_p3 = scmp.lt.s32.totalorder %s7347_s6, %s10983_s13 }
  0x48   : > { %691 = vmatpush.msra.mxu1 %v7685_v16  ;;  %709 = vmatpush.msra.mxu2 %v7787_v41  ;;  %v7826_v48 = vld [vmem:[%s10972_s2 + $0x48] sm:$0xff]  ;;  %v7842_v52 = vld [vmem:[%s10972_s2 + $0x38] sm:$0xff]  ;;  %v7849_v53 = vld [vmem:[%s10972_s2 + $0x30] sm:$0xff]  ;;  %p7349_p0 = scmp.ne.s32.totalorder %s7347_s6, %s7348_s27  ;;  %p7354_p4 = scmp.lt.s32.totalorder %s7352_s17, %s7348_s27 }
  0x49   : > { %669 = vmatpush.msra.mxu0 %v7665_v11  ;;  %1302 = vmatpush.msra.mxu3 %v7665_v11  ;;  %v7856_v54 = vld [vmem:[%s10972_s2 + $0x28] sm:$0xff]  ;;  %v7863_v55 = vld [vmem:[%s10972_s2 + $0x20] sm:$0xff]  ;;  %v7872_v58 = vld [vmem:[%s10972_s2 + $0x18] sm:$0xff] }
  0x4a   : > { %692 = vmatpush.msra.mxu1 %v7692_v18  ;;  %710 = vmatpush.msra.mxu2 %v7794_v42  ;;  %v7877_v59 = vld [vmem:[%s10972_s2 + $0x10] sm:$0xff]  ;;  %v7884_v60 = vld [vmem:[%s10972_s2 + $0x8] sm:$0xff]  ;;  %v7891_v61 = vld [vmem:[%s10972_s2] sm:$0xff]  ;;  %p7350_p1 = pnand %p7349_p0, %p7534_p5  ;;  %p7355_p7 = por %p7354_p4, %p7353_p3 }
  0x4b   : > { %670 = vmatpush.msra.mxu0 %v7672_v13  ;;  %1303 = vmatpush.msra.mxu3 %v7672_v13 }
  0x4c   : > { %693 = vmatpush.msra.mxu1 %v7700_v20  ;;  %711 = vmatpush.msra.mxu2 %v7801_v43  ;;  %p7351_p2 = pneg %p7350_p1 }
  0x4d   : > { %671 = vmatpush.msra.mxu0 %v7679_v15  ;;  %1304 = vmatpush.msra.mxu3 %v7679_v15 }
  0x4e   : > { %694 = vmatpush.msra.mxu1 %v7707_v22  ;;  %712 = vmatpush.msra.mxu2 %v7812_v46  ;;  %p7356_p8 = pnand %p7355_p7, %p7351_p2 }
  0x4f   : > { %672 = vmatpush.msra.mxu0 %v7687_v17  ;;  %1305 = vmatpush.msra.mxu3 %v7687_v17 }
  0x50   : > { %695 = vmatpush.msra.mxu1 %v7714_v24  ;;  %713 = vmatpush.msra.mxu2 %v7819_v47 }
  0x51   : > { %673 = vmatpush.msra.mxu0 %v7694_v19  ;;  %1306 = vmatpush.msra.mxu3 %v7694_v19 }
  0x52   : > { %696 = vmatpush.msra.mxu1 %v7724_v26  ;;  %714 = vmatpush.msra.mxu2 %v7826_v48 }
  0x53   : > { %674 = vmatpush.msra.mxu0 %v7702_v21  ;;  %1307 = vmatpush.msra.mxu3 %v7702_v21 }
  0x54   : > { %697 = vmatpush.msra.mxu1 %v7731_v28  ;;  %715 = vmatpush.msra.mxu2 %v7833_v49 }
  0x55   : > { %675 = vmatpush.msra.mxu0 %v7709_v23  ;;  %1308 = vmatpush.msra.mxu3 %v7709_v23 }
  0x56   : > { %698 = vmatpush.msra.mxu1 %v7739_v31  ;;  %716 = vmatpush.msra.mxu2 %v7842_v52 }
  0x57   : > { %676 = vmatpush.msra.mxu0 %v7716_v25  ;;  %1309 = vmatpush.msra.mxu3 %v7716_v25 }
  0x58   : > { %699 = vmatpush.msra.mxu1 %v7744_v32  ;;  %717 = vmatpush.msra.mxu2 %v7849_v53 }
  0x59   : > { %677 = vmatpush.msra.mxu0 %v7726_v27  ;;  %1310 = vmatpush.msra.mxu3 %v7726_v27 }
  0x5a   : > { %1311 = vmatmul.f32.vlgmr.msra.gmra.mxu3 %v7423_v30  ;;  %678 = vmatmul.f32.vlgmr.msra.gmra.mxu0 %v7733_v29 }
  0x5b   : > { %1336 = vmatpush.msrb.mxu0 %v7642_v4  ;;  %700 = vmatpush.msra.mxu1 %v7748_v33 }
  0x5c   : > { %701 = vmatmul.f32.vlgmr.msra.gmra.mxu1 %v7733_v29  ;;  %1916 = vmatpush.msrb.mxu3 %v7782_v40 }
  0x5d   : > { %1337 = vmatpush.msrb.mxu0 %v7649_v6  ;;  %718 = vmatpush.msra.mxu2 %v7856_v54 }
  0x5e   : > { %1917 = vmatpush.msrb.mxu3 %v7787_v41 }
  0x5f   : > { %1338 = vmatpush.msrb.mxu0 %v7656_v8  ;;  %719 = vmatpush.msra.mxu2 %v7863_v55 }
  0x60   : > { %1918 = vmatpush.msrb.mxu3 %v7794_v42 }
  0x61   : > { %1339 = vmatpush.msrb.mxu0 %v7663_v10  ;;  %720 = vmatpush.msra.mxu2 %v7872_v58 }
  0x62   : > { %1314 = vmatmul.f32.gmra.mxu3 %v7423_v30  ;;  %681 = vmatmul.f32.gmra.mxu0 %v7752_v34 }
  0x63   : > { %1340 = vmatpush.msrb.mxu0 %v7670_v12  ;;  %1919 = vmatpush.msrb.mxu3 %v7801_v43 }
  0x64   : > { %704 = vmatmul.f32.gmra.mxu1 %v7752_v34  ;;  %721 = vmatpush.msra.mxu2 %v7877_v59 }
  0x65   : > { %1341 = vmatpush.msrb.mxu0 %v7677_v14  ;;  %1920 = vmatpush.msrb.mxu3 %v7812_v46 }
  0x66   : > { %722 = vmatpush.msra.mxu2 %v7884_v60 }
  0x67   : > { %1342 = vmatpush.msrb.mxu0 %v7685_v16  ;;  %1921 = vmatpush.msrb.mxu3 %v7819_v47 }
  0x68   : > { %723 = vmatpush.msra.mxu2 %v7891_v61 }
  0x69   : > { %1343 = vmatpush.msrb.mxu0 %v7692_v18  ;;  %1922 = vmatpush.msrb.mxu3 %v7826_v48 }
  0x6a   : > { %1317 = vmatmul.f32.gmra.mxu3 %v7423_v30  ;;  %724 = vmatmul.f32.vlgmr.msra.gmra.mxu2 %v7733_v29  ;;  %v8012_v29 = vld [vmem:[#allocation8 + $0x10] sm:$0xff] }
  0x6b   : > { %1344 = vmatpush.msrb.mxu0 %v7700_v20  ;;  %1923 = vmatpush.msrb.mxu3 %v7833_v49 }
  0x6d   : > { %1345 = vmatpush.msrb.mxu0 %v7707_v22  ;;  %1924 = vmatpush.msrb.mxu3 %v7842_v52 }
  0x6f   : > { %1346 = vmatpush.msrb.mxu0 %v7714_v24  ;;  %1925 = vmatpush.msrb.mxu3 %v7849_v53 }
  0x71   : > { %1347 = vmatpush.msrb.mxu0 %v7724_v26  ;;  %1926 = vmatpush.msrb.mxu3 %v7856_v54 }
  0x72   : > { %1320 = vmatmul.f32.gmra.mxu3 %v7423_v30  ;;  %727 = vmatmul.f32.gmra.mxu2 %v7752_v34 }
  0x73   : > { %1348 = vmatpush.msrb.mxu0 %v7731_v28  ;;  %1927 = vmatpush.msrb.mxu3 %v7863_v55 }
  0x75   : > { %1349 = vmatpush.msrb.mxu0 %v7739_v31  ;;  %1928 = vmatpush.msrb.mxu3 %v7872_v58 }
  0x77   : > { %1350 = vmatpush.msrb.mxu0 %v7744_v32  ;;  %1929 = vmatpush.msrb.mxu3 %v7877_v59 }
  0x79   : > { %1351 = vmatpush.msrb.mxu0 %v7748_v33  ;;  %1930 = vmatpush.msrb.mxu3 %v7884_v60 }
  0x7a   : > { %1352 = vmatmul.f32.vlgmr.msrb.gmra.mxu0 %v7423_v30  ;;  %1323 = vmatmul.f32.gmra.mxu3 %v7423_v30 }
  0x7b   : > { %1931 = vmatpush.msrb.mxu3 %v7891_v61 }
  0x7d   : > { %2078 = vmatpush.msra.mxu3 %v7628_v0 }
  0x7f   : > { %2079 = vmatpush.msra.mxu3 %v7630_v1  ;;  %v604_v1 = vld [vmem:[%s10973_s3] sm:$0xff] }
  0x81   : > { %2080 = vmatpush.msra.mxu3 %v7634_v2 }
  0x82   : > { %1355 = vmatmul.f32.gmra.mxu0 %v7423_v30  ;;  %1326 = vmatmul.f32.gmra.mxu3 %v7423_v30 }
  0x83   : > { %2081 = vmatpush.msra.mxu3 %v7638_v3  ;;  %v605_v3 = vld [vmem:[%s10973_s3 + $0x8] sm:$0xff] }
  0x85   : > { %2082 = vmatpush.msra.mxu3 %v7644_v5  ;;  %v606_v5 = vld [vmem:[%s10973_s3 + $0x10] sm:$0xff] }
  0x87   : > { %2083 = vmatpush.msra.mxu3 %v7651_v7  ;;  %v608_v7 = vld [vmem:[%s10973_s3 + $0x20] sm:$0xff] }
  0x89   : > { %2084 = vmatpush.msra.mxu3 %v7658_v9  ;;  %v610_v9 = vld [vmem:[%s10973_s3 + $0x30] sm:$0xff] }
  0x8a   : > { %1358 = vmatmul.f32.gmra.mxu0 %v7423_v30  ;;  %1329 = vmatmul.f32.gmra.mxu3 %v7423_v30 }
  0x8b   : > { %2085 = vmatpush.msra.mxu3 %v7665_v11  ;;  %v612_v11 = vld [vmem:[%s10973_s3 + $0x40] sm:$0xff] }
  0x8d   : > { %2086 = vmatpush.msra.mxu3 %v7672_v13 }
  0x8f   : > { %2087 = vmatpush.msra.mxu3 %v7679_v15 }
  0x91   : > { %2088 = vmatpush.msra.mxu3 %v7687_v17 }
  0x92   : > { %1361 = vmatmul.f32.gmra.mxu0 %v7423_v30  ;;  %1332 = vmatmul.f32.gmra.mxu3 %v7423_v30 }
  0x93   : > { %2089 = vmatpush.msra.mxu3 %v7694_v19 }
  0x95   : > { %2090 = vmatpush.msra.mxu3 %v7702_v21 }
  0x97   : > { %2091 = vmatpush.msra.mxu3 %v7709_v23 }
  0x99   : > { %2092 = vmatpush.msra.mxu3 %v7716_v25  ;;  %v8006_v25 = vld [vmem:[#allocation8] sm:$0xff] }
  0x9a   : > { %1364 = vmatmul.f32.gmra.mxu0 %v7423_v30 }
  0x9b   : > { %2093 = vmatpush.msra.mxu3 %v7726_v27 }
  0xa2   : > { %1367 = vmatmul.f32.gmra.mxu0 %v7423_v30 }
  0xaa   : > { %1370 = vmatmul.f32.gmra.mxu0 %v7423_v30 }
  0xb2   : > { %1373 = vmatmul.f32.gmra.mxu0 %v7423_v30 }
  0xd7   : > { %v7771_v36 = vpop.f32.mrf.mxu0 }
  0xd9   : > { %v7987_v13 = vpop.f32.mrf.mxu1 }
  0xda   : > { %v749_v34 = vrot.slane %v7987_v13, 5 }
  0xdd   : > { %v7769_v35 = vpop.f32.mrf.mxu3 }
  0xdf   : > { %v7775_v38 = vpop.f32.mrf.mxu0 }
  0xe0   : > { %11010 = vst [vmem:[#allocation29_spill] sm:$0xff] %v7775_v38 }
  0xe1   : > { %v705_v15 = vpop.f32.mrf.mxu1 }
  0xe2   : > { %v752_v17 = vrot.slane %v705_v15, 1  ;;  %v753_v19 = vrot.slane %v705_v15, 2  ;;  %v955_v23 = vperm.slane %v705_v15, 0 }
  0xe4   : > { %v8008_v27 = vperm.slane %v753_v19, 0 }
  0xe5   : > { %v7773_v37 = vpop.f32.mrf.mxu3 }
  0xed   : > { %v7777_v39 = vpop.f32.mrf.mxu3 }
  0xf5   : > { %v1321_v44 = vpop.f32.mrf.mxu3 }
  0xf7   : > { %v7807_v45 = vpop.f32.mrf.mxu0 }
  0xfd   : > { %v1324_v50 = vpop.f32.mrf.mxu3 }
  0xff   : > { %v7837_v51 = vpop.f32.mrf.mxu0 }
 0x105   : > { %v1327_v56 = vpop.f32.mrf.mxu3 }
 0x107   : > { %v7867_v57 = vpop.f32.mrf.mxu0 }
 0x10d   : > { %v1330_v62 = vpop.f32.mrf.mxu3 }
 0x10f   : > { %v1362_v63 = vpop.f32.mrf.mxu0 }
 0x115   : > { %v1333_v30 = vpop.f32.mrf.mxu3 }
 0x116   : > { %1434 = vmatpush.msrb.mxu1 %v1333_v30 }
 0x117   : > { %v1365_v38 = vpop.f32.mrf.mxu0 }
 0x118   : > { %1435 = vmatpush.msrb.mxu1 %v1330_v62 }
 0x11a   : > { %1436 = vmatpush.msrb.mxu1 %v1327_v56 }
 0x11c   : > { %1437 = vmatpush.msrb.mxu1 %v1324_v50  ;;  %v8039_v50 = vld [vmem:[%s10979_s9 + $0x10] sm:$0xff] }
 0x11e   : > { %1438 = vmatpush.msrb.mxu1 %v1321_v44 }
 0x11f   : > { %v1368_v0 = vpop.f32.mrf.mxu0 }
 0x120   : > { %1439 = vmatpush.msrb.mxu1 %v7777_v39 }
 0x122   : > { %1440 = vmatpush.msrb.mxu1 %v7773_v37 }
 0x124   : > { %1441 = vmatpush.msrb.mxu1 %v7769_v35  ;;  %v8024_v35 = vld [vmem:[%s10979_s9] sm:$0xff] }
 0x125   : > { %5820 = vmatmul.msk.f32.vlgmr.msrb.gmra.mxu1 %vm1377_vm0, %v604_v1 }
 0x126   : > { %2119 = vmatpush.msra.mxu1 %v7642_v4 }
 0x127   : > { %v1371_v2 = vpop.f32.mrf.mxu0 }
 0x128   : > { %2120 = vmatpush.msra.mxu1 %v7649_v6  ;;  %v607_v6 = vld [vmem:[%s10973_s3 + $0x18] sm:$0xff] }
 0x12a   : > { %2121 = vmatpush.msra.mxu1 %v7656_v8  ;;  %v609_v8 = vld [vmem:[%s10973_s3 + $0x28] sm:$0xff] }
 0x12c   : > { %2122 = vmatpush.msra.mxu1 %v7663_v10  ;;  %v611_v10 = vld [vmem:[%s10973_s3 + $0x38] sm:$0xff] }
 0x12d   : > { %5821 = vmatmul.msk.f32.gmra.mxu1 %vm1377_vm0, %v605_v3 }
 0x12e   : > { %2123 = vmatpush.msra.mxu1 %v7670_v12  ;;  %v7982_v12 = vld [vmem:[%s10973_s3 + $0x48] sm:$0xff] }
 0x12f   : > { %v1374_v4 = vpop.f32.mrf.mxu0 }
 0x130   : > { %1499 = vmatpush.msrb.mxu2 %v1374_v4  ;;  %2124 = vmatpush.msra.mxu1 %v7677_v14  ;;  %v7992_v14 = vld [vmem:[%s10973_s3 + $0x50] sm:$0xff] }
 0x132   : > { %1500 = vmatpush.msrb.mxu2 %v1371_v2  ;;  %2125 = vmatpush.msra.mxu1 %v7685_v16  ;;  %v746_v16 = vrot.slane %v7987_v13, 2 }
 0x134   : > { %1501 = vmatpush.msrb.mxu2 %v1368_v0  ;;  %2126 = vmatpush.msra.mxu1 %v7692_v18  ;;  %v747_v18 = vrot.slane %v7987_v13, 3  ;;  %v949_v21 = vperm.slane %v746_v16, 0 }
 0x135   : > { %5822 = vmatmul.msk.f32.gmra.mxu1 %vm1377_vm0, %v606_v5 }
 0x136   : > { %1502 = vmatpush.msrb.mxu2 %v1365_v38  ;;  %2127 = vmatpush.msra.mxu1 %v7700_v20  ;;  %v8002_v20 = vld [vmem:[%s10973_s3 + $0x58] sm:$0xff]  ;;  %v981_v38 = vmul.f32 %v949_v21, %v8012_v29 }
 0x138   : > { %1503 = vmatpush.msrb.mxu2 %v1362_v63  ;;  %2128 = vmatpush.msra.mxu1 %v7707_v22  ;;  %v754_v22 = vrot.slane %v705_v15, 3  ;;  %v8056_v0 = vadd.f32 %v8039_v50, %v981_v38 }
 0x13a   : > { %1504 = vmatpush.msrb.mxu2 %v7867_v57  ;;  %2129 = vmatpush.msra.mxu1 %v7714_v24  ;;  %v8004_v24 = vperm.slane %v752_v17, 0 }
 0x13c   : > { %1505 = vmatpush.msrb.mxu2 %v7837_v51  ;;  %2130 = vmatpush.msra.mxu1 %v7724_v26  ;;  %v950_v26 = vperm.slane %v747_v18, 0  ;;  %v8044_v51 = vld [vmem:[%s10979_s9 + $0x18] sm:$0xff] }
 0x13d   : > { %5823 = vmatmul.msk.f32.gmra.mxu1 %vm1377_vm0, %v607_v6 }
 0x13e   : > { %1506 = vmatpush.msrb.mxu2 %v7807_v45  ;;  %2131 = vmatpush.msra.mxu1 %v7731_v28  ;;  %v8010_v28 = vld [vmem:[#allocation8 + $0x8] sm:$0xff]  ;;  %v983_v44 = vmul.f32 %v950_v26, %v8006_v25  ;;  %v985_v62 = vmul.f32 %v950_v26, %v8012_v29 }
 0x13f   : > { %5836 = vmatmul.msk.f32.vlgmr.msrb.gmra.mxu2 %vm1377_vm0, %v604_v1  ;;  %v980_v37 = vmul.f32 %v949_v21, %v8010_v28  ;;  %v8034_v45 = vld [vmem:[%s10979_s9 + $0x8] sm:$0xff]  ;;  %v984_v57 = vmul.f32 %v950_v26, %v8010_v28 }
 0x140   : > { %2132 = vmatpush.msra.mxu1 %v7739_v31  ;;  %v8014_v31 = vld [vmem:[#allocation8 + $0x18] sm:$0xff]  ;;  %v8062_v2 = vadd.f32 %v8024_v35, %v983_v44  ;;  %v8068_v4 = vadd.f32 %v8039_v50, %v985_v62 }
 0x141   : > { %v982_v39 = vmul.f32 %v949_v21, %v8014_v31  ;;  %v986_v63 = vmul.f32 %v950_v26, %v8014_v31  ;;  %v8053_v30 = vadd.f32 %v8034_v45, %v980_v37 }
 0x142   : > { %2133 = vmatpush.msra.mxu1 %v7744_v32  ;;  %v979_v32 = vmul.f32 %v949_v21, %v8006_v25 }
 0x143   : > { %v8059_v1 = vadd.f32 %v8044_v51, %v982_v39 }
 0x144   : > { %2134 = vmatpush.msra.mxu1 %v7748_v33  ;;  %v748_v33 = vrot.slane %v7987_v13, 4  ;;  %v8047_v56 = vadd.f32 %v8024_v35, %v979_v32 }
 0x145   : > { %5824 = vmatmul.msk.f32.gmra.mxu1 %vm1377_vm0, %v608_v7 }
 0x147   : > { %5837 = vmatmul.msk.f32.gmra.mxu2 %vm1377_vm0, %v605_v3  ;;  %v8065_v3 = vadd.f32 %v8034_v45, %v984_v57 }
 0x14d   : > { %5825 = vmatmul.msk.f32.gmra.mxu1 %vm1377_vm0, %v609_v8 }
 0x14f   : > { %5838 = vmatmul.msk.f32.gmra.mxu2 %vm1377_vm0, %v606_v5  ;;  %v8071_v5 = vadd.f32 %v8044_v51, %v986_v63 }
 0x155   : > { %5826 = vmatmul.msk.f32.gmra.mxu1 %vm1377_vm0, %v610_v9 }
 0x157   : > { %5839 = vmatmul.msk.f32.gmra.mxu2 %vm1377_vm0, %v607_v6  ;;  %v951_v6 = vperm.slane %v748_v33, 0 }
 0x159   : > { %v987_v15 = vmul.f32 %v951_v6, %v8006_v25  ;;  %v988_v16 = vmul.f32 %v951_v6, %v8010_v28  ;;  %v989_v17 = vmul.f32 %v951_v6, %v8012_v29  ;;  %v990_v18 = vmul.f32 %v951_v6, %v8014_v31 }
 0x15a   : > { %v1003_v6 = vmul.f32 %v955_v23, %v8006_v25 }
 0x15b   : > { %v8091_v32 = vadd.f32 %v8024_v35, %v987_v15  ;;  %v8094_v33 = vadd.f32 %v8034_v45, %v988_v16  ;;  %v8100_v37 = vadd.f32 %v8044_v51, %v990_v18  ;;  %v1005_v15 = vmul.f32 %v955_v23, %v8012_v29 }
 0x15c   : > { %v1006_v16 = vmul.f32 %v955_v23, %v8014_v31  ;;  %v1008_v18 = vmul.f32 %v8004_v24, %v8010_v28 }
 0x15d   : > { %5827 = vmatmul.msk.f32.gmra.mxu1 %vm1377_vm0, %v611_v10  ;;  %11011 = vst [vmem:[#allocation30_spill] sm:$0xff] %v8091_v32 }
 0x15e   : > { %11012 = vst [vmem:[#allocation31_spill] sm:$0xff] %v8094_v33 }
 0x15f   : > { %5840 = vmatmul.msk.f32.gmra.mxu2 %vm1377_vm0, %v608_v7  ;;  %v8073_v7 = vperm.slane %v754_v22, 0  ;;  %11014 = vst [vmem:[#allocation33_spill] sm:$0xff] %v8100_v37 }
 0x165   : > { %5828 = vmatmul.msk.f32.gmra.mxu1 %vm1377_vm0, %v612_v11 }
 0x167   : > { %5841 = vmatmul.msk.f32.gmra.mxu2 %vm1377_vm0, %v609_v8  ;;  %v952_v8 = vperm.slane %v749_v34, 0  ;;  %v8097_v34 = vadd.f32 %v8039_v50, %v989_v17  ;;  %v1007_v17 = vmul.f32 %v8004_v24, %v8006_v25 }
 0x169   : > { %v991_v19 = vmul.f32 %v952_v8, %v8006_v25  ;;  %v992_v21 = vmul.f32 %v952_v8, %v8010_v28  ;;  %v993_v22 = vmul.f32 %v952_v8, %v8012_v29  ;;  %v994_v26 = vmul.f32 %v952_v8, %v8014_v31  ;;  %11013 = vst [vmem:[#allocation32_spill] sm:$0xff] %v8097_v34 }
 0x16a   : > { %v1004_v8 = vmul.f32 %v955_v23, %v8010_v28 }
 0x16b   : > { %v8105_v38 = vadd.f32 %v8024_v35, %v991_v19  ;;  %v8108_v39 = vadd.f32 %v8034_v45, %v992_v21  ;;  %v8111_v44 = vadd.f32 %v8039_v50, %v993_v22  ;;  %v8114_v57 = vadd.f32 %v8044_v51, %v994_v26 }
 0x16d   : > { %5829 = vmatmul.msk.f32.gmra.mxu1 %vm1377_vm0, %v7982_v12  ;;  %11015 = vst [vmem:[#allocation34_spill] sm:$0xff] %v8105_v38 }
 0x16e   : > { %11016 = vst [vmem:[#allocation35_spill] sm:$0xff] %v8108_v39 }
 0x16f   : > { %5842 = vmatmul.msk.f32.gmra.mxu2 %vm1377_vm0, %v610_v9  ;;  %v750_v9 = vrot.slane %v7987_v13, 6  ;;  %11017 = vst [vmem:[#allocation36_spill] sm:$0xff] %v8111_v44 }
 0x170   : > { %11018 = vst [vmem:[#allocation37_spill] sm:$0xff] %v8114_v57  ;;  %v617_v57 = vld [vmem:[%s10973_s3 + $0x68] sm:$0xff] }
 0x171   : > { %v953_v62 = vperm.slane %v750_v9, 0 }
 0x173   : > { %v995_v19 = vmul.f32 %v953_v62, %v8006_v25  ;;  %v997_v9 = vmul.f32 %v953_v62, %v8012_v29 }
 0x175   : > { %5830 = vmatmul.msk.f32.gmra.mxu1 %vm1377_vm0, %v7992_v14  ;;  %v8138_v44 = vadd.f32 %v8024_v35, %v995_v19 }
 0x177   : > { %5843 = vmatmul.msk.f32.gmra.mxu2 %vm1377_vm0, %v611_v10  ;;  %v751_v10 = vrot.slane %v7987_v13, 7  ;;  %11019 = vst [vmem:[#allocation38_spill] sm:$0xff] %v8138_v44 }
 0x179   : > { %v954_v63 = vperm.slane %v751_v10, 0  ;;  %v998_v10 = vmul.f32 %v953_v62, %v8014_v31 }
 0x17b   : > { %v999_v21 = vmul.f32 %v954_v63, %v8006_v25  ;;  %v1000_v22 = vmul.f32 %v954_v63, %v8010_v28  ;;  %v1001_v23 = vmul.f32 %v954_v63, %v8012_v29  ;;  %v1002_v26 = vmul.f32 %v954_v63, %v8014_v31 }
 0x17c   : > { %v8147_v38 = vadd.f32 %v8044_v51, %v998_v10  ;;  %v8168_v10 = vadd.f32 %v8039_v50, %v1005_v15  ;;  %v1011_v15 = vmul.f32 %v8008_v27, %v8006_v25 }
 0x17d   : > { %5831 = vmatmul.msk.f32.gmra.mxu1 %vm1377_vm0, %v8002_v20  ;;  %v8150_v37 = vadd.f32 %v8024_v35, %v999_v21  ;;  %v8153_v63 = vadd.f32 %v8034_v45, %v1000_v22  ;;  %v8156_v34 = vadd.f32 %v8039_v50, %v1001_v23  ;;  %v8159_v19 = vadd.f32 %v8044_v51, %v1002_v26 }
 0x17e   : > { %11022 = vst [vmem:[#allocation41_spill] sm:$0xff] %v8147_v38  ;;  %v8171_v21 = vadd.f32 %v8044_v51, %v1006_v16  ;;  %v8175_v22 = vadd.f32 %v8024_v35, %v1007_v17  ;;  %v8178_v23 = vadd.f32 %v8034_v45, %v1008_v18  ;;  %v1012_v16 = vmul.f32 %v8008_v27, %v8010_v28 }
 0x17f   : > { %5844 = vmatmul.msk.f32.gmra.mxu2 %vm1377_vm0, %v612_v11  ;;  %v8080_v11 = vld [vmem:[%s10973_s3 + $0x60] sm:$0xff]  ;;  %11023 = vst [vmem:[#allocation42_spill] sm:$0xff] %v8150_v37  ;;  %v1013_v17 = vmul.f32 %v8008_v27, %v8012_v29  ;;  %v1014_v18 = vmul.f32 %v8008_v27, %v8014_v31 }
 0x180   : > { %11024 = vst [vmem:[#allocation43_spill] sm:$0xff] %v8153_v63 }
 0x181   : > { %11025 = vst [vmem:[#allocation44_spill] sm:$0xff] %v8156_v34  ;;  %v8211_v27 = vadd.f32 %v8039_v50, %v1013_v17 }
 0x182   : > { %11026 = vst [vmem:[#allocation45_spill] sm:$0xff] %v8159_v19 }
 0x183   : > { %11029 = vst [vmem:[#allocation48_spill] sm:$0xff] %v8168_v10 }
 0x184   : > { %11030 = vst [vmem:[#allocation49_spill] sm:$0xff] %v8171_v21  ;;  %v8208_v21 = vadd.f32 %v8034_v45, %v1012_v16  ;;  %v618_v16 = vld [vmem:[%s10973_s3 + $0x70] sm:$0xff] }
 0x185   : > { %5832 = vmatmul.msk.f32.gmra.mxu1 %vm1377_vm0, %v8080_v11  ;;  %11031 = vst [vmem:[#allocation50_spill] sm:$0xff] %v8175_v22  ;;  %v8205_v22 = vadd.f32 %v8024_v35, %v1011_v15  ;;  %v1018_v15 = vmul.f32 %v8073_v7, %v8014_v31 }
 0x186   : > { %11032 = vst [vmem:[#allocation51_spill] sm:$0xff] %v8178_v23  ;;  %v1016_v23 = vmul.f32 %v8073_v7, %v8010_v28 }
 0x187   : > { %5845 = vmatmul.msk.f32.gmra.mxu2 %vm1377_vm0, %v7982_v12  ;;  %v996_v12 = vmul.f32 %v953_v62, %v8010_v28  ;;  %v8144_v62 = vadd.f32 %v8039_v50, %v997_v9  ;;  %v8165_v9 = vadd.f32 %v8034_v45, %v1004_v8  ;;  %v1010_v8 = vmul.f32 %v8004_v24, %v8014_v31 }
 0x188   : > { %11035 = vst [vmem:[#allocation54_spill] sm:$0xff] %v8205_v22  ;;  %v1017_v28 = vmul.f32 %v8073_v7, %v8012_v29 }
 0x189   : > { %v8141_v39 = vadd.f32 %v8034_v45, %v996_v12  ;;  %11021 = vst [vmem:[#allocation40_spill] sm:$0xff] %v8144_v62  ;;  %v8162_v12 = vadd.f32 %v8024_v35, %v1003_v6  ;;  %v1009_v6 = vmul.f32 %v8004_v24, %v8012_v29  ;;  %v8198_v24 = vadd.f32 %v8044_v51, %v1010_v8  ;;  %v619_v29 = vld [vmem:[%s10973_s3 + $0x78] sm:$0xff] }
 0x18a   : > { %11028 = vst [vmem:[#allocation47_spill] sm:$0xff] %v8165_v9  ;;  %v8230_v17 = vadd.f32 %v8039_v50, %v1017_v28 }
 0x18b   : > { %11020 = vst [vmem:[#allocation39_spill] sm:$0xff] %v8141_v39  ;;  %v8195_v26 = vadd.f32 %v8039_v50, %v1009_v6  ;;  %v8214_v6 = vadd.f32 %v8044_v51, %v1014_v18  ;;  %v8233_v18 = vadd.f32 %v8044_v51, %v1018_v15  ;;  %v8251_v50 = vld [vmem:[%s10975_s5] sm:$0xff] }
 0x18c   : > { %11027 = vst [vmem:[#allocation46_spill] sm:$0xff] %v8162_v12 }
 0x18d   : > { %5833 = vmatmul.msk.f32.gmra.mxu1 %vm1377_vm0, %v617_v57  ;;  %11033 = vst [vmem:[#allocation52_spill] sm:$0xff] %v8195_v26 }
 0x18e   : > { %11034 = vst [vmem:[#allocation53_spill] sm:$0xff] %v8198_v24 }
 0x18f   : > { %5846 = vmatmul.msk.f32.gmra.mxu2 %vm1377_vm0, %v7992_v14  ;;  %v1015_v14 = vmul.f32 %v8073_v7, %v8006_v25  ;;  %11036 = vst [vmem:[#allocation55_spill] sm:$0xff] %v8208_v21  ;;  %v8220_v25 = vadd.f32 %v8034_v45, %v1016_v23  ;;  %v8256_v23 = vld [vmem:[#allocation11] sm:$0xff] }
 0x190   : > { %11037 = vst [vmem:[#allocation56_spill] sm:$0xff] %v8211_v27 }
 0x191   : > { %11038 = vst [vmem:[#allocation57_spill] sm:$0xff] %v8214_v6  ;;  %v8217_v8 = vadd.f32 %v8024_v35, %v1015_v14  ;;  %v8263_v14 = vld [vmem:[%s10975_s5 + $0x8] sm:$0xff] }
 0x192   : > { %11040 = vst [vmem:[#allocation59_spill] sm:$0xff] %v8220_v25 }
 0x193   : > { %11039 = vst [vmem:[#allocation58_spill] sm:$0xff] %v8217_v8  ;;  %v8277_v8 = vld [vmem:[%s10975_s5 + $0x10] sm:$0xff] }
 0x194   : > { %11041 = vst [vmem:[#allocation60_spill] sm:$0xff] %v8230_v17  ;;  %v8270_v17 = vld [vmem:[#allocation11 + $0x8] sm:$0xff] }
 0x195   : > { %11042 = vst [vmem:[#allocation61_spill] sm:$0xff] %v8233_v18  ;;  %5834 = vmatmul.msk.f32.gmra.mxu1 %vm1377_vm0, %v618_v16  ;;  %v8268_v18 = vld [vmem:[#allocation14 + $0x8] sm:$0xff] }
 0x196   : > { %vm633_vm2 = vcmp.gt.f32.partialorder %v8268_v18, 0.5 }
 0x197   : > { %5847 = vmatmul.msk.f32.gmra.mxu2 %vm1377_vm0, %v8002_v20  ;;  %v771_v20 = vperm.slane %v7771_v36, 0 }
 0x199   : > { %v795_v7 = vmul.f32 %v771_v20, %v8251_v50 }
 0x19d   : > { %5835 = vmatmul.msk.f32.gmra.mxu1 %vm1377_vm0, %v619_v29 }
 0x19f   : > { %5848 = vmatmul.msk.f32.gmra.mxu2 %vm1377_vm0, %v8080_v11  ;;  %v8254_v11 = vld [vmem:[#allocation14] sm:$0xff] }
 0x1a0   : > { %vm632_vm1 = vcmp.gt.f32.partialorder %v8254_v11, 0.5 }
 0x1a2   : > { %v1443_v31 = vpop.f32.mrf.mxu1 }
 0x1a7   : > { %5849 = vmatmul.msk.f32.gmra.mxu2 %vm1377_vm0, %v617_v57  ;;  %v847_v57 = vadd.f32 %v8256_v23, %v795_v7 }
 0x1aa   : > { %v1446_v35 = vpop.f32.mrf.mxu1 }
 0x1af   : > { %5850 = vmatmul.msk.f32.gmra.mxu2 %vm1377_vm0, %v618_v16 }
 0x1b2   : > { %v1449_v45 = vpop.f32.mrf.mxu1 }
 0x1b7   : > { %5851 = vmatmul.msk.f32.gmra.mxu2 %vm1377_vm0, %v619_v29  ;;  %v796_v29 = vmul.f32 %v771_v20, %v8263_v14 }
 0x1b9   : > { %v848_v7 = vadd.f32 %v8270_v17, %v796_v29 }
 0x1ba   : > { %v1452_v51 = vpop.f32.mrf.mxu1 }
 0x1c2   : > { %v1455_v28 = vpop.f32.mrf.mxu1 }
 0x1c3   : > { %v1556_v15 = vsel %vm632_vm1, %v1455_v28, %v1443_v31  ;;  %v797_v28 = vmul.f32 %v771_v20, %v8277_v8 }
 0x1c4   : > { %v1572_v16 = vadd.f32 %v1556_v15, %v847_v57  ;;  %v8282_v15 = vld [vmem:[#allocation14 + $0x10] sm:$0xff] }
 0x1c5   : > { %vm634_vm3 = vcmp.gt.f32.partialorder %v8282_v15, 0.5 }
 0x1c6   : > { %v5852_v25 = vmul.f32 -1.442695, %v1572_v16  ;;  %v8284_v16 = vld [vmem:[#allocation11 + $0x10] sm:$0xff] }
 0x1c7   : > { %v849_v29 = vadd.f32 %v8284_v16, %v797_v28 }
 0x1c8   : > { %6282 = vpow2.f32 %v5852_v25 }
 0x1ca   : > { %v1458_v6 = vpop.f32.mrf.mxu1 }
 0x1cb   : > { %v1557_v31 = vsel %vm633_vm2, %v1458_v6, %v1446_v35  ;;  %v8291_v6 = vld [vmem:[%s10975_s5 + $0x18] sm:$0xff] }
 0x1cc   : > { %v1573_v57 = vadd.f32 %v1557_v31, %v848_v7  ;;  %v798_v22 = vmul.f32 %v771_v20, %v8291_v6 }
 0x1ce   : > { %v6283_v25 = vpop.eup %6282  ;;  %v5853_v27 = vmul.f32 -1.442695, %v1573_v57  ;;  %v8296_v57 = vld [vmem:[#allocation14 + $0x18] sm:$0xff] }
 0x1cf   : > { %v1604_v21 = vadd.f32 1.0, %v6283_v25  ;;  %vm10991_vm4 = vcmp.gt.f32.partialorder %v8296_v57, 0.5 }
 0x1d0   : > { %6284 = vpow2.f32 %v5853_v27  ;;  %v8298_v27 = vld [vmem:[#allocation11 + $0x18] sm:$0xff] }
 0x1d1   : > { %6286 = vrcp.f32 %v1604_v21  ;;  %v850_v10 = vadd.f32 %v8298_v27, %v798_v22  ;;  %v1621_v19 = vand.u32 2147483647, %v1604_v21  ;;  %vm1617_vm6 = vweird.f32 %v1604_v21 }
 0x1d2   : > { %v1461_v35 = vpop.f32.mrf.mxu1 }
 0x1d3   : > { %v1558_v7 = vsel %vm634_vm3, %v1461_v35, %v1449_v45  ;;  %vm1622_vm8 = vcmp.eq.f32.partialorder %v1621_v19, 8.507059e+37 }
 0x1d4   : > { %v1574_v31 = vadd.f32 %v1558_v7, %v849_v29  ;;  %v1623_v29 = vand.u32 2147483648, %v1604_v21 }
 0x1d6   : > { %v6285_v25 = vpop.eup %6284  ;;  %v5854_v24 = vmul.f32 -1.442695, %v1574_v31  ;;  %v1624_v22 = vor.u32 1.1754944e-38, %v1623_v29 }
 0x1d7   : > { %v6287_v28 = vpop.eup %6286  ;;  %v1605_v26 = vadd.f32 1.0, %v6285_v25 }
 0x1d8   : > { %6288 = vpow2.f32 %v5854_v24  ;;  %v1613_v9 = vmul.f32 %v6287_v28, %v1604_v21  ;;  %vm1618_vm5 = vweird.f32 %v6287_v28 }
 0x1d9   : > { %6290 = vrcp.f32 %v1605_v26  ;;  %vm1619_vm7 = vmor %vm1617_vm6, %vm1618_vm5  ;;  %vm1632_vm10 = vweird.f32 %v1605_v26 }
 0x1da   : > { %v1464_v12 = vpop.f32.mrf.mxu1  ;;  %v1614_v45 = vsub.f32 1.0, %v1613_v9 }
 0x1db   : > { %v1559_v20 = vsel %vm10991_vm4, %v1464_v12, %v1452_v51 }
 0x1dc   : > { %v1575_v35 = vadd.f32 %v1559_v20, %v850_v10  ;;  %v1615_v7 = vmul.f32 %v6287_v28, %v1614_v45  ;;  %v1638_v45 = vand.u32 2147483648, %v1605_v26 }
 0x1de   : > { %v6289_v31 = vpop.eup %6288  ;;  %v5855_v34 = vmul.f32 -1.442695, %v1575_v35  ;;  %v1616_v25 = vadd.f32 %v6287_v28, %v1615_v7  ;;  %v1636_v35 = vand.u32 2147483647, %v1605_v26  ;;  %v1639_v19 = vor.u32 1.1754944e-38, %v1638_v45 }
 0x1df   : > { %v6291_v24 = vpop.eup %6290  ;;  %v1606_v63 = vadd.f32 1.0, %v6289_v31 }
 0x1e0   : > { %6292 = vpow2.f32 %v5855_v34  ;;  %v1620_v37 = vsel %vm1619_vm7, %v6287_v28, %v1616_v25  ;;  %v1628_v9 = vmul.f32 %v6291_v24, %v1605_v26  ;;  %vm1633_vm9 = vweird.f32 %v6291_v24 }
 0x1e1   : > { %6294 = vrcp.f32 %v1606_v63  ;;  %v1625_v38 = vsel %vm1622_vm8, %v1624_v22, %v1620_v37  ;;  %vm1634_vm11 = vmor %vm1632_vm10, %vm1633_vm9  ;;  %vm1637_vm12 = vcmp.eq.f32.partialorder %v1636_v35, 8.507059e+37  ;;  %vm1647_vm14 = vweird.f32 %v1606_v63 }
 0x1e2   : > { %v8304_v12 = vpop.f32.mrf.mxu1  ;;  %v1908_v10 = vmul.f32 0.0, %v1625_v38  ;;  %v1629_v51 = vsub.f32 1.0, %v1628_v9  ;;  %v1651_v9 = vand.u32 2147483647, %v1606_v63 }
 0x1e4   : > { %1932 = vmatmul.f32.vlgmr.msrb.gmra.mxu3 %v1908_v10  ;;  %v1630_v20 = vmul.f32 %v6291_v24, %v1629_v51  ;;  %vm1652_vm5 = vcmp.eq.f32.partialorder %v1651_v9, 8.507059e+37 }
 0x1e5   : > { %2652 = vmatpush.msrb.mxu3 %v7782_v40  ;;  %v1653_v40 = vand.u32 2147483648, %v1606_v63 }
 0x1e6   : > { %v6293_v21 = vpop.eup %6292  ;;  %v1631_v7 = vadd.f32 %v6291_v24, %v1630_v20 }
 0x1e7   : > { %v6295_v34 = vpop.eup %6294  ;;  %v1607_v28 = vadd.f32 1.0, %v6293_v21  ;;  %2653 = vmatpush.msrb.mxu3 %v7787_v41  ;;  %v1654_v10 = vor.u32 1.1754944e-38, %v1653_v40 }
 0x1e8   : > { %v1635_v37 = vsel %vm1634_vm11, %v6291_v24, %v1631_v7  ;;  %v1643_v38 = vmul.f32 %v6295_v34, %v1606_v63  ;;  %vm1648_vm13 = vweird.f32 %v6295_v34 }
 0x1e9   : > { %6296 = vrcp.f32 %v1607_v28  ;;  %v1640_v29 = vsel %vm1637_vm12, %v1639_v19, %v1635_v37  ;;  %2654 = vmatpush.msrb.mxu3 %v7794_v42  ;;  %vm1649_vm15 = vmor %vm1647_vm14, %vm1648_vm13  ;;  %v1668_v21 = vand.u32 2147483648, %v1607_v28  ;;  %v1666_v63 = vand.u32 2147483647, %v1607_v28 }
 0x1ea   : > { %v1470_v31 = vpop.f32.mrf.mxu1  ;;  %v1909_v25 = vmul.f32 0.0, %v1640_v29  ;;  %v1644_v22 = vsub.f32 1.0, %v1643_v38  ;;  %vm1662_vm7 = vweird.f32 %v1607_v28 }
 0x1eb   : > { %2655 = vmatpush.msrb.mxu3 %v7801_v43  ;;  %vm1667_vm9 = vcmp.eq.f32.partialorder %v1666_v63, 8.507059e+37 }
 0x1ec   : > { %1935 = vmatmul.f32.gmra.mxu3 %v1909_v25  ;;  %v1645_v26 = vmul.f32 %v6295_v34, %v1644_v22 }
 0x1ed   : > { %2656 = vmatpush.msrb.mxu3 %v7812_v46 }
 0x1ee   : > { %v1646_v41 = vadd.f32 %v6295_v34, %v1645_v26 }
 0x1ef   : > { %v6297_v24 = vpop.eup %6296  ;;  %2657 = vmatpush.msrb.mxu3 %v7819_v47  ;;  %v733_v47 = vrot.slane %v7771_v36, 1 }
 0x1f0   : > { %v1650_v42 = vsel %vm1649_vm15, %v6295_v34, %v1646_v41  ;;  %v1658_v51 = vmul.f32 %v6297_v24, %v1607_v28  ;;  %vm1663_vm6 = vweird.f32 %v6297_v24  ;;  %v1669_v34 = vor.u32 1.1754944e-38, %v1668_v21 }
 0x1f1   : > { %v1655_v45 = vsel %vm1652_vm5, %v1654_v10, %v1650_v42  ;;  %2658 = vmatpush.msrb.mxu3 %v7826_v48  ;;  %vm1664_vm8 = vmor %vm1662_vm7, %vm1663_vm6  ;;  %v772_v38 = vperm.slane %v733_v47, 0 }
 0x1f2   : > { %v1473_v43 = vpop.f32.mrf.mxu1  ;;  %v1910_v20 = vmul.f32 0.0, %v1655_v45  ;;  %v1659_v35 = vsub.f32 1.0, %v1658_v51 }
 0x1f3   : > { %2659 = vmatpush.msrb.mxu3 %v7833_v49  ;;  %v800_v25 = vmul.f32 %v772_v38, %v8263_v14  ;;  %v801_v22 = vmul.f32 %v772_v38, %v8277_v8 }
 0x1f4   : > { %1938 = vmatmul.f32.gmra.mxu3 %v1910_v20  ;;  %v1660_v46 = vmul.f32 %v6297_v24, %v1659_v35 }
 0x1f5   : > { %2660 = vmatpush.msrb.mxu3 %v7842_v52  ;;  %v799_v52 = vmul.f32 %v772_v38, %v8251_v50 }
 0x1f6   : > { %v1661_v7 = vadd.f32 %v6297_v24, %v1660_v46 }
 0x1f7   : > { %2661 = vmatpush.msrb.mxu3 %v7849_v53  ;;  %v851_v53 = vadd.f32 %v8256_v23, %v799_v52 }
 0x1f8   : > { %v1665_v48 = vsel %vm1664_vm8, %v6297_v24, %v1661_v7  ;;  %v802_v24 = vmul.f32 %v772_v38, %v8291_v6 }
 0x1f9   : > { %v1670_v19 = vsel %vm1667_vm9, %v1669_v34, %v1665_v48  ;;  %2662 = vmatpush.msrb.mxu3 %v7856_v54 }
 0x1fa   : > { %v1476_v49 = vpop.f32.mrf.mxu1  ;;  %v1911_v37 = vmul.f32 0.0, %v1670_v19  ;;  %v854_v42 = vadd.f32 %v8298_v27, %v802_v24 }
 0x1fb   : > { %2663 = vmatpush.msrb.mxu3 %v7863_v55 }
 0x1fc   : > { %1941 = vmatmul.f32.gmra.mxu3 %v1911_v37 }
 0x1fd   : > { %2664 = vmatpush.msrb.mxu3 %v7872_v58  ;;  %v852_v58 = vadd.f32 %v8270_v17, %v800_v25 }
 0x1ff   : > { %2665 = vmatpush.msrb.mxu3 %v7877_v59 }
 0x201   : > { %2666 = vmatpush.msrb.mxu3 %v7884_v60 }
 0x202   : > { %v1479_v28 = vpop.f32.mrf.mxu1 }
 0x203   : > { %v1560_v54 = vsel %vm632_vm1, %v1479_v28, %v8304_v12  ;;  %2667 = vmatpush.msrb.mxu3 %v7891_v61  ;;  %v853_v61 = vadd.f32 %v8284_v16, %v801_v22 }
 0x204   : > { %v1576_v29 = vadd.f32 %v1560_v54, %v851_v53 }
 0x206   : > { %v5856_v55 = vmul.f32 -1.442695, %v1576_v29 }
 0x208   : > { %6298 = vpow2.f32 %v5856_v55 }
 0x20a   : > { %v1482_v50 = vpop.f32.mrf.mxu1 }
 0x20b   : > { %v1561_v59 = vsel %vm633_vm2, %v1482_v50, %v1470_v31 }
 0x20c   : > { %v1577_v60 = vadd.f32 %v1561_v59, %v852_v58 }
 0x20e   : > { %v5857_v23 = vmul.f32 -1.442695, %v1577_v60  ;;  %v6299_v40 = vpop.eup %6298 }
 0x20f   : > { %v1608_v26 = vadd.f32 1.0, %v6299_v40 }
 0x210   : > { %6300 = vpow2.f32 %v5857_v23 }
 0x211   : > { %6302 = vrcp.f32 %v1608_v26  ;;  %v1683_v35 = vand.u32 2147483648, %v1608_v26  ;;  %v1681_v21 = vand.u32 2147483647, %v1608_v26  ;;  %vm1677_vm11 = vweird.f32 %v1608_v26 }
 0x212   : > { %v1485_v12 = vpop.f32.mrf.mxu1 }
 0x213   : > { %v1562_v14 = vsel %vm634_vm3, %v1485_v12, %v1473_v43  ;;  %v1684_v34 = vor.u32 1.1754944e-38, %v1683_v35  ;;  %vm1682_vm13 = vcmp.eq.f32.partialorder %v1681_v21, 8.507059e+37 }
 0x214   : > { %v1578_v9 = vadd.f32 %v1562_v14, %v853_v61 }
 0x216   : > { %v6301_v17 = vpop.eup %6300  ;;  %v5858_v41 = vmul.f32 -1.442695, %v1578_v9 }
 0x217   : > { %v1609_v31 = vadd.f32 1.0, %v6301_v17  ;;  %v6303_v10 = vpop.eup %6302 }
 0x218   : > { %6304 = vpow2.f32 %v5858_v41  ;;  %v1673_v8 = vmul.f32 %v6303_v10, %v1608_v26  ;;  %vm1678_vm10 = vweird.f32 %v6303_v10 }
 0x219   : > { %6306 = vrcp.f32 %v1609_v31  ;;  %vm1679_vm12 = vmor %vm1677_vm11, %vm1678_vm10  ;;  %v1698_v38 = vand.u32 2147483648, %v1609_v31  ;;  %v1696_v53 = vand.u32 2147483647, %v1609_v31  ;;  %vm1692_vm15 = vweird.f32 %v1609_v31 }
 0x21a   : > { %v1488_v51 = vpop.f32.mrf.mxu1  ;;  %v1674_v45 = vsub.f32 1.0, %v1673_v8 }
 0x21b   : > { %v1563_v16 = vsel %vm10991_vm4, %v1488_v51, %v1476_v49  ;;  %v1699_v25 = vor.u32 1.1754944e-38, %v1698_v38  ;;  %vm1697_vm6 = vcmp.eq.f32.partialorder %v1696_v53, 8.507059e+37 }
 0x21c   : > { %v1579_v20 = vadd.f32 %v1563_v16, %v854_v42  ;;  %v1675_v43 = vmul.f32 %v6303_v10, %v1674_v45 }
 0x21e   : > { %v6305_v46 = vpop.eup %6304  ;;  %v5859_v63 = vmul.f32 -1.442695, %v1579_v20  ;;  %v1676_v47 = vadd.f32 %v6303_v10, %v1675_v43 }
 0x21f   : > { %v6307_v6 = vpop.eup %6306  ;;  %v1610_v7 = vadd.f32 1.0, %v6305_v46 }
 0x220   : > { %6308 = vpow2.f32 %v5859_v63  ;;  %v1688_v27 = vmul.f32 %v6307_v6, %v1609_v31  ;;  %v1680_v48 = vsel %vm1679_vm12, %v6303_v10, %v1676_v47  ;;  %vm1693_vm14 = vweird.f32 %v6307_v6 }
 0x221   : > { %6310 = vrcp.f32 %v1610_v7  ;;  %v1685_v19 = vsel %vm1682_vm13, %v1684_v34, %v1680_v48  ;;  %vm1694_vm5 = vmor %vm1692_vm15, %vm1693_vm14  ;;  %v1713_v22 = vand.u32 2147483648, %v1610_v7  ;;  %v1711_v26 = vand.u32 2147483647, %v1610_v7 }
 0x222   : > { %v1689_v49 = vsub.f32 1.0, %v1688_v27  ;;  %v1912_v37 = vmul.f32 0.0, %v1685_v19  ;;  %vm1707_vm8 = vweird.f32 %v1610_v7 }
 0x223   : > { %v1714_v14 = vor.u32 1.1754944e-38, %v1713_v22  ;;  %vm1712_vm10 = vcmp.eq.f32.partialorder %v1711_v26, 8.507059e+37  ;;  %v8366_v26 = vld [vmem:[#allocation13 + $0x8] sm:$0xff] }
 0x224   : > { %v1690_v52 = vmul.f32 %v6307_v6, %v1689_v49  ;;  %1944 = vmatmul.f32.gmra.mxu3 %v1912_v37 }
 0x226   : > { %v6309_v28 = vpop.eup %6308  ;;  %v1691_v54 = vadd.f32 %v6307_v6, %v1690_v52 }
 0x227   : > { %v6311_v29 = vpop.eup %6310  ;;  %v1611_v55 = vadd.f32 1.0, %v6309_v28  ;;  %v8347_v28 = vld [vmem:[#allocation10] sm:$0xff] }
 0x228   : > { %v1695_v58 = vsel %vm1694_vm5, %v6307_v6, %v1691_v54  ;;  %v1703_v50 = vmul.f32 %v6311_v29, %v1610_v7  ;;  %vm1708_vm7 = vweird.f32 %v6311_v29  ;;  %v8340_v7 = vpop.f32.mrf.mxu2  ;;  %v8349_v54 = vld [vmem:[#allocation10 + $0x8] sm:$0xff] }
 0x229   : > { %6312 = vrcp.f32 %v1611_v55  ;;  %v1700_v59 = vsel %vm1697_vm6, %v1699_v25, %v1695_v58  ;;  %vm1709_vm9 = vmor %vm1707_vm8, %vm1708_vm7  ;;  %v1728_v10 = vand.u32 2147483648, %v1611_v55  ;;  %v1726_v42 = vand.u32 2147483647, %v1611_v55  ;;  %v620_v58 = vld [vmem:[%s10974_s4] sm:$0xff] }
 0x22a   : > { %v1913_v60 = vmul.f32 0.0, %v1700_v59  ;;  %v1704_v23 = vsub.f32 1.0, %v1703_v50  ;;  %vm1722_vm12 = vweird.f32 %v1611_v55  ;;  %v758_v37 = vrot.slane %v8340_v7, 2  ;;  %v8357_v50 = vld [vmem:[#allocation10 + $0x18] sm:$0xff] }
 0x22b   : > { %v1729_v16 = vor.u32 1.1754944e-38, %v1728_v10  ;;  %vm1727_vm14 = vcmp.eq.f32.partialorder %v1726_v42, 8.507059e+37  ;;  %v761_v42 = vrot.slane %v8340_v7, 5 }
 0x22c   : > { %v1705_v40 = vmul.f32 %v6311_v29, %v1704_v23  ;;  %1947 = vmatmul.f32.gmra.mxu3 %v1913_v60  ;;  %v1125_v38 = vperm.slane %v758_v37, 0 }
 0x22e   : > { %v1706_v61 = vadd.f32 %v6311_v29, %v1705_v40  ;;  %v1155_v59 = vmul.f32 %v1125_v38, %v8347_v28  ;;  %v1156_v60 = vmul.f32 %v1125_v38, %v8349_v54  ;;  %v8364_v40 = vld [vmem:[#allocation13] sm:$0xff] }
 0x22f   : > { %v6313_v12 = vpop.eup %6312 }
 0x230   : > { %v1710_v9 = vsel %vm1709_vm9, %v6311_v29, %v1706_v61  ;;  %v1718_v17 = vmul.f32 %v6313_v12, %v1611_v55  ;;  %vm1723_vm11 = vweird.f32 %v6313_v12  ;;  %v728_v34 = vpop.f32.mrf.mxu2  ;;  %v8351_v29 = vld [vmem:[#allocation10 + $0x10] sm:$0xff]  ;;  %v759_v55 = vrot.slane %v8340_v7, 3 }
 0x231   : > { %v1715_v41 = vsel %vm1712_vm10, %v1714_v14, %v1710_v9  ;;  %vm1724_vm13 = vmor %vm1722_vm12, %vm1723_vm11  ;;  %v764_v52 = vrot.slane %v728_v34, 1  ;;  %v765_v53 = vrot.slane %v728_v34, 2  ;;  %v766_v25 = vrot.slane %v728_v34, 3  ;;  %v8368_v61 = vld [vmem:[#allocation13 + $0x10] sm:$0xff]  ;;  %v8373_v9 = vld [vmem:[#allocation13 + $0x18] sm:$0xff] }
 0x232   : > { %v1914_v24 = vmul.f32 0.0, %v1715_v41  ;;  %v1719_v31 = vsub.f32 1.0, %v1718_v17  ;;  %v1157_v23 = vmul.f32 %v1125_v38, %v8351_v29  ;;  %v8362_v22 = vperm.slane %v728_v34, 0 }
 0x233   : > { %v8371_v14 = vperm.slane %v764_v52, 0  ;;  %v8376_v17 = vadd.f32 %v8364_v40, %v1155_v59  ;;  %v8379_v41 = vadd.f32 %v8366_v26, %v1156_v60  ;;  %v1126_v10 = vperm.slane %v759_v55, 0  ;;  %v621_v59 = vld [vmem:[%s10974_s4 + $0x8] sm:$0xff] }
 0x234   : > { %v1720_v8 = vmul.f32 %v6313_v12, %v1719_v31  ;;  %1950 = vmatmul.f32.gmra.mxu3 %v1914_v24  ;;  %v8382_v24 = vadd.f32 %v8368_v61, %v1157_v23 }
 0x236   : > { %v1721_v51 = vadd.f32 %v6313_v12, %v1720_v8  ;;  %v760_v8 = vrot.slane %v8340_v7, 4 }
 0x238   : > { %v1725_v45 = vsel %vm1724_vm13, %v6313_v12, %v1721_v51  ;;  %v8342_v48 = vpop.f32.mrf.mxu2  ;;  %v1158_v12 = vmul.f32 %v1125_v38, %v8357_v50  ;;  %v8389_v51 = vperm.slane %v765_v53, 0 }
 0x239   : > { %v1730_v20 = vsel %vm1727_vm14, %v1729_v16, %v1725_v45  ;;  %v8391_v16 = vperm.slane %v766_v25, 0  ;;  %v762_v45 = vrot.slane %v8340_v7, 6 }
 0x23a   : > { %v1915_v35 = vmul.f32 0.0, %v1730_v20  ;;  %v8385_v31 = vadd.f32 %v8373_v9, %v1158_v12  ;;  %v763_v20 = vrot.slane %v8340_v7, 7 }
 0x23b   : > { %v1129_v34 = vperm.slane %v762_v45, 0 }
 0x23c   : > { %1953 = vmatmul.f32.gmra.mxu3 %v1915_v35 }
 0x240   : > { %v8344_v49 = vpop.f32.mrf.mxu2 }
 0x248   : > { %v8396_v35 = vpop.f32.mrf.mxu2 }
 0x267   : > { %v1933_v43 = vpop.f32.mrf.mxu3 }
 0x26f   : > { %v1936_v21 = vpop.f32.mrf.mxu3 }
 0x277   : > { %v1939_v46 = vpop.f32.mrf.mxu3 }
 0x27f   : > { %v1942_v63 = vpop.f32.mrf.mxu3 }
 0x2a7   : > { %v1945_v6 = vpop.f32.mrf.mxu3 }
 0x2af   : > { %v1948_v47 = vpop.f32.mrf.mxu3 }
 0x2b7   : > { %v1951_v27 = vpop.f32.mrf.mxu3 }
 0x2bf   : > { %v1954_v19 = vpop.f32.mrf.mxu3 }
 0x2c0   : > { %1989 = vmatpush.msra.mxu0 %v1954_v19 }
 0x2c2   : > { %1990 = vmatpush.msra.mxu0 %v1951_v27  ;;  %v1130_v27 = vperm.slane %v763_v20, 0 }
 0x2c4   : > { %1991 = vmatpush.msra.mxu0 %v1948_v47  ;;  %v1128_v47 = vperm.slane %v761_v42, 0 }
 0x2c6   : > { %1992 = vmatpush.msra.mxu0 %v1945_v6  ;;  %v1127_v6 = vperm.slane %v760_v8, 0  ;;  %v1167_v60 = vmul.f32 %v1128_v47, %v8347_v28  ;;  %v1168_v23 = vmul.f32 %v1128_v47, %v8349_v54  ;;  %v1169_v12 = vmul.f32 %v1128_v47, %v8351_v29 }
 0x2c8   : > { %1993 = vmatpush.msra.mxu0 %v1942_v63  ;;  %v1162_v63 = vmul.f32 %v1126_v10, %v8357_v50  ;;  %v1163_v53 = vmul.f32 %v1127_v6, %v8347_v28  ;;  %v1164_v55 = vmul.f32 %v1127_v6, %v8349_v54  ;;  %v1165_v25 = vmul.f32 %v1127_v6, %v8351_v29 }
 0x2ca   : > { %1994 = vmatpush.msra.mxu0 %v1939_v46  ;;  %v1161_v46 = vmul.f32 %v1126_v10, %v8351_v29  ;;  %v8412_v52 = vadd.f32 %v8373_v9, %v1162_v63  ;;  %v8426_v8 = vadd.f32 %v8364_v40, %v1163_v53  ;;  %v8429_v42 = vadd.f32 %v8366_v26, %v1164_v55 }
 0x2cb   : > { %v8432_v45 = vadd.f32 %v8368_v61, %v1165_v25  ;;  %v1173_v53 = vmul.f32 %v1129_v34, %v8351_v29  ;;  %v1174_v55 = vmul.f32 %v1129_v34, %v8357_v50  ;;  %v1175_v25 = vmul.f32 %v1130_v27, %v8347_v28 }
 0x2cc   : > { %1995 = vmatpush.msra.mxu0 %v1936_v21  ;;  %v1160_v21 = vmul.f32 %v1126_v10, %v8349_v54  ;;  %v8409_v38 = vadd.f32 %v8368_v61, %v1161_v46  ;;  %11045 = vst [vmem:[#allocation64_spill] sm:$0xff] %v8412_v52  ;;  %v8444_v46 = vadd.f32 %v8368_v61, %v1169_v12 }
 0x2cd   : > { %11046 = vst [vmem:[#allocation65_spill] sm:$0xff] %v8426_v8  ;;  %v8468_v62 = vadd.f32 %v8373_v9, %v1174_v55  ;;  %v8473_v39 = vadd.f32 %v8364_v40, %v1175_v25  ;;  %v1181_v55 = vmul.f32 %v8362_v22, %v8351_v29  ;;  %v1182_v25 = vmul.f32 %v8362_v22, %v8357_v50 }
 0x2ce   : > { %1996 = vmatpush.msra.mxu0 %v1933_v43  ;;  %v1159_v43 = vmul.f32 %v1126_v10, %v8347_v28  ;;  %v8406_v37 = vadd.f32 %v8366_v26, %v1160_v21  ;;  %11044 = vst [vmem:[#allocation63_spill] sm:$0xff] %v8409_v38  ;;  %v1170_v10 = vmul.f32 %v1128_v47, %v8357_v50 }
 0x2cf   : > { %5868 = vmatmul.msk.f32.vlgmr.msra.gmra.mxu0 %vm1377_vm0, %v620_v58  ;;  %v1166_v58 = vmul.f32 %v1127_v6, %v8357_v50  ;;  %11047 = vst [vmem:[#allocation66_spill] sm:$0xff] %v8429_v42  ;;  %v8441_v21 = vadd.f32 %v8366_v26, %v1168_v23  ;;  %v1171_v6 = vmul.f32 %v1129_v34, %v8347_v28 }
 0x2d0   : > { %v8403_v19 = vadd.f32 %v8364_v40, %v1159_v43  ;;  %11043 = vst [vmem:[#allocation62_spill] sm:$0xff] %v8406_v37  ;;  %v8438_v43 = vadd.f32 %v8364_v40, %v1167_v60  ;;  %v8447_v63 = vadd.f32 %v8373_v9, %v1170_v10  ;;  %v1172_v47 = vmul.f32 %v1129_v34, %v8349_v54  ;;  %v8470_v34 = vpop.f32.mrf.mxu2 }
 0x2d1   : > { %11048 = vst [vmem:[#allocation67_spill] sm:$0xff] %v8432_v45  ;;  %v8435_v20 = vadd.f32 %v8373_v9, %v1166_v58  ;;  %v1176_v58 = vmul.f32 %v1130_v27, %v8349_v54  ;;  %v1177_v60 = vmul.f32 %v1130_v27, %v8351_v29  ;;  %v1178_v23 = vmul.f32 %v1130_v27, %v8357_v50 }
 0x2d2   : > { %11050 = vst [vmem:[#allocation69_spill] sm:$0xff] %v8438_v43  ;;  %v8459_v12 = vadd.f32 %v8364_v40, %v1171_v6  ;;  %v8465_v10 = vadd.f32 %v8368_v61, %v1173_v53  ;;  %v1180_v53 = vmul.f32 %v8362_v22, %v8349_v54 }
 0x2d3   : > { %11049 = vst [vmem:[#allocation68_spill] sm:$0xff] %v8435_v20  ;;  %v8476_v44 = vadd.f32 %v8366_v26, %v1176_v58  ;;  %v8479_v27 = vadd.f32 %v8368_v61, %v1177_v60  ;;  %v8482_v6 = vadd.f32 %v8373_v9, %v1178_v23  ;;  %v622_v58 = vld [vmem:[%s10974_s4 + $0x10] sm:$0xff]  ;;  %v1183_v60 = vmul.f32 %v8371_v14, %v8347_v28 }
 0x2d4   : > { %11051 = vst [vmem:[#allocation70_spill] sm:$0xff] %v8441_v21  ;;  %v1184_v23 = vmul.f32 %v8371_v14, %v8349_v54 }
 0x2d5   : > { %11052 = vst [vmem:[#allocation71_spill] sm:$0xff] %v8444_v46 }
 0x2d6   : > { %11053 = vst [vmem:[#allocation72_spill] sm:$0xff] %v8447_v63 }
 0x2d7   : > { %5869 = vmatmul.msk.f32.gmra.mxu0 %vm1377_vm0, %v621_v59  ;;  %11054 = vst [vmem:[#allocation73_spill] sm:$0xff] %v8459_v12  ;;  %v8462_v59 = vadd.f32 %v8366_v26, %v1172_v47  ;;  %v1179_v47 = vmul.f32 %v8362_v22, %v8347_v28  ;;  %v8507_v22 = vadd.f32 %v8366_v26, %v1180_v53 }
 0x2d8   : > { %11056 = vst [vmem:[#allocation75_spill] sm:$0xff] %v8465_v10  ;;  %v8516_v10 = vadd.f32 %v8364_v40, %v1183_v60  ;;  %v1187_v53 = vmul.f32 %v8389_v51, %v8347_v28  ;;  %v1190_v60 = vmul.f32 %v8389_v51, %v8357_v50 }
 0x2d9   : > { %11055 = vst [vmem:[#allocation74_spill] sm:$0xff] %v8462_v59  ;;  %v8519_v59 = vadd.f32 %v8366_v26, %v1184_v23  ;;  %v1194_v23 = vmul.f32 %v8391_v16, %v8357_v50 }
 0x2da   : > { %11057 = vst [vmem:[#allocation76_spill] sm:$0xff] %v8468_v62  ;;  %v8513_v62 = vadd.f32 %v8373_v9, %v1182_v25  ;;  %v1189_v25 = vmul.f32 %v8389_v51, %v8351_v29 }
 0x2db   : > { %11058 = vst [vmem:[#allocation77_spill] sm:$0xff] %v8473_v39  ;;  %v8510_v39 = vadd.f32 %v8368_v61, %v1181_v55  ;;  %v1188_v55 = vmul.f32 %v8389_v51, %v8349_v54 }
 0x2dc   : > { %11059 = vst [vmem:[#allocation78_spill] sm:$0xff] %v8476_v44  ;;  %v8504_v44 = vadd.f32 %v8364_v40, %v1179_v47  ;;  %v8551_v51 = vadd.f32 %v8368_v61, %v1189_v25  ;;  %v623_v25 = vld [vmem:[%s10974_s4 + $0x18] sm:$0xff] }
 0x2dd   : > { %11060 = vst [vmem:[#allocation79_spill] sm:$0xff] %v8479_v27  ;;  %v1186_v27 = vmul.f32 %v8371_v14, %v8357_v50 }
 0x2de   : > { %11061 = vst [vmem:[#allocation80_spill] sm:$0xff] %v8482_v6  ;;  %v1185_v6 = vmul.f32 %v8371_v14, %v8351_v29 }
 0x2df   : > { %11062 = vst [vmem:[#allocation81_spill] sm:$0xff] %v8504_v44  ;;  %v8525_v47 = vadd.f32 %v8373_v9, %v1186_v27  ;;  %5870 = vmatmul.msk.f32.gmra.mxu0 %vm1377_vm0, %v622_v58  ;;  %v1192_v27 = vmul.f32 %v8391_v16, %v8349_v54  ;;  %v1193_v58 = vmul.f32 %v8391_v16, %v8351_v29 }
 0x2e0   : > { %11063 = vst [vmem:[#allocation82_spill] sm:$0xff] %v8507_v22  ;;  %v8522_v14 = vadd.f32 %v8368_v61, %v1185_v6  ;;  %v1191_v6 = vmul.f32 %v8391_v16, %v8347_v28  ;;  %v6764_v22 = vld [vmem:[#allocation8 + $0x8] sm:$0xff] }
 0x2e1   : > { %11064 = vst [vmem:[#allocation83_spill] sm:$0xff] %v8510_v39  ;;  %v8563_v16 = vadd.f32 %v8368_v61, %v1193_v58 }
 0x2e2   : > { %11065 = vst [vmem:[#allocation84_spill] sm:$0xff] %v8513_v62  ;;  %v8560_v62 = vadd.f32 %v8366_v26, %v1192_v27  ;;  %v625_v27 = vld [vmem:[%s10974_s4 + $0x28] sm:$0xff] }
 0x2e3   : > { %11066 = vst [vmem:[#allocation85_spill] sm:$0xff] %v8516_v10  ;;  %v8557_v10 = vadd.f32 %v8364_v40, %v1191_v6 }
 0x2e4   : > { %11067 = vst [vmem:[#allocation86_spill] sm:$0xff] %v8519_v59  ;;  %v8554_v59 = vadd.f32 %v8373_v9, %v1190_v60  ;;  %v624_v60 = vld [vmem:[%s10974_s4 + $0x20] sm:$0xff] }
 0x2e5   : > { %11068 = vst [vmem:[#allocation87_spill] sm:$0xff] %v8522_v14  ;;  %v8548_v14 = vadd.f32 %v8366_v26, %v1188_v55  ;;  %v1520_v55 = vpop.f32.mrf.mxu2 }
 0x2e6   : > { %11069 = vst [vmem:[#allocation88_spill] sm:$0xff] %v8525_v47  ;;  %v8545_v47 = vadd.f32 %v8364_v40, %v1187_v53  ;;  %v8566_v53 = vadd.f32 %v8373_v9, %v1194_v23  ;;  %v626_v23 = vld [vmem:[%s10974_s4 + $0x30] sm:$0xff] }
 0x2e7   : > { %11071 = vst [vmem:[#allocation90_spill] sm:$0xff] %v8548_v14  ;;  %5871 = vmatmul.msk.f32.gmra.mxu0 %vm1377_vm0, %v623_v25  ;;  %v8600_v14 = vld [vmem:[#allocation16 + $0x8] sm:$0xff] }
 0x2e8   : > { %11070 = vst [vmem:[#allocation89_spill] sm:$0xff] %v8545_v47  ;;  %vm649_vm5 = vcmp.gt.f32.partialorder %v8600_v14, 0.5 }
 0x2e9   : > { %11072 = vst [vmem:[#allocation91_spill] sm:$0xff] %v8551_v51  ;;  %v6763_v51 = vld [vmem:[%s10979_s9] sm:$0xff] }
 0x2ea   : > { %11073 = vst [vmem:[#allocation92_spill] sm:$0xff] %v8554_v59 }
 0x2eb   : > { %11074 = vst [vmem:[#allocation93_spill] sm:$0xff] %v8557_v10  ;;  %v6762_v10 = vld [vmem:[#allocation8] sm:$0xff] }
 0x2ec   : > { %11075 = vst [vmem:[#allocation94_spill] sm:$0xff] %v8560_v62 }
 0x2ed   : > { %11076 = vst [vmem:[#allocation95_spill] sm:$0xff] %v8563_v16  ;;  %v1523_v6 = vpop.f32.mrf.mxu2  ;;  %v947_v16 = vperm.slane %v7987_v13, 0 }
 0x2ee   : > { %11077 = vst [vmem:[#allocation96_spill] sm:$0xff] %v8566_v53  ;;  %v627_v53 = vld [vmem:[%s10974_s4 + $0x38] sm:$0xff]  ;;  %v1733_v63 = vsel %vm649_vm5, %v1523_v6, %v8344_v49 }
 0x2ef   : > { %5872 = vmatmul.msk.f32.gmra.mxu0 %vm1377_vm0, %v624_v60  ;;  %v971_v59 = vmul.f32 %v6762_v10, %v947_v16  ;;  %v972_v44 = vmul.f32 %v6764_v22, %v947_v16 }
 0x2f5   : > { %v1526_v58 = vpop.f32.mrf.mxu2 }
 0x2f7   : > { %5873 = vmatmul.msk.f32.gmra.mxu0 %vm1377_vm0, %v625_v27  ;;  %v8591_v27 = vld [vmem:[#allocation16] sm:$0xff] }
 0x2f8   : > { %vm648_vm15 = vcmp.gt.f32.partialorder %v8591_v27, 0.5 }
 0x2fd   : > { %v1529_v25 = vpop.f32.mrf.mxu2 }
 0x2ff   : > { %5874 = vmatmul.msk.f32.gmra.mxu0 %vm1377_vm0, %v626_v23  ;;  %v1732_v23 = vsel %vm648_vm15, %v1520_v55, %v8342_v48  ;;  %v6765_v48 = vld [vmem:[%s10979_s9 + $0x8] sm:$0xff] }
 0x300   : > { %v1024_v55 = vadd.f32 %v6765_v48, %v972_v44  ;;  %v8622_v44 = vld [vmem:[%s10979_s9 + $0x10] sm:$0xff] }
 0x305   : > { %v1532_v60 = vpop.f32.mrf.mxu2 }
 0x307   : > { %5875 = vmatmul.msk.f32.gmra.mxu0 %vm1377_vm0, %v627_v53  ;;  %v1023_v53 = vadd.f32 %v6763_v51, %v971_v59  ;;  %v8611_v59 = vld [vmem:[#allocation16 + $0x10] sm:$0xff] }
 0x308   : > { %vm650_vm6 = vcmp.gt.f32.partialorder %v8611_v59, 0.5 }
 0x309   : > { %v1748_v47 = vadd.f32 %v1732_v23, %v1023_v53  ;;  %v1749_v23 = vadd.f32 %v1733_v63, %v1024_v55  ;;  %v6766_v53 = vld [vmem:[#allocation8 + $0x10] sm:$0xff]  ;;  %v1734_v49 = vsel %vm650_vm6, %v1526_v58, %v8396_v35  ;;  %v8625_v63 = vld [vmem:[#allocation16 + $0x18] sm:$0xff]  ;;  %v745_v58 = vrot.slane %v7987_v13, 1 }
 0x30a   : > { %v973_v46 = vmul.f32 %v6766_v53, %v947_v16  ;;  %vm651_vm7 = vcmp.gt.f32.partialorder %v8625_v63, 0.5 }
 0x30b   : > { %v5860_v12 = vmul.f32 -1.442695, %v1748_v47  ;;  %v5861_v47 = vmul.f32 -1.442695, %v1749_v23  ;;  %v8630_v23 = vld [vmem:[#allocation8 + $0x18] sm:$0xff] }
 0x30c   : > { %v974_v35 = vmul.f32 %v8630_v23, %v947_v16 }
 0x30d   : > { %v8589_v62 = vpop.f32.mrf.mxu2  ;;  %6314 = vpow2.f32 %v5860_v12  ;;  %v1025_v12 = vadd.f32 %v8622_v44, %v973_v46  ;;  %v1735_v46 = vsel %vm651_vm7, %v1529_v25, %v8470_v34 }
 0x30e   : > { %6316 = vpow2.f32 %v5861_v47 }
 0x30f   : > { %v1750_v55 = vadd.f32 %v1734_v49, %v1025_v12  ;;  %v8641_v49 = vld [vmem:[%s10979_s9 + $0x18] sm:$0xff]  ;;  %v948_v12 = vperm.slane %v745_v58, 0 }
 0x311   : > { %v5862_v20 = vmul.f32 -1.442695, %v1750_v55  ;;  %v975_v55 = vmul.f32 %v6762_v10, %v948_v12  ;;  %v8655_v10 = vperm.slane %v8340_v7, 0 }
 0x313   : > { %v6315_v6 = vpop.eup %6314  ;;  %v1027_v32 = vadd.f32 %v6763_v51, %v975_v55 }
 0x314   : > { %v8627_v43 = vadd.f32 1.0, %v6315_v6  ;;  %v6317_v47 = vpop.eup %6316  ;;  %v1026_v6 = vadd.f32 %v8641_v49, %v974_v35 }
 0x315   : > { %v8602_v39 = vpop.f32.mrf.mxu2  ;;  %v8644_v13 = vadd.f32 1.0, %v6317_v47 }
 0x316   : > { %6318 = vrcp.f32 %v8627_v43  ;;  %v1751_v16 = vadd.f32 %v1735_v46, %v1026_v6  ;;  %v976_v46 = vmul.f32 %v6764_v22, %v948_v12  ;;  %vm1793_vm9 = vweird.f32 %v8627_v43 }
 0x317   : > { %6320 = vpow2.f32 %v5862_v20  ;;  %vm1808_vm13 = vweird.f32 %v8644_v13 }
 0x318   : > { %v5863_v8 = vmul.f32 -1.442695, %v1751_v16  ;;  %6322 = vrcp.f32 %v8644_v13 }
 0x31a   : > { %6324 = vpow2.f32 %v5863_v8  ;;  %v1028_v8 = vadd.f32 %v6765_v48, %v976_v46  ;;  %v1797_v48 = vand.u32 2147483647, %v8627_v43 }
 0x31c   : > { %v6319_v42 = vpop.eup %6318  ;;  %vm1798_vm11 = vcmp.eq.f32.partialorder %v1797_v48, 8.507059e+37 }
 0x31d   : > { %v8614_v21 = vpop.f32.mrf.mxu2  ;;  %v6321_v25 = vpop.eup %6320  ;;  %v1789_v33 = vmul.f32 %v6319_v42, %v8627_v43  ;;  %vm1794_vm8 = vweird.f32 %v6319_v42 }
 0x31e   : > { %v8650_v58 = vadd.f32 1.0, %v6321_v25  ;;  %v8652_v47 = vpop.eup %6322  ;;  %v977_v25 = vmul.f32 %v6766_v53, %v948_v12  ;;  %vm8677_vm10 = vmor %vm1793_vm9, %vm1794_vm8 }
 0x31f   : > { %v1790_v20 = vsub.f32 1.0, %v1789_v33  ;;  %v1147_v33 = vmul.f32 %v8655_v10, %v8347_v28  ;;  %vm1809_vm12 = vweird.f32 %v8652_v47 }
 0x320   : > { %6326 = vrcp.f32 %v8650_v58  ;;  %v6325_v51 = vpop.eup %6324  ;;  %vm8705_vm14 = vmor %vm1808_vm13, %vm1809_vm12 }
 0x321   : > { %v8665_v55 = vadd.f32 1.0, %v6325_v51 }
 0x325   : > { %v1544_v45 = vpop.f32.mrf.mxu2 }
 0x326   : > { %v1736_v34 = vsel %vm648_vm15, %v1544_v45, %v1532_v60  ;;  %v1791_v60 = vmul.f32 %v6319_v42, %v1790_v20  ;;  %v8667_v38 = vpop.eup %6326 }
 0x327   : > { %v1752_v35 = vadd.f32 %v1736_v34, %v1027_v32  ;;  %v1804_v32 = vmul.f32 %v8652_v47, %v8644_v13  ;;  %vm1824_vm9 = vweird.f32 %v8667_v38 }
 0x329   : > { %v5864_v6 = vmul.f32 -1.442695, %v1752_v35  ;;  %v1805_v34 = vsub.f32 1.0, %v1804_v32  ;;  %v1792_v35 = vadd.f32 %v6319_v42, %v1791_v60  ;;  %v1819_v32 = vmul.f32 %v8667_v38, %v8650_v58 }
 0x32b   : > { %6328 = vpow2.f32 %v5864_v6  ;;  %v1806_v60 = vmul.f32 %v8652_v47, %v1805_v34 }
 0x32c   : > { %6330 = vrcp.f32 %v8665_v55 }
 0x32d   : > { %v1547_v52 = vpop.f32.mrf.mxu2 }
 0x32e   : > { %v1737_v45 = vsel %vm649_vm5, %v1547_v52, %v8589_v62  ;;  %v1199_v62 = vadd.f32 %v8364_v40, %v1147_v33  ;;  %v1799_v52 = vand.u32 2147483648, %v8627_v43  ;;  %v1029_v43 = vadd.f32 %v8622_v44, %v977_v25 }
 0x32f   : > { %v1753_v22 = vadd.f32 %v1737_v45, %v1028_v8  ;;  %v1796_v8 = vsel %vm8677_vm10, %v6319_v42, %v1792_v35  ;;  %v978_v33 = vmul.f32 %v8630_v23, %v948_v12  ;;  %v1807_v44 = vadd.f32 %v8652_v47, %v1806_v60 }
 0x330   : > { %v1814_v25 = vand.u32 2147483648, %v8644_v13  ;;  %vm1823_vm10 = vweird.f32 %v8650_v58 }
 0x331   : > { %v5865_v20 = vmul.f32 -1.442695, %v1753_v22  ;;  %v6329_v51 = vpop.eup %6328  ;;  %v1800_v22 = vor.u32 1.1754944e-38, %v1799_v52  ;;  %v1030_v23 = vadd.f32 %v8641_v49, %v978_v33 }
 0x332   : > { %v8694_v42 = vpop.eup %6330  ;;  %v1815_v33 = vor.u32 1.1754944e-38, %v1814_v25 }
 0x333   : > { %v1801_v34 = vsel %vm1798_vm11, %v1800_v22, %v1796_v8  ;;  %v1811_v8 = vsel %vm8705_vm14, %v8652_v47, %v1807_v44  ;;  %vm8732_vm11 = vmor %vm1823_vm10, %vm1824_vm9  ;;  %vm1839_vm13 = vweird.f32 %v8694_v42  ;;  %vm1838_vm14 = vweird.f32 %v8665_v55 }
 0x334   : > { %v2054_v52 = vsub.f32 1.0, %v1801_v34 }
 0x335   : > { %v1550_v16 = vpop.f32.mrf.mxu2 }
 0x336   : > { %v1738_v53 = vsel %vm650_vm6, %v1550_v16, %v8602_v39  ;;  %v1148_v39 = vmul.f32 %v8655_v10, %v8349_v54 }
 0x337   : > { %v1754_v16 = vadd.f32 %v1738_v53, %v1029_v43 }
 0x338   : > { %v1200_v12 = vadd.f32 %v8366_v26, %v1148_v39 }
 0x339   : > { %v5866_v35 = vmul.f32 -1.442695, %v1754_v16 }
 0x33d   : > { %v1553_v37 = vpop.f32.mrf.mxu2 }
 0x33e   : > { %v1739_v6 = vsel %vm651_vm7, %v1553_v37, %v8614_v21  ;;  %v1149_v37 = vmul.f32 %v8655_v10, %v8351_v29 }
 0x33f   : > { %v1755_v21 = vadd.f32 %v1739_v6, %v1030_v23  ;;  %v1829_v23 = vand.u32 2147483648, %v8650_v58 }
 0x340   : > { %v1201_v44 = vadd.f32 %v8368_v61, %v1149_v37  ;;  %v6772_v37 = vld [vmem:[#allocation5 + $0xd0] sm:$0xff] }
 0x341   : > { %v5867_v25 = vmul.f32 -1.442695, %v1755_v21 }
 0x34c   : > { %v1998_v46 = vpop.f32.mrf.mxu0 }
 0x34d   : > { %v2030_v45 = vadd.f32 %v1998_v46, %v1199_v62  ;;  %v8690_v62 = vadd.f32 1.0, %v6329_v51  ;;  %v1820_v46 = vsub.f32 1.0, %v1819_v32  ;;  %v2046_v51 = vmul.f32 0.0, %v1801_v34 }
 0x34f   : > { %6332 = vtanh.f32 %v2030_v45  ;;  %v1821_v32 = vmul.f32 %v8667_v38, %v1820_v46 }
 0x350   : > { %6334 = vpow2.f32 %v5865_v20  ;;  %v1812_v20 = vand.u32 2147483647, %v8644_v13  ;;  %v1834_v13 = vmul.f32 %v8694_v42, %v8665_v55 }
 0x351   : > { %6336 = vrcp.f32 %v8690_v62  ;;  %v1822_v47 = vadd.f32 %v8667_v38, %v1821_v32 }
 0x352   : > { %vm1813_vm8 = vcmp.eq.f32.partialorder %v1812_v20, 8.507059e+37  ;;  %v1835_v34 = vsub.f32 1.0, %v1834_v13 }
 0x353   : > { %v1816_v16 = vsel %vm1813_vm8, %v1815_v33, %v1811_v8  ;;  %v1150_v8 = vmul.f32 %v8655_v10, %v8357_v50  ;;  %v757_v33 = vrot.slane %v8340_v7, 1  ;;  %vm8762_vm8 = vmor %vm1838_vm14, %vm1839_vm13 }
 0x354   : > { %v2001_v48 = vpop.f32.mrf.mxu0  ;;  %v2047_v49 = vmul.f32 0.0, %v1816_v16 }
 0x355   : > { %v6333_v53 = vpop.eup %6332  ;;  %v2031_v45 = vadd.f32 %v2001_v48, %v1200_v12  ;;  %v6770_v12 = vld [vmem:[#allocation5 + $0xf0] sm:$0xff]  ;;  %v1202_v10 = vadd.f32 %v8373_v9, %v1150_v8 }
 0x356   : > { %v6335_v60 = vpop.eup %6334  ;;  %v2062_v43 = vmul.f32 %v6333_v53, %v2054_v52  ;;  %v1827_v52 = vand.u32 2147483647, %v8650_v58  ;;  %v1826_v58 = vsel %vm8732_vm11, %v8667_v38, %v1822_v47  ;;  %v1844_v47 = vand.u32 2147483648, %v8665_v55  ;;  %v6776_v8 = vld [vmem:[#allocation5 + $0x90] sm:$0xff] }
 0x357   : > { %6338 = vtanh.f32 %v2031_v45  ;;  %v8719_v39 = vadd.f32 1.0, %v6335_v60  ;;  %v8725_v46 = vpop.eup %6336  ;;  %v6771_v45 = vld [vmem:[#allocation5 + $0xe0] sm:$0xff]  ;;  %v1836_v60 = vmul.f32 %v8694_v42, %v1835_v34  ;;  %vm1853_vm11 = vweird.f32 %v8690_v62 }
 0x358   : > { %6340 = vpow2.f32 %v5866_v35  ;;  %v8717_v22 = vadd.f32 %v2062_v43, %v2046_v51  ;;  %v2055_v35 = vsub.f32 1.0, %v1816_v16  ;;  %v1849_v32 = vmul.f32 %v8725_v46, %v8690_v62 }
 0x359   : > { %6342 = vrcp.f32 %v8719_v39  ;;  %v1830_v43 = vor.u32 1.1754944e-38, %v1829_v23  ;;  %vm1828_vm12 = vcmp.eq.f32.partialorder %v1827_v52, 8.507059e+37  ;;  %v1837_v38 = vadd.f32 %v8694_v42, %v1836_v60 }
 0x35a   : > { %2094 = vmatmul.f32.vlgmr.msra.gmra.mxu3 %v8717_v22  ;;  %2135 = vmatmul.f32.vlgmr.msra.gmra.mxu1 %v8717_v22  ;;  %v8757_v23 = vperm.slane %v757_v33, 0  ;;  %v1842_v52 = vand.u32 2147483647, %v8665_v55  ;;  %vm1854_vm10 = vweird.f32 %v8725_v46 }
 0x35b   : > { %2791 = vmatpush.msra.mxu3 %v6770_v12  ;;  %v1831_v34 = vsel %vm1828_vm12, %v1830_v43, %v1826_v58  ;;  %v1850_v12 = vsub.f32 1.0, %v1849_v32  ;;  %v1841_v55 = vsel %vm8762_vm8, %v8694_v42, %v1837_v38  ;;  %v1845_v58 = vor.u32 1.1754944e-38, %v1844_v47  ;;  %v6778_v47 = vld [vmem:[#allocation5 + $0x70] sm:$0xff]  ;;  %vm8789_vm12 = vmor %vm1853_vm11, %vm1854_vm10 }
 0x35c   : > { %v2004_v20 = vpop.f32.mrf.mxu0  ;;  %v1151_v43 = vmul.f32 %v8757_v23, %v8347_v28  ;;  %vm1843_vm9 = vcmp.eq.f32.partialorder %v1842_v52, 8.507059e+37  ;;  %vm1868_vm8 = vweird.f32 %v8719_v39 }
 0x35d   : > { %v6339_v48 = vpop.eup %6338  ;;  %v2032_v6 = vadd.f32 %v2004_v20, %v1201_v44  ;;  %2792 = vmatpush.msra.mxu3 %v6771_v45  ;;  %v6773_v44 = vld [vmem:[#allocation5 + $0xc0] sm:$0xff]  ;;  %v1851_v60 = vmul.f32 %v8725_v46, %v1850_v12 }
 0x35e   : > { %v6341_v51 = vpop.eup %6340  ;;  %v2063_v13 = vmul.f32 %v6339_v48, %v2055_v35  ;;  %v2056_v35 = vsub.f32 1.0, %v1831_v34  ;;  %v6775_v45 = vld [vmem:[#allocation5 + $0xa0] sm:$0xff]  ;;  %v1203_v38 = vadd.f32 %v8364_v40, %v1151_v43 }
 0x35f   : > { %6344 = vtanh.f32 %v2032_v6  ;;  %2793 = vmatpush.msra.mxu3 %v6772_v37  ;;  %v8747_v16 = vadd.f32 1.0, %v6341_v51  ;;  %v8753_v7 = vpop.eup %6342  ;;  %v1852_v42 = vadd.f32 %v8725_v46, %v1851_v60  ;;  %v6779_v40 = vld [vmem:[#allocation5 + $0x60] sm:$0xff] }
 0x360   : > { %6346 = vpow2.f32 %v5867_v25  ;;  %v8745_v21 = vadd.f32 %v2063_v13, %v2047_v49  ;;  %v6774_v25 = vld [vmem:[#allocation5 + $0xb0] sm:$0xff]  ;;  %v2048_v49 = vmul.f32 0.0, %v1831_v34  ;;  %v1864_v32 = vmul.f32 %v8753_v7, %v8719_v39  ;;  %v6781_v43 = vld [vmem:[#allocation5 + $0x40] sm:$0xff] }
 0x361   : > { %2794 = vmatpush.msra.mxu3 %v6773_v44  ;;  %6348 = vrcp.f32 %v8747_v16  ;;  %v1846_v34 = vsel %vm1843_vm9, %v1845_v58, %v1841_v55  ;;  %v6777_v44 = vld [vmem:[#allocation5 + $0x80] sm:$0xff]  ;;  %vm1869_vm14 = vweird.f32 %v8753_v7 }
 0x362   : > { %2097 = vmatmul.f32.gmra.mxu3 %v8745_v21  ;;  %2138 = vmatmul.f32.gmra.mxu1 %v8745_v21  ;;  %v1865_v12 = vsub.f32 1.0, %v1864_v32  ;;  %v1152_v32 = vmul.f32 %v8757_v23, %v8349_v54  ;;  %vm8813_vm9 = vmor %vm1868_vm8, %vm1869_vm14 }
 0x363   : > { %2795 = vmatpush.msra.mxu3 %v6774_v25  ;;  %v2057_v25 = vsub.f32 1.0, %v1846_v34 }
 0x364   : > { %v2007_v20 = vpop.f32.mrf.mxu0  ;;  %v1204_v54 = vadd.f32 %v8366_v26, %v1152_v32 }
 0x365   : > { %v6345_v48 = vpop.eup %6344  ;;  %v2033_v6 = vadd.f32 %v2007_v20, %v1202_v10  ;;  %2796 = vmatpush.msra.mxu3 %v6775_v45  ;;  %v1859_v10 = vand.u32 2147483648, %v8690_v62 }
 0x366   : > { %v6347_v51 = vpop.eup %6346  ;;  %v2064_v13 = vmul.f32 %v6345_v48, %v2056_v35  ;;  %v1857_v35 = vand.u32 2147483647, %v8690_v62  ;;  %v1856_v62 = vsel %vm8789_vm12, %v8725_v46, %v1852_v42  ;;  %vm1883_vm12 = vweird.f32 %v8747_v16 }
 0x367   : > { %6350 = vtanh.f32 %v2033_v6  ;;  %2797 = vmatpush.msra.mxu3 %v6776_v8  ;;  %v8776_v37 = vadd.f32 1.0, %v6347_v51  ;;  %v8782_v28 = vpop.eup %6348  ;;  %v2049_v6 = vmul.f32 0.0, %v1846_v34  ;;  %v1860_v60 = vor.u32 1.1754944e-38, %v1859_v10 }
 0x368   : > { %v8774_v33 = vadd.f32 %v2064_v13, %v2048_v49  ;;  %v1866_v49 = vmul.f32 %v8753_v7, %v1865_v12  ;;  %v1879_v45 = vmul.f32 %v8782_v28, %v8747_v16  ;;  %v6780_v13 = vld [vmem:[#allocation5 + $0x50] sm:$0xff]  ;;  %vm1858_vm13 = vcmp.eq.f32.partialorder %v1857_v35, 8.507059e+37 }
 0x369   : > { %2798 = vmatpush.msra.mxu3 %v6777_v44  ;;  %6352 = vrcp.f32 %v8776_v37  ;;  %v1861_v58 = vsel %vm1858_vm13, %v1860_v60, %v1856_v62  ;;  %v1874_v44 = vand.u32 2147483648, %v8719_v39  ;;  %v6782_v12 = vld [vmem:[#allocation5 + $0x30] sm:$0xff]  ;;  %v6785_v62 = vld [vmem:[#allocation5] sm:$0xff]  ;;  %vm1884_vm11 = vweird.f32 %v8782_v28 }
 0x36a   : > { %2100 = vmatmul.f32.gmra.mxu3 %v8774_v33  ;;  %2141 = vmatmul.f32.gmra.mxu1 %v8774_v33  ;;  %v1880_v8 = vsub.f32 1.0, %v1879_v45  ;;  %v1867_v46 = vadd.f32 %v8753_v7, %v1866_v49  ;;  %v2058_v42 = vsub.f32 1.0, %v1861_v58  ;;  %v6784_v49 = vld [vmem:[#allocation5 + $0x10] sm:$0xff]  ;;  %vm1885_vm13 = vmor %vm1883_vm12, %vm1884_vm11 }
 0x36b   : > { %2799 = vmatpush.msra.mxu3 %v6778_v47 }
 0x36c   : > { %v2010_v52 = vpop.f32.mrf.mxu0  ;;  %v1881_v26 = vmul.f32 %v8782_v28, %v1880_v8 }
 0x36d   : > { %v6351_v20 = vpop.eup %6350  ;;  %v2034_v53 = vadd.f32 %v2010_v52, %v1203_v38  ;;  %2800 = vmatpush.msra.mxu3 %v6779_v40  ;;  %v1872_v38 = vand.u32 2147483647, %v8719_v39  ;;  %v2050_v52 = vmul.f32 0.0, %v1861_v58  ;;  %v1871_v39 = vsel %vm8813_vm9, %v8753_v7, %v1867_v46 }
 0x36e   : > { %v2065_v51 = vmul.f32 %v6351_v20, %v2057_v25  ;;  %v6783_v20 = vld [vmem:[#allocation5 + $0x20] sm:$0xff]  ;;  %v1153_v40 = vmul.f32 %v8757_v23, %v8351_v29  ;;  %v1882_v7 = vadd.f32 %v8782_v28, %v1881_v26  ;;  %v1889_v29 = vand.u32 2147483648, %v8747_v16 }
 0x36f   : > { %6354 = vtanh.f32 %v2034_v53  ;;  %2801 = vmatpush.msra.mxu3 %v6780_v13  ;;  %v8807_v34 = vpop.eup %6352  ;;  %vm1873_vm10 = vcmp.eq.f32.partialorder %v1872_v38, 8.507059e+37  ;;  %v1887_v58 = vand.u32 2147483647, %v8747_v16  ;;  %v1904_v25 = vand.u32 2147483648, %v8776_v37 }
 0x370   : > { %v8801_v55 = vadd.f32 %v2065_v51, %v2049_v6  ;;  %v1894_v48 = vmul.f32 %v8807_v34, %v8776_v37  ;;  %v1875_v6 = vor.u32 1.1754944e-38, %v1874_v44  ;;  %v1205_v32 = vadd.f32 %v8368_v61, %v1153_v40 }
 0x371   : > { %2802 = vmatpush.msra.mxu3 %v6781_v43  ;;  %v1890_v38 = vor.u32 1.1754944e-38, %v1889_v29  ;;  %v1154_v61 = vmul.f32 %v8757_v23, %v8357_v50  ;;  %vm1888_vm14 = vcmp.eq.f32.partialorder %v1887_v58, 8.507059e+37  ;;  %vm1899_vm8 = vweird.f32 %v8807_v34 }
 0x372   : > { %2103 = vmatmul.f32.gmra.mxu3 %v8801_v55  ;;  %2144 = vmatmul.f32.gmra.mxu1 %v8801_v55  ;;  %v1876_v51 = vsel %vm1873_vm10, %v1875_v6, %v1871_v39  ;;  %v1895_v60 = vsub.f32 1.0, %v1894_v48  ;;  %vm1898_vm9 = vweird.f32 %v8776_v37  ;;  %v1902_v50 = vand.u32 2147483647, %v8776_v37 }
 0x373   : > { %2803 = vmatpush.msra.mxu3 %v6782_v12  ;;  %v2059_v13 = vsub.f32 1.0, %v1876_v51  ;;  %v1886_v12 = vsel %vm1885_vm13, %v8782_v28, %v1882_v7  ;;  %v1206_v28 = vadd.f32 %v8373_v9, %v1154_v61  ;;  %vm1900_vm10 = vmor %vm1898_vm9, %vm1899_vm8  ;;  %v1905_v39 = vor.u32 1.1754944e-38, %v1904_v25  ;;  %v6789_v25 = vld [vmem:[%s10973_s3 + $0x18] sm:$0xff] }
 0x374   : > { %v2013_v10 = vpop.f32.mrf.mxu0  ;;  %vm1903_vm11 = vcmp.eq.f32.partialorder %v1902_v50, 8.507059e+37  ;;  %v6791_v50 = vld [vmem:[%s10973_s3 + $0x28] sm:$0xff] }
 0x375   : > { %v6355_v47 = vpop.eup %6354  ;;  %v2035_v35 = vadd.f32 %v2013_v10, %v1204_v54  ;;  %2804 = vmatpush.msra.mxu3 %v6783_v20  ;;  %v1896_v54 = vmul.f32 %v8807_v34, %v1895_v60 }
 0x376   : > { %v2066_v53 = vmul.f32 %v6355_v47, %v2058_v42  ;;  %v2051_v42 = vmul.f32 0.0, %v1876_v51  ;;  %v1891_v47 = vsel %vm1888_vm14, %v1890_v38, %v1886_v12 }
 0x377   : > { %6356 = vtanh.f32 %v2035_v35  ;;  %2805 = vmatpush.msra.mxu3 %v6784_v49  ;;  %v1897_v16 = vadd.f32 %v8807_v34, %v1896_v54  ;;  %v2060_v35 = vsub.f32 1.0, %v1891_v47 }
 0x378   : > { %v8825_v45 = vadd.f32 %v2066_v53, %v2050_v52  ;;  %v2052_v53 = vmul.f32 0.0, %v1891_v47  ;;  %v6786_v47 = vld [vmem:[%s10973_s3] sm:$0xff] }
 0x379   : > { %2806 = vmatpush.msra.mxu3 %v6785_v62  ;;  %v1901_v48 = vsel %vm1900_vm10, %v8807_v34, %v1897_v16  ;;  %v6787_v16 = vld [vmem:[%s10973_s3 + $0x8] sm:$0xff] }
 0x37a   : > { %2106 = vmatmul.f32.gmra.mxu3 %v8825_v45  ;;  %2147 = vmatmul.f32.gmra.mxu1 %v8825_v45  ;;  %v1906_v9 = vsel %vm1903_vm11, %v1905_v39, %v1901_v48  ;;  %v6796_v48 = vld [vmem:[%s10973_s3 + $0x50] sm:$0xff]  ;;  %v6798_v39 = vld [vmem:[%s10973_s3 + $0x60] sm:$0xff] }
 0x37b   : > { %v2061_v40 = vsub.f32 1.0, %v1906_v9  ;;  %v2053_v51 = vmul.f32 0.0, %v1906_v9  ;;  %v6799_v9 = vld [vmem:[%s10973_s3 + $0x68] sm:$0xff] }
 0x37c   : > { %v2016_v43 = vpop.f32.mrf.mxu0 }
 0x37d   : > { %v6357_v8 = vpop.eup %6356  ;;  %v2036_v46 = vadd.f32 %v2016_v43, %v1205_v32 }
 0x37e   : > { %v2067_v44 = vmul.f32 %v6357_v8, %v2059_v13 }
 0x37f   : > { %6358 = vtanh.f32 %v2036_v46 }
 0x380   : > { %v8839_v10 = vadd.f32 %v2067_v44, %v2051_v42 }
 0x382   : > { %2109 = vmatmul.f32.gmra.mxu3 %v8839_v10  ;;  %2150 = vmatmul.f32.gmra.mxu1 %v8839_v10 }
 0x384   : > { %v2019_v23 = vpop.f32.mrf.mxu0 }
 0x385   : > { %v6359_v52 = vpop.eup %6358  ;;  %v2037_v20 = vadd.f32 %v2019_v23, %v1206_v28  ;;  %v6788_v28 = vld [vmem:[%s10973_s3 + $0x10] sm:$0xff] }
 0x386   : > { %v2068_v26 = vmul.f32 %v6359_v52, %v2060_v35  ;;  %v6790_v35 = vld [vmem:[%s10973_s3 + $0x20] sm:$0xff]  ;;  %v6792_v23 = vld [vmem:[%s10973_s3 + $0x30] sm:$0xff]  ;;  %v6793_v52 = vld [vmem:[%s10973_s3 + $0x38] sm:$0xff] }
 0x387   : > { %6360 = vtanh.f32 %v2037_v20  ;;  %v6794_v20 = vld [vmem:[%s10973_s3 + $0x40] sm:$0xff] }
 0x388   : > { %v8850_v6 = vadd.f32 %v2068_v26, %v2052_v53  ;;  %v6795_v26 = vld [vmem:[%s10973_s3 + $0x48] sm:$0xff]  ;;  %v6797_v53 = vld [vmem:[%s10973_s3 + $0x58] sm:$0xff] }
 0x38a   : > { %2112 = vmatmul.f32.gmra.mxu3 %v8850_v6  ;;  %2153 = vmatmul.f32.gmra.mxu1 %v8850_v6 }
 0x38d   : > { %v6361_v37 = vpop.eup %6360 }
 0x38e   : > { %v2069_v49 = vmul.f32 %v6361_v37, %v2061_v40  ;;  %v6800_v40 = vld [vmem:[%s10973_s3 + $0x70] sm:$0xff]  ;;  %v6801_v37 = vld [vmem:[%s10973_s3 + $0x78] sm:$0xff] }
 0x390   : > { %v8854_v62 = vadd.f32 %v2069_v49, %v2053_v51 }
 0x392   : > { %2115 = vmatmul.f32.gmra.mxu3 %v8854_v62  ;;  %2156 = vmatmul.f32.gmra.mxu1 %v8854_v62 }
 0x3d7   : > { %v2136_v34 = vpop.f32.mrf.mxu1 }
 0x3dd   : > { %v2095_v60 = vpop.f32.mrf.mxu3 }
 0x3df   : > { %v2139_v7 = vpop.f32.mrf.mxu1 }
 0x3e5   : > { %v2098_v32 = vpop.f32.mrf.mxu3 }
 0x3e7   : > { %v2142_v29 = vpop.f32.mrf.mxu1 }
 0x3ed   : > { %v2101_v13 = vpop.f32.mrf.mxu3 }
 0x3ef   : > { %v2145_v58 = vpop.f32.mrf.mxu1 }
 0x3f5   : > { %v2104_v43 = vpop.f32.mrf.mxu3 }
 0x3f7   : > { %v2148_v8 = vpop.f32.mrf.mxu1 }
 0x3fd   : > { %v2107_v46 = vpop.f32.mrf.mxu3 }
 0x3ff   : > { %v2151_v54 = vpop.f32.mrf.mxu1 }
 0x405   : > { %v2110_v44 = vpop.f32.mrf.mxu3 }
 0x407   : > { %v2154_v12 = vpop.f32.mrf.mxu1 }
 0x40d   : > { %v2113_v42 = vpop.f32.mrf.mxu3 }
 0x40f   : > { %v2157_v38 = vpop.f32.mrf.mxu1 }
 0x410   : > { %2233 = vmatpush.msrb.mxu0 %v2157_v38  ;;  %v8956_v38 = vld [vmem:[#allocation11 + $0x8] sm:$0xff] }
 0x412   : > { %2234 = vmatpush.msrb.mxu0 %v2154_v12  ;;  %v8953_v12 = vld [vmem:[%s10975_s5 + $0x8] sm:$0xff] }
 0x414   : > { %2235 = vmatpush.msrb.mxu0 %v2151_v54 }
 0x415   : > { %v2116_v61 = vpop.f32.mrf.mxu3 }
 0x416   : > { %2168 = vmatpush.msra.mxu2 %v2116_v61  ;;  %2236 = vmatpush.msrb.mxu0 %v2148_v8 }
 0x418   : > { %2169 = vmatpush.msra.mxu2 %v2113_v42  ;;  %2237 = vmatpush.msrb.mxu0 %v2145_v58  ;;  %v8945_v58 = vld [vmem:[#allocation11] sm:$0xff] }
 0x41a   : > { %2170 = vmatpush.msra.mxu2 %v2110_v44  ;;  %2238 = vmatpush.msrb.mxu0 %v2142_v29  ;;  %v8942_v29 = vld [vmem:[%s10975_s5] sm:$0xff] }
 0x41c   : > { %2171 = vmatpush.msra.mxu2 %v2107_v46  ;;  %2239 = vmatpush.msrb.mxu0 %v2139_v7 }
 0x41e   : > { %2172 = vmatpush.msra.mxu2 %v2104_v43  ;;  %2240 = vmatpush.msrb.mxu0 %v2136_v34 }
 0x41f   : > { %5892 = vmatmul.msk.f32.vlgmr.msrb.gmra.mxu0 %vm1377_vm0, %v6786_v47 }
 0x420   : > { %2173 = vmatpush.msra.mxu2 %v2101_v13 }
 0x422   : > { %2174 = vmatpush.msra.mxu2 %v2098_v32 }
 0x424   : > { %2175 = vmatpush.msra.mxu2 %v2095_v60  ;;  %v734_v60 = vrot.slane %v7771_v36, 2 }
 0x425   : > { %5876 = vmatmul.msk.f32.vlgmr.msra.gmra.mxu2 %vm1377_vm0, %v6786_v47 }
 0x426   : > { %v773_v32 = vperm.slane %v734_v60, 0 }
 0x427   : > { %5893 = vmatmul.msk.f32.gmra.mxu0 %vm1377_vm0, %v6787_v16 }
 0x428   : > { %v803_v13 = vmul.f32 %v8942_v29, %v773_v32  ;;  %v804_v42 = vmul.f32 %v8953_v12, %v773_v32 }
 0x42a   : > { %v855_v43 = vadd.f32 %v8945_v58, %v803_v13  ;;  %v856_v61 = vadd.f32 %v8956_v38, %v804_v42 }
 0x42d   : > { %5877 = vmatmul.msk.f32.gmra.mxu2 %vm1377_vm0, %v6787_v16 }
 0x42f   : > { %5894 = vmatmul.msk.f32.gmra.mxu0 %vm1377_vm0, %v6788_v28 }
 0x435   : > { %5878 = vmatmul.msk.f32.gmra.mxu2 %vm1377_vm0, %v6788_v28 }
 0x437   : > { %5895 = vmatmul.msk.f32.gmra.mxu0 %vm1377_vm0, %v6789_v25 }
 0x43d   : > { %5879 = vmatmul.msk.f32.gmra.mxu2 %vm1377_vm0, %v6789_v25 }
 0x43f   : > { %5896 = vmatmul.msk.f32.gmra.mxu0 %vm1377_vm0, %v6790_v35 }
 0x445   : > { %5880 = vmatmul.msk.f32.gmra.mxu2 %vm1377_vm0, %v6790_v35 }
 0x447   : > { %5897 = vmatmul.msk.f32.gmra.mxu0 %vm1377_vm0, %v6791_v50 }
 0x44d   : > { %5881 = vmatmul.msk.f32.gmra.mxu2 %vm1377_vm0, %v6791_v50  ;;  %v8964_v50 = vld [vmem:[%s10975_s5 + $0x10] sm:$0xff] }
 0x44f   : > { %5898 = vmatmul.msk.f32.gmra.mxu0 %vm1377_vm0, %v6792_v23 }
 0x455   : > { %5882 = vmatmul.msk.f32.gmra.mxu2 %vm1377_vm0, %v6792_v23  ;;  %v805_v23 = vmul.f32 %v8964_v50, %v773_v32 }
 0x457   : > { %5899 = vmatmul.msk.f32.gmra.mxu0 %vm1377_vm0, %v6793_v52 }
 0x45d   : > { %5883 = vmatmul.msk.f32.gmra.mxu2 %vm1377_vm0, %v6793_v52 }
 0x45f   : > { %5900 = vmatmul.msk.f32.gmra.mxu0 %vm1377_vm0, %v6794_v20 }
 0x465   : > { %5884 = vmatmul.msk.f32.gmra.mxu2 %vm1377_vm0, %v6794_v20  ;;  %v8967_v20 = vld [vmem:[#allocation11 + $0x10] sm:$0xff] }
 0x467   : > { %5901 = vmatmul.msk.f32.gmra.mxu0 %vm1377_vm0, %v6795_v26 }
 0x46d   : > { %5885 = vmatmul.msk.f32.gmra.mxu2 %vm1377_vm0, %v6795_v26  ;;  %v857_v26 = vadd.f32 %v8967_v20, %v805_v23 }
 0x46f   : > { %5902 = vmatmul.msk.f32.gmra.mxu0 %vm1377_vm0, %v6796_v48 }
 0x475   : > { %5886 = vmatmul.msk.f32.gmra.mxu2 %vm1377_vm0, %v6796_v48 }
 0x477   : > { %5903 = vmatmul.msk.f32.gmra.mxu0 %vm1377_vm0, %v6797_v53 }
 0x47d   : > { %5887 = vmatmul.msk.f32.gmra.mxu2 %vm1377_vm0, %v6797_v53 }
 0x47f   : > { %5904 = vmatmul.msk.f32.gmra.mxu0 %vm1377_vm0, %v6798_v39 }
 0x485   : > { %5888 = vmatmul.msk.f32.gmra.mxu2 %vm1377_vm0, %v6798_v39 }
 0x487   : > { %5905 = vmatmul.msk.f32.gmra.mxu0 %vm1377_vm0, %v6799_v9 }
 0x48d   : > { %5889 = vmatmul.msk.f32.gmra.mxu2 %vm1377_vm0, %v6799_v9 }
 0x48f   : > { %5906 = vmatmul.msk.f32.gmra.mxu0 %vm1377_vm0, %v6800_v40 }
 0x495   : > { %5890 = vmatmul.msk.f32.gmra.mxu2 %vm1377_vm0, %v6800_v40 }
 0x497   : > { %5907 = vmatmul.msk.f32.gmra.mxu0 %vm1377_vm0, %v6801_v37 }
 0x49d   : > { %5891 = vmatmul.msk.f32.gmra.mxu2 %vm1377_vm0, %v6801_v37  ;;  %v8975_v37 = vld [vmem:[%s10975_s5 + $0x18] sm:$0xff] }
 0x4a8   : > { %v2177_v49 = vpop.f32.mrf.mxu2 }
 0x4b0   : > { %v2180_v51 = vpop.f32.mrf.mxu2 }
 0x4b8   : > { %v2183_v34 = vpop.f32.mrf.mxu2 }
 0x4c0   : > { %v2186_v7 = vpop.f32.mrf.mxu2 }
 0x4c8   : > { %v2189_v8 = vpop.f32.mrf.mxu2 }
 0x4c9   : > { %v2290_v46 = vsel %vm632_vm1, %v2189_v8, %v2177_v49  ;;  %v806_v49 = vmul.f32 %v8975_v37, %v773_v32  ;;  %v8978_v8 = vld [vmem:[#allocation11 + $0x18] sm:$0xff] }
 0x4ca   : > { %v2307_v54 = vadd.f32 %v2290_v46, %v855_v43 }
 0x4cc   : > { %v5908_v44 = vmul.f32 -1.442695, %v2307_v54 }
 0x4ce   : > { %6362 = vpow2.f32 %v5908_v44 }
 0x4d0   : > { %v2192_v47 = vpop.f32.mrf.mxu2 }
 0x4d1   : > { %v2291_v16 = vsel %vm633_vm2, %v2192_v47, %v2180_v51 }
 0x4d2   : > { %v2308_v28 = vadd.f32 %v2291_v16, %v856_v61 }
 0x4d4   : > { %v6363_v25 = vpop.eup %6362  ;;  %v5909_v35 = vmul.f32 -1.442695, %v2308_v28 }
 0x4d5   : > { %v2339_v52 = vadd.f32 1.0, %v6363_v25 }
 0x4d6   : > { %6364 = vpow2.f32 %v5909_v35 }
 0x4d7   : > { %6366 = vrcp.f32 %v2339_v52  ;;  %v2358_v44 = vand.u32 2147483648, %v2339_v52  ;;  %v2356_v47 = vand.u32 2147483647, %v2339_v52  ;;  %vm2352_vm13 = vweird.f32 %v2339_v52 }
 0x4d8   : > { %v2195_v48 = vpop.f32.mrf.mxu2 }
 0x4d9   : > { %v2292_v53 = vsel %vm634_vm3, %v2195_v48, %v2183_v34  ;;  %v858_v34 = vadd.f32 %v8978_v8, %v806_v49  ;;  %v2359_v23 = vor.u32 1.1754944e-38, %v2358_v44  ;;  %vm2357_vm8 = vcmp.eq.f32.partialorder %v2356_v47, 8.507059e+37  ;;  %v6811_v44 = vld [vmem:[%s10972_s2 + $0x70] sm:$0xff] }
 0x4da   : > { %v2309_v39 = vadd.f32 %v2292_v53, %v857_v26 }
 0x4dc   : > { %v6365_v9 = vpop.eup %6364  ;;  %v5910_v40 = vmul.f32 -1.442695, %v2309_v39 }
 0x4dd   : > { %v6367_v51 = vpop.eup %6366  ;;  %v2340_v60 = vadd.f32 1.0, %v6365_v9 }
 0x4de   : > { %v2348_v13 = vmul.f32 %v6367_v51, %v2339_v52  ;;  %6368 = vpow2.f32 %v5910_v40  ;;  %vm2353_vm12 = vweird.f32 %v6367_v51 }
 0x4df   : > { %6370 = vrcp.f32 %v2340_v60  ;;  %vm2354_vm14 = vmor %vm2352_vm13, %vm2353_vm12  ;;  %v2373_v40 = vand.u32 2147483648, %v2340_v60  ;;  %v2371_v49 = vand.u32 2147483647, %v2340_v60  ;;  %vm2367_vm10 = vweird.f32 %v2340_v60 }
 0x4e0   : > { %v2349_v43 = vsub.f32 1.0, %v2348_v13  ;;  %v2198_v46 = vpop.f32.mrf.mxu2  ;;  %v6810_v13 = vld [vmem:[%s10972_s2 + $0x78] sm:$0xff] }
 0x4e1   : > { %v2293_v54 = vsel %vm10991_vm4, %v2198_v46, %v2186_v7  ;;  %vm2372_vm12 = vcmp.eq.f32.partialorder %v2371_v49, 8.507059e+37 }
 0x4e2   : > { %v2350_v42 = vmul.f32 %v6367_v51, %v2349_v43  ;;  %v2310_v61 = vadd.f32 %v2293_v54, %v858_v34  ;;  %v2374_v54 = vor.u32 1.1754944e-38, %v2373_v40 }
 0x4e4   : > { %v6369_v32 = vpop.eup %6368  ;;  %v5911_v16 = vmul.f32 -1.442695, %v2310_v61  ;;  %v2351_v28 = vadd.f32 %v6367_v51, %v2350_v42 }
 0x4e5   : > { %v6371_v25 = vpop.eup %6370  ;;  %v2341_v35 = vadd.f32 1.0, %v6369_v32  ;;  %v6812_v32 = vld [vmem:[%s10972_s2 + $0x68] sm:$0xff] }
 0x4e6   : > { %6372 = vpow2.f32 %v5911_v16  ;;  %v2355_v26 = vsel %vm2354_vm14, %v6367_v51, %v2351_v28  ;;  %v2363_v48 = vmul.f32 %v6371_v25, %v2340_v60  ;;  %vm2368_vm9 = vweird.f32 %v6371_v25 }
 0x4e7   : > { %6374 = vrcp.f32 %v2341_v35  ;;  %v2360_v53 = vsel %vm2357_vm8, %v2359_v23, %v2355_v26  ;;  %vm2369_vm11 = vmor %vm2367_vm10, %vm2368_vm9  ;;  %v2388_v23 = vand.u32 2147483648, %v2341_v35  ;;  %v6813_v26 = vld [vmem:[%s10972_s2 + $0x60] sm:$0xff]  ;;  %vm2382_vm14 = vweird.f32 %v2341_v35 }
 0x4e8   : > { %v8983_v7 = vpop.f32.mrf.mxu2  ;;  %v2644_v39 = vmul.f32 %v2360_v53, %v8717_v22  ;;  %v2364_v9 = vsub.f32 1.0, %v2363_v48  ;;  %v2386_v48 = vand.u32 2147483647, %v2341_v35  ;;  %v6814_v53 = vld [vmem:[%s10972_s2 + $0x58] sm:$0xff] }
 0x4e9   : > { %v2389_v40 = vor.u32 1.1754944e-38, %v2388_v23 }
 0x4ea   : > { %2668 = vmatmul.f32.vlgmr.msrb.gmra.mxu3 %v2644_v39  ;;  %v2365_v52 = vmul.f32 %v6371_v25, %v2364_v9  ;;  %vm2387_vm9 = vcmp.eq.f32.partialorder %v2386_v48, 8.507059e+37 }
 0x4eb   : > { %3365 = vmatpush.msrb.mxu3 %v6810_v13 }
 0x4ec   : > { %v6373_v51 = vpop.eup %6372  ;;  %v2366_v43 = vadd.f32 %v6371_v25, %v2365_v52  ;;  %v6815_v52 = vld [vmem:[%s10972_s2 + $0x50] sm:$0xff] }
 0x4ed   : > { %v6375_v34 = vpop.eup %6374  ;;  %v2342_v46 = vadd.f32 1.0, %v6373_v51  ;;  %3366 = vmatpush.msrb.mxu3 %v6811_v44 }
 0x4ee   : > { %v2370_v42 = vsel %vm2369_vm11, %v6371_v25, %v2366_v43  ;;  %v2378_v61 = vmul.f32 %v6375_v34, %v2341_v35  ;;  %vm2383_vm13 = vweird.f32 %v6375_v34  ;;  %v6816_v43 = vld [vmem:[%s10972_s2 + $0x48] sm:$0xff] }
 0x4ef   : > { %6376 = vrcp.f32 %v2342_v46  ;;  %v2375_v47 = vsel %vm2372_vm12, %v2374_v54, %v2370_v42  ;;  %3367 = vmatpush.msrb.mxu3 %v6812_v32  ;;  %vm2384_vm8 = vmor %vm2382_vm14, %vm2383_vm13  ;;  %v2403_v42 = vand.u32 2147483648, %v2342_v46  ;;  %v6818_v32 = vld [vmem:[%s10972_s2 + $0x38] sm:$0xff]  ;;  %vm2397_vm11 = vweird.f32 %v2342_v46 }
 0x4f0   : > { %v8995_v60 = vpop.f32.mrf.mxu2  ;;  %v2645_v16 = vmul.f32 %v2375_v47, %v8745_v21  ;;  %v2379_v28 = vsub.f32 1.0, %v2378_v61  ;;  %v6817_v61 = vld [vmem:[%s10972_s2 + $0x40] sm:$0xff]  ;;  %v2401_v47 = vand.u32 2147483647, %v2342_v46 }
 0x4f1   : > { %3368 = vmatpush.msrb.mxu3 %v6813_v26  ;;  %v2404_v23 = vor.u32 1.1754944e-38, %v2403_v42  ;;  %v6819_v26 = vld [vmem:[%s10972_s2 + $0x30] sm:$0xff] }
 0x4f2   : > { %2671 = vmatmul.f32.gmra.mxu3 %v2645_v16  ;;  %v2380_v25 = vmul.f32 %v6375_v34, %v2379_v28  ;;  %v735_v28 = vrot.slane %v7771_v36, 3  ;;  %vm2402_vm13 = vcmp.eq.f32.partialorder %v2401_v47, 8.507059e+37 }
 0x4f3   : > { %3369 = vmatpush.msrb.mxu3 %v6814_v53  ;;  %v6820_v53 = vld [vmem:[%s10972_s2 + $0x28] sm:$0xff] }
 0x4f4   : > { %v2381_v39 = vadd.f32 %v6375_v34, %v2380_v25 }
 0x4f5   : > { %v6377_v9 = vpop.eup %6376  ;;  %3370 = vmatpush.msrb.mxu3 %v6815_v52  ;;  %v6821_v52 = vld [vmem:[%s10972_s2 + $0x20] sm:$0xff] }
 0x4f6   : > { %v2385_v49 = vsel %vm2384_vm8, %v6375_v34, %v2381_v39  ;;  %v2393_v13 = vmul.f32 %v6377_v9, %v2342_v46  ;;  %vm2398_vm10 = vweird.f32 %v6377_v9 }
 0x4f7   : > { %v2390_v51 = vsel %vm2387_vm9, %v2389_v40, %v2385_v49  ;;  %3371 = vmatpush.msrb.mxu3 %v6816_v43  ;;  %vm2399_vm12 = vmor %vm2397_vm11, %vm2398_vm10  ;;  %v774_v40 = vperm.slane %v735_v28, 0 }
 0x4f8   : > { %v2207_v54 = vpop.f32.mrf.mxu2  ;;  %v2646_v35 = vmul.f32 %v2390_v51, %v8774_v33  ;;  %v2394_v44 = vsub.f32 1.0, %v2393_v13  ;;  %v6823_v13 = vld [vmem:[%s10972_s2 + $0x10] sm:$0xff]  ;;  %v6824_v51 = vld [vmem:[%s10972_s2 + $0x8] sm:$0xff] }
 0x4f9   : > { %3372 = vmatpush.msrb.mxu3 %v6817_v61  ;;  %v807_v49 = vmul.f32 %v8942_v29, %v774_v40  ;;  %v6825_v29 = vld [vmem:[%s10972_s2] sm:$0xff] }
 0x4fa   : > { %2674 = vmatmul.f32.gmra.mxu3 %v2646_v35  ;;  %v2395_v34 = vmul.f32 %v6377_v9, %v2394_v44 }
 0x4fb   : > { %3373 = vmatpush.msrb.mxu3 %v6818_v32  ;;  %v859_v43 = vadd.f32 %v8945_v58, %v807_v49 }
 0x4fc   : > { %v2396_v16 = vadd.f32 %v6377_v9, %v2395_v34  ;;  %v808_v34 = vmul.f32 %v8953_v12, %v774_v40 }
 0x4fd   : > { %3374 = vmatpush.msrb.mxu3 %v6819_v26 }
 0x4fe   : > { %v2400_v25 = vsel %vm2399_vm12, %v6377_v9, %v2396_v16  ;;  %v6822_v9 = vld [vmem:[%s10972_s2 + $0x18] sm:$0xff]  ;;  %v860_v47 = vadd.f32 %v8956_v38, %v808_v34 }
 0x4ff   : > { %v2405_v48 = vsel %vm2402_vm13, %v2404_v23, %v2400_v25  ;;  %3375 = vmatpush.msrb.mxu3 %v6820_v53  ;;  %v809_v23 = vmul.f32 %v8964_v50, %v774_v40 }
 0x500   : > { %v2210_v39 = vpop.f32.mrf.mxu2  ;;  %v2647_v46 = vmul.f32 %v2405_v48, %v8801_v55 }
 0x501   : > { %3376 = vmatpush.msrb.mxu3 %v6821_v52  ;;  %v861_v25 = vadd.f32 %v8967_v20, %v809_v23  ;;  %v810_v52 = vmul.f32 %v8975_v37, %v774_v40 }
 0x502   : > { %2677 = vmatmul.f32.gmra.mxu3 %v2647_v46 }
 0x503   : > { %3377 = vmatpush.msrb.mxu3 %v6822_v9  ;;  %v862_v50 = vadd.f32 %v8978_v8, %v810_v52 }
 0x505   : > { %3378 = vmatpush.msrb.mxu3 %v6823_v13 }
 0x507   : > { %3379 = vmatpush.msrb.mxu3 %v6824_v51 }
 0x508   : > { %v2213_v35 = vpop.f32.mrf.mxu2 }
 0x509   : > { %v2294_v44 = vsel %vm632_vm1, %v2213_v35, %v8983_v7  ;;  %3380 = vmatpush.msrb.mxu3 %v6825_v29 }
 0x50a   : > { %v2311_v42 = vadd.f32 %v2294_v44, %v859_v43 }
 0x50c   : > { %v5912_v61 = vmul.f32 -1.442695, %v2311_v42 }
 0x50e   : > { %6378 = vpow2.f32 %v5912_v61 }
 0x510   : > { %v2216_v32 = vpop.f32.mrf.mxu2 }
 0x511   : > { %v2295_v58 = vsel %vm633_vm2, %v2216_v32, %v8995_v60 }
 0x512   : > { %v2312_v16 = vadd.f32 %v2295_v58, %v860_v47 }
 0x514   : > { %v6379_v28 = vpop.eup %6378  ;;  %v5913_v7 = vmul.f32 -1.442695, %v2312_v16 }
 0x515   : > { %v2343_v26 = vadd.f32 1.0, %v6379_v28 }
 0x516   : > { %6380 = vpow2.f32 %v5913_v7 }
 0x517   : > { %6382 = vrcp.f32 %v2343_v26  ;;  %v2418_v43 = vand.u32 2147483648, %v2343_v26  ;;  %v2416_v44 = vand.u32 2147483647, %v2343_v26  ;;  %vm2412_vm8 = vweird.f32 %v2343_v26 }
 0x518   : > { %v2219_v48 = vpop.f32.mrf.mxu2 }
 0x519   : > { %v2296_v12 = vsel %vm634_vm3, %v2219_v48, %v2207_v54  ;;  %v2419_v34 = vor.u32 1.1754944e-38, %v2418_v43  ;;  %vm2417_vm10 = vcmp.eq.f32.partialorder %v2416_v44, 8.507059e+37 }
 0x51a   : > { %v2313_v38 = vadd.f32 %v2296_v12, %v861_v25 }
 0x51c   : > { %v6381_v53 = vpop.eup %6380  ;;  %v5914_v46 = vmul.f32 -1.442695, %v2313_v38 }
 0x51d   : > { %v6383_v60 = vpop.eup %6382  ;;  %v2344_v9 = vadd.f32 1.0, %v6381_v53 }
 0x51e   : > { %6384 = vpow2.f32 %v5914_v46  ;;  %v2408_v49 = vmul.f32 %v6383_v60, %v2343_v26  ;;  %vm2413_vm14 = vweird.f32 %v6383_v60 }
 0x51f   : > { %6386 = vrcp.f32 %v2344_v9  ;;  %vm2414_vm9 = vmor %vm2412_vm8, %vm2413_vm14  ;;  %v2433_v16 = vand.u32 2147483648, %v2344_v9  ;;  %v2431_v7 = vand.u32 2147483647, %v2344_v9  ;;  %vm2427_vm12 = vweird.f32 %v2344_v9 }
 0x520   : > { %v2222_v13 = vpop.f32.mrf.mxu2  ;;  %v2409_v51 = vsub.f32 1.0, %v2408_v49 }
 0x521   : > { %v2297_v20 = vsel %vm10991_vm4, %v2222_v13, %v2210_v39  ;;  %v2434_v12 = vor.u32 1.1754944e-38, %v2433_v16  ;;  %vm2432_vm14 = vcmp.eq.f32.partialorder %v2431_v7, 8.507059e+37 }
 0x522   : > { %v2314_v35 = vadd.f32 %v2297_v20, %v862_v50  ;;  %v2410_v54 = vmul.f32 %v6383_v60, %v2409_v51 }
 0x524   : > { %v6385_v29 = vpop.eup %6384  ;;  %v5915_v42 = vmul.f32 -1.442695, %v2314_v35  ;;  %v2411_v37 = vadd.f32 %v6383_v60, %v2410_v54 }
 0x525   : > { %v6387_v40 = vpop.eup %6386  ;;  %v2345_v61 = vadd.f32 1.0, %v6385_v29 }
 0x526   : > { %6388 = vpow2.f32 %v5915_v42  ;;  %v2415_v8 = vsel %vm2414_vm9, %v6383_v60, %v2411_v37  ;;  %v2423_v47 = vmul.f32 %v6387_v40, %v2344_v9  ;;  %vm2428_vm11 = vweird.f32 %v6387_v40 }
 0x527   : > { %6390 = vrcp.f32 %v2345_v61  ;;  %v2420_v32 = vsel %vm2417_vm10, %v2419_v34, %v2415_v8  ;;  %vm2429_vm13 = vmor %vm2427_vm12, %vm2428_vm11  ;;  %v2448_v49 = vand.u32 2147483648, %v2345_v61  ;;  %v2446_v13 = vand.u32 2147483647, %v2345_v61 }
 0x528   : > { %v2648_v39 = vmul.f32 %v2420_v32, %v8825_v45  ;;  %v2424_v58 = vsub.f32 1.0, %v2423_v47  ;;  %vm2442_vm9 = vweird.f32 %v2345_v61 }
 0x529   : > { %v2449_v20 = vor.u32 1.1754944e-38, %v2448_v49  ;;  %vm2447_vm11 = vcmp.eq.f32.partialorder %v2446_v13, 8.507059e+37  ;;  %v6830_v49 = vld [vmem:[#allocation5 + $0xc8] sm:$0xff]  ;;  %v6832_v13 = vld [vmem:[#allocation5 + $0xb8] sm:$0xff] }
 0x52a   : > { %2680 = vmatmul.f32.gmra.mxu3 %v2648_v39  ;;  %v2425_v28 = vmul.f32 %v6387_v40, %v2424_v58 }
 0x52c   : > { %v6389_v23 = vpop.eup %6388  ;;  %v2426_v26 = vadd.f32 %v6387_v40, %v2425_v28 }
 0x52d   : > { %v6391_v25 = vpop.eup %6390  ;;  %v2346_v48 = vadd.f32 1.0, %v6389_v23 }
 0x52e   : > { %v2430_v38 = vsel %vm2429_vm13, %v6387_v40, %v2426_v26  ;;  %v2438_v53 = vmul.f32 %v6391_v25, %v2345_v61  ;;  %vm2443_vm8 = vweird.f32 %v6391_v25 }
 0x52f   : > { %6392 = vrcp.f32 %v2346_v48  ;;  %v2435_v46 = vsel %vm2432_vm14, %v2434_v12, %v2430_v38  ;;  %vm2444_vm10 = vmor %vm2442_vm9, %vm2443_vm8  ;;  %v2463_v42 = vand.u32 2147483648, %v2346_v48  ;;  %v2461_v40 = vand.u32 2147483647, %v2346_v48  ;;  %v6826_v38 = vld [vmem:[%s10974_s4] sm:$0xff] }
 0x530   : > { %v2649_v52 = vmul.f32 %v2435_v46, %v8839_v10  ;;  %v2439_v60 = vsub.f32 1.0, %v2438_v53  ;;  %vm2457_vm13 = vweird.f32 %v2346_v48  ;;  %v6827_v46 = vld [vmem:[#allocation5 + $0xf8] sm:$0xff] }
 0x531   : > { %v2464_v8 = vor.u32 1.1754944e-38, %v2463_v42  ;;  %vm2462_vm4 = vcmp.eq.f32.partialorder %v2461_v40, 8.507059e+37  ;;  %v6839_v42 = vld [vmem:[#allocation5 + $0x58] sm:$0xff] }
 0x532   : > { %2683 = vmatmul.f32.gmra.mxu3 %v2649_v52  ;;  %v2440_v50 = vmul.f32 %v6391_v25, %v2439_v60  ;;  %v6828_v52 = vld [vmem:[#allocation5 + $0xe8] sm:$0xff]  ;;  %v6829_v60 = vld [vmem:[#allocation5 + $0xd8] sm:$0xff] }
 0x533   : > { %v6841_v40 = vld [vmem:[%s10974_s4 + $0x18] sm:$0xff] }
 0x534   : > { %v2441_v51 = vadd.f32 %v6391_v25, %v2440_v50  ;;  %v6831_v50 = vld [vmem:[%s10974_s4 + $0x8] sm:$0xff] }
 0x535   : > { %v6393_v9 = vpop.eup %6392 }
 0x536   : > { %v2445_v43 = vsel %vm2444_vm10, %v6391_v25, %v2441_v51  ;;  %v2453_v35 = vmul.f32 %v6393_v9, %v2346_v48  ;;  %vm2458_vm12 = vweird.f32 %v6393_v9  ;;  %v9062_v25 = vpop.f32.mrf.mxu0 }
 0x537   : > { %v2450_v54 = vsel %vm2447_vm11, %v2449_v20, %v2445_v43  ;;  %vm2459_vm14 = vmor %vm2457_vm13, %vm2458_vm12  ;;  %v6834_v20 = vld [vmem:[#allocation5 + $0x98] sm:$0xff]  ;;  %v6835_v43 = vld [vmem:[#allocation5 + $0x88] sm:$0xff] }
 0x538   : > { %v2650_v44 = vmul.f32 %v2450_v54, %v8850_v6  ;;  %v2454_v29 = vsub.f32 1.0, %v2453_v35  ;;  %v6836_v35 = vld [vmem:[%s10974_s4 + $0x10] sm:$0xff]  ;;  %v6837_v54 = vld [vmem:[#allocation5 + $0x78] sm:$0xff] }
 0x53a   : > { %2686 = vmatmul.f32.gmra.mxu3 %v2650_v44  ;;  %v2455_v37 = vmul.f32 %v6393_v9, %v2454_v29  ;;  %v6838_v44 = vld [vmem:[#allocation5 + $0x68] sm:$0xff] }
 0x53c   : > { %v2456_v34 = vadd.f32 %v6393_v9, %v2455_v37  ;;  %v6840_v37 = vld [vmem:[#allocation5 + $0x48] sm:$0xff] }
 0x53e   : > { %v2460_v61 = vsel %vm2459_vm14, %v6393_v9, %v2456_v34  ;;  %v9064_v48 = vpop.f32.mrf.mxu0  ;;  %v6833_v9 = vld [vmem:[#allocation5 + $0xa8] sm:$0xff]  ;;  %v6842_v34 = vld [vmem:[#allocation5 + $0x38] sm:$0xff] }
 0x53f   : > { %v2465_v47 = vsel %vm2462_vm4, %v2464_v8, %v2460_v61  ;;  %v6843_v8 = vld [vmem:[#allocation5 + $0x28] sm:$0xff]  ;;  %v6844_v61 = vld [vmem:[#allocation5 + $0x18] sm:$0xff] }
 0x540   : > { %v2651_v32 = vmul.f32 %v2465_v47, %v8854_v62 }
 0x542   : > { %2689 = vmatmul.f32.gmra.mxu3 %v2651_v32  ;;  %v6845_v32 = vld [vmem:[#allocation5 + $0x8] sm:$0xff] }
 0x546   : > { %v9070_v53 = vpop.f32.mrf.mxu0 }
 0x54e   : > { %v2251_v51 = vpop.f32.mrf.mxu0 }
 0x556   : > { %v2254_v29 = vpop.f32.mrf.mxu0 }
 0x55e   : > { %v2257_v47 = vpop.f32.mrf.mxu0 }
 0x56d   : > { %v2669_v39 = vpop.f32.mrf.mxu3 }
 0x575   : > { %v2672_v58 = vpop.f32.mrf.mxu3 }
 0x57d   : > { %v2675_v16 = vpop.f32.mrf.mxu3 }
 0x585   : > { %v2678_v28 = vpop.f32.mrf.mxu3 }
 0x5ad   : > { %v2681_v7 = vpop.f32.mrf.mxu3 }
 0x5b5   : > { %v2684_v23 = vpop.f32.mrf.mxu3 }
 0x5bd   : > { %v2687_v26 = vpop.f32.mrf.mxu3 }
 0x5c5   : > { %v2690_v12 = vpop.f32.mrf.mxu3 }
 0x5c6   : > { %2701 = vmatpush.msrb.mxu1 %v2690_v12 }
 0x5c8   : > { %2702 = vmatpush.msrb.mxu1 %v2687_v26 }
 0x5ca   : > { %2703 = vmatpush.msrb.mxu1 %v2684_v23  ;;  %v6849_v23 = vld [vmem:[%s10974_s4 + $0x38] sm:$0xff] }
 0x5cc   : > { %2704 = vmatpush.msrb.mxu1 %v2681_v7 }
 0x5ce   : > { %2705 = vmatpush.msrb.mxu1 %v2678_v28  ;;  %v6848_v28 = vld [vmem:[%s10974_s4 + $0x30] sm:$0xff] }
 0x5d0   : > { %2706 = vmatpush.msrb.mxu1 %v2675_v16  ;;  %v2260_v16 = vpop.f32.mrf.mxu0 }
 0x5d2   : > { %2707 = vmatpush.msrb.mxu1 %v2672_v58  ;;  %v6847_v58 = vld [vmem:[%s10974_s4 + $0x28] sm:$0xff] }
 0x5d4   : > { %2708 = vmatpush.msrb.mxu1 %v2669_v39  ;;  %v6846_v39 = vld [vmem:[%s10974_s4 + $0x20] sm:$0xff] }
 0x5d5   : > { %5924 = vmatmul.msk.f32.vlgmr.msrb.gmra.mxu1 %vm1377_vm0, %v6826_v38  ;;  %v2467_v38 = vsel %vm648_vm15, %v2254_v29, %v9062_v25 }
 0x5d6   : > { %2832 = vmatpush.msra.mxu1 %v6827_v46  ;;  %v2484_v46 = vadd.f32 %v2467_v38, %v8047_v56 }
 0x5d8   : > { %2833 = vmatpush.msra.mxu1 %v6828_v52  ;;  %v2263_v7 = vpop.f32.mrf.mxu0 }
 0x5da   : > { %2834 = vmatpush.msra.mxu1 %v6829_v60  ;;  %v5916_v60 = vmul.f32 -1.442695, %v2484_v46 }
 0x5dc   : > { %2835 = vmatpush.msra.mxu1 %v6830_v49  ;;  %v2468_v49 = vsel %vm649_vm5, %v2257_v47, %v9064_v48  ;;  %6394 = vpow2.f32 %v5916_v60  ;;  %v2470_v48 = vsel %vm651_vm7, %v2263_v7, %v2251_v51 }
 0x5dd   : > { %5925 = vmatmul.msk.f32.gmra.mxu1 %vm1377_vm0, %v6831_v50  ;;  %v2485_v50 = vadd.f32 %v2468_v49, %v8053_v30  ;;  %v2487_v30 = vadd.f32 %v2470_v48, %v8059_v1 }
 0x5de   : > { %2836 = vmatpush.msra.mxu1 %v6832_v13 }
 0x5e0   : > { %2837 = vmatpush.msra.mxu1 %v6833_v9  ;;  %v2266_v26 = vpop.f32.mrf.mxu0  ;;  %v5917_v9 = vmul.f32 -1.442695, %v2485_v50 }
 0x5e2   : > { %2838 = vmatpush.msra.mxu1 %v6834_v20  ;;  %v2469_v20 = vsel %vm650_vm6, %v2260_v16, %v9070_v53  ;;  %6396 = vpow2.f32 %v5917_v9 }
 0x5e3   : > { %v2486_v56 = vadd.f32 %v2469_v20, %v8056_v0 }
 0x5e4   : > { %2839 = vmatpush.msra.mxu1 %v6835_v43  ;;  %v6395_v43 = vpop.eup %6394 }
 0x5e5   : > { %5926 = vmatmul.msk.f32.gmra.mxu1 %vm1377_vm0, %v6836_v35  ;;  %v2516_v25 = vadd.f32 1.0, %v6395_v43  ;;  %v5918_v35 = vmul.f32 -1.442695, %v2486_v56 }
 0x5e6   : > { %2840 = vmatpush.msra.mxu1 %v6837_v54 }
 0x5e7   : > { %6398 = vrcp.f32 %v2516_v25  ;;  %v2535_v46 = vand.u32 2147483648, %v2516_v25  ;;  %vm2529_vm8 = vweird.f32 %v2516_v25 }
 0x5e8   : > { %2841 = vmatpush.msra.mxu1 %v6838_v44  ;;  %v2269_v12 = vpop.f32.mrf.mxu0  ;;  %v6397_v44 = vpop.eup %6396  ;;  %6400 = vpow2.f32 %v5918_v35 }
 0x5e9   : > { %v9117_v29 = vadd.f32 1.0, %v6397_v44  ;;  %v2536_v35 = vor.u32 1.1754944e-38, %v2535_v46 }
 0x5ea   : > { %2842 = vmatpush.msra.mxu1 %v6839_v42 }
 0x5eb   : > { %6402 = vrcp.f32 %v9117_v29  ;;  %vm2544_vm12 = vweird.f32 %v9117_v29 }
 0x5ec   : > { %2843 = vmatpush.msra.mxu1 %v6840_v37  ;;  %v5919_v37 = vmul.f32 -1.442695, %v2487_v30 }
 0x5ed   : > { %5927 = vmatmul.msk.f32.gmra.mxu1 %vm1377_vm0, %v6841_v40  ;;  %v6399_v42 = vpop.eup %6398 }
 0x5ee   : > { %2844 = vmatpush.msra.mxu1 %v6842_v34  ;;  %v6401_v53 = vpop.eup %6400  ;;  %v2525_v40 = vmul.f32 %v6399_v42, %v2516_v25  ;;  %6404 = vpow2.f32 %v5919_v37  ;;  %vm2530_vm4 = vweird.f32 %v6399_v42  ;;  %v2550_v37 = vand.u32 2147483648, %v9117_v29 }
 0x5ef   : > { %v9123_v51 = vadd.f32 1.0, %v6401_v53  ;;  %vm2531_vm9 = vmor %vm2529_vm8, %vm2530_vm4 }
 0x5f0   : > { %2845 = vmatpush.msra.mxu1 %v6843_v8  ;;  %v2272_v52 = vpop.f32.mrf.mxu0 }
 0x5f1   : > { %v9125_v47 = vpop.eup %6402  ;;  %6406 = vrcp.f32 %v9123_v51  ;;  %vm2559_vm8 = vweird.f32 %v9123_v51 }
 0x5f2   : > { %2846 = vmatpush.msra.mxu1 %v6844_v61  ;;  %v2526_v61 = vsub.f32 1.0, %v2525_v40  ;;  %v2540_v16 = vmul.f32 %v9125_v47, %v9117_v29  ;;  %vm2545_vm11 = vweird.f32 %v9125_v47 }
 0x5f3   : > { %vm2546_vm13 = vmor %vm2544_vm12, %vm2545_vm11 }
 0x5f4   : > { %2847 = vmatpush.msra.mxu1 %v6845_v32 }
 0x5f5   : > { %5928 = vmatmul.msk.f32.gmra.mxu1 %vm1377_vm0, %v6846_v39  ;;  %v6405_v39 = vpop.eup %6404 }
 0x5f6   : > { %v9133_v7 = vadd.f32 1.0, %v6405_v39 }
 0x5f7   : > { %v9135_v38 = vpop.eup %6406 }
 0x5f8   : > { %v9108_v13 = vpop.f32.mrf.mxu0  ;;  %v2555_v43 = vmul.f32 %v9135_v38, %v9123_v51  ;;  %vm2560_vm4 = vweird.f32 %v9135_v38  ;;  %vm2574_vm12 = vweird.f32 %v9133_v7 }
 0x5fd   : > { %5929 = vmatmul.msk.f32.gmra.mxu1 %vm1377_vm0, %v6847_v58  ;;  %v2527_v58 = vmul.f32 %v6399_v42, %v2526_v61 }
 0x600   : > { %v2278_v54 = vpop.f32.mrf.mxu0 }
 0x601   : > { %v2471_v0 = vsel %vm648_vm15, %v2278_v54, %v2266_v26  ;;  %v2528_v26 = vadd.f32 %v6399_v42, %v2527_v58 }
 0x602   : > { %v2488_v8 = vadd.f32 %v2471_v0, %v8062_v2 }
 0x603   : > { %v2532_v56 = vsel %vm2531_vm9, %v6399_v42, %v2528_v26  ;;  %v2565_v26 = vand.u32 2147483648, %v9123_v51  ;;  %vm9179_vm9 = vmor %vm2559_vm8, %vm2560_vm4 }
 0x604   : > { %v5920_v1 = vmul.f32 -1.442695, %v2488_v8 }
 0x605   : > { %5930 = vmatmul.msk.f32.gmra.mxu1 %vm1377_vm0, %v6848_v28 }
 0x606   : > { %6408 = vpow2.f32 %v5920_v1 }
 0x607   : > { %6410 = vrcp.f32 %v9133_v7 }
 0x608   : > { %v2281_v34 = vpop.f32.mrf.mxu0 }
 0x609   : > { %v2472_v32 = vsel %vm649_vm5, %v2281_v34, %v2269_v12  ;;  %v2533_v12 = vand.u32 2147483647, %v2516_v25 }
 0x60a   : > { %v2489_v28 = vadd.f32 %v2472_v32, %v8065_v3 }
 0x60b   : > { %vm2534_vm10 = vcmp.eq.f32.partialorder %v2533_v12, 8.507059e+37  ;;  %v2563_v12 = vand.u32 2147483647, %v9123_v51 }
 0x60c   : > { %v5921_v60 = vmul.f32 -1.442695, %v2489_v28  ;;  %v6409_v9 = vpop.eup %6408  ;;  %v2537_v48 = vsel %vm2534_vm10, %v2536_v35, %v2532_v56 }
 0x60d   : > { %5931 = vmatmul.msk.f32.gmra.mxu1 %vm1377_vm0, %v6849_v23  ;;  %v2541_v23 = vsub.f32 1.0, %v2540_v16  ;;  %v9145_v54 = vadd.f32 1.0, %v6409_v9  ;;  %v9149_v30 = vpop.eup %6410  ;;  %v2767_v0 = vsub.f32 1.0, %v2537_v48  ;;  %v2759_v8 = vmul.f32 %v2537_v48, %v8717_v22 }
 0x60e   : > { %v2570_v39 = vmul.f32 %v9149_v30, %v9133_v7  ;;  %v2551_v16 = vor.u32 1.1754944e-38, %v2550_v37  ;;  %vm2564_vm10 = vcmp.eq.f32.partialorder %v2563_v12, 8.507059e+37  ;;  %v6853_v37 = vld [vmem:[#allocation5 + $0xc0] sm:$0xff]  ;;  %vm2575_vm11 = vweird.f32 %v9149_v30 }
 0x60f   : > { %v2542_v20 = vmul.f32 %v9125_v47, %v2541_v23  ;;  %v2595_v12 = vand.u32 2147483648, %v9145_v54  ;;  %vm2589_vm8 = vweird.f32 %v9145_v54 }
 0x610   : > { %v2284_v2 = vpop.f32.mrf.mxu0 }
 0x611   : > { %v2473_v50 = vsel %vm650_vm6, %v2284_v2, %v2272_v52  ;;  %v2556_v52 = vsub.f32 1.0, %v2555_v43  ;;  %v2571_v2 = vsub.f32 1.0, %v2570_v39  ;;  %v6851_v43 = vld [vmem:[#allocation5 + $0xe0] sm:$0xff] }
 0x612   : > { %v2490_v25 = vadd.f32 %v2473_v50, %v8068_v4  ;;  %v2548_v4 = vand.u32 2147483647, %v9117_v29 }
 0x613   : > { %v2557_v32 = vmul.f32 %v9135_v38, %v2556_v52  ;;  %v2572_v35 = vmul.f32 %v9149_v30, %v2571_v2  ;;  %v2566_v52 = vor.u32 1.1754944e-38, %v2565_v26 }
 0x614   : > { %v5922_v42 = vmul.f32 -1.442695, %v2490_v25  ;;  %vm2549_vm14 = vcmp.eq.f32.partialorder %v2548_v4, 8.507059e+37  ;;  %v2580_v4 = vand.u32 2147483648, %v9133_v7 }
 0x615   : > { %v2558_v23 = vadd.f32 %v9135_v38, %v2557_v32 }
 0x616   : > { %v2581_v2 = vor.u32 1.1754944e-38, %v2580_v4 }
 0x617   : > { %v2562_v48 = vsel %vm9179_vm9, %v9135_v38, %v2558_v23  ;;  %v2573_v38 = vadd.f32 %v9149_v30, %v2572_v35  ;;  %v6856_v23 = vld [vmem:[#allocation5 + $0x90] sm:$0xff] }
 0x618   : > { %v2287_v44 = vpop.f32.mrf.mxu0 }
 0x619   : > { %v2474_v34 = vsel %vm651_vm7, %v2287_v44, %v9108_v13  ;;  %v6852_v44 = vld [vmem:[#allocation5 + $0xd0] sm:$0xff] }
 0x61a   : > { %v2491_v28 = vadd.f32 %v2474_v34, %v8071_v5  ;;  %v6850_v5 = vld [vmem:[#allocation5 + $0xf0] sm:$0xff]  ;;  %v2578_v34 = vand.u32 2147483647, %v9133_v7 }
 0x61c   : > { %v5923_v46 = vmul.f32 -1.442695, %v2491_v28 }
 0x652   : > { %v2710_v49 = vpop.f32.mrf.mxu1 }
 0x653   : > { %v2743_v3 = vadd.f32 %v2710_v49, %v8376_v17  ;;  %v2543_v17 = vadd.f32 %v9125_v47, %v2542_v20 }
 0x655   : > { %6412 = vtanh.f32 %v2743_v3  ;;  %v2547_v58 = vsel %vm2546_vm13, %v9125_v47, %v2543_v17  ;;  %v2567_v17 = vsel %vm2564_vm10, %v2566_v52, %v2562_v48  ;;  %vm9205_vm13 = vmor %vm2574_vm12, %vm2575_vm11  ;;  %v2593_v3 = vand.u32 2147483647, %v9145_v54 }
 0x656   : > { %6414 = vpow2.f32 %v5921_v60  ;;  %v2761_v39 = vmul.f32 %v2567_v17, %v8774_v33 }
 0x657   : > { %6416 = vrcp.f32 %v9145_v54  ;;  %vm2594_vm10 = vcmp.eq.f32.partialorder %v2593_v3, 8.507059e+37  ;;  %v11099_v3 = vld [vmem:[#allocation63_spill] sm:$0xff] }
 0x65a   : > { %v2713_v53 = vpop.f32.mrf.mxu1 }
 0x65b   : > { %v6413_v40 = vpop.eup %6412  ;;  %v2744_v61 = vadd.f32 %v2713_v53, %v8379_v41  ;;  %v2552_v41 = vsel %vm2549_vm14, %v2551_v16, %v2547_v58  ;;  %v6854_v53 = vld [vmem:[#allocation5 + $0xb0] sm:$0xff]  ;;  %vm2579_vm14 = vcmp.eq.f32.partialorder %v2578_v34, 8.507059e+37 }
 0x65c   : > { %v6415_v1 = vpop.eup %6414  ;;  %v2775_v29 = vmul.f32 %v6413_v40, %v2767_v0  ;;  %v2768_v60 = vsub.f32 1.0, %v2552_v41  ;;  %v2760_v20 = vmul.f32 %v2552_v41, %v8745_v21  ;;  %v2769_v40 = vsub.f32 1.0, %v2567_v17  ;;  %v6860_v17 = vld [vmem:[#allocation5 + $0x50] sm:$0xff] }
 0x65d   : > { %6418 = vtanh.f32 %v2744_v61  ;;  %v9167_v22 = vadd.f32 1.0, %v6415_v1  ;;  %v9173_v47 = vpop.eup %6416  ;;  %v2577_v41 = vsel %vm9205_vm13, %v9149_v30, %v2573_v38 }
 0x65e   : > { %6420 = vpow2.f32 %v5922_v42  ;;  %v9165_v13 = vadd.f32 %v2775_v29, %v2759_v8  ;;  %v2585_v51 = vmul.f32 %v9173_v47, %v9145_v54  ;;  %v6855_v29 = vld [vmem:[#allocation5 + $0xa0] sm:$0xff]  ;;  %v2582_v26 = vsel %vm2579_vm14, %v2581_v2, %v2577_v41  ;;  %v6864_v2 = vld [vmem:[#allocation5 + $0x10] sm:$0xff] }
 0x65f   : > { %6422 = vrcp.f32 %v9167_v22  ;;  %vm2590_vm4 = vweird.f32 %v9173_v47  ;;  %v2762_v35 = vmul.f32 %v2582_v26, %v8801_v55  ;;  %v2610_v4 = vand.u32 2147483648, %v9167_v22 }
 0x660   : > { %2807 = vmatmul.f32.vlgmr.msra.gmra.mxu3 %v9165_v13  ;;  %2848 = vmatmul.f32.vlgmr.msra.gmra.mxu1 %v9165_v13  ;;  %v2586_v42 = vsub.f32 1.0, %v2585_v51  ;;  %vm9231_vm9 = vmor %vm2589_vm8, %vm2590_vm4  ;;  %v6859_v51 = vld [vmem:[#allocation5 + $0x60] sm:$0xff]  ;;  %vm2604_vm12 = vweird.f32 %v9167_v22  ;;  %v2608_v34 = vand.u32 2147483647, %v9167_v22 }
 0x661   : > { %3504 = vmatpush.msra.mxu3 %v6850_v5  ;;  %v6857_v5 = vld [vmem:[#allocation5 + $0x80] sm:$0xff]  ;;  %v2611_v41 = vor.u32 1.1754944e-38, %v2610_v4 }
 0x662   : > { %v2716_v49 = vpop.f32.mrf.mxu1  ;;  %v2587_v16 = vmul.f32 %v9173_v47, %v2586_v42  ;;  %vm2609_vm14 = vcmp.eq.f32.partialorder %v2608_v34, 8.507059e+37 }
 0x663   : > { %v6419_v50 = vpop.eup %6418  ;;  %v2745_v9 = vadd.f32 %v2716_v49, %v8382_v24  ;;  %3505 = vmatpush.msra.mxu3 %v6851_v43  ;;  %v6858_v49 = vld [vmem:[#allocation5 + $0x70] sm:$0xff] }
 0x664   : > { %v6421_v56 = vpop.eup %6420  ;;  %v2776_v25 = vmul.f32 %v6419_v50, %v2768_v60  ;;  %v2588_v60 = vadd.f32 %v9173_v47, %v2587_v16  ;;  %v2770_v50 = vsub.f32 1.0, %v2582_v26  ;;  %v6865_v26 = vld [vmem:[#allocation5] sm:$0xff] }
 0x665   : > { %6424 = vtanh.f32 %v2745_v9  ;;  %3506 = vmatpush.msra.mxu3 %v6852_v44  ;;  %v9193_v21 = vadd.f32 1.0, %v6421_v56  ;;  %v9199_v0 = vpop.eup %6422  ;;  %v2596_v44 = vor.u32 1.1754944e-38, %v2595_v12 }
 0x666   : > { %6426 = vpow2.f32 %v5923_v46  ;;  %v9191_v24 = vadd.f32 %v2776_v25, %v2760_v20  ;;  %v2600_v7 = vmul.f32 %v9199_v0, %v9167_v22  ;;  %v2592_v52 = vsel %vm9231_vm9, %v9173_v47, %v2588_v60 }
 0x667   : > { %3507 = vmatpush.msra.mxu3 %v6853_v37  ;;  %6428 = vrcp.f32 %v9193_v21  ;;  %v2597_v55 = vsel %vm2594_vm10, %v2596_v44, %v2592_v52  ;;  %v6861_v37 = vld [vmem:[#allocation5 + $0x40] sm:$0xff]  ;;  %vm2605_vm11 = vweird.f32 %v9199_v0  ;;  %vm2619_vm8 = vweird.f32 %v9193_v21 }
 0x668   : > { %2810 = vmatmul.f32.gmra.mxu3 %v9191_v24  ;;  %2851 = vmatmul.f32.gmra.mxu1 %v9191_v24  ;;  %v2601_v46 = vsub.f32 1.0, %v2600_v7  ;;  %vm9254_vm13 = vmor %vm2604_vm12, %vm2605_vm11  ;;  %v2623_v12 = vand.u32 2147483647, %v9193_v21 }
 0x669   : > { %3508 = vmatpush.msra.mxu3 %v6854_v53  ;;  %v6862_v53 = vld [vmem:[#allocation5 + $0x30] sm:$0xff] }
 0x66a   : > { %v2719_v8 = vpop.f32.mrf.mxu1  ;;  %v2602_v25 = vmul.f32 %v9199_v0, %v2601_v46  ;;  %vm2624_vm10 = vcmp.eq.f32.partialorder %v2623_v12, 8.507059e+37  ;;  %v6869_v12 = vld [vmem:[%s10973_s3 + $0x18] sm:$0xff] }
 0x66b   : > { %v6425_v61 = vpop.eup %6424  ;;  %v2746_v32 = vadd.f32 %v2719_v8, %v8385_v31  ;;  %3509 = vmatpush.msra.mxu3 %v6855_v29  ;;  %v2763_v29 = vmul.f32 %v2597_v55, %v8825_v45 }
 0x66c   : > { %v6427_v58 = vpop.eup %6426  ;;  %v2777_v28 = vmul.f32 %v6425_v61, %v2769_v40  ;;  %v2603_v38 = vadd.f32 %v9199_v0, %v2602_v25  ;;  %v2771_v40 = vsub.f32 1.0, %v2597_v55 }
 0x66d   : > { %6430 = vtanh.f32 %v2746_v32  ;;  %3510 = vmatpush.msra.mxu3 %v6856_v23  ;;  %v9219_v33 = vadd.f32 1.0, %v6427_v58  ;;  %v9225_v30 = vpop.eup %6428  ;;  %v11098_v32 = vld [vmem:[#allocation62_spill] sm:$0xff]  ;;  %v6863_v58 = vld [vmem:[#allocation5 + $0x20] sm:$0xff] }
 0x66e   : > { %v9217_v31 = vadd.f32 %v2777_v28, %v2761_v39  ;;  %v2615_v48 = vmul.f32 %v9225_v30, %v9193_v21  ;;  %v2607_v22 = vsel %vm9254_vm13, %v9199_v0, %v2603_v38  ;;  %vm2620_vm4 = vweird.f32 %v9225_v30 }
 0x66f   : > { %3511 = vmatpush.msra.mxu3 %v6857_v5  ;;  %6432 = vrcp.f32 %v9219_v33  ;;  %v2612_v45 = vsel %vm2609_vm14, %v2611_v41, %v2607_v22  ;;  %v2625_v0 = vand.u32 2147483648, %v9193_v21  ;;  %vm2621_vm9 = vmor %vm2619_vm8, %vm2620_vm4  ;;  %vm2634_vm12 = vweird.f32 %v9219_v33 }
 0x670   : > { %2813 = vmatmul.f32.gmra.mxu3 %v9217_v31  ;;  %2854 = vmatmul.f32.gmra.mxu1 %v9217_v31  ;;  %v2616_v42 = vsub.f32 1.0, %v2615_v48  ;;  %v2772_v60 = vsub.f32 1.0, %v2612_v45  ;;  %vm11101_vm4 = vcmp.gt.f32.partialorder %v8296_v57, 0.5 }
 0x671   : > { %3512 = vmatpush.msra.mxu3 %v6858_v49 }
 0x672   : > { %v2722_v9 = vpop.f32.mrf.mxu1  ;;  %v2617_v16 = vmul.f32 %v9225_v30, %v2616_v42 }
 0x673   : > { %v6431_v20 = vpop.eup %6430  ;;  %v2747_v56 = vadd.f32 %v2722_v9, %v8403_v19  ;;  %3513 = vmatpush.msra.mxu3 %v6859_v51  ;;  %v2626_v51 = vor.u32 1.1754944e-38, %v2625_v0  ;;  %v6867_v0 = vld [vmem:[%s10973_s3 + $0x8] sm:$0xff] }
 0x674   : > { %v2778_v54 = vmul.f32 %v6431_v20, %v2770_v50  ;;  %v2618_v46 = vadd.f32 %v9225_v30, %v2617_v16 }
 0x675   : > { %6434 = vtanh.f32 %v2747_v56  ;;  %3514 = vmatpush.msra.mxu3 %v6860_v17  ;;  %v9249_v47 = vpop.eup %6432  ;;  %v11100_v17 = vld [vmem:[#allocation64_spill] sm:$0xff] }
 0x676   : > { %v9243_v19 = vadd.f32 %v2778_v54, %v2762_v35  ;;  %v2630_v7 = vmul.f32 %v9249_v47, %v9219_v33  ;;  %v2622_v56 = vsel %vm2621_vm9, %v9225_v30, %v2618_v46  ;;  %v2764_v35 = vmul.f32 %v2612_v45, %v8839_v10  ;;  %v6866_v46 = vld [vmem:[%s10973_s3] sm:$0xff] }
 0x677   : > { %3515 = vmatpush.msra.mxu3 %v6861_v37  ;;  %v2627_v48 = vsel %vm2624_vm10, %v2626_v51, %v2622_v56  ;;  %vm2635_vm11 = vweird.f32 %v9249_v47  ;;  %v2640_v54 = vand.u32 2147483648, %v9219_v33  ;;  %v2638_v10 = vand.u32 2147483647, %v9219_v33  ;;  %v6876_v56 = vld [vmem:[%s10973_s3 + $0x50] sm:$0xff]  ;;  %v6878_v51 = vld [vmem:[%s10973_s3 + $0x60] sm:$0xff] }
 0x678   : > { %2816 = vmatmul.f32.gmra.mxu3 %v9243_v19  ;;  %2857 = vmatmul.f32.gmra.mxu1 %v9243_v19  ;;  %v2631_v5 = vsub.f32 1.0, %v2630_v7  ;;  %v2773_v52 = vsub.f32 1.0, %v2627_v48  ;;  %vm2636_vm13 = vmor %vm2634_vm12, %vm2635_vm11  ;;  %v2765_v38 = vmul.f32 %v2627_v48, %v8850_v6  ;;  %v6879_v48 = vld [vmem:[%s10973_s3 + $0x68] sm:$0xff] }
 0x679   : > { %3516 = vmatpush.msra.mxu3 %v6862_v53  ;;  %v2641_v4 = vor.u32 1.1754944e-38, %v2640_v54  ;;  %vm2639_vm14 = vcmp.eq.f32.partialorder %v2638_v10, 8.507059e+37  ;;  %v6881_v54 = vld [vmem:[%s10973_s3 + $0x78] sm:$0xff] }
 0x67a   : > { %v2725_v8 = vpop.f32.mrf.mxu1  ;;  %v2632_v20 = vmul.f32 %v9249_v47, %v2631_v5 }
 0x67b   : > { %v6435_v61 = vpop.eup %6434  ;;  %v2748_v39 = vadd.f32 %v2725_v8, %v11098_v32  ;;  %3517 = vmatpush.msra.mxu3 %v6863_v58 }
 0x67c   : > { %v2779_v28 = vmul.f32 %v6435_v61, %v2771_v40  ;;  %v2633_v21 = vadd.f32 %v9249_v47, %v2632_v20  ;;  %v6874_v20 = vld [vmem:[%s10973_s3 + $0x40] sm:$0xff] }
 0x67d   : > { %6436 = vtanh.f32 %v2748_v39  ;;  %3518 = vmatpush.msra.mxu3 %v6864_v2 }
 0x67e   : > { %v9266_v23 = vadd.f32 %v2779_v28, %v2763_v29  ;;  %v2637_v42 = vsel %vm2636_vm13, %v9249_v47, %v2633_v21  ;;  %v6880_v21 = vld [vmem:[%s10973_s3 + $0x70] sm:$0xff] }
 0x67f   : > { %3519 = vmatpush.msra.mxu3 %v6865_v26  ;;  %v2642_v40 = vsel %vm2639_vm14, %v2641_v4, %v2637_v42 }
 0x680   : > { %2819 = vmatmul.f32.gmra.mxu3 %v9266_v23  ;;  %2860 = vmatmul.f32.gmra.mxu1 %v9266_v23  ;;  %v2774_v33 = vsub.f32 1.0, %v2642_v40  ;;  %v2766_v61 = vmul.f32 %v2642_v40, %v8854_v62 }
 0x682   : > { %v2728_v49 = vpop.f32.mrf.mxu1 }
 0x683   : > { %v6437_v50 = vpop.eup %6436  ;;  %v2749_v9 = vadd.f32 %v2728_v49, %v11099_v3  ;;  %v6870_v49 = vld [vmem:[%s10973_s3 + $0x20] sm:$0xff]  ;;  %v6872_v3 = vld [vmem:[%s10973_s3 + $0x30] sm:$0xff] }
 0x684   : > { %v2780_v43 = vmul.f32 %v6437_v50, %v2772_v60  ;;  %v6868_v60 = vld [vmem:[%s10973_s3 + $0x10] sm:$0xff]  ;;  %v6871_v50 = vld [vmem:[%s10973_s3 + $0x28] sm:$0xff] }
 0x685   : > { %6438 = vtanh.f32 %v2749_v9  ;;  %v6873_v9 = vld [vmem:[%s10973_s3 + $0x38] sm:$0xff] }
 0x686   : > { %v9279_v25 = vadd.f32 %v2780_v43, %v2764_v35  ;;  %v6875_v43 = vld [vmem:[%s10973_s3 + $0x48] sm:$0xff]  ;;  %v6877_v35 = vld [vmem:[%s10973_s3 + $0x58] sm:$0xff] }
 0x688   : > { %2822 = vmatmul.f32.gmra.mxu3 %v9279_v25  ;;  %2863 = vmatmul.f32.gmra.mxu1 %v9279_v25 }
 0x68a   : > { %v2731_v30 = vpop.f32.mrf.mxu1 }
 0x68b   : > { %v6439_v44 = vpop.eup %6438  ;;  %v2750_v55 = vadd.f32 %v2731_v30, %v11100_v17 }
 0x68c   : > { %v2781_v37 = vmul.f32 %v6439_v44, %v2773_v52  ;;  %v736_v44 = vrot.slane %v7771_v36, 4 }
 0x68d   : > { %6440 = vtanh.f32 %v2750_v55 }
 0x68e   : > { %v9291_v53 = vadd.f32 %v2781_v37, %v2765_v38  ;;  %v775_v55 = vperm.slane %v736_v44, 0  ;;  %v9384_v37 = vld [vmem:[%s10975_s5] sm:$0xff] }
 0x68f   : > { %v9387_v38 = vld [vmem:[#allocation11] sm:$0xff] }
 0x690   : > { %2825 = vmatmul.f32.gmra.mxu3 %v9291_v53  ;;  %2866 = vmatmul.f32.gmra.mxu1 %v9291_v53  ;;  %v811_v42 = vmul.f32 %v9384_v37, %v775_v55 }
 0x692   : > { %v863_v4 = vadd.f32 %v9387_v38, %v811_v42 }
 0x693   : > { %v6441_v34 = vpop.eup %6440 }
 0x694   : > { %v2782_v8 = vmul.f32 %v6441_v34, %v2774_v33 }
 0x696   : > { %v9296_v1 = vadd.f32 %v2782_v8, %v2766_v61  ;;  %v9395_v61 = vld [vmem:[%s10975_s5 + $0x8] sm:$0xff] }
 0x698   : > { %2828 = vmatmul.f32.gmra.mxu3 %v9296_v1  ;;  %2869 = vmatmul.f32.gmra.mxu1 %v9296_v1 }
 0x6dd   : > { %v2849_v6 = vpop.f32.mrf.mxu1 }
 0x6e3   : > { %v2808_v47 = vpop.f32.mrf.mxu3 }
 0x6e5   : > { %v2852_v32 = vpop.f32.mrf.mxu1 }
 0x6eb   : > { %v2811_v39 = vpop.f32.mrf.mxu3 }
 0x6ed   : > { %v2855_v29 = vpop.f32.mrf.mxu1 }
 0x6f3   : > { %v2814_v58 = vpop.f32.mrf.mxu3 }
 0x6f5   : > { %v2858_v16 = vpop.f32.mrf.mxu1 }
 0x6fb   : > { %v2817_v7 = vpop.f32.mrf.mxu3 }
 0x6fd   : > { %v2861_v28 = vpop.f32.mrf.mxu1 }
 0x703   : > { %v2820_v22 = vpop.f32.mrf.mxu3 }
 0x705   : > { %v2864_v41 = vpop.f32.mrf.mxu1 }
 0x70b   : > { %v2823_v2 = vpop.f32.mrf.mxu3 }
 0x70d   : > { %v2867_v45 = vpop.f32.mrf.mxu1 }
 0x713   : > { %v2826_v62 = vpop.f32.mrf.mxu3 }
 0x715   : > { %v2870_v26 = vpop.f32.mrf.mxu1 }
 0x716   : > { %2946 = vmatpush.msra.mxu0 %v2870_v26 }
 0x718   : > { %2947 = vmatpush.msra.mxu0 %v2867_v45 }
 0x71a   : > { %2948 = vmatpush.msra.mxu0 %v2864_v41 }
 0x71b   : > { %v2829_v5 = vpop.f32.mrf.mxu3 }
 0x71c   : > { %2881 = vmatpush.msrb.mxu2 %v2829_v5  ;;  %2949 = vmatpush.msra.mxu0 %v2861_v28  ;;  %v9406_v28 = vld [vmem:[%s10975_s5 + $0x10] sm:$0xff] }
 0x71e   : > { %2882 = vmatpush.msrb.mxu2 %v2826_v62  ;;  %2950 = vmatpush.msra.mxu0 %v2858_v16 }
 0x720   : > { %2883 = vmatpush.msrb.mxu2 %v2823_v2  ;;  %2951 = vmatpush.msra.mxu0 %v2855_v29  ;;  %v9409_v2 = vld [vmem:[#allocation11 + $0x10] sm:$0xff] }
 0x722   : > { %2884 = vmatpush.msrb.mxu2 %v2820_v22  ;;  %2952 = vmatpush.msra.mxu0 %v2852_v32  ;;  %v813_v22 = vmul.f32 %v9406_v28, %v775_v55 }
 0x724   : > { %2885 = vmatpush.msrb.mxu2 %v2817_v7  ;;  %2953 = vmatpush.msra.mxu0 %v2849_v6  ;;  %v812_v6 = vmul.f32 %v9395_v61, %v775_v55  ;;  %v865_v45 = vadd.f32 %v9409_v2, %v813_v22 }
 0x725   : > { %5948 = vmatmul.msk.f32.vlgmr.msra.gmra.mxu0 %vm1377_vm0, %v6866_v46 }
 0x726   : > { %2886 = vmatpush.msrb.mxu2 %v2814_v58 }
 0x728   : > { %2887 = vmatpush.msrb.mxu2 %v2811_v39 }
 0x72a   : > { %2888 = vmatpush.msrb.mxu2 %v2808_v47  ;;  %v9398_v47 = vld [vmem:[#allocation11 + $0x8] sm:$0xff] }
 0x72b   : > { %5932 = vmatmul.msk.f32.vlgmr.msrb.gmra.mxu2 %vm1377_vm0, %v6866_v46  ;;  %v864_v32 = vadd.f32 %v9398_v47, %v812_v6 }
 0x72d   : > { %5949 = vmatmul.msk.f32.gmra.mxu0 %vm1377_vm0, %v6867_v0 }
 0x733   : > { %5933 = vmatmul.msk.f32.gmra.mxu2 %vm1377_vm0, %v6867_v0 }
 0x735   : > { %5950 = vmatmul.msk.f32.gmra.mxu0 %vm1377_vm0, %v6868_v60 }
 0x73b   : > { %5934 = vmatmul.msk.f32.gmra.mxu2 %vm1377_vm0, %v6868_v60  ;;  %v9417_v60 = vld [vmem:[%s10975_s5 + $0x18] sm:$0xff] }
 0x73d   : > { %5951 = vmatmul.msk.f32.gmra.mxu0 %vm1377_vm0, %v6869_v12 }
 0x743   : > { %5935 = vmatmul.msk.f32.gmra.mxu2 %vm1377_vm0, %v6869_v12  ;;  %v814_v12 = vmul.f32 %v9417_v60, %v775_v55 }
 0x745   : > { %5952 = vmatmul.msk.f32.gmra.mxu0 %vm1377_vm0, %v6870_v49 }
 0x74b   : > { %5936 = vmatmul.msk.f32.gmra.mxu2 %vm1377_vm0, %v6870_v49 }
 0x74d   : > { %5953 = vmatmul.msk.f32.gmra.mxu0 %vm1377_vm0, %v6871_v50 }
 0x753   : > { %5937 = vmatmul.msk.f32.gmra.mxu2 %vm1377_vm0, %v6871_v50 }
 0x755   : > { %5954 = vmatmul.msk.f32.gmra.mxu0 %vm1377_vm0, %v6872_v3 }
 0x75b   : > { %5938 = vmatmul.msk.f32.gmra.mxu2 %vm1377_vm0, %v6872_v3 }
 0x75d   : > { %5955 = vmatmul.msk.f32.gmra.mxu0 %vm1377_vm0, %v6873_v9 }
 0x763   : > { %5939 = vmatmul.msk.f32.gmra.mxu2 %vm1377_vm0, %v6873_v9 }
 0x765   : > { %5956 = vmatmul.msk.f32.gmra.mxu0 %vm1377_vm0, %v6874_v20 }
 0x76b   : > { %5940 = vmatmul.msk.f32.gmra.mxu2 %vm1377_vm0, %v6874_v20  ;;  %v9420_v20 = vld [vmem:[#allocation11 + $0x18] sm:$0xff] }
 0x76d   : > { %5957 = vmatmul.msk.f32.gmra.mxu0 %vm1377_vm0, %v6875_v43 }
 0x773   : > { %5941 = vmatmul.msk.f32.gmra.mxu2 %vm1377_vm0, %v6875_v43  ;;  %v866_v43 = vadd.f32 %v9420_v20, %v814_v12 }
 0x775   : > { %5958 = vmatmul.msk.f32.gmra.mxu0 %vm1377_vm0, %v6876_v56 }
 0x77b   : > { %5942 = vmatmul.msk.f32.gmra.mxu2 %vm1377_vm0, %v6876_v56 }
 0x77d   : > { %5959 = vmatmul.msk.f32.gmra.mxu0 %vm1377_vm0, %v6877_v35 }
 0x783   : > { %5943 = vmatmul.msk.f32.gmra.mxu2 %vm1377_vm0, %v6877_v35 }
 0x785   : > { %5960 = vmatmul.msk.f32.gmra.mxu0 %vm1377_vm0, %v6878_v51 }
 0x78b   : > { %5944 = vmatmul.msk.f32.gmra.mxu2 %vm1377_vm0, %v6878_v51 }
 0x78d   : > { %5961 = vmatmul.msk.f32.gmra.mxu0 %vm1377_vm0, %v6879_v48 }
 0x793   : > { %5945 = vmatmul.msk.f32.gmra.mxu2 %vm1377_vm0, %v6879_v48 }
 0x795   : > { %5962 = vmatmul.msk.f32.gmra.mxu0 %vm1377_vm0, %v6880_v21 }
 0x79b   : > { %5946 = vmatmul.msk.f32.gmra.mxu2 %vm1377_vm0, %v6880_v21 }
 0x79d   : > { %5963 = vmatmul.msk.f32.gmra.mxu0 %vm1377_vm0, %v6881_v54 }
 0x7a3   : > { %5947 = vmatmul.msk.f32.gmra.mxu2 %vm1377_vm0, %v6881_v54 }
 0x7ae   : > { %v2890_v52 = vpop.f32.mrf.mxu2 }
 0x7b6   : > { %v2893_v10 = vpop.f32.mrf.mxu2 }
 0x7be   : > { %v2896_v30 = vpop.f32.mrf.mxu2 }
 0x7c6   : > { %v2899_v17 = vpop.f32.mrf.mxu2 }
 0x7ce   : > { %v2902_v40 = vpop.f32.mrf.mxu2 }
 0x7cf   : > { %v3003_v33 = vsel %vm632_vm1, %v2902_v40, %v2890_v52 }
 0x7d0   : > { %v3020_v34 = vadd.f32 %v3003_v33, %v863_v4 }
 0x7d2   : > { %v5964_v8 = vmul.f32 -1.442695, %v3020_v34 }
 0x7d4   : > { %6442 = vpow2.f32 %v5964_v8 }
 0x7d6   : > { %v2905_v39 = vpop.f32.mrf.mxu2 }
 0x7d7   : > { %v3004_v29 = vsel %vm633_vm2, %v2905_v39, %v2893_v10 }
 0x7d8   : > { %v3021_v58 = vadd.f32 %v3004_v29, %v864_v32  ;;  %v6890_v29 = vld [vmem:[%s10972_s2 + $0x78] sm:$0xff] }
 0x7da   : > { %v6443_v16 = vpop.eup %6442  ;;  %v5965_v7 = vmul.f32 -1.442695, %v3021_v58 }
 0x7db   : > { %v3052_v41 = vadd.f32 1.0, %v6443_v16 }
 0x7dc   : > { %6444 = vpow2.f32 %v5965_v7 }
 0x7dd   : > { %6446 = vrcp.f32 %v3052_v41  ;;  %v3071_v51 = vand.u32 2147483648, %v3052_v41  ;;  %v3069_v54 = vand.u32 2147483647, %v3052_v41  ;;  %vm3065_vm9 = vweird.f32 %v3052_v41 }
 0x7de   : > { %v2908_v62 = vpop.f32.mrf.mxu2 }
 0x7df   : > { %v3005_v26 = vsel %vm634_vm3, %v2908_v62, %v2896_v30  ;;  %v3072_v42 = vor.u32 1.1754944e-38, %v3071_v51  ;;  %vm3070_vm11 = vcmp.eq.f32.partialorder %v3069_v54, 8.507059e+37 }
 0x7e0   : > { %v3022_v5 = vadd.f32 %v3005_v26, %v865_v45  ;;  %v6891_v45 = vld [vmem:[%s10972_s2 + $0x70] sm:$0xff] }
 0x7e2   : > { %v6445_v46 = vpop.eup %6444  ;;  %v5966_v0 = vmul.f32 -1.442695, %v3022_v5 }
 0x7e3   : > { %v6447_v49 = vpop.eup %6446  ;;  %v3053_v50 = vadd.f32 1.0, %v6445_v46  ;;  %v6892_v46 = vld [vmem:[%s10972_s2 + $0x68] sm:$0xff] }
 0x7e4   : > { %v3061_v3 = vmul.f32 %v6447_v49, %v3052_v41  ;;  %6448 = vpow2.f32 %v5966_v0  ;;  %vm3066_vm8 = vweird.f32 %v6447_v49 }
 0x7e5   : > { %6450 = vrcp.f32 %v3053_v50  ;;  %vm3067_vm10 = vmor %vm3065_vm9, %vm3066_vm8  ;;  %v3086_v6 = vand.u32 2147483648, %v3053_v50  ;;  %v3084_v39 = vand.u32 2147483647, %v3053_v50  ;;  %vm3080_vm13 = vweird.f32 %v3053_v50 }
 0x7e6   : > { %v3062_v9 = vsub.f32 1.0, %v3061_v3  ;;  %v2911_v56 = vpop.f32.mrf.mxu2  ;;  %v6893_v3 = vld [vmem:[%s10972_s2 + $0x60] sm:$0xff] }
 0x7e7   : > { %v3006_v35 = vsel %vm11101_vm4, %v2911_v56, %v2899_v17  ;;  %v3087_v41 = vor.u32 1.1754944e-38, %v3086_v6  ;;  %vm3085_vm4 = vcmp.eq.f32.partialorder %v3084_v39, 8.507059e+37  ;;  %v6894_v56 = vld [vmem:[%s10972_s2 + $0x58] sm:$0xff] }
 0x7e8   : > { %v3063_v48 = vmul.f32 %v6447_v49, %v3062_v9  ;;  %v3023_v21 = vadd.f32 %v3006_v35, %v866_v43 }
 0x7ea   : > { %v6449_v52 = vpop.eup %6448  ;;  %v5967_v10 = vmul.f32 -1.442695, %v3023_v21  ;;  %v3064_v30 = vadd.f32 %v6447_v49, %v3063_v48  ;;  %v6895_v21 = vld [vmem:[%s10972_s2 + $0x50] sm:$0xff] }
 0x7eb   : > { %v6451_v44 = vpop.eup %6450  ;;  %v3054_v55 = vadd.f32 1.0, %v6449_v52 }
 0x7ec   : > { %6452 = vpow2.f32 %v5967_v10  ;;  %v3068_v4 = vsel %vm3067_vm10, %v6447_v49, %v3064_v30  ;;  %v3076_v40 = vmul.f32 %v6451_v44, %v3053_v50  ;;  %vm3081_vm12 = vweird.f32 %v6451_v44  ;;  %v6896_v30 = vld [vmem:[%s10972_s2 + $0x48] sm:$0xff] }
 0x7ed   : > { %6454 = vrcp.f32 %v3054_v55  ;;  %v3073_v33 = vsel %vm3070_vm11, %v3072_v42, %v3068_v4  ;;  %vm3082_vm14 = vmor %vm3080_vm13, %vm3081_vm12  ;;  %v3101_v50 = vand.u32 2147483648, %v3054_v55  ;;  %v3099_v43 = vand.u32 2147483647, %v3054_v55 }
 0x7ee   : > { %v9425_v17 = vpop.f32.mrf.mxu2  ;;  %v3357_v34 = vmul.f32 %v3073_v33, %v9165_v13  ;;  %v3077_v8 = vsub.f32 1.0, %v3076_v40  ;;  %vm3095_vm9 = vweird.f32 %v3054_v55  ;;  %v6897_v40 = vld [vmem:[%s10972_s2 + $0x40] sm:$0xff] }
 0x7ef   : > { %v3102_v48 = vor.u32 1.1754944e-38, %v3101_v50  ;;  %vm3100_vm11 = vcmp.eq.f32.partialorder %v3099_v43, 8.507059e+37 }
 0x7f0   : > { %3381 = vmatmul.f32.vlgmr.msrb.gmra.mxu3 %v3357_v34  ;;  %v3078_v32 = vmul.f32 %v6451_v44, %v3077_v8  ;;  %v6898_v8 = vld [vmem:[%s10972_s2 + $0x38] sm:$0xff] }
 0x7f1   : > { %4078 = vmatpush.msrb.mxu3 %v6890_v29  ;;  %v6899_v29 = vld [vmem:[%s10972_s2 + $0x30] sm:$0xff] }
 0x7f2   : > { %v6453_v58 = vpop.eup %6452  ;;  %v3079_v16 = vadd.f32 %v6451_v44, %v3078_v32  ;;  %v737_v32 = vrot.slane %v7771_v36, 5 }
 0x7f3   : > { %v6455_v7 = vpop.eup %6454  ;;  %v3055_v22 = vadd.f32 1.0, %v6453_v58  ;;  %4079 = vmatpush.msrb.mxu3 %v6891_v45 }
 0x7f4   : > { %v3083_v62 = vsel %vm3082_vm14, %v6451_v44, %v3079_v16  ;;  %v3091_v26 = vmul.f32 %v6455_v7, %v3054_v55  ;;  %vm3096_vm8 = vweird.f32 %v6455_v7  ;;  %v776_v45 = vperm.slane %v737_v32, 0 }
 0x7f5   : > { %6456 = vrcp.f32 %v3055_v22  ;;  %v3088_v5 = vsel %vm3085_vm4, %v3087_v41, %v3083_v62  ;;  %4080 = vmatpush.msrb.mxu3 %v6892_v46  ;;  %vm3097_vm10 = vmor %vm3095_vm9, %vm3096_vm8  ;;  %v3116_v4 = vand.u32 2147483648, %v3055_v22  ;;  %v3114_v34 = vand.u32 2147483647, %v3055_v22  ;;  %v6901_v62 = vld [vmem:[%s10972_s2 + $0x20] sm:$0xff]  ;;  %v6903_v46 = vld [vmem:[%s10972_s2 + $0x10] sm:$0xff] }
 0x7f6   : > { %v9437_v0 = vpop.f32.mrf.mxu2  ;;  %v3358_v12 = vmul.f32 %v3088_v5, %v9191_v24  ;;  %v3092_v49 = vsub.f32 1.0, %v3091_v26  ;;  %vm3110_vm13 = vweird.f32 %v3055_v22  ;;  %v6902_v26 = vld [vmem:[%s10972_s2 + $0x18] sm:$0xff]  ;;  %v815_v5 = vmul.f32 %v9384_v37, %v776_v45  ;;  %v6905_v37 = vld [vmem:[%s10972_s2] sm:$0xff] }
 0x7f7   : > { %4081 = vmatpush.msrb.mxu3 %v6893_v3  ;;  %v3117_v39 = vor.u32 1.1754944e-38, %v3116_v4  ;;  %vm3115_vm4 = vcmp.eq.f32.partialorder %v3114_v34, 8.507059e+37  ;;  %v818_v4 = vmul.f32 %v9417_v60, %v776_v45  ;;  %vm11102_vm8 = vcmp.gt.f32.partialorder %v8296_v57, 0.5 }
 0x7f8   : > { %3384 = vmatmul.f32.gmra.mxu3 %v3358_v12  ;;  %v3093_v9 = vmul.f32 %v6455_v7, %v3092_v49  ;;  %v6904_v12 = vld [vmem:[%s10972_s2 + $0x8] sm:$0xff]  ;;  %v867_v49 = vadd.f32 %v9387_v38, %v815_v5 }
 0x7f9   : > { %4082 = vmatpush.msrb.mxu3 %v6894_v56  ;;  %v816_v56 = vmul.f32 %v9395_v61, %v776_v45 }
 0x7fa   : > { %v3094_v35 = vadd.f32 %v6455_v7, %v3093_v9 }
 0x7fb   : > { %v6457_v51 = vpop.eup %6456  ;;  %4083 = vmatpush.msrb.mxu3 %v6895_v21 }
 0x7fc   : > { %v3098_v54 = vsel %vm3097_vm10, %v6455_v7, %v3094_v35  ;;  %v3106_v52 = vmul.f32 %v6457_v51, %v3055_v22  ;;  %vm3111_vm12 = vweird.f32 %v6457_v51  ;;  %v6900_v7 = vld [vmem:[%s10972_s2 + $0x28] sm:$0xff]  ;;  %v868_v35 = vadd.f32 %v9398_v47, %v816_v56 }
 0x7fd   : > { %v3103_v10 = vsel %vm3100_vm11, %v3102_v48, %v3098_v54  ;;  %4084 = vmatpush.msrb.mxu3 %v6896_v30  ;;  %vm3112_vm14 = vmor %vm3110_vm13, %vm3111_vm12  ;;  %v817_v54 = vmul.f32 %v9406_v28, %v776_v45  ;;  %v870_v28 = vadd.f32 %v9420_v20, %v818_v4 }
 0x7fe   : > { %v2920_v44 = vpop.f32.mrf.mxu2  ;;  %v3359_v55 = vmul.f32 %v3103_v10, %v9217_v31  ;;  %v3107_v42 = vsub.f32 1.0, %v3106_v52 }
 0x7ff   : > { %4085 = vmatpush.msrb.mxu3 %v6897_v40  ;;  %v869_v10 = vadd.f32 %v9409_v2, %v817_v54 }
 0x800   : > { %3387 = vmatmul.f32.gmra.mxu3 %v3359_v55  ;;  %v3108_v33 = vmul.f32 %v6457_v51, %v3107_v42 }
 0x801   : > { %4086 = vmatpush.msrb.mxu3 %v6898_v8 }
 0x802   : > { %v3109_v6 = vadd.f32 %v6457_v51, %v3108_v33 }
 0x803   : > { %4087 = vmatpush.msrb.mxu3 %v6899_v29 }
 0x804   : > { %v3113_v58 = vsel %vm3112_vm14, %v6457_v51, %v3109_v6 }
 0x805   : > { %v3118_v16 = vsel %vm3115_vm4, %v3117_v39, %v3113_v58  ;;  %4088 = vmatpush.msrb.mxu3 %v6900_v7 }
 0x806   : > { %v2923_v41 = vpop.f32.mrf.mxu2  ;;  %v3360_v22 = vmul.f32 %v3118_v16, %v9243_v19 }
 0x807   : > { %4089 = vmatpush.msrb.mxu3 %v6901_v62 }
 0x808   : > { %3390 = vmatmul.f32.gmra.mxu3 %v3360_v22 }
 0x809   : > { %4090 = vmatpush.msrb.mxu3 %v6902_v26 }
 0x80b   : > { %4091 = vmatpush.msrb.mxu3 %v6903_v46 }
 0x80d   : > { %4092 = vmatpush.msrb.mxu3 %v6904_v12 }
 0x80e   : > { %v2926_v50 = vpop.f32.mrf.mxu2 }
 0x80f   : > { %v3007_v3 = vsel %vm632_vm1, %v2926_v50, %v9425_v17  ;;  %4093 = vmatpush.msrb.mxu3 %v6905_v37 }
 0x810   : > { %v3024_v9 = vadd.f32 %v3007_v3, %v867_v49 }
 0x812   : > { %v5968_v43 = vmul.f32 -1.442695, %v3024_v9 }
 0x814   : > { %6458 = vpow2.f32 %v5968_v43 }
 0x816   : > { %v2929_v51 = vpop.f32.mrf.mxu2 }
 0x817   : > { %v3008_v38 = vsel %vm633_vm2, %v2929_v51, %v9437_v0 }
 0x818   : > { %v3025_v48 = vadd.f32 %v3008_v38, %v868_v35 }
 0x81a   : > { %v6459_v21 = vpop.eup %6458  ;;  %v5969_v17 = vmul.f32 -1.442695, %v3025_v48 }
 0x81b   : > { %v3056_v52 = vadd.f32 1.0, %v6459_v21 }
 0x81c   : > { %6460 = vpow2.f32 %v5969_v17 }
 0x81d   : > { %6462 = vrcp.f32 %v3056_v52  ;;  %v3131_v6 = vand.u32 2147483648, %v3056_v52  ;;  %v3129_v39 = vand.u32 2147483647, %v3056_v52  ;;  %vm3125_vm10 = vweird.f32 %v3056_v52 }
 0x81e   : > { %v2932_v30 = vpop.f32.mrf.mxu2 }
 0x81f   : > { %v3009_v61 = vsel %vm634_vm3, %v2932_v30, %v2920_v44  ;;  %v3132_v22 = vor.u32 1.1754944e-38, %v3131_v6  ;;  %vm3130_vm12 = vcmp.eq.f32.partialorder %v3129_v39, 8.507059e+37 }
 0x820   : > { %v3026_v47 = vadd.f32 %v3009_v61, %v869_v10 }
 0x822   : > { %v6461_v55 = vpop.eup %6460  ;;  %v5970_v42 = vmul.f32 -1.442695, %v3026_v47 }
 0x823   : > { %v6463_v0 = vpop.eup %6462  ;;  %v3057_v40 = vadd.f32 1.0, %v6461_v55 }
 0x824   : > { %6464 = vpow2.f32 %v5970_v42  ;;  %v3121_v33 = vmul.f32 %v6463_v0, %v3056_v52  ;;  %vm3126_vm9 = vweird.f32 %v6463_v0 }
 0x825   : > { %6466 = vrcp.f32 %v3057_v40  ;;  %vm3127_vm11 = vmor %vm3125_vm10, %vm3126_vm9  ;;  %v3146_v5 = vand.u32 2147483648, %v3057_v40  ;;  %v3144_v12 = vand.u32 2147483647, %v3057_v40  ;;  %vm3140_vm14 = vweird.f32 %v3057_v40 }
 0x826   : > { %v2935_v34 = vpop.f32.mrf.mxu2  ;;  %v3122_v8 = vsub.f32 1.0, %v3121_v33 }
 0x827   : > { %v3010_v2 = vsel %vm11102_vm8, %v2935_v34, %v2923_v41  ;;  %v3147_v9 = vor.u32 1.1754944e-38, %v3146_v5  ;;  %vm3145_vm8 = vcmp.eq.f32.partialorder %v3144_v12, 8.507059e+37  ;;  %v6910_v5 = vld [vmem:[#allocation5 + $0xc8] sm:$0xff]  ;;  %v6912_v12 = vld [vmem:[#allocation5 + $0xb8] sm:$0xff] }
 0x828   : > { %v3027_v32 = vadd.f32 %v3010_v2, %v870_v28  ;;  %v3123_v44 = vmul.f32 %v6463_v0, %v3122_v8 }
 0x82a   : > { %v6465_v29 = vpop.eup %6464  ;;  %v5971_v58 = vmul.f32 -1.442695, %v3027_v32  ;;  %v3124_v60 = vadd.f32 %v6463_v0, %v3123_v44 }
 0x82b   : > { %v6467_v16 = vpop.eup %6466  ;;  %v3058_v7 = vadd.f32 1.0, %v6465_v29 }
 0x82c   : > { %6468 = vpow2.f32 %v5971_v58  ;;  %v3128_v20 = vsel %vm3127_vm11, %v6463_v0, %v3124_v60  ;;  %v3136_v45 = vmul.f32 %v6467_v16, %v3057_v40  ;;  %vm3141_vm13 = vweird.f32 %v6467_v16 }
 0x82d   : > { %6470 = vrcp.f32 %v3058_v7  ;;  %v3133_v62 = vsel %vm3130_vm12, %v3132_v22, %v3128_v20  ;;  %vm3142_vm4 = vmor %vm3140_vm14, %vm3141_vm13  ;;  %v3161_v48 = vand.u32 2147483648, %v3058_v7  ;;  %v3159_v17 = vand.u32 2147483647, %v3058_v7  ;;  %v6906_v20 = vld [vmem:[%s10974_s4] sm:$0xff] }
 0x82e   : > { %v3361_v41 = vmul.f32 %v3133_v62, %v9266_v23  ;;  %v3137_v26 = vsub.f32 1.0, %v3136_v45  ;;  %vm3155_vm10 = vweird.f32 %v3058_v7  ;;  %v6907_v62 = vld [vmem:[#allocation5 + $0xf8] sm:$0xff] }
 0x82f   : > { %v3162_v10 = vor.u32 1.1754944e-38, %v3161_v48  ;;  %vm3160_vm12 = vcmp.eq.f32.partialorder %v3159_v17, 8.507059e+37  ;;  %v6921_v48 = vld [vmem:[%s10974_s4 + $0x18] sm:$0xff]  ;;  %v6923_v17 = vld [vmem:[#allocation5 + $0x28] sm:$0xff] }
 0x830   : > { %3393 = vmatmul.f32.gmra.mxu3 %v3361_v41  ;;  %v3138_v46 = vmul.f32 %v6467_v16, %v3137_v26  ;;  %v6908_v41 = vld [vmem:[#allocation5 + $0xe8] sm:$0xff]  ;;  %v6909_v26 = vld [vmem:[#allocation5 + $0xd8] sm:$0xff] }
 0x832   : > { %v6469_v49 = vpop.eup %6468  ;;  %v3139_v50 = vadd.f32 %v6467_v16, %v3138_v46  ;;  %v6911_v46 = vld [vmem:[%s10974_s4 + $0x8] sm:$0xff] }
 0x833   : > { %v6471_v3 = vpop.eup %6470  ;;  %v3059_v37 = vadd.f32 1.0, %v6469_v49 }
 0x834   : > { %v3143_v43 = vsel %vm3142_vm4, %v6467_v16, %v3139_v50  ;;  %v3151_v56 = vmul.f32 %v6471_v3, %v3058_v7  ;;  %vm3156_vm9 = vweird.f32 %v6471_v3  ;;  %v9504_v16 = vpop.f32.mrf.mxu0  ;;  %v6913_v50 = vld [vmem:[#allocation5 + $0xa8] sm:$0xff] }
 0x835   : > { %6472 = vrcp.f32 %v3059_v37  ;;  %v3148_v35 = vsel %vm3145_vm8, %v3147_v9, %v3143_v43  ;;  %vm3157_vm11 = vmor %vm3155_vm10, %vm3156_vm9  ;;  %v3176_v4 = vand.u32 2147483648, %v3059_v37  ;;  %v3174_v40 = vand.u32 2147483647, %v3059_v37  ;;  %v6916_v9 = vld [vmem:[%s10974_s4 + $0x10] sm:$0xff]  ;;  %v6917_v43 = vld [vmem:[#allocation5 + $0x78] sm:$0xff] }
 0x836   : > { %v3362_v51 = vmul.f32 %v3148_v35, %v9279_v25  ;;  %v3152_v38 = vsub.f32 1.0, %v3151_v56  ;;  %vm3170_vm14 = vweird.f32 %v3059_v37  ;;  %v6918_v56 = vld [vmem:[#allocation5 + $0x68] sm:$0xff] }
 0x837   : > { %v3177_v28 = vor.u32 1.1754944e-38, %v3176_v4  ;;  %vm3175_vm8 = vcmp.eq.f32.partialorder %v3174_v40, 8.507059e+37  ;;  %v6929_v4 = vld [vmem:[%s10974_s4 + $0x38] sm:$0xff] }
 0x838   : > { %3396 = vmatmul.f32.gmra.mxu3 %v3362_v51  ;;  %v3153_v21 = vmul.f32 %v6471_v3, %v3152_v38  ;;  %v6919_v51 = vld [vmem:[#allocation5 + $0x58] sm:$0xff]  ;;  %v6920_v38 = vld [vmem:[#allocation5 + $0x48] sm:$0xff] }
 0x83a   : > { %v3154_v54 = vadd.f32 %v6471_v3, %v3153_v21  ;;  %v6922_v21 = vld [vmem:[#allocation5 + $0x38] sm:$0xff] }
 0x83b   : > { %v6473_v52 = vpop.eup %6472 }
 0x83c   : > { %v3158_v30 = vsel %vm3157_vm11, %v6471_v3, %v3154_v54  ;;  %v3166_v61 = vmul.f32 %v6473_v52, %v3059_v37  ;;  %vm3171_vm13 = vweird.f32 %v6473_v52  ;;  %v9506_v22 = vpop.f32.mrf.mxu0  ;;  %v6914_v3 = vld [vmem:[#allocation5 + $0x98] sm:$0xff]  ;;  %v6915_v37 = vld [vmem:[#allocation5 + $0x88] sm:$0xff] }
 0x83d   : > { %v3163_v47 = vsel %vm3160_vm12, %v3162_v10, %v3158_v30  ;;  %vm3172_vm4 = vmor %vm3170_vm14, %vm3171_vm13  ;;  %v6924_v54 = vld [vmem:[#allocation5 + $0x18] sm:$0xff]  ;;  %v6925_v10 = vld [vmem:[#allocation5 + $0x8] sm:$0xff] }
 0x83e   : > { %v3363_v55 = vmul.f32 %v3163_v47, %v9291_v53  ;;  %v3167_v42 = vsub.f32 1.0, %v3166_v61  ;;  %v6926_v30 = vld [vmem:[%s10974_s4 + $0x20] sm:$0xff]  ;;  %v6927_v61 = vld [vmem:[%s10974_s4 + $0x28] sm:$0xff] }
 0x840   : > { %3399 = vmatmul.f32.gmra.mxu3 %v3363_v55  ;;  %v3168_v0 = vmul.f32 %v6473_v52, %v3167_v42  ;;  %v6928_v55 = vld [vmem:[%s10974_s4 + $0x30] sm:$0xff] }
 0x842   : > { %v3169_v33 = vadd.f32 %v6473_v52, %v3168_v0 }
 0x844   : > { %v3173_v34 = vsel %vm3172_vm4, %v6473_v52, %v3169_v33  ;;  %v9512_v45 = vpop.f32.mrf.mxu0 }
 0x845   : > { %v3178_v8 = vsel %vm3175_vm8, %v3177_v28, %v3173_v34  ;;  %v11103_v28 = vld [vmem:[#allocation30_spill] sm:$0xff] }
 0x846   : > { %v3364_v2 = vmul.f32 %v3178_v8, %v9296_v1 }
 0x848   : > { %3402 = vmatmul.f32.gmra.mxu3 %v3364_v2 }
 0x84c   : > { %v2964_v49 = vpop.f32.mrf.mxu0 }
 0x854   : > { %v2967_v35 = vpop.f32.mrf.mxu0 }
 0x855   : > { %v3180_v33 = vsel %vm648_vm15, %v2967_v35, %v9504_v16  ;;  %v11105_v16 = vld [vmem:[#allocation32_spill] sm:$0xff] }
 0x856   : > { %v3197_v34 = vadd.f32 %v3180_v33, %v11103_v28 }
 0x858   : > { %v5972_v2 = vmul.f32 -1.442695, %v3197_v34 }
 0x85a   : > { %6474 = vpow2.f32 %v5972_v2  ;;  %v11109_v2 = vld [vmem:[#allocation65_spill] sm:$0xff] }
 0x85c   : > { %v2970_v52 = vpop.f32.mrf.mxu0 }
 0x864   : > { %v2973_v47 = vpop.f32.mrf.mxu0 }
 0x86c   : > { %v2976_v42 = vpop.f32.mrf.mxu0 }
 0x873   : > { %v3382_v6 = vpop.f32.mrf.mxu3 }
 0x874   : > { %v2979_v0 = vpop.f32.mrf.mxu0 }
 0x87b   : > { %v3385_v32 = vpop.f32.mrf.mxu3 }
 0x87c   : > { %v2982_v40 = vpop.f32.mrf.mxu0 }
 0x883   : > { %v3388_v44 = vpop.f32.mrf.mxu3 }
 0x884   : > { %v2985_v8 = vpop.f32.mrf.mxu0 }
 0x88b   : > { %v3391_v39 = vpop.f32.mrf.mxu3 }
 0x8b3   : > { %v3394_v29 = vpop.f32.mrf.mxu3 }
 0x8bb   : > { %v3397_v58 = vpop.f32.mrf.mxu3 }
 0x8c3   : > { %v3400_v60 = vpop.f32.mrf.mxu3 }
 0x8cb   : > { %v3403_v7 = vpop.f32.mrf.mxu3 }
 0x8cc   : > { %3414 = vmatpush.msrb.mxu1 %v3403_v7 }
 0x8ce   : > { %3415 = vmatpush.msrb.mxu1 %v3400_v60  ;;  %v6475_v60 = vpop.eup %6474 }
 0x8d0   : > { %3416 = vmatpush.msrb.mxu1 %v3397_v58  ;;  %v3182_v58 = vsel %vm650_vm6, %v2973_v47, %v9512_v45 }
 0x8d1   : > { %v3199_v7 = vadd.f32 %v3182_v58, %v11105_v16  ;;  %v11110_v16 = vld [vmem:[#allocation36_spill] sm:$0xff] }
 0x8d2   : > { %3417 = vmatpush.msrb.mxu1 %v3394_v29 }
 0x8d4   : > { %3418 = vmatpush.msrb.mxu1 %v3391_v39  ;;  %v9550_v39 = vpop.f32.mrf.mxu0 }
 0x8d6   : > { %3419 = vmatpush.msrb.mxu1 %v3388_v44 }
 0x8d8   : > { %3420 = vmatpush.msrb.mxu1 %v3385_v32  ;;  %v11104_v32 = vld [vmem:[#allocation31_spill] sm:$0xff] }
 0x8da   : > { %3421 = vmatpush.msrb.mxu1 %v3382_v6  ;;  %v3181_v6 = vsel %vm649_vm5, %v2970_v52, %v9506_v22  ;;  %v3183_v22 = vsel %vm651_vm7, %v2976_v42, %v2964_v49 }
 0x8db   : > { %5980 = vmatmul.msk.f32.vlgmr.msrb.gmra.mxu1 %vm1377_vm0, %v6906_v20  ;;  %v3198_v44 = vadd.f32 %v3181_v6, %v11104_v32  ;;  %v3229_v20 = vadd.f32 1.0, %v6475_v60 }
 0x8dc   : > { %3545 = vmatpush.msra.mxu1 %v6907_v62  ;;  %v5974_v62 = vmul.f32 -1.442695, %v3199_v7 }
 0x8dd   : > { %v5973_v29 = vmul.f32 -1.442695, %v3198_v44  ;;  %vm3242_vm10 = vweird.f32 %v3229_v20 }
 0x8de   : > { %3546 = vmatpush.msra.mxu1 %v6908_v41  ;;  %v2991_v41 = vpop.f32.mrf.mxu0 }
 0x8df   : > { %6476 = vpow2.f32 %v5973_v29  ;;  %v3184_v45 = vsel %vm648_vm15, %v2991_v41, %v2979_v0  ;;  %v3248_v0 = vand.u32 2147483648, %v3229_v20 }
 0x8e0   : > { %3547 = vmatpush.msra.mxu1 %v6909_v26  ;;  %6478 = vrcp.f32 %v3229_v20 }
 0x8e1   : > { %6480 = vpow2.f32 %v5974_v62  ;;  %v3249_v60 = vor.u32 1.1754944e-38, %v3248_v0  ;;  %v6930_v0 = vld [vmem:[#allocation5 + $0xf0] sm:$0xff] }
 0x8e2   : > { %3548 = vmatpush.msra.mxu1 %v6910_v5  ;;  %v11106_v5 = vld [vmem:[#allocation33_spill] sm:$0xff] }
 0x8e3   : > { %5981 = vmatmul.msk.f32.gmra.mxu1 %vm1377_vm0, %v6911_v46  ;;  %v3200_v46 = vadd.f32 %v3183_v22, %v11106_v5 }
 0x8e4   : > { %3549 = vmatpush.msra.mxu1 %v6912_v12 }
 0x8e5   : > { %v6477_v26 = vpop.eup %6476 }
 0x8e6   : > { %3550 = vmatpush.msra.mxu1 %v6913_v50  ;;  %v9559_v12 = vadd.f32 1.0, %v6477_v26  ;;  %v6479_v50 = vpop.eup %6478 }
 0x8e7   : > { %vm3243_vm9 = vweird.f32 %v6479_v50 }
 0x8e8   : > { %3551 = vmatpush.msra.mxu1 %v6914_v3  ;;  %v5975_v3 = vmul.f32 -1.442695, %v3200_v46  ;;  %6482 = vrcp.f32 %v9559_v12  ;;  %vm3244_vm11 = vmor %vm3242_vm10, %vm3243_vm9  ;;  %v3263_v5 = vand.u32 2147483648, %v9559_v12  ;;  %vm3257_vm14 = vweird.f32 %v9559_v12 }
 0x8ea   : > { %3552 = vmatpush.msra.mxu1 %v6915_v37  ;;  %v6481_v37 = vpop.eup %6480  ;;  %6484 = vpow2.f32 %v5975_v3  ;;  %v3261_v3 = vand.u32 2147483647, %v9559_v12 }
 0x8eb   : > { %5982 = vmatmul.msk.f32.gmra.mxu1 %vm1377_vm0, %v6916_v9  ;;  %v3238_v9 = vmul.f32 %v6479_v50, %v3229_v20  ;;  %v9565_v49 = vadd.f32 1.0, %v6481_v37 }
 0x8ec   : > { %3553 = vmatpush.msra.mxu1 %v6917_v43  ;;  %v2994_v43 = vpop.f32.mrf.mxu0  ;;  %vm3262_vm8 = vcmp.eq.f32.partialorder %v3261_v3, 8.507059e+37 }
 0x8ed   : > { %6486 = vrcp.f32 %v9565_v49  ;;  %vm3272_vm10 = vweird.f32 %v9565_v49 }
 0x8ee   : > { %3554 = vmatpush.msra.mxu1 %v6918_v56  ;;  %v11107_v56 = vld [vmem:[#allocation34_spill] sm:$0xff] }
 0x8ef   : > { %v3201_v35 = vadd.f32 %v3184_v45, %v11107_v56  ;;  %v11111_v56 = vld [vmem:[#allocation66_spill] sm:$0xff] }
 0x8f0   : > { %3555 = vmatpush.msra.mxu1 %v6919_v51  ;;  %v3239_v51 = vsub.f32 1.0, %v3238_v9 }
 0x8f2   : > { %3556 = vmatpush.msra.mxu1 %v6920_v38  ;;  %v9567_v38 = vpop.eup %6482 }
 0x8f3   : > { %5983 = vmatmul.msk.f32.gmra.mxu1 %vm1377_vm0, %v6921_v48  ;;  %v5976_v48 = vmul.f32 -1.442695, %v3201_v35  ;;  %v3253_v52 = vmul.f32 %v9567_v38, %v9559_v12  ;;  %vm3258_vm13 = vweird.f32 %v9567_v38 }
 0x8f4   : > { %3557 = vmatpush.msra.mxu1 %v6922_v21  ;;  %v3185_v21 = vsel %vm649_vm5, %v2994_v43, %v2982_v40  ;;  %v3246_v40 = vand.u32 2147483647, %v3229_v20  ;;  %vm3259_vm4 = vmor %vm3257_vm14, %vm3258_vm13 }
 0x8f5   : > { %6488 = vpow2.f32 %v5976_v48 }
 0x8f6   : > { %3558 = vmatpush.msra.mxu1 %v6923_v17  ;;  %v6485_v17 = vpop.eup %6484  ;;  %vm3247_vm12 = vcmp.eq.f32.partialorder %v3246_v40, 8.507059e+37 }
 0x8f7   : > { %v9575_v47 = vadd.f32 1.0, %v6485_v17 }
 0x8f8   : > { %3559 = vmatpush.msra.mxu1 %v6924_v54  ;;  %v3240_v54 = vmul.f32 %v6479_v50, %v3239_v51 }
 0x8f9   : > { %6490 = vrcp.f32 %v9575_v47  ;;  %vm3287_vm14 = vweird.f32 %v9575_v47 }
 0x8fa   : > { %3560 = vmatpush.msra.mxu1 %v6925_v10  ;;  %v11108_v10 = vld [vmem:[#allocation35_spill] sm:$0xff]  ;;  %v3241_v42 = vadd.f32 %v6479_v50, %v3240_v54  ;;  %v3264_v54 = vor.u32 1.1754944e-38, %v3263_v5 }
 0x8fb   : > { %5984 = vmatmul.msk.f32.gmra.mxu1 %vm1377_vm0, %v6926_v30  ;;  %v3202_v30 = vadd.f32 %v3185_v21, %v11108_v10 }
 0x8fc   : > { %v3245_v58 = vsel %vm3244_vm11, %v6479_v50, %v3241_v42  ;;  %v3278_v42 = vand.u32 2147483648, %v9565_v49 }
 0x8fd   : > { %v5977_v33 = vmul.f32 -1.442695, %v3202_v30  ;;  %v3250_v62 = vsel %vm3247_vm12, %v3249_v60, %v3245_v58  ;;  %v6931_v58 = vld [vmem:[#allocation5 + $0xe0] sm:$0xff] }
 0x8fe   : > { %v3480_v50 = vsub.f32 1.0, %v3250_v62  ;;  %v3472_v43 = vmul.f32 %v3250_v62, %v9165_v13 }
 0x903   : > { %5985 = vmatmul.msk.f32.gmra.mxu1 %vm1377_vm0, %v6927_v61  ;;  %v2997_v61 = vpop.f32.mrf.mxu0 }
 0x904   : > { %v3186_v34 = vsel %vm650_vm6, %v2997_v61, %v2985_v8 }
 0x905   : > { %v3203_v7 = vadd.f32 %v3186_v34, %v11110_v16 }
 0x907   : > { %v5978_v46 = vmul.f32 -1.442695, %v3203_v7 }
 0x90b   : > { %5986 = vmatmul.msk.f32.gmra.mxu1 %vm1377_vm0, %v6928_v55  ;;  %v3254_v55 = vsub.f32 1.0, %v3253_v52  ;;  %v3000_v41 = vpop.f32.mrf.mxu0  ;;  %v11112_v52 = vld [vmem:[#allocation37_spill] sm:$0xff] }
 0x90c   : > { %v3187_v9 = vsel %vm651_vm7, %v3000_v41, %v9550_v39  ;;  %v6932_v41 = vld [vmem:[#allocation5 + $0xd0] sm:$0xff] }
 0x90d   : > { %v3255_v44 = vmul.f32 %v9567_v38, %v3254_v55  ;;  %v3204_v10 = vadd.f32 %v3187_v9, %v11112_v52 }
 0x90f   : > { %v3256_v22 = vadd.f32 %v9567_v38, %v3255_v44 }
 0x911   : > { %v3260_v17 = vsel %vm3259_vm4, %v9567_v38, %v3256_v22 }
 0x912   : > { %v3265_v30 = vsel %vm3262_vm8, %v3264_v54, %v3260_v17  ;;  %v6935_v17 = vld [vmem:[#allocation5 + $0xa0] sm:$0xff] }
 0x913   : > { %5987 = vmatmul.msk.f32.gmra.mxu1 %vm1377_vm0, %v6929_v4  ;;  %v9577_v4 = vpop.eup %6486  ;;  %v3481_v40 = vsub.f32 1.0, %v3265_v30 }
 0x914   : > { %v6489_v32 = vpop.eup %6488  ;;  %v3268_v29 = vmul.f32 %v9577_v4, %v9565_v49  ;;  %vm3273_vm9 = vweird.f32 %v9577_v4 }
 0x915   : > { %v9587_v20 = vadd.f32 1.0, %v6489_v32  ;;  %v9591_v26 = vpop.eup %6490  ;;  %vm9621_vm11 = vmor %vm3272_vm10, %vm3273_vm9  ;;  %v11115_v32 = vld [vmem:[#allocation67_spill] sm:$0xff] }
 0x916   : > { %v3269_v8 = vsub.f32 1.0, %v3268_v29  ;;  %v3283_v21 = vmul.f32 %v9591_v26, %v9575_v47  ;;  %v3473_v29 = vmul.f32 %v3265_v30, %v9191_v24  ;;  %vm3288_vm13 = vweird.f32 %v9591_v26 }
 0x917   : > { %vm9647_vm4 = vmor %vm3287_vm14, %vm3288_vm13  ;;  %vm3302_vm10 = vweird.f32 %v9587_v20 }
 0x918   : > { %v3270_v48 = vmul.f32 %v9577_v4, %v3269_v8  ;;  %v3284_v61 = vsub.f32 1.0, %v3283_v21  ;;  %v3279_v8 = vor.u32 1.1754944e-38, %v3278_v42 }
 0x91a   : > { %v3271_v55 = vadd.f32 %v9577_v4, %v3270_v48  ;;  %v3285_v16 = vmul.f32 %v9591_v26, %v3284_v61  ;;  %v11118_v48 = vld [vmem:[#allocation68_spill] sm:$0xff] }
 0x91c   : > { %v3275_v62 = vsel %vm9621_vm11, %v9577_v4, %v3271_v55  ;;  %v3286_v4 = vadd.f32 %v9591_v26, %v3285_v16  ;;  %v6936_v55 = vld [vmem:[#allocation5 + $0x90] sm:$0xff] }
 0x91e   : > { %v3290_v30 = vsel %vm9647_vm4, %v9591_v26, %v3286_v4  ;;  %v6941_v4 = vld [vmem:[#allocation5 + $0x40] sm:$0xff] }
 0x958   : > { %v3423_v28 = vpop.f32.mrf.mxu1 }
 0x959   : > { %v3456_v6 = vadd.f32 %v3423_v28, %v11109_v2  ;;  %v3276_v28 = vand.u32 2147483647, %v9565_v49 }
 0x95b   : > { %6492 = vtanh.f32 %v3456_v6  ;;  %vm3277_vm12 = vcmp.eq.f32.partialorder %v3276_v28, 8.507059e+37 }
 0x95c   : > { %6494 = vpow2.f32 %v5977_v33  ;;  %v5979_v33 = vmul.f32 -1.442695, %v3204_v10  ;;  %v3280_v5 = vsel %vm3277_vm12, %v3279_v8, %v3275_v62 }
 0x95d   : > { %6496 = vrcp.f32 %v9587_v20  ;;  %v3482_v9 = vsub.f32 1.0, %v3280_v5 }
 0x960   : > { %v3426_v45 = vpop.f32.mrf.mxu1 }
 0x961   : > { %v6493_v37 = vpop.eup %6492  ;;  %v3457_v35 = vadd.f32 %v3426_v45, %v11111_v56  ;;  %v3293_v45 = vand.u32 2147483648, %v9575_v47 }
 0x962   : > { %v6495_v51 = vpop.eup %6494  ;;  %v3488_v12 = vmul.f32 %v6493_v37, %v3480_v50  ;;  %v6934_v37 = vld [vmem:[#allocation5 + $0xb0] sm:$0xff] }
 0x963   : > { %6498 = vtanh.f32 %v3457_v35  ;;  %v9609_v13 = vadd.f32 1.0, %v6495_v51  ;;  %v9615_v38 = vpop.eup %6496  ;;  %v3294_v61 = vor.u32 1.1754944e-38, %v3293_v45 }
 0x964   : > { %6500 = vpow2.f32 %v5978_v46  ;;  %v9607_v39 = vadd.f32 %v3488_v12, %v3472_v43  ;;  %v3298_v49 = vmul.f32 %v9615_v38, %v9587_v20  ;;  %v6933_v46 = vld [vmem:[#allocation5 + $0xc0] sm:$0xff]  ;;  %v3291_v43 = vand.u32 2147483647, %v9575_v47 }
 0x965   : > { %6502 = vrcp.f32 %v9609_v13  ;;  %v3474_v12 = vmul.f32 %v3280_v5, %v9217_v31  ;;  %vm3303_vm9 = vweird.f32 %v9615_v38  ;;  %vm3317_vm14 = vweird.f32 %v9609_v13 }
 0x966   : > { %3520 = vmatmul.f32.vlgmr.msra.gmra.mxu3 %v9607_v39  ;;  %3561 = vmatmul.f32.vlgmr.msra.gmra.mxu1 %v9607_v39  ;;  %v3299_v50 = vsub.f32 1.0, %v3298_v49  ;;  %vm3292_vm8 = vcmp.eq.f32.partialorder %v3291_v43, 8.507059e+37  ;;  %vm9673_vm11 = vmor %vm3302_vm10, %vm3303_vm9  ;;  %v6942_v43 = vld [vmem:[#allocation5 + $0x30] sm:$0xff] }
 0x967   : > { %4217 = vmatpush.msra.mxu3 %v6930_v0  ;;  %v3295_v0 = vsel %vm3292_vm8, %v3294_v61, %v3290_v30 }
 0x968   : > { %v3429_v34 = vpop.f32.mrf.mxu1  ;;  %v3300_v52 = vmul.f32 %v9615_v38, %v3299_v50  ;;  %v3483_v6 = vsub.f32 1.0, %v3295_v0  ;;  %v3475_v49 = vmul.f32 %v3295_v0, %v9243_v19 }
 0x969   : > { %v6499_v2 = vpop.eup %6498  ;;  %v3458_v44 = vadd.f32 %v3429_v34, %v11115_v32  ;;  %4218 = vmatpush.msra.mxu3 %v6931_v58  ;;  %v3308_v34 = vand.u32 2147483648, %v9587_v20  ;;  %v3306_v32 = vand.u32 2147483647, %v9587_v20 }
 0x96a   : > { %v6501_v60 = vpop.eup %6500  ;;  %v3489_v7 = vmul.f32 %v6499_v2, %v3481_v40  ;;  %v3301_v28 = vadd.f32 %v9615_v38, %v3300_v52  ;;  %v6938_v2 = vld [vmem:[#allocation5 + $0x70] sm:$0xff]  ;;  %v6943_v52 = vld [vmem:[#allocation5 + $0x20] sm:$0xff] }
 0x96b   : > { %6504 = vtanh.f32 %v3458_v44  ;;  %4219 = vmatpush.msra.mxu3 %v6932_v41  ;;  %v9635_v22 = vadd.f32 1.0, %v6501_v60  ;;  %v9641_v3 = vpop.eup %6502  ;;  %v11121_v60 = vld [vmem:[#allocation69_spill] sm:$0xff]  ;;  %v3309_v5 = vor.u32 1.1754944e-38, %v3308_v34  ;;  %vm3307_vm12 = vcmp.eq.f32.partialorder %v3306_v32, 8.507059e+37 }
 0x96c   : > { %6506 = vpow2.f32 %v5979_v33  ;;  %v9633_v24 = vadd.f32 %v3489_v7, %v3473_v29  ;;  %v3313_v47 = vmul.f32 %v9641_v3, %v9609_v13  ;;  %v6937_v33 = vld [vmem:[#allocation5 + $0x80] sm:$0xff]  ;;  %v3305_v41 = vsel %vm9673_vm11, %v9615_v38, %v3301_v28 }
 0x96d   : > { %4220 = vmatpush.msra.mxu3 %v6933_v46  ;;  %6508 = vrcp.f32 %v9635_v22  ;;  %v6939_v7 = vld [vmem:[#allocation5 + $0x60] sm:$0xff]  ;;  %v6940_v46 = vld [vmem:[#allocation5 + $0x50] sm:$0xff]  ;;  %v3310_v19 = vsel %vm3307_vm12, %v3309_v5, %v3305_v41  ;;  %vm3318_vm13 = vweird.f32 %v9641_v3  ;;  %vm3332_vm10 = vweird.f32 %v9635_v22 }
 0x96e   : > { %3523 = vmatmul.f32.gmra.mxu3 %v9633_v24  ;;  %3564 = vmatmul.f32.gmra.mxu1 %v9633_v24  ;;  %v3314_v40 = vsub.f32 1.0, %v3313_v47  ;;  %vm9696_vm4 = vmor %vm3317_vm14, %vm3318_vm13 }
 0x96f   : > { %4221 = vmatpush.msra.mxu3 %v6934_v37 }
 0x970   : > { %v3432_v56 = vpop.f32.mrf.mxu1  ;;  %v3315_v62 = vmul.f32 %v9641_v3, %v3314_v40 }
 0x971   : > { %v6505_v35 = vpop.eup %6504  ;;  %v3459_v21 = vadd.f32 %v3432_v56, %v11118_v48  ;;  %4222 = vmatpush.msra.mxu3 %v6935_v17  ;;  %v3484_v56 = vsub.f32 1.0, %v3310_v19 }
 0x972   : > { %v6507_v54 = vpop.eup %6506  ;;  %v3490_v10 = vmul.f32 %v6505_v35, %v3482_v9  ;;  %v3316_v37 = vadd.f32 %v9641_v3, %v3315_v62  ;;  %v3323_v9 = vand.u32 2147483648, %v9609_v13  ;;  %v3321_v35 = vand.u32 2147483647, %v9609_v13 }
 0x973   : > { %6510 = vtanh.f32 %v3459_v21  ;;  %4223 = vmatpush.msra.mxu3 %v6936_v55  ;;  %v9661_v31 = vadd.f32 1.0, %v6507_v54  ;;  %v9667_v26 = vpop.eup %6508  ;;  %v3476_v54 = vmul.f32 %v3310_v19, %v9266_v23  ;;  %v6944_v55 = vld [vmem:[#allocation5 + $0x10] sm:$0xff] }
 0x974   : > { %v9659_v42 = vadd.f32 %v3490_v10, %v3474_v12  ;;  %v3328_v8 = vmul.f32 %v9667_v26, %v9635_v22  ;;  %v11124_v12 = vld [vmem:[#allocation70_spill] sm:$0xff]  ;;  %v3320_v13 = vsel %vm9696_vm4, %v9641_v3, %v3316_v37  ;;  %v3324_v61 = vor.u32 1.1754944e-38, %v3323_v9 }
 0x975   : > { %4224 = vmatpush.msra.mxu3 %v6937_v33  ;;  %6512 = vrcp.f32 %v9661_v31  ;;  %vm3322_vm8 = vcmp.eq.f32.partialorder %v3321_v35, 8.507059e+37  ;;  %v6945_v33 = vld [vmem:[#allocation5] sm:$0xff]  ;;  %vm3333_vm9 = vweird.f32 %v9667_v26  ;;  %v3338_v3 = vand.u32 2147483648, %v9635_v22 }
 0x976   : > { %3526 = vmatmul.f32.gmra.mxu3 %v9659_v42  ;;  %3567 = vmatmul.f32.gmra.mxu1 %v9659_v42  ;;  %v3329_v45 = vsub.f32 1.0, %v3328_v8  ;;  %v3325_v23 = vsel %vm3322_vm8, %v3324_v61, %v3320_v13  ;;  %vm3334_vm11 = vmor %vm3332_vm10, %vm3333_vm9  ;;  %vm3347_vm14 = vweird.f32 %v9661_v31  ;;  %vm11127_vm9 = vcmp.gt.f32.partialorder %v8296_v57, 0.5 }
 0x977   : > { %4225 = vmatpush.msra.mxu3 %v6938_v2  ;;  %v3485_v34 = vsub.f32 1.0, %v3325_v23  ;;  %v3336_v2 = vand.u32 2147483647, %v9635_v22 }
 0x978   : > { %v3435_v44 = vpop.f32.mrf.mxu1  ;;  %v3330_v47 = vmul.f32 %v9667_v26, %v3329_v45 }
 0x979   : > { %v6511_v29 = vpop.eup %6510  ;;  %v3460_v16 = vadd.f32 %v3435_v44, %v11121_v60  ;;  %4226 = vmatpush.msra.mxu3 %v6939_v7  ;;  %v11125_v44 = vld [vmem:[#allocation71_spill] sm:$0xff]  ;;  %v3339_v7 = vor.u32 1.1754944e-38, %v3338_v3  ;;  %vm3337_vm12 = vcmp.eq.f32.partialorder %v3336_v2, 8.507059e+37  ;;  %v6947_v3 = vld [vmem:[%s10973_s3 + $0x8] sm:$0xff]  ;;  %v6949_v2 = vld [vmem:[%s10973_s3 + $0x18] sm:$0xff] }
 0x97a   : > { %v3491_v20 = vmul.f32 %v6511_v29, %v3483_v6  ;;  %v3331_v28 = vadd.f32 %v9667_v26, %v3330_v47 }
 0x97b   : > { %6514 = vtanh.f32 %v3460_v16  ;;  %4227 = vmatpush.msra.mxu3 %v6940_v46  ;;  %v9691_v38 = vpop.eup %6512  ;;  %v11126_v46 = vld [vmem:[#allocation72_spill] sm:$0xff] }
 0x97c   : > { %v9685_v50 = vadd.f32 %v3491_v20, %v3475_v49  ;;  %v3343_v10 = vmul.f32 %v9691_v38, %v9661_v31  ;;  %v3335_v16 = vsel %vm3334_vm11, %v9667_v26, %v3331_v28  ;;  %v3477_v49 = vmul.f32 %v3325_v23, %v9279_v25  ;;  %v6946_v28 = vld [vmem:[%s10973_s3] sm:$0xff] }
 0x97d   : > { %4228 = vmatpush.msra.mxu3 %v6941_v4  ;;  %v3340_v8 = vsel %vm3337_vm12, %v3339_v7, %v3335_v16  ;;  %vm3348_vm13 = vweird.f32 %v9691_v38  ;;  %v3353_v20 = vand.u32 2147483648, %v9661_v31  ;;  %v3351_v25 = vand.u32 2147483647, %v9661_v31  ;;  %v6956_v16 = vld [vmem:[%s10973_s3 + $0x50] sm:$0xff]  ;;  %v6958_v7 = vld [vmem:[%s10973_s3 + $0x60] sm:$0xff] }
 0x97e   : > { %3529 = vmatmul.f32.gmra.mxu3 %v9685_v50  ;;  %3570 = vmatmul.f32.gmra.mxu1 %v9685_v50  ;;  %v3344_v40 = vsub.f32 1.0, %v3343_v10  ;;  %v3486_v41 = vsub.f32 1.0, %v3340_v8  ;;  %vm3349_vm4 = vmor %vm3347_vm14, %vm3348_vm13  ;;  %v3478_v37 = vmul.f32 %v3340_v8, %v9291_v53  ;;  %v6959_v8 = vld [vmem:[%s10973_s3 + $0x68] sm:$0xff] }
 0x97f   : > { %4229 = vmatpush.msra.mxu3 %v6942_v43  ;;  %v3354_v9 = vor.u32 1.1754944e-38, %v3353_v20  ;;  %vm3352_vm8 = vcmp.eq.f32.partialorder %v3351_v25, 8.507059e+37  ;;  %v6961_v20 = vld [vmem:[%s10973_s3 + $0x78] sm:$0xff] }
 0x980   : > { %v3438_v51 = vpop.f32.mrf.mxu1  ;;  %v3345_v58 = vmul.f32 %v9691_v38, %v3344_v40 }
 0x981   : > { %v6515_v48 = vpop.eup %6514  ;;  %v3461_v17 = vadd.f32 %v3438_v51, %v11124_v12  ;;  %4230 = vmatpush.msra.mxu3 %v6943_v52 }
 0x982   : > { %v3492_v30 = vmul.f32 %v6515_v48, %v3484_v56  ;;  %v3346_v22 = vadd.f32 %v9691_v38, %v3345_v58  ;;  %v6954_v58 = vld [vmem:[%s10973_s3 + $0x40] sm:$0xff] }
 0x983   : > { %6516 = vtanh.f32 %v3461_v17  ;;  %4231 = vmatpush.msra.mxu3 %v6944_v55 }
 0x984   : > { %v9708_v0 = vadd.f32 %v3492_v30, %v3476_v54  ;;  %v3350_v45 = vsel %vm3349_vm4, %v9691_v38, %v3346_v22  ;;  %v6960_v22 = vld [vmem:[%s10973_s3 + $0x70] sm:$0xff] }
 0x985   : > { %4232 = vmatpush.msra.mxu3 %v6945_v33  ;;  %v3355_v56 = vsel %vm3352_vm8, %v3354_v9, %v3350_v45 }
 0x986   : > { %3532 = vmatmul.f32.gmra.mxu3 %v9708_v0  ;;  %3573 = vmatmul.f32.gmra.mxu1 %v9708_v0  ;;  %v3487_v31 = vsub.f32 1.0, %v3355_v56  ;;  %v3479_v48 = vmul.f32 %v3355_v56, %v9296_v1 }
 0x988   : > { %v3441_v6 = vpop.f32.mrf.mxu1 }
 0x989   : > { %v6517_v32 = vpop.eup %6516  ;;  %v3462_v29 = vadd.f32 %v3441_v6, %v11125_v44  ;;  %v6950_v6 = vld [vmem:[%s10973_s3 + $0x20] sm:$0xff]  ;;  %v6952_v44 = vld [vmem:[%s10973_s3 + $0x30] sm:$0xff] }
 0x98a   : > { %v3493_v60 = vmul.f32 %v6517_v32, %v3485_v34  ;;  %v6948_v34 = vld [vmem:[%s10973_s3 + $0x10] sm:$0xff]  ;;  %v6951_v32 = vld [vmem:[%s10973_s3 + $0x28] sm:$0xff] }
 0x98b   : > { %6518 = vtanh.f32 %v3462_v29  ;;  %v6953_v29 = vld [vmem:[%s10973_s3 + $0x38] sm:$0xff] }
 0x98c   : > { %v9721_v62 = vadd.f32 %v3493_v60, %v3477_v49  ;;  %v6955_v60 = vld [vmem:[%s10973_s3 + $0x48] sm:$0xff]  ;;  %v6957_v49 = vld [vmem:[%s10973_s3 + $0x58] sm:$0xff] }
 0x98e   : > { %3535 = vmatmul.f32.gmra.mxu3 %v9721_v62  ;;  %3576 = vmatmul.f32.gmra.mxu1 %v9721_v62 }
 0x990   : > { %v3444_v26 = vpop.f32.mrf.mxu1 }
 0x991   : > { %v6519_v5 = vpop.eup %6518  ;;  %v3463_v19 = vadd.f32 %v3444_v26, %v11126_v46 }
 0x992   : > { %v3494_v4 = vmul.f32 %v6519_v5, %v3486_v41  ;;  %v738_v5 = vrot.slane %v7771_v36, 6 }
 0x993   : > { %6520 = vtanh.f32 %v3463_v19 }
 0x994   : > { %v9733_v43 = vadd.f32 %v3494_v4, %v3478_v37  ;;  %v777_v19 = vperm.slane %v738_v5, 0  ;;  %v9826_v4 = vld [vmem:[%s10975_s5] sm:$0xff] }
 0x995   : > { %v9829_v37 = vld [vmem:[#allocation11] sm:$0xff] }
 0x996   : > { %3538 = vmatmul.f32.gmra.mxu3 %v9733_v43  ;;  %3579 = vmatmul.f32.gmra.mxu1 %v9733_v43  ;;  %v819_v45 = vmul.f32 %v9826_v4, %v777_v19 }
 0x998   : > { %v871_v9 = vadd.f32 %v9829_v37, %v819_v45 }
 0x999   : > { %v6521_v35 = vpop.eup %6520 }
 0x99a   : > { %v3495_v51 = vmul.f32 %v6521_v35, %v3487_v31 }
 0x99c   : > { %v9738_v21 = vadd.f32 %v3495_v51, %v3479_v48  ;;  %v9837_v48 = vld [vmem:[%s10975_s5 + $0x8] sm:$0xff] }
 0x99e   : > { %3541 = vmatmul.f32.gmra.mxu3 %v9738_v21  ;;  %3582 = vmatmul.f32.gmra.mxu1 %v9738_v21 }
 0x9e3   : > { %v3562_v53 = vpop.f32.mrf.mxu1 }
 0x9e9   : > { %v3521_v38 = vpop.f32.mrf.mxu3 }
 0x9eb   : > { %v3565_v12 = vpop.f32.mrf.mxu1 }
 0x9f1   : > { %v3524_v17 = vpop.f32.mrf.mxu3 }
 0x9f3   : > { %v3568_v54 = vpop.f32.mrf.mxu1 }
 0x9f9   : > { %v3527_v52 = vpop.f32.mrf.mxu3 }
 0x9fb   : > { %v3571_v47 = vpop.f32.mrf.mxu1 }
 0xa01   : > { %v3530_v10 = vpop.f32.mrf.mxu3 }
 0xa03   : > { %v3574_v30 = vpop.f32.mrf.mxu1 }
 0xa09   : > { %v3533_v13 = vpop.f32.mrf.mxu3 }
 0xa0b   : > { %v3577_v61 = vpop.f32.mrf.mxu1 }
 0xa11   : > { %v3536_v55 = vpop.f32.mrf.mxu3 }
 0xa13   : > { %v3580_v23 = vpop.f32.mrf.mxu1 }
 0xa19   : > { %v3539_v1 = vpop.f32.mrf.mxu3 }
 0xa1b   : > { %v3583_v33 = vpop.f32.mrf.mxu1 }
 0xa1c   : > { %3659 = vmatpush.msrb.mxu0 %v3583_v33 }
 0xa1e   : > { %3660 = vmatpush.msrb.mxu0 %v3580_v23 }
 0xa20   : > { %3661 = vmatpush.msrb.mxu0 %v3577_v61 }
 0xa21   : > { %v3542_v40 = vpop.f32.mrf.mxu3 }
 0xa22   : > { %3594 = vmatpush.msra.mxu2 %v3542_v40  ;;  %3662 = vmatpush.msrb.mxu0 %v3574_v30  ;;  %v9848_v30 = vld [vmem:[%s10975_s5 + $0x10] sm:$0xff] }
 0xa24   : > { %3595 = vmatpush.msra.mxu2 %v3539_v1  ;;  %3663 = vmatpush.msrb.mxu0 %v3571_v47 }
 0xa26   : > { %3596 = vmatpush.msra.mxu2 %v3536_v55  ;;  %3664 = vmatpush.msrb.mxu0 %v3568_v54  ;;  %v9851_v55 = vld [vmem:[#allocation11 + $0x10] sm:$0xff] }
 0xa28   : > { %3597 = vmatpush.msra.mxu2 %v3533_v13  ;;  %3665 = vmatpush.msrb.mxu0 %v3565_v12  ;;  %v821_v13 = vmul.f32 %v9848_v30, %v777_v19 }
 0xa2a   : > { %3598 = vmatpush.msra.mxu2 %v3530_v10  ;;  %3666 = vmatpush.msrb.mxu0 %v3562_v53  ;;  %v820_v53 = vmul.f32 %v9837_v48, %v777_v19  ;;  %v873_v23 = vadd.f32 %v9851_v55, %v821_v13 }
 0xa2b   : > { %6004 = vmatmul.msk.f32.vlgmr.msrb.gmra.mxu0 %vm1377_vm0, %v6946_v28 }
 0xa2c   : > { %3599 = vmatpush.msra.mxu2 %v3527_v52 }
 0xa2e   : > { %3600 = vmatpush.msra.mxu2 %v3524_v17 }
 0xa30   : > { %3601 = vmatpush.msra.mxu2 %v3521_v38  ;;  %v9840_v38 = vld [vmem:[#allocation11 + $0x8] sm:$0xff] }
 0xa31   : > { %5988 = vmatmul.msk.f32.vlgmr.msra.gmra.mxu2 %vm1377_vm0, %v6946_v28  ;;  %v872_v12 = vadd.f32 %v9840_v38, %v820_v53 }
 0xa33   : > { %6005 = vmatmul.msk.f32.gmra.mxu0 %vm1377_vm0, %v6947_v3 }
 0xa39   : > { %5989 = vmatmul.msk.f32.gmra.mxu2 %vm1377_vm0, %v6947_v3 }
 0xa3b   : > { %6006 = vmatmul.msk.f32.gmra.mxu0 %vm1377_vm0, %v6948_v34 }
 0xa41   : > { %5990 = vmatmul.msk.f32.gmra.mxu2 %vm1377_vm0, %v6948_v34  ;;  %v9859_v34 = vld [vmem:[%s10975_s5 + $0x18] sm:$0xff] }
 0xa43   : > { %6007 = vmatmul.msk.f32.gmra.mxu0 %vm1377_vm0, %v6949_v2 }
 0xa49   : > { %5991 = vmatmul.msk.f32.gmra.mxu2 %vm1377_vm0, %v6949_v2  ;;  %v822_v2 = vmul.f32 %v9859_v34, %v777_v19 }
 0xa4b   : > { %6008 = vmatmul.msk.f32.gmra.mxu0 %vm1377_vm0, %v6950_v6 }
 0xa51   : > { %5992 = vmatmul.msk.f32.gmra.mxu2 %vm1377_vm0, %v6950_v6 }
 0xa53   : > { %6009 = vmatmul.msk.f32.gmra.mxu0 %vm1377_vm0, %v6951_v32 }
 0xa59   : > { %5993 = vmatmul.msk.f32.gmra.mxu2 %vm1377_vm0, %v6951_v32 }
 0xa5b   : > { %6010 = vmatmul.msk.f32.gmra.mxu0 %vm1377_vm0, %v6952_v44 }
 0xa61   : > { %5994 = vmatmul.msk.f32.gmra.mxu2 %vm1377_vm0, %v6952_v44 }
 0xa63   : > { %6011 = vmatmul.msk.f32.gmra.mxu0 %vm1377_vm0, %v6953_v29 }
 0xa69   : > { %5995 = vmatmul.msk.f32.gmra.mxu2 %vm1377_vm0, %v6953_v29 }
 0xa6b   : > { %6012 = vmatmul.msk.f32.gmra.mxu0 %vm1377_vm0, %v6954_v58 }
 0xa71   : > { %5996 = vmatmul.msk.f32.gmra.mxu2 %vm1377_vm0, %v6954_v58  ;;  %v9862_v58 = vld [vmem:[#allocation11 + $0x18] sm:$0xff] }
 0xa73   : > { %6013 = vmatmul.msk.f32.gmra.mxu0 %vm1377_vm0, %v6955_v60 }
 0xa79   : > { %5997 = vmatmul.msk.f32.gmra.mxu2 %vm1377_vm0, %v6955_v60  ;;  %v874_v60 = vadd.f32 %v9862_v58, %v822_v2 }
 0xa7b   : > { %6014 = vmatmul.msk.f32.gmra.mxu0 %vm1377_vm0, %v6956_v16 }
 0xa81   : > { %5998 = vmatmul.msk.f32.gmra.mxu2 %vm1377_vm0, %v6956_v16 }
 0xa83   : > { %6015 = vmatmul.msk.f32.gmra.mxu0 %vm1377_vm0, %v6957_v49 }
 0xa89   : > { %5999 = vmatmul.msk.f32.gmra.mxu2 %vm1377_vm0, %v6957_v49 }
 0xa8b   : > { %6016 = vmatmul.msk.f32.gmra.mxu0 %vm1377_vm0, %v6958_v7 }
 0xa91   : > { %6000 = vmatmul.msk.f32.gmra.mxu2 %vm1377_vm0, %v6958_v7 }
 0xa93   : > { %6017 = vmatmul.msk.f32.gmra.mxu0 %vm1377_vm0, %v6959_v8 }
 0xa99   : > { %6001 = vmatmul.msk.f32.gmra.mxu2 %vm1377_vm0, %v6959_v8 }
 0xa9b   : > { %6018 = vmatmul.msk.f32.gmra.mxu0 %vm1377_vm0, %v6960_v22 }
 0xaa1   : > { %6002 = vmatmul.msk.f32.gmra.mxu2 %vm1377_vm0, %v6960_v22 }
 0xaa3   : > { %6019 = vmatmul.msk.f32.gmra.mxu0 %vm1377_vm0, %v6961_v20 }
 0xaa9   : > { %6003 = vmatmul.msk.f32.gmra.mxu2 %vm1377_vm0, %v6961_v20 }
 0xab4   : > { %v3603_v41 = vpop.f32.mrf.mxu2 }
 0xabc   : > { %v3606_v25 = vpop.f32.mrf.mxu2 }
 0xac4   : > { %v3609_v26 = vpop.f32.mrf.mxu2 }
 0xacc   : > { %v3612_v46 = vpop.f32.mrf.mxu2 }
 0xad4   : > { %v3615_v56 = vpop.f32.mrf.mxu2 }
 0xad5   : > { %v3716_v31 = vsel %vm632_vm1, %v3615_v56, %v3603_v41 }
 0xad6   : > { %v3733_v35 = vadd.f32 %v3716_v31, %v871_v9 }
 0xad8   : > { %v6020_v51 = vmul.f32 -1.442695, %v3733_v35 }
 0xada   : > { %6522 = vpow2.f32 %v6020_v51 }
 0xadc   : > { %v3618_v17 = vpop.f32.mrf.mxu2 }
 0xadd   : > { %v3717_v54 = vsel %vm633_vm2, %v3618_v17, %v3606_v25 }
 0xade   : > { %v3734_v52 = vadd.f32 %v3717_v54, %v872_v12  ;;  %v6970_v54 = vld [vmem:[%s10972_s2 + $0x78] sm:$0xff] }
 0xae0   : > { %v6523_v47 = vpop.eup %6522  ;;  %v6021_v10 = vmul.f32 -1.442695, %v3734_v52 }
 0xae1   : > { %v3765_v61 = vadd.f32 1.0, %v6523_v47 }
 0xae2   : > { %6524 = vpow2.f32 %v6021_v10 }
 0xae3   : > { %6526 = vrcp.f32 %v3765_v61  ;;  %v3784_v7 = vand.u32 2147483648, %v3765_v61  ;;  %v3782_v20 = vand.u32 2147483647, %v3765_v61  ;;  %vm3778_vm11 = vweird.f32 %v3765_v61 }
 0xae4   : > { %v3621_v1 = vpop.f32.mrf.mxu2 }
 0xae5   : > { %v3718_v33 = vsel %vm634_vm3, %v3621_v1, %v3609_v26  ;;  %v3785_v45 = vor.u32 1.1754944e-38, %v3784_v7  ;;  %vm3783_vm13 = vcmp.eq.f32.partialorder %v3782_v20, 8.507059e+37 }
 0xae6   : > { %v3735_v40 = vadd.f32 %v3718_v33, %v873_v23  ;;  %v6971_v23 = vld [vmem:[%s10972_s2 + $0x70] sm:$0xff] }
 0xae8   : > { %v6525_v28 = vpop.eup %6524  ;;  %v6022_v3 = vmul.f32 -1.442695, %v3735_v40 }
 0xae9   : > { %v6527_v6 = vpop.eup %6526  ;;  %v3766_v32 = vadd.f32 1.0, %v6525_v28  ;;  %v6972_v28 = vld [vmem:[%s10972_s2 + $0x68] sm:$0xff] }
 0xaea   : > { %v3774_v44 = vmul.f32 %v6527_v6, %v3765_v61  ;;  %6528 = vpow2.f32 %v6022_v3  ;;  %vm3779_vm10 = vweird.f32 %v6527_v6 }
 0xaeb   : > { %6530 = vrcp.f32 %v3766_v32  ;;  %vm3780_vm12 = vmor %vm3778_vm11, %vm3779_vm10  ;;  %v3799_v53 = vand.u32 2147483648, %v3766_v32  ;;  %v3797_v17 = vand.u32 2147483647, %v3766_v32  ;;  %vm3793_vm4 = vweird.f32 %v3766_v32 }
 0xaec   : > { %v3775_v29 = vsub.f32 1.0, %v3774_v44  ;;  %v3624_v16 = vpop.f32.mrf.mxu2  ;;  %v6973_v44 = vld [vmem:[%s10972_s2 + $0x60] sm:$0xff] }
 0xaed   : > { %v3719_v49 = vsel %vm11127_vm9, %v3624_v16, %v3612_v46  ;;  %v3800_v61 = vor.u32 1.1754944e-38, %v3799_v53  ;;  %vm3798_vm9 = vcmp.eq.f32.partialorder %v3797_v17, 8.507059e+37  ;;  %v6974_v16 = vld [vmem:[%s10972_s2 + $0x58] sm:$0xff] }
 0xaee   : > { %v3776_v8 = vmul.f32 %v6527_v6, %v3775_v29  ;;  %v3736_v22 = vadd.f32 %v3719_v49, %v874_v60 }
 0xaf0   : > { %v6529_v41 = vpop.eup %6528  ;;  %v6023_v25 = vmul.f32 -1.442695, %v3736_v22  ;;  %v3777_v26 = vadd.f32 %v6527_v6, %v3776_v8  ;;  %v6975_v22 = vld [vmem:[%s10972_s2 + $0x50] sm:$0xff] }
 0xaf1   : > { %v6531_v5 = vpop.eup %6530  ;;  %v3767_v19 = vadd.f32 1.0, %v6529_v41 }
 0xaf2   : > { %6532 = vpow2.f32 %v6023_v25  ;;  %v3781_v9 = vsel %vm3780_vm12, %v6527_v6, %v3777_v26  ;;  %v3789_v56 = vmul.f32 %v6531_v5, %v3766_v32  ;;  %vm3794_vm14 = vweird.f32 %v6531_v5  ;;  %v6976_v26 = vld [vmem:[%s10972_s2 + $0x48] sm:$0xff] }
 0xaf3   : > { %6534 = vrcp.f32 %v3767_v19  ;;  %v3786_v31 = vsel %vm3783_vm13, %v3785_v45, %v3781_v9  ;;  %vm3795_vm8 = vmor %vm3793_vm4, %vm3794_vm14  ;;  %v3814_v32 = vand.u32 2147483648, %v3767_v19  ;;  %v3812_v60 = vand.u32 2147483647, %v3767_v19 }
 0xaf4   : > { %v9867_v46 = vpop.f32.mrf.mxu2  ;;  %v4070_v35 = vmul.f32 %v3786_v31, %v9607_v39  ;;  %v3790_v51 = vsub.f32 1.0, %v3789_v56  ;;  %vm3808_vm11 = vweird.f32 %v3767_v19  ;;  %v6977_v56 = vld [vmem:[%s10972_s2 + $0x40] sm:$0xff] }
 0xaf5   : > { %v3815_v8 = vor.u32 1.1754944e-38, %v3814_v32  ;;  %vm3813_vm13 = vcmp.eq.f32.partialorder %v3812_v60, 8.507059e+37 }
 0xaf6   : > { %4094 = vmatmul.f32.vlgmr.msrb.gmra.mxu3 %v4070_v35  ;;  %v3791_v12 = vmul.f32 %v6531_v5, %v3790_v51  ;;  %v6978_v51 = vld [vmem:[%s10972_s2 + $0x38] sm:$0xff] }
 0xaf7   : > { %4791 = vmatpush.msrb.mxu3 %v6970_v54  ;;  %v6979_v54 = vld [vmem:[%s10972_s2 + $0x30] sm:$0xff] }
 0xaf8   : > { %v6533_v52 = vpop.eup %6532  ;;  %v3792_v47 = vadd.f32 %v6531_v5, %v3791_v12  ;;  %v739_v12 = vrot.slane %v7771_v36, 7  ;;  %v6981_v36 = vld [vmem:[%s10972_s2 + $0x20] sm:$0xff] }
 0xaf9   : > { %v6535_v10 = vpop.eup %6534  ;;  %v3768_v13 = vadd.f32 1.0, %v6533_v52  ;;  %4792 = vmatpush.msrb.mxu3 %v6971_v23 }
 0xafa   : > { %v3796_v1 = vsel %vm3795_vm8, %v6531_v5, %v3792_v47  ;;  %v3804_v33 = vmul.f32 %v6535_v10, %v3767_v19  ;;  %vm3809_vm10 = vweird.f32 %v6535_v10  ;;  %v778_v23 = vperm.slane %v739_v12, 0 }
 0xafb   : > { %6536 = vrcp.f32 %v3768_v13  ;;  %v3801_v40 = vsel %vm3798_vm9, %v3800_v61, %v3796_v1  ;;  %4793 = vmatpush.msrb.mxu3 %v6972_v28  ;;  %vm3810_vm12 = vmor %vm3808_vm11, %vm3809_vm10  ;;  %v3829_v9 = vand.u32 2147483648, %v3768_v13  ;;  %v3827_v35 = vand.u32 2147483647, %v3768_v13  ;;  %v6982_v1 = vld [vmem:[%s10972_s2 + $0x18] sm:$0xff]  ;;  %v6984_v28 = vld [vmem:[%s10972_s2 + $0x8] sm:$0xff] }
 0xafc   : > { %v9879_v3 = vpop.f32.mrf.mxu2  ;;  %v4071_v2 = vmul.f32 %v3801_v40, %v9633_v24  ;;  %v3805_v6 = vsub.f32 1.0, %v3804_v33  ;;  %vm3823_vm4 = vweird.f32 %v3768_v13  ;;  %v823_v33 = vmul.f32 %v9826_v4, %v778_v23  ;;  %v6983_v40 = vld [vmem:[%s10972_s2 + $0x10] sm:$0xff]  ;;  %v6985_v4 = vld [vmem:[%s10972_s2] sm:$0xff] }
 0xafd   : > { %4794 = vmatpush.msrb.mxu3 %v6973_v44  ;;  %v3830_v17 = vor.u32 1.1754944e-38, %v3829_v9  ;;  %vm3828_vm9 = vcmp.eq.f32.partialorder %v3827_v35, 8.507059e+37  ;;  %v824_v60 = vmul.f32 %v9837_v48, %v778_v23  ;;  %vm11128_vm10 = vcmp.gt.f32.partialorder %v8296_v57, 0.5 }
 0xafe   : > { %4097 = vmatmul.f32.gmra.mxu3 %v4071_v2  ;;  %v3806_v29 = vmul.f32 %v6535_v10, %v3805_v6  ;;  %v875_v2 = vadd.f32 %v9829_v37, %v823_v33 }
 0xaff   : > { %4795 = vmatpush.msrb.mxu3 %v6974_v16  ;;  %v876_v16 = vadd.f32 %v9840_v38, %v824_v60 }
 0xb00   : > { %v3807_v49 = vadd.f32 %v6535_v10, %v3806_v29 }
 0xb01   : > { %v6537_v7 = vpop.eup %6536  ;;  %4796 = vmatpush.msrb.mxu3 %v6975_v22  ;;  %v825_v22 = vmul.f32 %v9848_v30, %v778_v23 }
 0xb02   : > { %v3811_v20 = vsel %vm3810_vm12, %v6535_v10, %v3807_v49  ;;  %v3819_v41 = vmul.f32 %v6537_v7, %v3768_v13  ;;  %vm3824_vm14 = vweird.f32 %v6537_v7  ;;  %v6980_v10 = vld [vmem:[%s10972_s2 + $0x28] sm:$0xff] }
 0xb03   : > { %v3816_v25 = vsel %vm3813_vm13, %v3815_v8, %v3811_v20  ;;  %4797 = vmatpush.msrb.mxu3 %v6976_v26  ;;  %vm3825_vm8 = vmor %vm3823_vm4, %vm3824_vm14 }
 0xb04   : > { %v3633_v5 = vpop.f32.mrf.mxu2  ;;  %v4072_v19 = vmul.f32 %v3816_v25, %v9659_v42  ;;  %v3820_v45 = vsub.f32 1.0, %v3819_v41  ;;  %v877_v41 = vadd.f32 %v9851_v55, %v825_v22 }
 0xb05   : > { %4798 = vmatpush.msrb.mxu3 %v6977_v56 }
 0xb06   : > { %4100 = vmatmul.f32.gmra.mxu3 %v4072_v19  ;;  %v3821_v31 = vmul.f32 %v6537_v7, %v3820_v45  ;;  %v826_v45 = vmul.f32 %v9859_v34, %v778_v23 }
 0xb07   : > { %4799 = vmatpush.msrb.mxu3 %v6978_v51 }
 0xb08   : > { %v3822_v53 = vadd.f32 %v6537_v7, %v3821_v31  ;;  %v878_v30 = vadd.f32 %v9862_v58, %v826_v45 }
 0xb09   : > { %4800 = vmatpush.msrb.mxu3 %v6979_v54 }
 0xb0a   : > { %v3826_v52 = vsel %vm3825_vm8, %v6537_v7, %v3822_v53 }
 0xb0b   : > { %v3831_v47 = vsel %vm3828_vm9, %v3830_v17, %v3826_v52  ;;  %4801 = vmatpush.msrb.mxu3 %v6980_v10 }
 0xb0c   : > { %v3636_v61 = vpop.f32.mrf.mxu2  ;;  %v4073_v13 = vmul.f32 %v3831_v47, %v9685_v50 }
 0xb0d   : > { %4802 = vmatpush.msrb.mxu3 %v6981_v36 }
 0xb0e   : > { %4103 = vmatmul.f32.gmra.mxu3 %v4073_v13 }
 0xb0f   : > { %4803 = vmatpush.msrb.mxu3 %v6982_v1 }
 0xb11   : > { %4804 = vmatpush.msrb.mxu3 %v6983_v40 }
 0xb13   : > { %4805 = vmatpush.msrb.mxu3 %v6984_v28 }
 0xb14   : > { %v3639_v6 = vpop.f32.mrf.mxu2 }
 0xb15   : > { %v3720_v32 = vsel %vm632_vm1, %v3639_v6, %v9867_v46  ;;  %4806 = vmatpush.msrb.mxu3 %v6985_v4 }
 0xb16   : > { %v3737_v44 = vadd.f32 %v3720_v32, %v875_v2 }
 0xb18   : > { %v6024_v29 = vmul.f32 -1.442695, %v3737_v44 }
 0xb1a   : > { %6538 = vpow2.f32 %v6024_v29 }
 0xb1c   : > { %v3642_v49 = vpop.f32.mrf.mxu2 }
 0xb1d   : > { %v3721_v37 = vsel %vm633_vm2, %v3642_v49, %v9879_v3 }
 0xb1e   : > { %v3738_v7 = vadd.f32 %v3721_v37, %v876_v16 }
 0xb20   : > { %v6539_v8 = vpop.eup %6538  ;;  %v6025_v46 = vmul.f32 -1.442695, %v3738_v7 }
 0xb21   : > { %v3769_v20 = vadd.f32 1.0, %v6539_v8 }
 0xb22   : > { %6540 = vpow2.f32 %v6025_v46 }
 0xb23   : > { %6542 = vrcp.f32 %v3769_v20  ;;  %v3844_v51 = vand.u32 2147483648, %v3769_v20  ;;  %v3842_v12 = vand.u32 2147483647, %v3769_v20  ;;  %vm3838_vm12 = vweird.f32 %v3769_v20 }
 0xb24   : > { %v3645_v25 = vpop.f32.mrf.mxu2 }
 0xb25   : > { %v3722_v48 = vsel %vm634_vm3, %v3645_v25, %v3633_v5  ;;  %v3845_v10 = vor.u32 1.1754944e-38, %v3844_v51  ;;  %vm3843_vm14 = vcmp.eq.f32.partialorder %v3842_v12, 8.507059e+37 }
 0xb26   : > { %v3739_v38 = vadd.f32 %v3722_v48, %v877_v41 }
 0xb28   : > { %v6541_v26 = vpop.eup %6540  ;;  %v6026_v19 = vmul.f32 -1.442695, %v3739_v38 }
 0xb29   : > { %v6543_v3 = vpop.eup %6542  ;;  %v3770_v9 = vadd.f32 1.0, %v6541_v26 }
 0xb2a   : > { %6544 = vpow2.f32 %v6026_v19  ;;  %v3834_v56 = vmul.f32 %v6543_v3, %v3769_v20  ;;  %vm3839_vm11 = vweird.f32 %v6543_v3 }
 0xb2b   : > { %6546 = vrcp.f32 %v3770_v9  ;;  %vm3840_vm13 = vmor %vm3838_vm12, %vm3839_vm11  ;;  %v3859_v1 = vand.u32 2147483648, %v3770_v9  ;;  %v3857_v40 = vand.u32 2147483647, %v3770_v9  ;;  %vm3853_vm8 = vweird.f32 %v3770_v9 }
 0xb2c   : > { %v3648_v31 = vpop.f32.mrf.mxu2  ;;  %v3835_v35 = vsub.f32 1.0, %v3834_v56 }
 0xb2d   : > { %v3723_v55 = vsel %vm11128_vm10, %v3648_v31, %v3636_v61  ;;  %v3860_v4 = vor.u32 1.1754944e-38, %v3859_v1  ;;  %vm3858_vm10 = vcmp.eq.f32.partialorder %v3857_v40, 8.507059e+37  ;;  %v6991_v1 = vld [vmem:[%s10974_s4 + $0x8] sm:$0xff] }
 0xb2e   : > { %v3740_v53 = vadd.f32 %v3723_v55, %v878_v30  ;;  %v3836_v5 = vmul.f32 %v6543_v3, %v3835_v35 }
 0xb30   : > { %v6545_v17 = vpop.eup %6544  ;;  %v6027_v54 = vmul.f32 -1.442695, %v3740_v53  ;;  %v3837_v34 = vadd.f32 %v6543_v3, %v3836_v5 }
 0xb31   : > { %v6547_v52 = vpop.eup %6546  ;;  %v3771_v47 = vadd.f32 1.0, %v6545_v17 }
 0xb32   : > { %6548 = vpow2.f32 %v6027_v54  ;;  %v3841_v58 = vsel %vm3840_vm13, %v6543_v3, %v3837_v34  ;;  %v3849_v13 = vmul.f32 %v6547_v52, %v3770_v9  ;;  %vm3854_vm4 = vweird.f32 %v6547_v52  ;;  %v9946_v34 = vpop.f32.mrf.mxu0 }
 0xb33   : > { %6550 = vrcp.f32 %v3771_v47  ;;  %v3846_v23 = vsel %vm3843_vm14, %v3845_v10, %v3841_v58  ;;  %vm3855_vm9 = vmor %vm3853_vm8, %vm3854_vm4  ;;  %v3874_v37 = vand.u32 2147483648, %v3771_v47  ;;  %v3872_v8 = vand.u32 2147483647, %v3771_v47  ;;  %v6986_v10 = vld [vmem:[%s10974_s4] sm:$0xff] }
 0xb34   : > { %v4074_v61 = vmul.f32 %v3846_v23, %v9708_v0  ;;  %v3850_v36 = vsub.f32 1.0, %v3849_v13  ;;  %vm3868_vm12 = vweird.f32 %v3771_v47  ;;  %v6987_v13 = vld [vmem:[#allocation5 + $0xf8] sm:$0xff]  ;;  %v6988_v23 = vld [vmem:[#allocation5 + $0xe8] sm:$0xff] }
 0xb35   : > { %v3875_v20 = vor.u32 1.1754944e-38, %v3874_v37  ;;  %vm3873_vm14 = vcmp.eq.f32.partialorder %v3872_v8, 8.507059e+37  ;;  %v7002_v37 = vld [vmem:[#allocation5 + $0x38] sm:$0xff] }
 0xb36   : > { %4106 = vmatmul.f32.gmra.mxu3 %v4074_v61  ;;  %v3851_v33 = vmul.f32 %v6547_v52, %v3850_v36  ;;  %v6989_v61 = vld [vmem:[#allocation5 + $0xd8] sm:$0xff]  ;;  %v6990_v36 = vld [vmem:[#allocation5 + $0xc8] sm:$0xff] }
 0xb37   : > { %v7004_v8 = vld [vmem:[#allocation5 + $0x18] sm:$0xff] }
 0xb38   : > { %v6549_v28 = vpop.eup %6548  ;;  %v3852_v2 = vadd.f32 %v6547_v52, %v3851_v33  ;;  %v6992_v33 = vld [vmem:[#allocation5 + $0xb8] sm:$0xff] }
 0xb39   : > { %v6551_v6 = vpop.eup %6550  ;;  %v3772_v32 = vadd.f32 1.0, %v6549_v28  ;;  %v6993_v28 = vld [vmem:[#allocation5 + $0xa8] sm:$0xff] }
 0xb3a   : > { %v3856_v44 = vsel %vm3855_vm9, %v6547_v52, %v3852_v2  ;;  %v3864_v29 = vmul.f32 %v6551_v6, %v3771_v47  ;;  %vm3869_vm11 = vweird.f32 %v6551_v6  ;;  %v9948_v47 = vpop.f32.mrf.mxu0  ;;  %v6994_v2 = vld [vmem:[#allocation5 + $0x98] sm:$0xff] }
 0xb3b   : > { %6552 = vrcp.f32 %v3772_v32  ;;  %v3861_v60 = vsel %vm3858_vm10, %v3860_v4, %v3856_v44  ;;  %vm3870_vm13 = vmor %vm3868_vm12, %vm3869_vm11  ;;  %v3889_v19 = vand.u32 2147483648, %v3772_v32  ;;  %v3887_v3 = vand.u32 2147483647, %v3772_v32  ;;  %v6997_v4 = vld [vmem:[#allocation5 + $0x78] sm:$0xff]  ;;  %v6998_v44 = vld [vmem:[#allocation5 + $0x68] sm:$0xff] }
 0xb3c   : > { %v4075_v16 = vmul.f32 %v3861_v60, %v9721_v62  ;;  %v3865_v49 = vsub.f32 1.0, %v3864_v29  ;;  %vm3883_vm8 = vweird.f32 %v3772_v32  ;;  %v6999_v60 = vld [vmem:[#allocation5 + $0x58] sm:$0xff] }
 0xb3d   : > { %v3890_v56 = vor.u32 1.1754944e-38, %v3889_v19  ;;  %vm3888_vm10 = vcmp.eq.f32.partialorder %v3887_v3, 8.507059e+37 }
 0xb3e   : > { %4109 = vmatmul.f32.gmra.mxu3 %v4075_v16  ;;  %v3866_v7 = vmul.f32 %v6551_v6, %v3865_v49  ;;  %v7000_v16 = vld [vmem:[#allocation5 + $0x48] sm:$0xff]  ;;  %v7001_v49 = vld [vmem:[%s10974_s4 + $0x18] sm:$0xff] }
 0xb40   : > { %v3867_v46 = vadd.f32 %v6551_v6, %v3866_v7  ;;  %v7003_v7 = vld [vmem:[#allocation5 + $0x28] sm:$0xff] }
 0xb41   : > { %v6553_v22 = vpop.eup %6552 }
 0xb42   : > { %v3871_v41 = vsel %vm3870_vm13, %v6551_v6, %v3867_v46  ;;  %v3879_v25 = vmul.f32 %v6553_v22, %v3772_v32  ;;  %vm3884_vm4 = vweird.f32 %v6553_v22  ;;  %v9954_v58 = vpop.f32.mrf.mxu0  ;;  %v6995_v6 = vld [vmem:[#allocation5 + $0x88] sm:$0xff]  ;;  %v6996_v32 = vld [vmem:[%s10974_s4 + $0x10] sm:$0xff] }
 0xb43   : > { %v3876_v48 = vsel %vm3873_vm14, %v3875_v20, %v3871_v41  ;;  %vm3885_vm9 = vmor %vm3883_vm8, %vm3884_vm4  ;;  %v7006_v20 = vld [vmem:[%s10974_s4 + $0x20] sm:$0xff]  ;;  %v7007_v41 = vld [vmem:[%s10974_s4 + $0x28] sm:$0xff] }
 0xb44   : > { %v4076_v38 = vmul.f32 %v3876_v48, %v9733_v43  ;;  %v3880_v26 = vsub.f32 1.0, %v3879_v25  ;;  %v7008_v48 = vld [vmem:[%s10974_s4 + $0x30] sm:$0xff] }
 0xb46   : > { %4112 = vmatmul.f32.gmra.mxu3 %v4076_v38  ;;  %v3881_v45 = vmul.f32 %v6553_v22, %v3880_v26  ;;  %v7009_v26 = vld [vmem:[%s10974_s4 + $0x38] sm:$0xff] }
 0xb48   : > { %v3882_v9 = vadd.f32 %v6553_v22, %v3881_v45 }
 0xb4a   : > { %v3886_v30 = vsel %vm3885_vm9, %v6553_v22, %v3882_v9  ;;  %v3677_v40 = vpop.f32.mrf.mxu0  ;;  %v7005_v22 = vld [vmem:[#allocation5 + $0x8] sm:$0xff] }
 0xb4b   : > { %v3891_v31 = vsel %vm3888_vm10, %v3890_v56, %v3886_v30  ;;  %v11129_v9 = vld [vmem:[#allocation38_spill] sm:$0xff] }
 0xb4c   : > { %v4077_v35 = vmul.f32 %v3891_v31, %v9738_v21 }
 0xb4e   : > { %4115 = vmatmul.f32.gmra.mxu3 %v4077_v35 }
 0xb52   : > { %v3680_v29 = vpop.f32.mrf.mxu0 }
 0xb53   : > { %v3893_v3 = vsel %vm648_vm15, %v3680_v29, %v9946_v34 }
 0xb54   : > { %v3910_v56 = vadd.f32 %v3893_v3, %v11129_v9 }
 0xb56   : > { %v6028_v31 = vmul.f32 -1.442695, %v3910_v56  ;;  %v11135_v56 = vld [vmem:[#allocation73_spill] sm:$0xff] }
 0xb58   : > { %6554 = vpow2.f32 %v6028_v31 }
 0xb5a   : > { %v3683_v46 = vpop.f32.mrf.mxu0 }
 0xb5b   : > { %v3894_v35 = vsel %vm649_vm5, %v3683_v46, %v9948_v47  ;;  %v11134_v46 = vld [vmem:[#allocation43_spill] sm:$0xff] }
 0xb62   : > { %v3686_v25 = vpop.f32.mrf.mxu0 }
 0xb6a   : > { %v3689_v38 = vpop.f32.mrf.mxu0 }
 0xb6b   : > { %v3896_v47 = vsel %vm651_vm7, %v3689_v38, %v3677_v40 }
 0xb72   : > { %v3692_v19 = vpop.f32.mrf.mxu0 }
 0xb79   : > { %v4095_v55 = vpop.f32.mrf.mxu3 }
 0xb7a   : > { %v3695_v45 = vpop.f32.mrf.mxu0 }
 0xb81   : > { %v4098_v51 = vpop.f32.mrf.mxu3 }
 0xb82   : > { %v3698_v30 = vpop.f32.mrf.mxu0 }
 0xb89   : > { %v4101_v53 = vpop.f32.mrf.mxu3 }
 0xb91   : > { %v4104_v5 = vpop.f32.mrf.mxu3 }
 0xbb9   : > { %v4107_v12 = vpop.f32.mrf.mxu3 }
 0xbc1   : > { %v4110_v17 = vpop.f32.mrf.mxu3 }
 0xbc9   : > { %v4113_v54 = vpop.f32.mrf.mxu3 }
 0xbd1   : > { %v4116_v52 = vpop.f32.mrf.mxu3 }
 0xbd2   : > { %4127 = vmatpush.msrb.mxu1 %v4116_v52 }
 0xbd4   : > { %4128 = vmatpush.msrb.mxu1 %v4113_v54  ;;  %v11131_v54 = vld [vmem:[#allocation40_spill] sm:$0xff] }
 0xbd6   : > { %4129 = vmatpush.msrb.mxu1 %v4110_v17  ;;  %v6555_v17 = vpop.eup %6554 }
 0xbd7   : > { %v3942_v52 = vadd.f32 1.0, %v6555_v17  ;;  %v11136_v17 = vld [vmem:[#allocation44_spill] sm:$0xff] }
 0xbd8   : > { %4130 = vmatpush.msrb.mxu1 %v4107_v12  ;;  %v3895_v12 = vsel %vm650_vm6, %v3686_v25, %v9954_v58 }
 0xbd9   : > { %v3912_v34 = vadd.f32 %v3895_v12, %v11131_v54  ;;  %vm3955_vm12 = vweird.f32 %v3942_v52 }
 0xbda   : > { %4131 = vmatpush.msrb.mxu1 %v4104_v5 }
 0xbdc   : > { %4132 = vmatpush.msrb.mxu1 %v4101_v53  ;;  %v9992_v53 = vpop.f32.mrf.mxu0 }
 0xbde   : > { %4133 = vmatpush.msrb.mxu1 %v4098_v51 }
 0xbe0   : > { %4134 = vmatpush.msrb.mxu1 %v4095_v55  ;;  %v11130_v55 = vld [vmem:[#allocation39_spill] sm:$0xff] }
 0xbe1   : > { %6036 = vmatmul.msk.f32.vlgmr.msrb.gmra.mxu1 %vm1377_vm0, %v6986_v10  ;;  %v3911_v51 = vadd.f32 %v3894_v35, %v11130_v55  ;;  %v6030_v10 = vmul.f32 -1.442695, %v3912_v34 }
 0xbe2   : > { %4258 = vmatpush.msra.mxu1 %v6987_v13 }
 0xbe3   : > { %v6029_v5 = vmul.f32 -1.442695, %v3911_v51 }
 0xbe4   : > { %4259 = vmatpush.msra.mxu1 %v6988_v23  ;;  %v3704_v13 = vpop.f32.mrf.mxu0 }
 0xbe5   : > { %6556 = vpow2.f32 %v6029_v5  ;;  %v3897_v58 = vsel %vm648_vm15, %v3704_v13, %v3692_v19 }
 0xbe6   : > { %4260 = vmatpush.msra.mxu1 %v6989_v61  ;;  %6558 = vrcp.f32 %v3942_v52  ;;  %v11132_v61 = vld [vmem:[#allocation41_spill] sm:$0xff] }
 0xbe7   : > { %6560 = vpow2.f32 %v6030_v10 }
 0xbe8   : > { %4261 = vmatpush.msra.mxu1 %v6990_v36  ;;  %v3913_v36 = vadd.f32 %v3896_v47, %v11132_v61 }
 0xbe9   : > { %6037 = vmatmul.msk.f32.gmra.mxu1 %vm1377_vm0, %v6991_v1 }
 0xbea   : > { %4262 = vmatpush.msra.mxu1 %v6992_v33 }
 0xbeb   : > { %v6557_v23 = vpop.eup %6556 }
 0xbec   : > { %4263 = vmatpush.msra.mxu1 %v6993_v28  ;;  %v10001_v1 = vadd.f32 1.0, %v6557_v23  ;;  %v6559_v33 = vpop.eup %6558  ;;  %v6031_v28 = vmul.f32 -1.442695, %v3913_v36 }
 0xbed   : > { %vm3956_vm11 = vweird.f32 %v6559_v33 }
 0xbee   : > { %4264 = vmatpush.msra.mxu1 %v6994_v2  ;;  %6562 = vrcp.f32 %v10001_v1  ;;  %v6561_v2 = vpop.eup %6560  ;;  %vm3957_vm13 = vmor %vm3955_vm12, %vm3956_vm11  ;;  %v3976_v23 = vand.u32 2147483648, %v10001_v1  ;;  %vm3970_vm8 = vweird.f32 %v10001_v1 }
 0xbef   : > { %6564 = vpow2.f32 %v6031_v28  ;;  %v10007_v40 = vadd.f32 1.0, %v6561_v2 }
 0xbf0   : > { %4265 = vmatpush.msra.mxu1 %v6995_v6  ;;  %v3951_v6 = vmul.f32 %v6559_v33, %v3942_v52 }
 0xbf1   : > { %6038 = vmatmul.msk.f32.gmra.mxu1 %vm1377_vm0, %v6996_v32  ;;  %v3707_v32 = vpop.f32.mrf.mxu0  ;;  %6566 = vrcp.f32 %v10007_v40  ;;  %vm3985_vm12 = vweird.f32 %v10007_v40 }
 0xbf2   : > { %4266 = vmatpush.msra.mxu1 %v6997_v4  ;;  %v11133_v4 = vld [vmem:[#allocation42_spill] sm:$0xff]  ;;  %v3952_v29 = vsub.f32 1.0, %v3951_v6 }
 0xbf4   : > { %4267 = vmatpush.msra.mxu1 %v6998_v44  ;;  %v3914_v44 = vadd.f32 %v3897_v58, %v11133_v4 }
 0xbf6   : > { %4268 = vmatpush.msra.mxu1 %v6999_v60  ;;  %v10009_v60 = vpop.eup %6562 }
 0xbf7   : > { %vm3971_vm4 = vweird.f32 %v10009_v60 }
 0xbf8   : > { %4269 = vmatpush.msra.mxu1 %v7000_v16  ;;  %v6032_v16 = vmul.f32 -1.442695, %v3914_v44  ;;  %vm3972_vm9 = vmor %vm3970_vm8, %vm3971_vm4 }
 0xbf9   : > { %6039 = vmatmul.msk.f32.gmra.mxu1 %vm1377_vm0, %v7001_v49  ;;  %v3898_v49 = vsel %vm649_vm5, %v3707_v32, %v3695_v45  ;;  %v3959_v45 = vand.u32 2147483647, %v3942_v52  ;;  %v11137_v32 = vld [vmem:[#allocation74_spill] sm:$0xff] }
 0xbfa   : > { %4270 = vmatpush.msra.mxu1 %v7002_v37  ;;  %v6565_v37 = vpop.eup %6564  ;;  %6568 = vpow2.f32 %v6032_v16 }
 0xbfb   : > { %v10019_v38 = vpop.eup %6566  ;;  %vm3960_vm14 = vcmp.eq.f32.partialorder %v3959_v45, 8.507059e+37  ;;  %v3989_v45 = vand.u32 2147483647, %v10007_v40 }
 0xbfc   : > { %4271 = vmatpush.msra.mxu1 %v7003_v7  ;;  %v3953_v7 = vmul.f32 %v6559_v33, %v3952_v29  ;;  %v3981_v51 = vmul.f32 %v10019_v38, %v10007_v40  ;;  %vm3986_vm11 = vweird.f32 %v10019_v38 }
 0xbfe   : > { %4272 = vmatpush.msra.mxu1 %v7004_v8  ;;  %v3966_v8 = vmul.f32 %v10009_v60, %v10001_v1 }
 0xc00   : > { %4273 = vmatpush.msra.mxu1 %v7005_v22  ;;  %v3915_v22 = vadd.f32 %v3898_v49, %v11134_v46  ;;  %v3967_v25 = vsub.f32 1.0, %v3966_v8  ;;  %v6569_v35 = vpop.eup %6568 }
 0xc01   : > { %6040 = vmatmul.msk.f32.gmra.mxu1 %vm1377_vm0, %v7006_v20  ;;  %v3710_v20 = vpop.f32.mrf.mxu0  ;;  %v10029_v34 = vadd.f32 1.0, %v6569_v35 }
 0xc02   : > { %v6033_v19 = vmul.f32 -1.442695, %v3915_v22  ;;  %v3899_v9 = vsel %vm650_vm6, %v3710_v20, %v3698_v30  ;;  %v3968_v55 = vmul.f32 %v10009_v60, %v3967_v25  ;;  %v3982_v30 = vsub.f32 1.0, %v3981_v51  ;;  %v7011_v51 = vld [vmem:[#allocation5 + $0xe0] sm:$0xff] }
 0xc03   : > { %v3916_v54 = vadd.f32 %v3899_v9, %v11136_v17  ;;  %v3991_v25 = vand.u32 2147483648, %v10007_v40 }
 0xc04   : > { %v3969_v13 = vadd.f32 %v10009_v60, %v3968_v55  ;;  %v3983_v29 = vmul.f32 %v10019_v38, %v3982_v30  ;;  %v7012_v30 = vld [vmem:[#allocation5 + $0xd0] sm:$0xff] }
 0xc05   : > { %v6034_v61 = vmul.f32 -1.442695, %v3916_v54 }
 0xc06   : > { %v3973_v49 = vsel %vm3972_vm9, %v10009_v60, %v3969_v13  ;;  %v3984_v20 = vadd.f32 %v10019_v38, %v3983_v29 }
 0xc09   : > { %6041 = vmatmul.msk.f32.gmra.mxu1 %vm1377_vm0, %v7007_v41  ;;  %v10017_v41 = vadd.f32 1.0, %v6565_v37  ;;  %v3713_v10 = vpop.f32.mrf.mxu0  ;;  %v3977_v37 = vor.u32 1.1754944e-38, %v3976_v23  ;;  %v7013_v23 = vld [vmem:[#allocation5 + $0xc0] sm:$0xff] }
 0xc0a   : > { %v3900_v2 = vsel %vm651_vm7, %v3713_v10, %v9992_v53 }
 0xc0b   : > { %6570 = vrcp.f32 %v10017_v41  ;;  %vm4000_vm8 = vweird.f32 %v10017_v41 }
 0xc11   : > { %6042 = vmatmul.msk.f32.gmra.mxu1 %vm1377_vm0, %v7008_v48  ;;  %v3954_v48 = vadd.f32 %v6559_v33, %v3953_v7  ;;  %v10033_v47 = vpop.eup %6570  ;;  %v11138_v7 = vld [vmem:[#allocation45_spill] sm:$0xff] }
 0xc12   : > { %v3996_v16 = vmul.f32 %v10033_v47, %v10017_v41  ;;  %v3917_v8 = vadd.f32 %v3900_v2, %v11138_v7  ;;  %vm4001_vm4 = vweird.f32 %v10033_v47  ;;  %v4004_v2 = vand.u32 2147483647, %v10017_v41 }
 0xc13   : > { %v3958_v5 = vsel %vm3957_vm13, %v6559_v33, %v3954_v48  ;;  %v3974_v33 = vand.u32 2147483647, %v10001_v1  ;;  %v7010_v48 = vld [vmem:[#allocation5 + $0xf0] sm:$0xff]  ;;  %vm10063_vm13 = vmor %vm3985_vm12, %vm3986_vm11  ;;  %vm4015_vm12 = vweird.f32 %v10029_v34 }
 0xc14   : > { %v3997_v22 = vsub.f32 1.0, %v3996_v16  ;;  %v3988_v54 = vsel %vm10063_vm13, %v10019_v38, %v3984_v20  ;;  %vm10089_vm9 = vmor %vm4000_vm8, %vm4001_vm4 }
 0xc15   : > { %vm3975_vm10 = vcmp.eq.f32.partialorder %v3974_v33, 8.507059e+37  ;;  %v4006_v33 = vand.u32 2147483648, %v10017_v41 }
 0xc16   : > { %v3978_v46 = vsel %vm3975_vm10, %v3977_v37, %v3973_v49  ;;  %vm4005_vm10 = vcmp.eq.f32.partialorder %v4004_v2, 8.507059e+37 }
 0xc17   : > { %v4186_v55 = vmul.f32 %v3978_v46, %v9633_v24 }
 0xc19   : > { %6043 = vmatmul.msk.f32.gmra.mxu1 %vm1377_vm0, %v7009_v26  ;;  %v3961_v26 = vand.u32 2147483648, %v3942_v52 }
 0xc1b   : > { %v3962_v12 = vor.u32 1.1754944e-38, %v3961_v26  ;;  %v6035_v26 = vmul.f32 -1.442695, %v3917_v8 }
 0xc1d   : > { %v3963_v52 = vsel %vm3960_vm14, %v3962_v12, %v3958_v5  ;;  %v3998_v12 = vmul.f32 %v10033_v47, %v3997_v22  ;;  %vm3990_vm14 = vcmp.eq.f32.partialorder %v3989_v45, 8.507059e+37  ;;  %v7016_v22 = vld [vmem:[#allocation5 + $0x90] sm:$0xff]  ;;  %v4021_v45 = vand.u32 2147483648, %v10029_v34 }
 0xc1e   : > { %v4193_v36 = vsub.f32 1.0, %v3963_v52  ;;  %v4185_v6 = vmul.f32 %v3963_v52, %v9607_v39  ;;  %v3992_v52 = vor.u32 1.1754944e-38, %v3991_v25 }
 0xc1f   : > { %v3999_v38 = vadd.f32 %v10033_v47, %v3998_v12 }
 0xc20   : > { %v3993_v13 = vsel %vm3990_vm14, %v3992_v52, %v3988_v54 }
 0xc21   : > { %v4187_v16 = vmul.f32 %v3993_v13, %v9659_v42  ;;  %v4003_v8 = vsel %vm10089_vm9, %v10033_v47, %v3999_v38 }
 0xc5e   : > { %v4136_v3 = vpop.f32.mrf.mxu1 }
 0xc5f   : > { %v4169_v31 = vadd.f32 %v4136_v3, %v11135_v56  ;;  %v4019_v56 = vand.u32 2147483647, %v10029_v34 }
 0xc61   : > { %6572 = vtanh.f32 %v4169_v31  ;;  %v11141_v31 = vld [vmem:[#allocation75_spill] sm:$0xff]  ;;  %vm4020_vm14 = vcmp.eq.f32.partialorder %v4019_v56, 8.507059e+37 }
 0xc62   : > { %6574 = vpow2.f32 %v6033_v19  ;;  %v4194_v19 = vsub.f32 1.0, %v3978_v46  ;;  %v4007_v46 = vor.u32 1.1754944e-38, %v4006_v33  ;;  %v11151_v56 = vld [vmem:[#allocation79_spill] sm:$0xff] }
 0xc63   : > { %6576 = vrcp.f32 %v10029_v34 }
 0xc64   : > { %v4008_v25 = vsel %vm4005_vm10, %v4007_v46, %v4003_v8  ;;  %v7024_v46 = vld [vmem:[#allocation5 + $0x10] sm:$0xff] }
 0xc65   : > { %v4188_v12 = vmul.f32 %v4008_v25, %v9685_v50 }
 0xc66   : > { %v4139_v28 = vpop.f32.mrf.mxu1 }
 0xc67   : > { %v6573_v58 = vpop.eup %6572  ;;  %v4170_v4 = vadd.f32 %v4139_v28, %v11137_v32  ;;  %v7014_v28 = vld [vmem:[#allocation5 + $0xb0] sm:$0xff] }
 0xc68   : > { %v6575_v44 = vpop.eup %6574  ;;  %v4201_v1 = vmul.f32 %v6573_v58, %v4193_v36  ;;  %v4195_v58 = vsub.f32 1.0, %v3993_v13  ;;  %v7020_v13 = vld [vmem:[#allocation5 + $0x50] sm:$0xff] }
 0xc69   : > { %6578 = vtanh.f32 %v4170_v4  ;;  %v10051_v39 = vadd.f32 1.0, %v6575_v44  ;;  %v10057_v60 = vpop.eup %6576  ;;  %v11144_v44 = vld [vmem:[#allocation76_spill] sm:$0xff] }
 0xc6a   : > { %6580 = vpow2.f32 %v6034_v61  ;;  %v10049_v53 = vadd.f32 %v4201_v1, %v4185_v6  ;;  %v4011_v40 = vmul.f32 %v10057_v60, %v10029_v34  ;;  %v7015_v1 = vld [vmem:[#allocation5 + $0xa0] sm:$0xff]  ;;  %vm4016_vm11 = vweird.f32 %v10057_v60 }
 0xc6b   : > { %6582 = vrcp.f32 %v10051_v39  ;;  %vm10115_vm13 = vmor %vm4015_vm12, %vm4016_vm11  ;;  %vm4030_vm8 = vweird.f32 %v10051_v39 }
 0xc6c   : > { %4233 = vmatmul.f32.vlgmr.msra.gmra.mxu3 %v10049_v53  ;;  %4274 = vmatmul.f32.vlgmr.msra.gmra.mxu1 %v10049_v53  ;;  %v4012_v61 = vsub.f32 1.0, %v4011_v40  ;;  %v7019_v40 = vld [vmem:[#allocation5 + $0x60] sm:$0xff] }
 0xc6d   : > { %4930 = vmatpush.msra.mxu3 %v7010_v48  ;;  %v7017_v48 = vld [vmem:[#allocation5 + $0x80] sm:$0xff] }
 0xc6e   : > { %v4142_v3 = vpop.f32.mrf.mxu1  ;;  %v4013_v37 = vmul.f32 %v10057_v60, %v4012_v61  ;;  %v7021_v61 = vld [vmem:[#allocation5 + $0x40] sm:$0xff] }
 0xc6f   : > { %v6579_v9 = vpop.eup %6578  ;;  %v4171_v35 = vadd.f32 %v4142_v3, %v11141_v31  ;;  %4931 = vmatpush.msra.mxu3 %v7011_v51  ;;  %v7018_v3 = vld [vmem:[#allocation5 + $0x70] sm:$0xff]  ;;  %v11147_v51 = vld [vmem:[#allocation77_spill] sm:$0xff] }
 0xc70   : > { %v6581_v5 = vpop.eup %6580  ;;  %v4202_v17 = vmul.f32 %v6579_v9, %v4194_v19  ;;  %v4014_v19 = vadd.f32 %v10057_v60, %v4013_v37  ;;  %v4196_v9 = vsub.f32 1.0, %v4008_v25  ;;  %v7025_v25 = vld [vmem:[#allocation5] sm:$0xff] }
 0xc71   : > { %6584 = vtanh.f32 %v4171_v35  ;;  %4932 = vmatpush.msra.mxu3 %v7012_v30  ;;  %v10077_v10 = vadd.f32 1.0, %v6581_v5  ;;  %v10083_v36 = vpop.eup %6582  ;;  %v4022_v30 = vor.u32 1.1754944e-38, %v4021_v45 }
 0xc72   : > { %6586 = vpow2.f32 %v6035_v26  ;;  %v10075_v24 = vadd.f32 %v4202_v17, %v4186_v55  ;;  %v4026_v41 = vmul.f32 %v10083_v36, %v10051_v39  ;;  %v4018_v52 = vsel %vm10115_vm13, %v10057_v60, %v4014_v19 }
 0xc73   : > { %4933 = vmatpush.msra.mxu3 %v7013_v23  ;;  %6588 = vrcp.f32 %v10077_v10  ;;  %v4023_v50 = vsel %vm4020_vm14, %v4022_v30, %v4018_v52  ;;  %vm4031_vm4 = vweird.f32 %v10083_v36  ;;  %vm4045_vm12 = vweird.f32 %v10077_v10  ;;  %v11152_v30 = vld [vmem:[#allocation80_spill] sm:$0xff] }
 0xc74   : > { %4236 = vmatmul.f32.gmra.mxu3 %v10075_v24  ;;  %4277 = vmatmul.f32.gmra.mxu1 %v10075_v24  ;;  %v4027_v26 = vsub.f32 1.0, %v4026_v41  ;;  %v4197_v2 = vsub.f32 1.0, %v4023_v50  ;;  %vm10138_vm9 = vmor %vm4030_vm8, %vm4031_vm4  ;;  %v4049_v45 = vand.u32 2147483647, %v10077_v10 }
 0xc75   : > { %4934 = vmatpush.msra.mxu3 %v7014_v28  ;;  %v4036_v28 = vand.u32 2147483648, %v10051_v39 }
 0xc76   : > { %v4145_v6 = vpop.f32.mrf.mxu1  ;;  %v4028_v17 = vmul.f32 %v10083_v36, %v4027_v26  ;;  %vm4050_vm14 = vcmp.eq.f32.partialorder %v4049_v45, 8.507059e+37  ;;  %v7030_v45 = vld [vmem:[%s10973_s3 + $0x20] sm:$0xff] }
 0xc77   : > { %v6585_v32 = vpop.eup %6584  ;;  %v4172_v29 = vadd.f32 %v4145_v6, %v11144_v44  ;;  %4935 = vmatpush.msra.mxu3 %v7015_v1  ;;  %v4034_v6 = vand.u32 2147483647, %v10051_v39  ;;  %v4189_v1 = vmul.f32 %v4023_v50, %v9708_v0  ;;  %v4037_v8 = vor.u32 1.1754944e-38, %v4036_v28 }
 0xc78   : > { %v6587_v49 = vpop.eup %6586  ;;  %v4203_v7 = vmul.f32 %v6585_v32, %v4195_v58  ;;  %v4029_v33 = vadd.f32 %v10083_v36, %v4028_v17  ;;  %v7022_v58 = vld [vmem:[#allocation5 + $0x30] sm:$0xff] }
 0xc79   : > { %6590 = vtanh.f32 %v4172_v29  ;;  %4936 = vmatpush.msra.mxu3 %v7016_v22  ;;  %v10103_v42 = vadd.f32 1.0, %v6587_v49  ;;  %v10109_v47 = vpop.eup %6588  ;;  %v11150_v29 = vld [vmem:[#allocation78_spill] sm:$0xff]  ;;  %v7023_v49 = vld [vmem:[#allocation5 + $0x20] sm:$0xff]  ;;  %vm4035_vm10 = vcmp.eq.f32.partialorder %v4034_v6, 8.507059e+37 }
 0xc7a   : > { %v10101_v20 = vadd.f32 %v4203_v7, %v4187_v16  ;;  %v4041_v54 = vmul.f32 %v10109_v47, %v10077_v10  ;;  %v4033_v39 = vsel %vm10138_vm9, %v10083_v36, %v4029_v33  ;;  %vm4046_vm11 = vweird.f32 %v10109_v47 }
 0xc7b   : > { %4937 = vmatpush.msra.mxu3 %v7017_v48  ;;  %6592 = vrcp.f32 %v10103_v42  ;;  %v4038_v0 = vsel %vm4035_vm10, %v4037_v8, %v4033_v39  ;;  %v4051_v36 = vand.u32 2147483648, %v10077_v10  ;;  %vm4047_vm13 = vmor %vm4045_vm12, %vm4046_vm11  ;;  %vm4060_vm8 = vweird.f32 %v10103_v42 }
 0xc7c   : > { %4239 = vmatmul.f32.gmra.mxu3 %v10101_v20  ;;  %4280 = vmatmul.f32.gmra.mxu1 %v10101_v20  ;;  %v4042_v38 = vsub.f32 1.0, %v4041_v54  ;;  %v4198_v19 = vsub.f32 1.0, %v4038_v0  ;;  %v4066_v54 = vand.u32 2147483648, %v10103_v42  ;;  %vm11154_vm11 = vcmp.gt.f32.partialorder %v8296_v57, 0.5 }
 0xc7d   : > { %4938 = vmatpush.msra.mxu3 %v7018_v3 }
 0xc7e   : > { %v4148_v31 = vpop.f32.mrf.mxu1  ;;  %v4043_v37 = vmul.f32 %v10109_v47, %v4042_v38  ;;  %v4067_v33 = vor.u32 1.1754944e-38, %v4066_v54 }
 0xc7f   : > { %v6591_v35 = vpop.eup %6590  ;;  %v4173_v5 = vadd.f32 %v4148_v31, %v11147_v51  ;;  %4939 = vmatpush.msra.mxu3 %v7019_v40 }
 0xc80   : > { %v4204_v34 = vmul.f32 %v6591_v35, %v4196_v9  ;;  %v4044_v26 = vadd.f32 %v10109_v47, %v4043_v37 }
 0xc81   : > { %6594 = vtanh.f32 %v4173_v5  ;;  %4940 = vmatpush.msra.mxu3 %v7020_v13  ;;  %v10133_v60 = vpop.eup %6592  ;;  %v4190_v5 = vmul.f32 %v4038_v0, %v9721_v62  ;;  %v4064_v62 = vand.u32 2147483647, %v10103_v42 }
 0xc82   : > { %v10127_v23 = vadd.f32 %v4204_v34, %v4188_v12  ;;  %v4056_v41 = vmul.f32 %v10133_v60, %v10103_v42  ;;  %v4048_v51 = vsel %vm4047_vm13, %v10109_v47, %v4044_v26  ;;  %v4052_v12 = vor.u32 1.1754944e-38, %v4051_v36  ;;  %v7027_v26 = vld [vmem:[%s10973_s3 + $0x8] sm:$0xff]  ;;  %v7028_v36 = vld [vmem:[%s10973_s3 + $0x10] sm:$0xff] }
 0xc83   : > { %4941 = vmatpush.msra.mxu3 %v7021_v61  ;;  %vm4061_vm4 = vweird.f32 %v10133_v60  ;;  %vm4065_vm10 = vcmp.eq.f32.partialorder %v4064_v62, 8.507059e+37 }
 0xc84   : > { %4242 = vmatmul.f32.gmra.mxu3 %v10127_v23  ;;  %4283 = vmatmul.f32.gmra.mxu1 %v10127_v23  ;;  %v4057_v48 = vsub.f32 1.0, %v4056_v41  ;;  %v4053_v17 = vsel %vm4050_vm14, %v4052_v12, %v4048_v51  ;;  %vm4062_vm9 = vmor %vm4060_vm8, %vm4061_vm4  ;;  %v7037_v51 = vld [vmem:[%s10973_s3 + $0x58] sm:$0xff]  ;;  %v7039_v12 = vld [vmem:[%s10973_s3 + $0x68] sm:$0xff] }
 0xc85   : > { %4942 = vmatpush.msra.mxu3 %v7022_v58  ;;  %v4199_v34 = vsub.f32 1.0, %v4053_v17  ;;  %v4191_v38 = vmul.f32 %v4053_v17, %v9733_v43  ;;  %v7040_v17 = vld [vmem:[%s10973_s3 + $0x70] sm:$0xff] }
 0xc86   : > { %v4151_v32 = vpop.f32.mrf.mxu1  ;;  %v4058_v35 = vmul.f32 %v10133_v60, %v4057_v48  ;;  %v7026_v48 = vld [vmem:[%s10973_s3] sm:$0xff] }
 0xc87   : > { %v6595_v4 = vpop.eup %6594  ;;  %v4174_v16 = vadd.f32 %v4151_v32, %v11150_v29  ;;  %4943 = vmatpush.msra.mxu3 %v7023_v49 }
 0xc88   : > { %v4205_v7 = vmul.f32 %v6595_v4, %v4197_v2  ;;  %v4059_v10 = vadd.f32 %v10133_v60, %v4058_v35  ;;  %v7035_v35 = vld [vmem:[%s10973_s3 + $0x48] sm:$0xff] }
 0xc89   : > { %6596 = vtanh.f32 %v4174_v16  ;;  %4944 = vmatpush.msra.mxu3 %v7024_v46 }
 0xc8a   : > { %v10150_v22 = vadd.f32 %v4205_v7, %v4189_v1  ;;  %v4063_v61 = vsel %vm4062_vm9, %v10133_v60, %v4059_v10  ;;  %v7041_v10 = vld [vmem:[%s10973_s3 + $0x78] sm:$0xff] }
 0xc8b   : > { %4945 = vmatpush.msra.mxu3 %v7025_v25  ;;  %v4068_v58 = vsel %vm4065_vm10, %v4067_v33, %v4063_v61  ;;  %v10271_v61 = vld [vmem:[#allocation11] sm:$0xff] }
 0xc8c   : > { %4245 = vmatmul.f32.gmra.mxu3 %v10150_v22  ;;  %4286 = vmatmul.f32.gmra.mxu1 %v10150_v22  ;;  %v4200_v42 = vsub.f32 1.0, %v4068_v58  ;;  %v4192_v32 = vmul.f32 %v4068_v58, %v9738_v21 }
 0xc8e   : > { %v4154_v3 = vpop.f32.mrf.mxu1 }
 0xc8f   : > { %v6597_v9 = vpop.eup %6596  ;;  %v4175_v31 = vadd.f32 %v4154_v3, %v11151_v56  ;;  %v7031_v3 = vld [vmem:[%s10973_s3 + $0x28] sm:$0xff]  ;;  %v7033_v56 = vld [vmem:[%s10973_s3 + $0x38] sm:$0xff] }
 0xc90   : > { %v4206_v55 = vmul.f32 %v6597_v9, %v4198_v19  ;;  %v7029_v19 = vld [vmem:[%s10973_s3 + $0x18] sm:$0xff]  ;;  %v7032_v9 = vld [vmem:[%s10973_s3 + $0x30] sm:$0xff] }
 0xc91   : > { %6598 = vtanh.f32 %v4175_v31  ;;  %v7034_v31 = vld [vmem:[%s10973_s3 + $0x40] sm:$0xff] }
 0xc92   : > { %v10163_v40 = vadd.f32 %v4206_v55, %v4190_v5  ;;  %v7036_v55 = vld [vmem:[%s10973_s3 + $0x50] sm:$0xff]  ;;  %v7038_v5 = vld [vmem:[%s10973_s3 + $0x60] sm:$0xff] }
 0xc94   : > { %4248 = vmatmul.f32.gmra.mxu3 %v10163_v40  ;;  %4289 = vmatmul.f32.gmra.mxu1 %v10163_v40 }
 0xc96   : > { %v4157_v47 = vpop.f32.mrf.mxu1 }
 0xc97   : > { %v6599_v52 = vpop.eup %6598  ;;  %v4176_v13 = vadd.f32 %v4157_v47, %v11152_v30  ;;  %v11153_v47 = vld [vmem:[#allocation29_spill] sm:$0xff] }
 0xc98   : > { %v4207_v50 = vmul.f32 %v6599_v52, %v4199_v34  ;;  %v779_v52 = vperm.slane %v11153_v47, 0 }
 0xc99   : > { %6600 = vtanh.f32 %v4176_v13  ;;  %v10268_v13 = vld [vmem:[%s10975_s5] sm:$0xff] }
 0xc9a   : > { %v10175_v28 = vadd.f32 %v4207_v50, %v4191_v38  ;;  %v827_v50 = vmul.f32 %v10268_v13, %v779_v52 }
 0xc9c   : > { %4251 = vmatmul.f32.gmra.mxu3 %v10175_v28  ;;  %4292 = vmatmul.f32.gmra.mxu1 %v10175_v28  ;;  %v879_v38 = vadd.f32 %v10271_v61, %v827_v50 }
 0xc9f   : > { %v6601_v2 = vpop.eup %6600 }
 0xca0   : > { %v4208_v6 = vmul.f32 %v6601_v2, %v4200_v42 }
 0xca2   : > { %v10180_v4 = vadd.f32 %v4208_v6, %v4192_v32  ;;  %v10279_v6 = vld [vmem:[%s10975_s5 + $0x8] sm:$0xff] }
 0xca3   : > { %v828_v32 = vmul.f32 %v10279_v6, %v779_v52 }
 0xca4   : > { %4254 = vmatmul.f32.gmra.mxu3 %v10180_v4  ;;  %4295 = vmatmul.f32.gmra.mxu1 %v10180_v4 }
 0xce9   : > { %v4275_v43 = vpop.f32.mrf.mxu1 }
 0xcef   : > { %v4234_v60 = vpop.f32.mrf.mxu3 }
 0xcf1   : > { %v4278_v44 = vpop.f32.mrf.mxu1 }
 0xcf7   : > { %v4237_v29 = vpop.f32.mrf.mxu3 }
 0xcf9   : > { %v4281_v16 = vpop.f32.mrf.mxu1 }
 0xcff   : > { %v4240_v1 = vpop.f32.mrf.mxu3 }
 0xd01   : > { %v4284_v49 = vpop.f32.mrf.mxu1 }
 0xd07   : > { %v4243_v37 = vpop.f32.mrf.mxu3 }
 0xd09   : > { %v4287_v41 = vpop.f32.mrf.mxu1 }
 0xd0f   : > { %v4246_v7 = vpop.f32.mrf.mxu3 }
 0xd11   : > { %v4290_v39 = vpop.f32.mrf.mxu1 }
 0xd17   : > { %v4249_v8 = vpop.f32.mrf.mxu3 }
 0xd19   : > { %v4293_v46 = vpop.f32.mrf.mxu1 }
 0xd1f   : > { %v4252_v21 = vpop.f32.mrf.mxu3 }
 0xd21   : > { %v4296_v0 = vpop.f32.mrf.mxu1 }
 0xd22   : > { %4372 = vmatpush.msra.mxu0 %v4296_v0 }
 0xd24   : > { %4373 = vmatpush.msra.mxu0 %v4293_v46 }
 0xd26   : > { %4374 = vmatpush.msra.mxu0 %v4290_v39  ;;  %v10293_v39 = vld [vmem:[#allocation11 + $0x10] sm:$0xff] }
 0xd27   : > { %v4255_v25 = vpop.f32.mrf.mxu3 }
 0xd28   : > { %4307 = vmatpush.msrb.mxu2 %v4255_v25  ;;  %4375 = vmatpush.msra.mxu0 %v4287_v41 }
 0xd2a   : > { %4308 = vmatpush.msrb.mxu2 %v4252_v21  ;;  %4376 = vmatpush.msra.mxu0 %v4284_v49 }
 0xd2c   : > { %4309 = vmatpush.msrb.mxu2 %v4249_v8  ;;  %4377 = vmatpush.msra.mxu0 %v4281_v16 }
 0xd2e   : > { %4310 = vmatpush.msrb.mxu2 %v4246_v7  ;;  %4378 = vmatpush.msra.mxu0 %v4278_v44 }
 0xd30   : > { %4311 = vmatpush.msrb.mxu2 %v4243_v37  ;;  %4379 = vmatpush.msra.mxu0 %v4275_v43  ;;  %v10282_v43 = vld [vmem:[#allocation11 + $0x8] sm:$0xff]  ;;  %v10290_v37 = vld [vmem:[%s10975_s5 + $0x10] sm:$0xff] }
 0xd31   : > { %6060 = vmatmul.msk.f32.vlgmr.msra.gmra.mxu0 %vm1377_vm0, %v7026_v48  ;;  %v829_v41 = vmul.f32 %v10290_v37, %v779_v52 }
 0xd32   : > { %4312 = vmatpush.msrb.mxu2 %v4240_v1 }
 0xd33   : > { %v881_v8 = vadd.f32 %v10293_v39, %v829_v41 }
 0xd34   : > { %4313 = vmatpush.msrb.mxu2 %v4237_v29 }
 0xd36   : > { %4314 = vmatpush.msrb.mxu2 %v4234_v60  ;;  %v880_v60 = vadd.f32 %v10282_v43, %v828_v32 }
 0xd37   : > { %6044 = vmatmul.msk.f32.vlgmr.msrb.gmra.mxu2 %vm1377_vm0, %v7026_v48 }
 0xd39   : > { %6061 = vmatmul.msk.f32.gmra.mxu0 %vm1377_vm0, %v7027_v26 }
 0xd3f   : > { %6045 = vmatmul.msk.f32.gmra.mxu2 %vm1377_vm0, %v7027_v26  ;;  %v10301_v26 = vld [vmem:[%s10975_s5 + $0x18] sm:$0xff] }
 0xd41   : > { %6062 = vmatmul.msk.f32.gmra.mxu0 %vm1377_vm0, %v7028_v36 }
 0xd47   : > { %6046 = vmatmul.msk.f32.gmra.mxu2 %vm1377_vm0, %v7028_v36  ;;  %v830_v36 = vmul.f32 %v10301_v26, %v779_v52 }
 0xd49   : > { %6063 = vmatmul.msk.f32.gmra.mxu0 %vm1377_vm0, %v7029_v19 }
 0xd4f   : > { %6047 = vmatmul.msk.f32.gmra.mxu2 %vm1377_vm0, %v7029_v19 }
 0xd51   : > { %6064 = vmatmul.msk.f32.gmra.mxu0 %vm1377_vm0, %v7030_v45 }
 0xd57   : > { %6048 = vmatmul.msk.f32.gmra.mxu2 %vm1377_vm0, %v7030_v45 }
 0xd59   : > { %6065 = vmatmul.msk.f32.gmra.mxu0 %vm1377_vm0, %v7031_v3 }
 0xd5f   : > { %6049 = vmatmul.msk.f32.gmra.mxu2 %vm1377_vm0, %v7031_v3 }
 0xd61   : > { %6066 = vmatmul.msk.f32.gmra.mxu0 %vm1377_vm0, %v7032_v9 }
 0xd67   : > { %6050 = vmatmul.msk.f32.gmra.mxu2 %vm1377_vm0, %v7032_v9 }
 0xd69   : > { %6067 = vmatmul.msk.f32.gmra.mxu0 %vm1377_vm0, %v7033_v56 }
 0xd6f   : > { %6051 = vmatmul.msk.f32.gmra.mxu2 %vm1377_vm0, %v7033_v56  ;;  %v10304_v56 = vld [vmem:[#allocation11 + $0x18] sm:$0xff] }
 0xd71   : > { %6068 = vmatmul.msk.f32.gmra.mxu0 %vm1377_vm0, %v7034_v31 }
 0xd77   : > { %6052 = vmatmul.msk.f32.gmra.mxu2 %vm1377_vm0, %v7034_v31  ;;  %v882_v31 = vadd.f32 %v10304_v56, %v830_v36 }
 0xd79   : > { %6069 = vmatmul.msk.f32.gmra.mxu0 %vm1377_vm0, %v7035_v35 }
 0xd7f   : > { %6053 = vmatmul.msk.f32.gmra.mxu2 %vm1377_vm0, %v7035_v35 }
 0xd81   : > { %6070 = vmatmul.msk.f32.gmra.mxu0 %vm1377_vm0, %v7036_v55 }
 0xd87   : > { %6054 = vmatmul.msk.f32.gmra.mxu2 %vm1377_vm0, %v7036_v55 }
 0xd89   : > { %6071 = vmatmul.msk.f32.gmra.mxu0 %vm1377_vm0, %v7037_v51 }
 0xd8f   : > { %6055 = vmatmul.msk.f32.gmra.mxu2 %vm1377_vm0, %v7037_v51 }
 0xd91   : > { %6072 = vmatmul.msk.f32.gmra.mxu0 %vm1377_vm0, %v7038_v5 }
 0xd97   : > { %6056 = vmatmul.msk.f32.gmra.mxu2 %vm1377_vm0, %v7038_v5 }
 0xd99   : > { %6073 = vmatmul.msk.f32.gmra.mxu0 %vm1377_vm0, %v7039_v12 }
 0xd9f   : > { %6057 = vmatmul.msk.f32.gmra.mxu2 %vm1377_vm0, %v7039_v12 }
 0xda1   : > { %6074 = vmatmul.msk.f32.gmra.mxu0 %vm1377_vm0, %v7040_v17 }
 0xda7   : > { %6058 = vmatmul.msk.f32.gmra.mxu2 %vm1377_vm0, %v7040_v17 }
 0xda9   : > { %6075 = vmatmul.msk.f32.gmra.mxu0 %vm1377_vm0, %v7041_v10 }
 0xdaf   : > { %6059 = vmatmul.msk.f32.gmra.mxu2 %vm1377_vm0, %v7041_v10 }
 0xdba   : > { %v4316_v54 = vpop.f32.mrf.mxu2 }
 0xdc2   : > { %v4319_v34 = vpop.f32.mrf.mxu2 }
 0xdca   : > { %v4322_v62 = vpop.f32.mrf.mxu2 }
 0xdd2   : > { %v4325_v30 = vpop.f32.mrf.mxu2 }
 0xdda   : > { %v4328_v33 = vpop.f32.mrf.mxu2 }
 0xddb   : > { %v4429_v58 = vsel %vm632_vm1, %v4328_v33, %v4316_v54 }
 0xddc   : > { %v4446_v42 = vadd.f32 %v4429_v58, %v879_v38 }
 0xdde   : > { %v6076_v2 = vmul.f32 -1.442695, %v4446_v42 }
 0xde0   : > { %6602 = vpow2.f32 %v6076_v2 }
 0xde2   : > { %v4331_v44 = vpop.f32.mrf.mxu2 }
 0xde3   : > { %v4430_v29 = vsel %vm633_vm2, %v4331_v44, %v4319_v34 }
 0xde4   : > { %v4447_v16 = vadd.f32 %v4430_v29, %v880_v60  ;;  %v7050_v29 = vld [vmem:[%s10972_s2 + $0x78] sm:$0xff] }
 0xde6   : > { %v6603_v1 = vpop.eup %6602  ;;  %v6077_v49 = vmul.f32 -1.442695, %v4447_v16 }
 0xde7   : > { %v4478_v7 = vadd.f32 1.0, %v6603_v1 }
 0xde8   : > { %6604 = vpow2.f32 %v6077_v49 }
 0xde9   : > { %6606 = vrcp.f32 %v4478_v7  ;;  %v4497_v51 = vand.u32 2147483648, %v4478_v7  ;;  %v4495_v17 = vand.u32 2147483647, %v4478_v7  ;;  %vm4491_vm13 = vweird.f32 %v4478_v7 }
 0xdea   : > { %v4334_v46 = vpop.f32.mrf.mxu2 }
 0xdeb   : > { %v4431_v21 = vsel %vm634_vm3, %v4334_v46, %v4322_v62  ;;  %v4498_v50 = vor.u32 1.1754944e-38, %v4497_v51  ;;  %vm4496_vm4 = vcmp.eq.f32.partialorder %v4495_v17, 8.507059e+37 }
 0xdec   : > { %v4448_v0 = vadd.f32 %v4431_v21, %v881_v8  ;;  %v7051_v8 = vld [vmem:[%s10972_s2 + $0x70] sm:$0xff] }
 0xdee   : > { %v6605_v25 = vpop.eup %6604  ;;  %v6078_v48 = vmul.f32 -1.442695, %v4448_v0 }
 0xdef   : > { %v6607_v19 = vpop.eup %6606  ;;  %v4479_v45 = vadd.f32 1.0, %v6605_v25  ;;  %v7052_v25 = vld [vmem:[%s10972_s2 + $0x68] sm:$0xff] }
 0xdf0   : > { %v4487_v3 = vmul.f32 %v6607_v19, %v4478_v7  ;;  %6608 = vpow2.f32 %v6078_v48  ;;  %vm4492_vm12 = vweird.f32 %v6607_v19 }
 0xdf1   : > { %6610 = vrcp.f32 %v4479_v45  ;;  %vm4493_vm14 = vmor %vm4491_vm13, %vm4492_vm12  ;;  %v4512_v32 = vand.u32 2147483648, %v4479_v45  ;;  %v4510_v44 = vand.u32 2147483647, %v4479_v45  ;;  %vm4506_vm9 = vweird.f32 %v4479_v45 }
 0xdf2   : > { %v4488_v9 = vsub.f32 1.0, %v4487_v3  ;;  %v4337_v35 = vpop.f32.mrf.mxu2  ;;  %v7053_v3 = vld [vmem:[%s10972_s2 + $0x60] sm:$0xff] }
 0xdf3   : > { %v4432_v55 = vsel %vm11154_vm11, %v4337_v35, %v4325_v30  ;;  %v4513_v7 = vor.u32 1.1754944e-38, %v4512_v32  ;;  %vm4511_vm11 = vcmp.eq.f32.partialorder %v4510_v44, 8.507059e+37  ;;  %v7054_v35 = vld [vmem:[%s10972_s2 + $0x58] sm:$0xff]  ;;  %v740_v32 = vrot.slane %v11153_v47, 1 }
 0xdf4   : > { %v4489_v5 = vmul.f32 %v6607_v19, %v4488_v9  ;;  %v4449_v12 = vadd.f32 %v4432_v55, %v882_v31 }
 0xdf6   : > { %v6609_v10 = vpop.eup %6608  ;;  %v6079_v54 = vmul.f32 -1.442695, %v4449_v12  ;;  %v4490_v34 = vadd.f32 %v6607_v19, %v4489_v5  ;;  %v7055_v12 = vld [vmem:[%s10972_s2 + $0x50] sm:$0xff] }
 0xdf7   : > { %v6611_v62 = vpop.eup %6610  ;;  %v4480_v52 = vadd.f32 1.0, %v6609_v10 }
 0xdf8   : > { %6612 = vpow2.f32 %v6079_v54  ;;  %v4494_v38 = vsel %vm4493_vm14, %v6607_v19, %v4490_v34  ;;  %v4502_v33 = vmul.f32 %v6611_v62, %v4479_v45  ;;  %vm4507_vm8 = vweird.f32 %v6611_v62  ;;  %v7056_v34 = vld [vmem:[%s10972_s2 + $0x48] sm:$0xff] }
 0xdf9   : > { %6614 = vrcp.f32 %v4480_v52  ;;  %v4499_v58 = vsel %vm4496_vm4, %v4498_v50, %v4494_v38  ;;  %vm4508_vm10 = vmor %vm4506_vm9, %vm4507_vm8  ;;  %v4527_v45 = vand.u32 2147483648, %v4480_v52  ;;  %v4525_v31 = vand.u32 2147483647, %v4480_v52 }
 0xdfa   : > { %v10309_v30 = vpop.f32.mrf.mxu2  ;;  %v4783_v42 = vmul.f32 %v4499_v58, %v10049_v53  ;;  %v4503_v2 = vsub.f32 1.0, %v4502_v33  ;;  %vm4521_vm13 = vweird.f32 %v4480_v52  ;;  %v7057_v33 = vld [vmem:[%s10972_s2 + $0x40] sm:$0xff] }
 0xdfb   : > { %v4528_v5 = vor.u32 1.1754944e-38, %v4527_v45  ;;  %vm4526_vm4 = vcmp.eq.f32.partialorder %v4525_v31, 8.507059e+37 }
 0xdfc   : > { %4807 = vmatmul.f32.vlgmr.msrb.gmra.mxu3 %v4783_v42  ;;  %v4504_v60 = vmul.f32 %v6611_v62, %v4503_v2  ;;  %v7058_v2 = vld [vmem:[%s10972_s2 + $0x38] sm:$0xff] }
 0xdfd   : > { %5504 = vmatpush.msrb.mxu3 %v7050_v29  ;;  %v7059_v29 = vld [vmem:[%s10972_s2 + $0x30] sm:$0xff] }
 0xdfe   : > { %v6613_v16 = vpop.eup %6612  ;;  %v4505_v1 = vadd.f32 %v6611_v62, %v4504_v60 }
 0xdff   : > { %v6615_v49 = vpop.eup %6614  ;;  %v4481_v41 = vadd.f32 1.0, %v6613_v16  ;;  %5505 = vmatpush.msrb.mxu3 %v7051_v8 }
 0xe00   : > { %v4509_v46 = vsel %vm4508_vm10, %v6611_v62, %v4505_v1  ;;  %v4517_v21 = vmul.f32 %v6615_v49, %v4480_v52  ;;  %vm4522_vm12 = vweird.f32 %v6615_v49 }
 0xe01   : > { %6616 = vrcp.f32 %v4481_v41  ;;  %v4514_v0 = vsel %vm4511_vm11, %v4513_v7, %v4509_v46  ;;  %5506 = vmatpush.msrb.mxu3 %v7052_v25  ;;  %vm4523_vm14 = vmor %vm4521_vm13, %vm4522_vm12  ;;  %v4542_v38 = vand.u32 2147483648, %v4481_v41  ;;  %v4540_v42 = vand.u32 2147483647, %v4481_v41  ;;  %v7063_v25 = vld [vmem:[%s10972_s2 + $0x10] sm:$0xff] }
 0xe02   : > { %v10321_v48 = vpop.f32.mrf.mxu2  ;;  %v4784_v36 = vmul.f32 %v4514_v0, %v10075_v24  ;;  %v4518_v19 = vsub.f32 1.0, %v4517_v21  ;;  %vm4536_vm9 = vweird.f32 %v4481_v41  ;;  %v780_v7 = vperm.slane %v740_v32, 0  ;;  %v7062_v21 = vld [vmem:[%s10972_s2 + $0x18] sm:$0xff] }
 0xe03   : > { %5507 = vmatpush.msrb.mxu3 %v7053_v3  ;;  %v4543_v44 = vor.u32 1.1754944e-38, %v4542_v38  ;;  %vm4541_vm11 = vcmp.eq.f32.partialorder %v4540_v42, 8.507059e+37  ;;  %vm11155_vm12 = vcmp.gt.f32.partialorder %v8296_v57, 0.5 }
 0xe04   : > { %4810 = vmatmul.f32.gmra.mxu3 %v4784_v36  ;;  %v4519_v9 = vmul.f32 %v6615_v49, %v4518_v19  ;;  %v831_v0 = vmul.f32 %v10268_v13, %v780_v7  ;;  %v7064_v36 = vld [vmem:[%s10972_s2 + $0x8] sm:$0xff]  ;;  %v7065_v13 = vld [vmem:[%s10972_s2] sm:$0xff]  ;;  %v834_v38 = vmul.f32 %v10301_v26, %v780_v7 }
 0xe05   : > { %5508 = vmatpush.msrb.mxu3 %v7054_v35  ;;  %v832_v35 = vmul.f32 %v10279_v6, %v780_v7 }
 0xe06   : > { %v4520_v55 = vadd.f32 %v6615_v49, %v4519_v9  ;;  %v883_v19 = vadd.f32 %v10271_v61, %v831_v0 }
 0xe07   : > { %v6617_v51 = vpop.eup %6616  ;;  %5509 = vmatpush.msrb.mxu3 %v7055_v12 }
 0xe08   : > { %v4524_v17 = vsel %vm4523_vm14, %v6615_v49, %v4520_v55  ;;  %v4532_v10 = vmul.f32 %v6617_v51, %v4481_v41  ;;  %vm4537_vm8 = vweird.f32 %v6617_v51  ;;  %v7060_v49 = vld [vmem:[%s10972_s2 + $0x28] sm:$0xff]  ;;  %v7061_v41 = vld [vmem:[%s10972_s2 + $0x20] sm:$0xff]  ;;  %v884_v55 = vadd.f32 %v10282_v43, %v832_v35 }
 0xe09   : > { %v4529_v54 = vsel %vm4526_vm4, %v4528_v5, %v4524_v17  ;;  %5510 = vmatpush.msrb.mxu3 %v7056_v34  ;;  %vm4538_vm10 = vmor %vm4536_vm9, %vm4537_vm8  ;;  %v833_v17 = vmul.f32 %v10290_v37, %v780_v7  ;;  %v886_v37 = vadd.f32 %v10304_v56, %v834_v38 }
 0xe0a   : > { %v4346_v62 = vpop.f32.mrf.mxu2  ;;  %v4785_v52 = vmul.f32 %v4529_v54, %v10101_v20  ;;  %v4533_v50 = vsub.f32 1.0, %v4532_v10 }
 0xe0b   : > { %5511 = vmatpush.msrb.mxu3 %v7057_v33  ;;  %v885_v54 = vadd.f32 %v10293_v39, %v833_v17 }
 0xe0c   : > { %4813 = vmatmul.f32.gmra.mxu3 %v4785_v52  ;;  %v4534_v58 = vmul.f32 %v6617_v51, %v4533_v50 }
 0xe0d   : > { %5512 = vmatpush.msrb.mxu3 %v7058_v2 }
 0xe0e   : > { %v4535_v60 = vadd.f32 %v6617_v51, %v4534_v58 }
 0xe0f   : > { %5513 = vmatpush.msrb.mxu3 %v7059_v29 }
 0xe10   : > { %v4539_v16 = vsel %vm4538_vm10, %v6617_v51, %v4535_v60 }
 0xe11   : > { %v4544_v1 = vsel %vm4541_vm11, %v4543_v44, %v4539_v16  ;;  %5514 = vmatpush.msrb.mxu3 %v7060_v49 }
 0xe12   : > { %v4349_v8 = vpop.f32.mrf.mxu2  ;;  %v4786_v46 = vmul.f32 %v4544_v1, %v10127_v23 }
 0xe13   : > { %5515 = vmatpush.msrb.mxu3 %v7061_v41 }
 0xe14   : > { %4816 = vmatmul.f32.gmra.mxu3 %v4786_v46 }
 0xe15   : > { %5516 = vmatpush.msrb.mxu3 %v7062_v21 }
 0xe17   : > { %5517 = vmatpush.msrb.mxu3 %v7063_v25 }
 0xe19   : > { %5518 = vmatpush.msrb.mxu3 %v7064_v36 }
 0xe1a   : > { %v4352_v45 = vpop.f32.mrf.mxu2 }
 0xe1b   : > { %v4433_v3 = vsel %vm632_vm1, %v4352_v45, %v10309_v30  ;;  %5519 = vmatpush.msrb.mxu3 %v7065_v13 }
 0xe1c   : > { %v4450_v9 = vadd.f32 %v4433_v3, %v883_v19 }
 0xe1e   : > { %v6080_v31 = vmul.f32 -1.442695, %v4450_v9 }
 0xe20   : > { %6618 = vpow2.f32 %v6080_v31 }
 0xe22   : > { %v4355_v51 = vpop.f32.mrf.mxu2 }
 0xe23   : > { %v4434_v61 = vsel %vm633_vm2, %v4355_v51, %v10321_v48 }
 0xe24   : > { %v4451_v5 = vadd.f32 %v4434_v61, %v884_v55 }
 0xe26   : > { %v6619_v12 = vpop.eup %6618  ;;  %v6081_v30 = vmul.f32 -1.442695, %v4451_v5 }
 0xe27   : > { %v4482_v10 = vadd.f32 1.0, %v6619_v12 }
 0xe28   : > { %6620 = vpow2.f32 %v6081_v30 }
 0xe29   : > { %6622 = vrcp.f32 %v4482_v10  ;;  %v4557_v32 = vand.u32 2147483648, %v4482_v10  ;;  %v4555_v44 = vand.u32 2147483647, %v4482_v10  ;;  %vm4551_vm14 = vweird.f32 %v4482_v10 }
 0xe2a   : > { %v4358_v34 = vpop.f32.mrf.mxu2 }
 0xe2b   : > { %v4435_v6 = vsel %vm634_vm3, %v4358_v34, %v4346_v62  ;;  %v4558_v7 = vor.u32 1.1754944e-38, %v4557_v32  ;;  %vm4556_vm8 = vcmp.eq.f32.partialorder %v4555_v44, 8.507059e+37 }
 0xe2c   : > { %v4452_v43 = vadd.f32 %v4435_v6, %v885_v54 }
 0xe2e   : > { %v6621_v52 = vpop.eup %6620  ;;  %v6082_v50 = vmul.f32 -1.442695, %v4452_v43 }
 0xe2f   : > { %v6623_v48 = vpop.eup %6622  ;;  %v4483_v33 = vadd.f32 1.0, %v6621_v52 }
 0xe30   : > { %6624 = vpow2.f32 %v6082_v50  ;;  %v4547_v58 = vmul.f32 %v6623_v48, %v4482_v10  ;;  %vm4552_vm13 = vweird.f32 %v6623_v48 }
 0xe31   : > { %6626 = vrcp.f32 %v4483_v33  ;;  %vm4553_vm4 = vmor %vm4551_vm14, %vm4552_vm13  ;;  %v4572_v0 = vand.u32 2147483648, %v4483_v33  ;;  %v4570_v36 = vand.u32 2147483647, %v4483_v33  ;;  %vm4566_vm10 = vweird.f32 %v4483_v33 }
 0xe32   : > { %v4361_v42 = vpop.f32.mrf.mxu2  ;;  %v4548_v2 = vsub.f32 1.0, %v4547_v58 }
 0xe33   : > { %v4436_v39 = vsel %vm11155_vm12, %v4361_v42, %v4349_v8  ;;  %v4573_v9 = vor.u32 1.1754944e-38, %v4572_v0  ;;  %vm4571_vm12 = vcmp.eq.f32.partialorder %v4570_v36, 8.507059e+37  ;;  %v7070_v0 = vld [vmem:[#allocation5 + $0xc8] sm:$0xff]  ;;  %v7072_v36 = vld [vmem:[#allocation5 + $0xb8] sm:$0xff] }
 0xe34   : > { %v4453_v60 = vadd.f32 %v4436_v39, %v886_v37  ;;  %v4549_v62 = vmul.f32 %v6623_v48, %v4548_v2 }
 0xe36   : > { %v6625_v29 = vpop.eup %6624  ;;  %v6083_v16 = vmul.f32 -1.442695, %v4453_v60  ;;  %v4550_v26 = vadd.f32 %v6623_v48, %v4549_v62 }
 0xe37   : > { %v6627_v1 = vpop.eup %6626  ;;  %v4484_v49 = vadd.f32 1.0, %v6625_v29 }
 0xe38   : > { %6628 = vpow2.f32 %v6083_v16  ;;  %v4554_v56 = vsel %vm4553_vm4, %v6623_v48, %v4550_v26  ;;  %v4562_v46 = vmul.f32 %v6627_v1, %v4483_v33  ;;  %vm4567_vm9 = vweird.f32 %v6627_v1 }
 0xe39   : > { %6630 = vrcp.f32 %v4484_v49  ;;  %v4559_v41 = vsel %vm4556_vm8, %v4558_v7, %v4554_v56  ;;  %vm4568_vm11 = vmor %vm4566_vm10, %vm4567_vm9  ;;  %v4587_v5 = vand.u32 2147483648, %v4484_v49  ;;  %v4585_v30 = vand.u32 2147483647, %v4484_v49  ;;  %v7066_v56 = vld [vmem:[%s10974_s4] sm:$0xff] }
 0xe3a   : > { %v4787_v8 = vmul.f32 %v4559_v41, %v10150_v22  ;;  %v4563_v21 = vsub.f32 1.0, %v4562_v46  ;;  %vm4581_vm14 = vweird.f32 %v4484_v49  ;;  %v7067_v41 = vld [vmem:[#allocation5 + $0xf8] sm:$0xff] }
 0xe3b   : > { %v4588_v54 = vor.u32 1.1754944e-38, %v4587_v5  ;;  %vm4586_vm8 = vcmp.eq.f32.partialorder %v4585_v30, 8.507059e+37  ;;  %v7081_v5 = vld [vmem:[%s10974_s4 + $0x18] sm:$0xff]  ;;  %v7083_v30 = vld [vmem:[#allocation5 + $0x28] sm:$0xff] }
 0xe3c   : > { %4819 = vmatmul.f32.gmra.mxu3 %v4787_v8  ;;  %v4564_v25 = vmul.f32 %v6627_v1, %v4563_v21  ;;  %v7068_v8 = vld [vmem:[#allocation5 + $0xe8] sm:$0xff]  ;;  %v7069_v21 = vld [vmem:[#allocation5 + $0xd8] sm:$0xff] }
 0xe3e   : > { %v6629_v19 = vpop.eup %6628  ;;  %v4565_v45 = vadd.f32 %v6627_v1, %v4564_v25  ;;  %v7071_v25 = vld [vmem:[%s10974_s4 + $0x8] sm:$0xff] }
 0xe3f   : > { %v6631_v3 = vpop.eup %6630  ;;  %v4485_v13 = vadd.f32 1.0, %v6629_v19 }
 0xe40   : > { %v4569_v31 = vsel %vm4568_vm11, %v6627_v1, %v4565_v45  ;;  %v4577_v35 = vmul.f32 %v6631_v3, %v4484_v49  ;;  %vm4582_vm13 = vweird.f32 %v6631_v3  ;;  %v10388_v1 = vpop.f32.mrf.mxu0  ;;  %v7073_v45 = vld [vmem:[#allocation5 + $0xa8] sm:$0xff] }
 0xe41   : > { %6632 = vrcp.f32 %v4485_v13  ;;  %v4574_v55 = vsel %vm4571_vm12, %v4573_v9, %v4569_v31  ;;  %vm4583_vm4 = vmor %vm4581_vm14, %vm4582_vm13  ;;  %v4602_v38 = vand.u32 2147483648, %v4485_v13  ;;  %v4600_v33 = vand.u32 2147483647, %v4485_v13  ;;  %v7076_v9 = vld [vmem:[%s10974_s4 + $0x10] sm:$0xff]  ;;  %v7077_v31 = vld [vmem:[#allocation5 + $0x78] sm:$0xff] }
 0xe42   : > { %v4788_v51 = vmul.f32 %v4574_v55, %v10163_v40  ;;  %v4578_v61 = vsub.f32 1.0, %v4577_v35  ;;  %vm4596_vm10 = vweird.f32 %v4485_v13  ;;  %v7078_v35 = vld [vmem:[#allocation5 + $0x68] sm:$0xff] }
 0xe43   : > { %v4603_v37 = vor.u32 1.1754944e-38, %v4602_v38  ;;  %vm4601_vm12 = vcmp.eq.f32.partialorder %v4600_v33, 8.507059e+37  ;;  %v7089_v38 = vld [vmem:[%s10974_s4 + $0x38] sm:$0xff] }
 0xe44   : > { %4822 = vmatmul.f32.gmra.mxu3 %v4788_v51  ;;  %v4579_v12 = vmul.f32 %v6631_v3, %v4578_v61  ;;  %v7079_v51 = vld [vmem:[#allocation5 + $0x58] sm:$0xff]  ;;  %v7080_v61 = vld [vmem:[#allocation5 + $0x48] sm:$0xff] }
 0xe46   : > { %v4580_v17 = vadd.f32 %v6631_v3, %v4579_v12  ;;  %v7082_v12 = vld [vmem:[#allocation5 + $0x38] sm:$0xff] }
 0xe47   : > { %v6633_v10 = vpop.eup %6632 }
 0xe48   : > { %v4584_v34 = vsel %vm4583_vm4, %v6631_v3, %v4580_v17  ;;  %v4592_v6 = vmul.f32 %v6633_v10, %v4485_v13  ;;  %vm4597_vm9 = vweird.f32 %v6633_v10  ;;  %v10390_v7 = vpop.f32.mrf.mxu0  ;;  %v7074_v3 = vld [vmem:[#allocation5 + $0x98] sm:$0xff]  ;;  %v7075_v13 = vld [vmem:[#allocation5 + $0x88] sm:$0xff] }
 0xe49   : > { %v4589_v43 = vsel %vm4586_vm8, %v4588_v54, %v4584_v34  ;;  %vm4598_vm11 = vmor %vm4596_vm10, %vm4597_vm9  ;;  %v7084_v17 = vld [vmem:[#allocation5 + $0x18] sm:$0xff]  ;;  %v7085_v54 = vld [vmem:[#allocation5 + $0x8] sm:$0xff] }
 0xe4a   : > { %v4789_v52 = vmul.f32 %v4589_v43, %v10175_v28  ;;  %v4593_v50 = vsub.f32 1.0, %v4592_v6  ;;  %v7086_v34 = vld [vmem:[%s10974_s4 + $0x20] sm:$0xff]  ;;  %v7087_v6 = vld [vmem:[%s10974_s4 + $0x28] sm:$0xff] }
 0xe4c   : > { %4825 = vmatmul.f32.gmra.mxu3 %v4789_v52  ;;  %v4594_v48 = vmul.f32 %v6633_v10, %v4593_v50  ;;  %v7088_v52 = vld [vmem:[%s10974_s4 + $0x30] sm:$0xff] }
 0xe4e   : > { %v4595_v58 = vadd.f32 %v6633_v10, %v4594_v48 }
 0xe50   : > { %v4599_v42 = vsel %vm4598_vm11, %v6633_v10, %v4595_v58  ;;  %v10396_v46 = vpop.f32.mrf.mxu0 }
 0xe51   : > { %v4604_v2 = vsel %vm4601_vm12, %v4603_v37, %v4599_v42  ;;  %v11156_v37 = vld [vmem:[#allocation46_spill] sm:$0xff] }
 0xe52   : > { %v4790_v39 = vmul.f32 %v4604_v2, %v10180_v4 }
 0xe54   : > { %4828 = vmatmul.f32.gmra.mxu3 %v4790_v39 }
 0xe58   : > { %v4390_v19 = vpop.f32.mrf.mxu0 }
 0xe60   : > { %v4393_v55 = vpop.f32.mrf.mxu0 }
 0xe61   : > { %v4606_v58 = vsel %vm648_vm15, %v4393_v55, %v10388_v1  ;;  %v11158_v1 = vld [vmem:[#allocation48_spill] sm:$0xff] }
 0xe62   : > { %v4623_v42 = vadd.f32 %v4606_v58, %v11156_v37 }
 0xe64   : > { %v6084_v39 = vmul.f32 -1.442695, %v4623_v42 }
 0xe66   : > { %6634 = vpow2.f32 %v6084_v39  ;;  %v11162_v39 = vld [vmem:[#allocation81_spill] sm:$0xff] }
 0xe68   : > { %v4396_v10 = vpop.f32.mrf.mxu0 }
 0xe70   : > { %v4399_v43 = vpop.f32.mrf.mxu0 }
 0xe78   : > { %v4402_v50 = vpop.f32.mrf.mxu0 }
 0xe7f   : > { %v4808_v32 = vpop.f32.mrf.mxu3 }
 0xe80   : > { %v4405_v48 = vpop.f32.mrf.mxu0 }
 0xe87   : > { %v4811_v60 = vpop.f32.mrf.mxu3 }
 0xe88   : > { %v4408_v33 = vpop.f32.mrf.mxu0 }
 0xe8f   : > { %v4814_v62 = vpop.f32.mrf.mxu3 }
 0xe90   : > { %v4411_v2 = vpop.f32.mrf.mxu0 }
 0xe97   : > { %v4817_v44 = vpop.f32.mrf.mxu3 }
 0xebf   : > { %v4820_v29 = vpop.f32.mrf.mxu3 }
 0xec7   : > { %v4823_v16 = vpop.f32.mrf.mxu3 }
 0xecf   : > { %v4826_v26 = vpop.f32.mrf.mxu3 }
 0xed7   : > { %v4829_v49 = vpop.f32.mrf.mxu3 }
 0xed8   : > { %4840 = vmatpush.msrb.mxu1 %v4829_v49 }
 0xeda   : > { %4841 = vmatpush.msrb.mxu1 %v4826_v26  ;;  %v6635_v26 = vpop.eup %6634 }
 0xedc   : > { %4842 = vmatpush.msrb.mxu1 %v4823_v16  ;;  %v4608_v16 = vsel %vm650_vm6, %v4399_v43, %v10396_v46 }
 0xedd   : > { %v4625_v49 = vadd.f32 %v4608_v16, %v11158_v1  ;;  %v11163_v1 = vld [vmem:[#allocation52_spill] sm:$0xff] }
 0xede   : > { %4843 = vmatpush.msrb.mxu1 %v4820_v29 }
 0xee0   : > { %4844 = vmatpush.msrb.mxu1 %v4817_v44  ;;  %v10434_v44 = vpop.f32.mrf.mxu0 }
 0xee2   : > { %4845 = vmatpush.msrb.mxu1 %v4814_v62 }
 0xee4   : > { %4846 = vmatpush.msrb.mxu1 %v4811_v60  ;;  %v11157_v60 = vld [vmem:[#allocation47_spill] sm:$0xff] }
 0xee6   : > { %4847 = vmatpush.msrb.mxu1 %v4808_v32  ;;  %v4607_v32 = vsel %vm649_vm5, %v4396_v10, %v10390_v7  ;;  %v4609_v7 = vsel %vm651_vm7, %v4402_v50, %v4390_v19 }
 0xee7   : > { %6092 = vmatmul.msk.f32.vlgmr.msrb.gmra.mxu1 %vm1377_vm0, %v7066_v56  ;;  %v4624_v62 = vadd.f32 %v4607_v32, %v11157_v60  ;;  %v4655_v56 = vadd.f32 1.0, %v6635_v26 }
 0xee8   : > { %4971 = vmatpush.msra.mxu1 %v7067_v41  ;;  %v6086_v41 = vmul.f32 -1.442695, %v4625_v49 }
 0xee9   : > { %v6085_v29 = vmul.f32 -1.442695, %v4624_v62  ;;  %vm4668_vm14 = vweird.f32 %v4655_v56 }
 0xeea   : > { %4972 = vmatpush.msra.mxu1 %v7068_v8  ;;  %v4417_v8 = vpop.f32.mrf.mxu0 }
 0xeeb   : > { %6636 = vpow2.f32 %v6085_v29  ;;  %v4610_v46 = vsel %vm648_vm15, %v4417_v8, %v4405_v48  ;;  %v4674_v48 = vand.u32 2147483648, %v4655_v56 }
 0xeec   : > { %4973 = vmatpush.msra.mxu1 %v7069_v21  ;;  %6638 = vrcp.f32 %v4655_v56 }
 0xeed   : > { %6640 = vpow2.f32 %v6086_v41  ;;  %v4675_v26 = vor.u32 1.1754944e-38, %v4674_v48 }
 0xeee   : > { %4974 = vmatpush.msra.mxu1 %v7070_v0  ;;  %v11159_v0 = vld [vmem:[#allocation49_spill] sm:$0xff] }
 0xeef   : > { %6093 = vmatmul.msk.f32.gmra.mxu1 %vm1377_vm0, %v7071_v25  ;;  %v4626_v25 = vadd.f32 %v4609_v7, %v11159_v0 }
 0xef0   : > { %4975 = vmatpush.msra.mxu1 %v7072_v36 }
 0xef1   : > { %v6637_v21 = vpop.eup %6636 }
 0xef2   : > { %4976 = vmatpush.msra.mxu1 %v7073_v45  ;;  %v10443_v36 = vadd.f32 1.0, %v6637_v21  ;;  %v6639_v45 = vpop.eup %6638 }
 0xef3   : > { %vm4669_vm13 = vweird.f32 %v6639_v45 }
 0xef4   : > { %4977 = vmatpush.msra.mxu1 %v7074_v3  ;;  %v6087_v3 = vmul.f32 -1.442695, %v4626_v25  ;;  %6642 = vrcp.f32 %v10443_v36  ;;  %vm4670_vm4 = vmor %vm4668_vm14, %vm4669_vm13  ;;  %v4689_v0 = vand.u32 2147483648, %v10443_v36  ;;  %vm4683_vm10 = vweird.f32 %v10443_v36 }
 0xef6   : > { %4978 = vmatpush.msra.mxu1 %v7075_v13  ;;  %v6641_v13 = vpop.eup %6640  ;;  %6644 = vpow2.f32 %v6087_v3  ;;  %v4687_v3 = vand.u32 2147483647, %v10443_v36 }
 0xef7   : > { %6094 = vmatmul.msk.f32.gmra.mxu1 %vm1377_vm0, %v7076_v9  ;;  %v4664_v9 = vmul.f32 %v6639_v45, %v4655_v56  ;;  %v10449_v19 = vadd.f32 1.0, %v6641_v13 }
 0xef8   : > { %4979 = vmatpush.msra.mxu1 %v7077_v31  ;;  %v4420_v31 = vpop.f32.mrf.mxu0  ;;  %vm4688_vm12 = vcmp.eq.f32.partialorder %v4687_v3, 8.507059e+37 }
 0xef9   : > { %6646 = vrcp.f32 %v10449_v19  ;;  %vm4698_vm14 = vweird.f32 %v10449_v19 }
 0xefa   : > { %4980 = vmatpush.msra.mxu1 %v7078_v35  ;;  %v11160_v35 = vld [vmem:[#allocation50_spill] sm:$0xff] }
 0xefb   : > { %v4627_v55 = vadd.f32 %v4610_v46, %v11160_v35  ;;  %v11164_v35 = vld [vmem:[#allocation82_spill] sm:$0xff] }
 0xefc   : > { %4981 = vmatpush.msra.mxu1 %v7079_v51  ;;  %v4665_v51 = vsub.f32 1.0, %v4664_v9 }
 0xefe   : > { %4982 = vmatpush.msra.mxu1 %v7080_v61  ;;  %v10451_v61 = vpop.eup %6642  ;;  %v4666_v10 = vmul.f32 %v6639_v45, %v4665_v51 }
 0xeff   : > { %6095 = vmatmul.msk.f32.gmra.mxu1 %vm1377_vm0, %v7081_v5  ;;  %v6088_v5 = vmul.f32 -1.442695, %v4627_v55  ;;  %vm4684_vm9 = vweird.f32 %v10451_v61 }
 0xf00   : > { %4983 = vmatpush.msra.mxu1 %v7082_v12  ;;  %v4611_v12 = vsel %vm649_vm5, %v4420_v31, %v4408_v33  ;;  %v4667_v50 = vadd.f32 %v6639_v45, %v4666_v10  ;;  %v4672_v33 = vand.u32 2147483647, %v4655_v56  ;;  %vm4685_vm11 = vmor %vm4683_vm10, %vm4684_vm9  ;;  %v11165_v10 = vld [vmem:[#allocation53_spill] sm:$0xff] }
 0xf01   : > { %6648 = vpow2.f32 %v6088_v5 }
 0xf02   : > { %4984 = vmatpush.msra.mxu1 %v7083_v30  ;;  %v6645_v30 = vpop.eup %6644  ;;  %v4671_v29 = vsel %vm4670_vm4, %v6639_v45, %v4667_v50  ;;  %vm4673_vm8 = vcmp.eq.f32.partialorder %v4672_v33, 8.507059e+37  ;;  %v4704_v50 = vand.u32 2147483648, %v10449_v19  ;;  %v4702_v33 = vand.u32 2147483647, %v10449_v19 }
 0xf03   : > { %v10459_v43 = vadd.f32 1.0, %v6645_v30  ;;  %v4676_v41 = vsel %vm4673_vm8, %v4675_v26, %v4671_v29 }
 0xf04   : > { %4985 = vmatpush.msra.mxu1 %v7084_v17  ;;  %v4679_v17 = vmul.f32 %v10451_v61, %v10443_v36  ;;  %v4906_v45 = vsub.f32 1.0, %v4676_v41  ;;  %v4898_v31 = vmul.f32 %v4676_v41, %v10049_v53  ;;  %vm4703_vm8 = vcmp.eq.f32.partialorder %v4702_v33, 8.507059e+37 }
 0xf05   : > { %6650 = vrcp.f32 %v10459_v43  ;;  %vm4713_vm10 = vweird.f32 %v10459_v43 }
 0xf06   : > { %4986 = vmatpush.msra.mxu1 %v7085_v54  ;;  %v11161_v54 = vld [vmem:[#allocation51_spill] sm:$0xff] }
 0xf07   : > { %6096 = vmatmul.msk.f32.gmra.mxu1 %vm1377_vm0, %v7086_v34  ;;  %v4628_v34 = vadd.f32 %v4611_v12, %v11161_v54 }
 0xf09   : > { %v6089_v58 = vmul.f32 -1.442695, %v4628_v34 }
 0xf0f   : > { %6097 = vmatmul.msk.f32.gmra.mxu1 %vm1377_vm0, %v7087_v6  ;;  %v4423_v6 = vpop.f32.mrf.mxu0 }
 0xf10   : > { %v4612_v42 = vsel %vm650_vm6, %v4423_v6, %v4411_v2 }
 0xf11   : > { %v4629_v49 = vadd.f32 %v4612_v42, %v11163_v1 }
 0xf13   : > { %v6090_v25 = vmul.f32 -1.442695, %v4629_v49  ;;  %v4705_v49 = vor.u32 1.1754944e-38, %v4704_v50  ;;  %v11168_v50 = vld [vmem:[#allocation85_spill] sm:$0xff] }
 0xf17   : > { %6098 = vmatmul.msk.f32.gmra.mxu1 %vm1377_vm0, %v7088_v52  ;;  %v4680_v52 = vsub.f32 1.0, %v4679_v17  ;;  %v4426_v8 = vpop.f32.mrf.mxu0  ;;  %v4690_v17 = vor.u32 1.1754944e-38, %v4689_v0 }
 0xf18   : > { %v4613_v9 = vsel %vm651_vm7, %v4426_v8, %v10434_v44 }
 0xf19   : > { %v4681_v16 = vmul.f32 %v10451_v61, %v4680_v52  ;;  %v4630_v54 = vadd.f32 %v4613_v9, %v11165_v10 }
 0xf1b   : > { %v4682_v7 = vadd.f32 %v10451_v61, %v4681_v16  ;;  %v6091_v48 = vmul.f32 -1.442695, %v4630_v54 }
 0xf1d   : > { %v4686_v36 = vsel %vm4685_vm11, %v10451_v61, %v4682_v7  ;;  %v4719_v7 = vand.u32 2147483648, %v10459_v43 }
 0xf1e   : > { %v4691_v34 = vsel %vm4688_vm12, %v4690_v17, %v4686_v36 }
 0xf1f   : > { %6099 = vmatmul.msk.f32.gmra.mxu1 %vm1377_vm0, %v7089_v38  ;;  %v10461_v38 = vpop.eup %6646 }
 0xf20   : > { %v6649_v60 = vpop.eup %6648  ;;  %v4694_v62 = vmul.f32 %v10461_v38, %v10449_v19  ;;  %vm4699_vm13 = vweird.f32 %v10461_v38 }
 0xf21   : > { %v10471_v56 = vadd.f32 1.0, %v6649_v60  ;;  %v10475_v21 = vpop.eup %6650  ;;  %vm4700_vm4 = vmor %vm4698_vm14, %vm4699_vm13  ;;  %v4899_v60 = vmul.f32 %v4691_v34, %v10075_v24 }
 0xf22   : > { %v4695_v2 = vsub.f32 1.0, %v4694_v62  ;;  %v4709_v5 = vmul.f32 %v10475_v21, %v10459_v43  ;;  %vm4714_vm9 = vweird.f32 %v10475_v21 }
 0xf23   : > { %vm4715_vm11 = vmor %vm4713_vm10, %vm4714_vm9  ;;  %v4734_v10 = vand.u32 2147483648, %v10471_v56  ;;  %vm4728_vm14 = vweird.f32 %v10471_v56 }
 0xf24   : > { %v4696_v30 = vmul.f32 %v10461_v38, %v4695_v2  ;;  %v4710_v6 = vsub.f32 1.0, %v4709_v5 }
 0xf26   : > { %v4697_v61 = vadd.f32 %v10461_v38, %v4696_v30  ;;  %v4711_v1 = vmul.f32 %v10475_v21, %v4710_v6 }
 0xf28   : > { %v4701_v26 = vsel %vm4700_vm4, %v10461_v38, %v4697_v61  ;;  %v4712_v24 = vadd.f32 %v10475_v21, %v4711_v1 }
 0xf29   : > { %v4706_v2 = vsel %vm4703_vm8, %v4705_v49, %v4701_v26 }
 0xf2a   : > { %v4908_v0 = vsub.f32 1.0, %v4706_v2  ;;  %v4900_v9 = vmul.f32 %v4706_v2, %v10101_v20  ;;  %v11169_v2 = vld [vmem:[#allocation86_spill] sm:$0xff] }
 0xf64   : > { %v4849_v37 = vpop.f32.mrf.mxu1 }
 0xf65   : > { %v4882_v32 = vadd.f32 %v4849_v37, %v11162_v39  ;;  %v11166_v39 = vld [vmem:[#allocation83_spill] sm:$0xff] }
 0xf67   : > { %6652 = vtanh.f32 %v4882_v32 }
 0xf68   : > { %6654 = vpow2.f32 %v6089_v58  ;;  %v4907_v58 = vsub.f32 1.0, %v4691_v34  ;;  %v4732_v34 = vand.u32 2147483647, %v10471_v56 }
 0xf69   : > { %6656 = vrcp.f32 %v10471_v56 }
 0xf6a   : > { %vm4733_vm8 = vcmp.eq.f32.partialorder %v4732_v34, 8.507059e+37 }
 0xf6c   : > { %v4852_v46 = vpop.f32.mrf.mxu1 }
 0xf6d   : > { %v6653_v13 = vpop.eup %6652  ;;  %v4883_v55 = vadd.f32 %v4852_v46, %v11164_v35  ;;  %v11167_v46 = vld [vmem:[#allocation84_spill] sm:$0xff] }
 0xf6e   : > { %v6655_v51 = vpop.eup %6654  ;;  %v4914_v12 = vmul.f32 %v6653_v13, %v4906_v45 }
 0xf6f   : > { %6658 = vtanh.f32 %v4883_v55  ;;  %v10493_v53 = vadd.f32 1.0, %v6655_v51  ;;  %v10499_v52 = vpop.eup %6656  ;;  %v4716_v51 = vsel %vm4715_vm11, %v10475_v21, %v4712_v24 }
 0xf70   : > { %6660 = vpow2.f32 %v6090_v25  ;;  %v10491_v44 = vadd.f32 %v4914_v12, %v4898_v31  ;;  %v4724_v29 = vmul.f32 %v10499_v52, %v10471_v56  ;;  %v4717_v25 = vand.u32 2147483647, %v10459_v43 }
 0xf71   : > { %6662 = vrcp.f32 %v10493_v53  ;;  %v4720_v12 = vor.u32 1.1754944e-38, %v4719_v7  ;;  %vm4729_vm13 = vweird.f32 %v10499_v52  ;;  %vm4743_vm10 = vweird.f32 %v10493_v53 }
 0xf72   : > { %4946 = vmatmul.f32.vlgmr.msra.gmra.mxu3 %v10491_v44  ;;  %4987 = vmatmul.f32.vlgmr.msra.gmra.mxu1 %v10491_v44  ;;  %v4725_v8 = vsub.f32 1.0, %v4724_v29  ;;  %vm4718_vm12 = vcmp.eq.f32.partialorder %v4717_v25, 8.507059e+37  ;;  %vm4730_vm4 = vmor %vm4728_vm14, %vm4729_vm13  ;;  %v4747_v26 = vand.u32 2147483647, %v10493_v53 }
 0xf73   : > { %v4721_v30 = vsel %vm4718_vm12, %v4720_v12, %v4716_v51  ;;  %v11170_v51 = vld [vmem:[#allocation87_spill] sm:$0xff] }
 0xf74   : > { %v4855_v37 = vpop.f32.mrf.mxu1  ;;  %v4726_v5 = vmul.f32 %v10499_v52, %v4725_v8  ;;  %v4909_v54 = vsub.f32 1.0, %v4721_v30  ;;  %vm4748_vm12 = vcmp.eq.f32.partialorder %v4747_v26, 8.507059e+37 }
 0xf75   : > { %v6659_v42 = vpop.eup %6658  ;;  %v4884_v32 = vadd.f32 %v4855_v37, %v11166_v39 }
 0xf76   : > { %v6661_v62 = vpop.eup %6660  ;;  %v4915_v16 = vmul.f32 %v6659_v42, %v4907_v58  ;;  %v4727_v20 = vadd.f32 %v10499_v52, %v4726_v5  ;;  %v4901_v58 = vmul.f32 %v4721_v30, %v10127_v23 }
 0xf77   : > { %6664 = vtanh.f32 %v4884_v32  ;;  %v10513_v41 = vadd.f32 1.0, %v6661_v62  ;;  %v10519_v38 = vpop.eup %6662  ;;  %v4735_v32 = vor.u32 1.1754944e-38, %v4734_v10 }
 0xf78   : > { %6666 = vpow2.f32 %v6091_v48  ;;  %v10511_v19 = vadd.f32 %v4915_v16, %v4899_v60  ;;  %v4739_v35 = vmul.f32 %v10519_v38, %v10493_v53  ;;  %v4731_v42 = vsel %vm4730_vm4, %v10499_v52, %v4727_v20 }
 0xf79   : > { %6668 = vrcp.f32 %v10513_v41  ;;  %v4736_v60 = vsel %vm4733_vm8, %v4735_v32, %v4731_v42  ;;  %vm4744_vm9 = vweird.f32 %v10519_v38  ;;  %v4749_v52 = vand.u32 2147483648, %v10493_v53 }
 0xf7a   : > { %4949 = vmatmul.f32.gmra.mxu3 %v10511_v19  ;;  %4990 = vmatmul.f32.gmra.mxu1 %v10511_v19  ;;  %v4740_v17 = vsub.f32 1.0, %v4739_v35  ;;  %v4910_v16 = vsub.f32 1.0, %v4736_v60  ;;  %vm4745_vm11 = vmor %vm4743_vm10, %vm4744_vm9  ;;  %v4902_v24 = vmul.f32 %v4736_v60, %v10150_v22  ;;  %vm4758_vm14 = vweird.f32 %v10513_v41 }
 0xf7c   : > { %v4858_v45 = vpop.f32.mrf.mxu1  ;;  %v4741_v39 = vmul.f32 %v10519_v38, %v4740_v17 }
 0xf7d   : > { %v6665_v3 = vpop.eup %6664  ;;  %v4885_v13 = vadd.f32 %v4858_v45, %v11167_v46 }
 0xf7e   : > { %v6667_v31 = vpop.eup %6666  ;;  %v4916_v55 = vmul.f32 %v6665_v3, %v4908_v0  ;;  %v4742_v23 = vadd.f32 %v10519_v38, %v4741_v39  ;;  %v4750_v3 = vor.u32 1.1754944e-38, %v4749_v52 }
 0xf7f   : > { %6670 = vtanh.f32 %v4885_v13  ;;  %v10533_v36 = vadd.f32 1.0, %v6667_v31  ;;  %v10539_v21 = vpop.eup %6668  ;;  %v4762_v31 = vand.u32 2147483647, %v10513_v41 }
 0xf80   : > { %v10531_v43 = vadd.f32 %v4916_v55, %v4900_v9  ;;  %v4754_v33 = vmul.f32 %v10539_v21, %v10513_v41  ;;  %v4746_v25 = vsel %vm4745_vm11, %v10519_v38, %v4742_v23  ;;  %vm4759_vm13 = vweird.f32 %v10539_v21 }
 0xf81   : > { %6672 = vrcp.f32 %v10533_v36  ;;  %v4751_v53 = vsel %vm4748_vm12, %v4750_v3, %v4746_v25  ;;  %v4764_v9 = vand.u32 2147483648, %v10513_v41  ;;  %vm4760_vm4 = vmor %vm4758_vm14, %vm4759_vm13  ;;  %vm4763_vm8 = vcmp.eq.f32.partialorder %v4762_v31, 8.507059e+37  ;;  %v7093_v31 = vld [vmem:[%s10973_s3 + $0x18] sm:$0xff] }
 0xf82   : > { %4952 = vmatmul.f32.gmra.mxu3 %v10531_v43  ;;  %4993 = vmatmul.f32.gmra.mxu1 %v10531_v43  ;;  %v4755_v62 = vsub.f32 1.0, %v4754_v33  ;;  %v4911_v38 = vsub.f32 1.0, %v4751_v53  ;;  %v4903_v17 = vmul.f32 %v4751_v53, %v10163_v40  ;;  %vm4773_vm10 = vweird.f32 %v10533_v36 }
 0xf83   : > { %v4765_v10 = vor.u32 1.1754944e-38, %v4764_v9  ;;  %v4777_v40 = vand.u32 2147483647, %v10533_v36  ;;  %v7091_v9 = vld [vmem:[%s10973_s3 + $0x8] sm:$0xff]  ;;  %vm11176_vm13 = vcmp.gt.f32.partialorder %v8296_v57, 0.5 }
 0xf84   : > { %v4861_v6 = vpop.f32.mrf.mxu1  ;;  %v4756_v45 = vmul.f32 %v10539_v21, %v4755_v62 }
 0xf85   : > { %v6671_v61 = vpop.eup %6670  ;;  %v4886_v48 = vadd.f32 %v4861_v6, %v11168_v50  ;;  %v4779_v6 = vand.u32 2147483648, %v10533_v36  ;;  %vm4778_vm12 = vcmp.eq.f32.partialorder %v4777_v40, 8.507059e+37 }
 0xf86   : > { %v4917_v37 = vmul.f32 %v6671_v61, %v4909_v54  ;;  %v4757_v22 = vadd.f32 %v10539_v21, %v4756_v45 }
 0xf87   : > { %6674 = vtanh.f32 %v4886_v48  ;;  %v6673_v29 = vpop.eup %6672  ;;  %v11171_v48 = vld [vmem:[#allocation88_spill] sm:$0xff]  ;;  %v4780_v39 = vor.u32 1.1754944e-38, %v4779_v6 }
 0xf88   : > { %v10551_v56 = vadd.f32 %v4917_v37, %v4901_v58  ;;  %v4769_v7 = vmul.f32 %v6673_v29, %v10533_v36  ;;  %v4761_v30 = vsel %vm4760_vm4, %v10539_v21, %v4757_v22  ;;  %vm4774_vm9 = vweird.f32 %v6673_v29  ;;  %v7090_v22 = vld [vmem:[%s10973_s3] sm:$0xff]  ;;  %v7105_v6 = vld [vmem:[%s10973_s3 + $0x78] sm:$0xff] }
 0xf89   : > { %v4766_v34 = vsel %vm4763_vm8, %v4765_v10, %v4761_v30  ;;  %vm4775_vm11 = vmor %vm4773_vm10, %vm4774_vm9  ;;  %v7099_v30 = vld [vmem:[%s10973_s3 + $0x48] sm:$0xff]  ;;  %v7102_v10 = vld [vmem:[%s10973_s3 + $0x60] sm:$0xff] }
 0xf8a   : > { %4955 = vmatmul.f32.gmra.mxu3 %v10551_v56  ;;  %4996 = vmatmul.f32.gmra.mxu1 %v10551_v56  ;;  %v4770_v13 = vsub.f32 1.0, %v4769_v7  ;;  %v4912_v61 = vsub.f32 1.0, %v4766_v34  ;;  %v4904_v42 = vmul.f32 %v4766_v34, %v10175_v28  ;;  %v7103_v34 = vld [vmem:[%s10973_s3 + $0x68] sm:$0xff] }
 0xf8c   : > { %v4864_v1 = vpop.f32.mrf.mxu1  ;;  %v4771_v20 = vmul.f32 %v6673_v29, %v4770_v13 }
 0xf8d   : > { %v6675_v49 = vpop.eup %6674  ;;  %v4887_v8 = vadd.f32 %v4864_v1, %v11169_v2 }
 0xf8e   : > { %v4918_v0 = vmul.f32 %v6675_v49, %v4910_v16  ;;  %v4772_v41 = vadd.f32 %v6673_v29, %v4771_v20  ;;  %v7101_v20 = vld [vmem:[%s10973_s3 + $0x58] sm:$0xff] }
 0xf8f   : > { %6676 = vtanh.f32 %v4887_v8 }
 0xf90   : > { %v10565_v46 = vadd.f32 %v4918_v0, %v4902_v24  ;;  %v4776_v37 = vsel %vm4775_vm11, %v6673_v29, %v4772_v41  ;;  %v7104_v41 = vld [vmem:[%s10973_s3 + $0x70] sm:$0xff] }
 0xf91   : > { %v4781_v60 = vsel %vm4778_vm12, %v4780_v39, %v4776_v37  ;;  %v741_v37 = vrot.slane %v11153_v47, 2 }
 0xf92   : > { %4958 = vmatmul.f32.gmra.mxu3 %v10565_v46  ;;  %4999 = vmatmul.f32.gmra.mxu1 %v10565_v46  ;;  %v4913_v36 = vsub.f32 1.0, %v4781_v60  ;;  %v4905_v52 = vmul.f32 %v4781_v60, %v10180_v4  ;;  %v11172_v60 = vld [vmem:[#allocation54_spill] sm:$0xff] }
 0xf94   : > { %v4867_v35 = vpop.f32.mrf.mxu1 }
 0xf95   : > { %v6677_v55 = vpop.eup %6676  ;;  %v4888_v5 = vadd.f32 %v4867_v35, %v11170_v51  ;;  %v7094_v35 = vld [vmem:[%s10973_s3 + $0x20] sm:$0xff]  ;;  %v7096_v51 = vld [vmem:[%s10973_s3 + $0x30] sm:$0xff] }
 0xf96   : > { %v4919_v12 = vmul.f32 %v6677_v55, %v4911_v38  ;;  %v7092_v38 = vld [vmem:[%s10973_s3 + $0x10] sm:$0xff]  ;;  %v7095_v55 = vld [vmem:[%s10973_s3 + $0x28] sm:$0xff] }
 0xf97   : > { %6678 = vtanh.f32 %v4888_v5  ;;  %v7097_v5 = vld [vmem:[%s10973_s3 + $0x38] sm:$0xff] }
 0xf98   : > { %v10577_v54 = vadd.f32 %v4919_v12, %v4903_v17  ;;  %v7098_v12 = vld [vmem:[%s10973_s3 + $0x40] sm:$0xff]  ;;  %v7100_v17 = vld [vmem:[%s10973_s3 + $0x50] sm:$0xff] }
 0xf9a   : > { %4961 = vmatmul.f32.gmra.mxu3 %v10577_v54  ;;  %5002 = vmatmul.f32.gmra.mxu1 %v10577_v54 }
 0xf9c   : > { %v4870_v21 = vpop.f32.mrf.mxu1 }
 0xf9d   : > { %v6679_v50 = vpop.eup %6678  ;;  %v4889_v58 = vadd.f32 %v4870_v21, %v11171_v48 }
 0xf9e   : > { %v4920_v33 = vmul.f32 %v6679_v50, %v4912_v61 }
 0xf9f   : > { %6680 = vtanh.f32 %v4889_v58 }
 0xfa0   : > { %v10586_v32 = vadd.f32 %v4920_v33, %v4904_v42 }
 0xfa2   : > { %4964 = vmatmul.f32.gmra.mxu3 %v10586_v32  ;;  %5005 = vmatmul.f32.gmra.mxu1 %v10586_v32 }
 0xfa5   : > { %v6681_v62 = vpop.eup %6680 }
 0xfa6   : > { %v4921_v23 = vmul.f32 %v6681_v62, %v4913_v36  ;;  %v781_v62 = vperm.slane %v741_v37, 0 }
 0xfa8   : > { %v10591_v16 = vadd.f32 %v4921_v23, %v4905_v52 }
 0xfaa   : > { %4967 = vmatmul.f32.gmra.mxu3 %v10591_v16  ;;  %5008 = vmatmul.f32.gmra.mxu1 %v10591_v16 }
 0xfef   : > { %v4988_v28 = vpop.f32.mrf.mxu1 }
 0xff5   : > { %v4947_v29 = vpop.f32.mrf.mxu3 }
 0xff7   : > { %v4991_v26 = vpop.f32.mrf.mxu1 }
 0xffd   : > { %v4950_v1 = vpop.f32.mrf.mxu3 }
 0xfff   : > { %v4994_v49 = vpop.f32.mrf.mxu1 }
0x1005   : > { %v4953_v2 = vpop.f32.mrf.mxu3 }
0x1007   : > { %v4997_v8 = vpop.f32.mrf.mxu1 }
0x100d   : > { %v4956_v24 = vpop.f32.mrf.mxu3 }
0x100f   : > { %v5000_v7 = vpop.f32.mrf.mxu1 }
0x1015   : > { %v4959_v0 = vpop.f32.mrf.mxu3 }
0x1017   : > { %v5003_v25 = vpop.f32.mrf.mxu1 }
0x101d   : > { %v4962_v45 = vpop.f32.mrf.mxu3 }
0x101f   : > { %v5006_v3 = vpop.f32.mrf.mxu1 }
0x1025   : > { %v4965_v4 = vpop.f32.mrf.mxu3 }
0x1027   : > { %v5009_v53 = vpop.f32.mrf.mxu1 }
0x1028   : > { %5085 = vmatpush.msrb.mxu0 %v5009_v53 }
0x102a   : > { %5086 = vmatpush.msrb.mxu0 %v5006_v3  ;;  %v10700_v3 = vld [vmem:[%s10975_s5 + $0x8] sm:$0xff] }
0x102c   : > { %5087 = vmatpush.msrb.mxu0 %v5003_v25 }
0x102d   : > { %v4968_v13 = vpop.f32.mrf.mxu3 }
0x102e   : > { %5020 = vmatpush.msra.mxu2 %v4968_v13  ;;  %5088 = vmatpush.msrb.mxu0 %v5000_v7  ;;  %v11174_v13 = vld [vmem:[#allocation56_spill] sm:$0xff] }
0x1030   : > { %5021 = vmatpush.msra.mxu2 %v4965_v4  ;;  %5089 = vmatpush.msrb.mxu0 %v4997_v8  ;;  %v836_v4 = vmul.f32 %v10700_v3, %v781_v62 }
0x1032   : > { %5022 = vmatpush.msra.mxu2 %v4962_v45  ;;  %5090 = vmatpush.msrb.mxu0 %v4994_v49 }
0x1034   : > { %5023 = vmatpush.msra.mxu2 %v4959_v0  ;;  %5091 = vmatpush.msrb.mxu0 %v4991_v26 }
0x1036   : > { %5024 = vmatpush.msra.mxu2 %v4956_v24  ;;  %5092 = vmatpush.msrb.mxu0 %v4988_v28  ;;  %v10684_v28 = vld [vmem:[%s10975_s5] sm:$0xff] }
0x1037   : > { %6116 = vmatmul.msk.f32.vlgmr.msrb.gmra.mxu0 %vm1377_vm0, %v7090_v22 }
0x1038   : > { %5025 = vmatpush.msra.mxu2 %v4953_v2  ;;  %v10692_v2 = vld [vmem:[#allocation11] sm:$0xff] }
0x103a   : > { %5026 = vmatpush.msra.mxu2 %v4950_v1  ;;  %v11173_v1 = vld [vmem:[#allocation55_spill] sm:$0xff] }
0x103c   : > { %5027 = vmatpush.msra.mxu2 %v4947_v29  ;;  %v835_v29 = vmul.f32 %v10684_v28, %v781_v62 }
0x103d   : > { %6100 = vmatmul.msk.f32.vlgmr.msra.gmra.mxu2 %vm1377_vm0, %v7090_v22 }
0x103e   : > { %v887_v8 = vadd.f32 %v10692_v2, %v835_v29 }
0x103f   : > { %6117 = vmatmul.msk.f32.gmra.mxu0 %vm1377_vm0, %v7091_v9 }
0x1045   : > { %6101 = vmatmul.msk.f32.gmra.mxu2 %vm1377_vm0, %v7091_v9  ;;  %v10708_v9 = vld [vmem:[#allocation11 + $0x8] sm:$0xff] }
0x1047   : > { %6118 = vmatmul.msk.f32.gmra.mxu0 %vm1377_vm0, %v7092_v38 }
0x104d   : > { %6102 = vmatmul.msk.f32.gmra.mxu2 %vm1377_vm0, %v7092_v38  ;;  %v888_v38 = vadd.f32 %v10708_v9, %v836_v4 }
0x104f   : > { %6119 = vmatmul.msk.f32.gmra.mxu0 %vm1377_vm0, %v7093_v31 }
0x1055   : > { %6103 = vmatmul.msk.f32.gmra.mxu2 %vm1377_vm0, %v7093_v31 }
0x1057   : > { %6120 = vmatmul.msk.f32.gmra.mxu0 %vm1377_vm0, %v7094_v35 }
0x105d   : > { %6104 = vmatmul.msk.f32.gmra.mxu2 %vm1377_vm0, %v7094_v35 }
0x105f   : > { %6121 = vmatmul.msk.f32.gmra.mxu0 %vm1377_vm0, %v7095_v55 }
0x1065   : > { %6105 = vmatmul.msk.f32.gmra.mxu2 %vm1377_vm0, %v7095_v55 }
0x1067   : > { %6122 = vmatmul.msk.f32.gmra.mxu0 %vm1377_vm0, %v7096_v51 }
0x106d   : > { %6106 = vmatmul.msk.f32.gmra.mxu2 %vm1377_vm0, %v7096_v51 }
0x106f   : > { %6123 = vmatmul.msk.f32.gmra.mxu0 %vm1377_vm0, %v7097_v5 }
0x1075   : > { %6107 = vmatmul.msk.f32.gmra.mxu2 %vm1377_vm0, %v7097_v5 }
0x1077   : > { %6124 = vmatmul.msk.f32.gmra.mxu0 %vm1377_vm0, %v7098_v12 }
0x107d   : > { %6108 = vmatmul.msk.f32.gmra.mxu2 %vm1377_vm0, %v7098_v12 }
0x107f   : > { %6125 = vmatmul.msk.f32.gmra.mxu0 %vm1377_vm0, %v7099_v30 }
0x1085   : > { %6109 = vmatmul.msk.f32.gmra.mxu2 %vm1377_vm0, %v7099_v30  ;;  %v10716_v30 = vld [vmem:[%s10975_s5 + $0x10] sm:$0xff] }
0x1087   : > { %6126 = vmatmul.msk.f32.gmra.mxu0 %vm1377_vm0, %v7100_v17 }
0x108d   : > { %6110 = vmatmul.msk.f32.gmra.mxu2 %vm1377_vm0, %v7100_v17  ;;  %v837_v17 = vmul.f32 %v10716_v30, %v781_v62 }
0x108f   : > { %6127 = vmatmul.msk.f32.gmra.mxu0 %vm1377_vm0, %v7101_v20 }
0x1095   : > { %6111 = vmatmul.msk.f32.gmra.mxu2 %vm1377_vm0, %v7101_v20 }
0x1097   : > { %6128 = vmatmul.msk.f32.gmra.mxu0 %vm1377_vm0, %v7102_v10 }
0x109d   : > { %6112 = vmatmul.msk.f32.gmra.mxu2 %vm1377_vm0, %v7102_v10 }
0x109f   : > { %6129 = vmatmul.msk.f32.gmra.mxu0 %vm1377_vm0, %v7103_v34 }
0x10a5   : > { %6113 = vmatmul.msk.f32.gmra.mxu2 %vm1377_vm0, %v7103_v34  ;;  %v11175_v34 = vld [vmem:[#allocation57_spill] sm:$0xff] }
0x10a7   : > { %6130 = vmatmul.msk.f32.gmra.mxu0 %vm1377_vm0, %v7104_v41 }
0x10ad   : > { %6114 = vmatmul.msk.f32.gmra.mxu2 %vm1377_vm0, %v7104_v41 }
0x10af   : > { %6131 = vmatmul.msk.f32.gmra.mxu0 %vm1377_vm0, %v7105_v6 }
0x10b4   : > { %v5094_v61 = vpop.f32.mrf.mxu0 }
0x10b5   : > { %6115 = vmatmul.msk.f32.gmra.mxu2 %vm1377_vm0, %v7105_v6  ;;  %v10724_v6 = vld [vmem:[#allocation11 + $0x10] sm:$0xff] }
0x10bc   : > { %v5097_v40 = vpop.f32.mrf.mxu0 }
0x10c0   : > { %v5029_v21 = vpop.f32.mrf.mxu2 }
0x10c4   : > { %v5100_v50 = vpop.f32.mrf.mxu0 }
0x10c8   : > { %v5032_v48 = vpop.f32.mrf.mxu2 }
0x10cc   : > { %v5103_v58 = vpop.f32.mrf.mxu0 }
0x10d0   : > { %v5035_v33 = vpop.f32.mrf.mxu2 }
0x10d4   : > { %v5106_v42 = vpop.f32.mrf.mxu0 }
0x10d5   : > { %v5319_v39 = vsel %vm648_vm15, %v5106_v42, %v5094_v61  ;;  %v889_v61 = vadd.f32 %v10724_v6, %v837_v17 }
0x10d6   : > { %v10679_v36 = vadd.f32 %v5319_v39, %v11172_v60 }
0x10d8   : > { %v5038_v23 = vpop.f32.mrf.mxu2 }
0x10dc   : > { %v5109_v52 = vpop.f32.mrf.mxu0 }
0x10dd   : > { %v5320_v26 = vsel %vm649_vm5, %v5109_v52, %v5097_v40 }
0x10de   : > { %v10690_v49 = vadd.f32 %v5320_v26, %v11173_v1  ;;  %v10735_v26 = vld [vmem:[#allocation11 + $0x18] sm:$0xff] }
0x10e0   : > { %v5041_v24 = vpop.f32.mrf.mxu2 }
0x10e1   : > { %v5142_v7 = vsel %vm632_vm1, %v5041_v24, %v5029_v21 }
0x10e2   : > { %v5159_v0 = vadd.f32 %v5142_v7, %v887_v8 }
0x10e4   : > { %v6132_v25 = vmul.f32 -1.442695, %v5159_v0  ;;  %v5112_v45 = vpop.f32.mrf.mxu0 }
0x10e5   : > { %v5321_v53 = vsel %vm650_vm6, %v5112_v45, %v5100_v50 }
0x10e6   : > { %6682 = vpow2.f32 %v6132_v25  ;;  %v10706_v22 = vadd.f32 %v5321_v53, %v11174_v13 }
0x10e8   : > { %v5044_v31 = vpop.f32.mrf.mxu2 }
0x10e9   : > { %v5143_v35 = vsel %vm633_vm2, %v5044_v31, %v5032_v48 }
0x10ea   : > { %v5160_v55 = vadd.f32 %v5143_v35, %v888_v38 }
0x10ec   : > { %v6683_v51 = vpop.eup %6682  ;;  %v6133_v5 = vmul.f32 -1.442695, %v5160_v55  ;;  %v5115_v12 = vpop.f32.mrf.mxu0 }
0x10ed   : > { %v5191_v20 = vadd.f32 1.0, %v6683_v51  ;;  %v5322_v10 = vsel %vm651_vm7, %v5115_v12, %v5103_v58  ;;  %v10732_v58 = vld [vmem:[%s10975_s5 + $0x18] sm:$0xff] }
0x10ee   : > { %6684 = vpow2.f32 %v6133_v5  ;;  %v10722_v41 = vadd.f32 %v5322_v10, %v11175_v34  ;;  %v838_v42 = vmul.f32 %v10732_v58, %v781_v62 }
0x10ef   : > { %6686 = vrcp.f32 %v5191_v20  ;;  %v5210_v24 = vand.u32 2147483648, %v5191_v20  ;;  %v5208_v25 = vand.u32 2147483647, %v5191_v20  ;;  %vm5204_vm4 = vweird.f32 %v5191_v20 }
0x10f0   : > { %v5047_v40 = vpop.f32.mrf.mxu2 }
0x10f1   : > { %v5144_v21 = vsel %vm634_vm3, %v5047_v40, %v5035_v33  ;;  %v890_v33 = vadd.f32 %v10735_v26, %v838_v42  ;;  %v5211_v38 = vor.u32 1.1754944e-38, %v5210_v24  ;;  %vm5209_vm9 = vcmp.eq.f32.partialorder %v5208_v25, 8.507059e+37 }
0x10f2   : > { %v5161_v50 = vadd.f32 %v5144_v21, %v889_v61 }
0x10f4   : > { %v6685_v48 = vpop.eup %6684  ;;  %v6134_v37 = vmul.f32 -1.442695, %v5161_v50 }
0x10f5   : > { %v6687_v39 = vpop.eup %6686  ;;  %v5192_v60 = vadd.f32 1.0, %v6685_v48 }
0x10f6   : > { %v5200_v52 = vmul.f32 %v6687_v39, %v5191_v20  ;;  %6688 = vpow2.f32 %v6134_v37  ;;  %vm5205_vm14 = vweird.f32 %v6687_v39 }
0x10f7   : > { %6690 = vrcp.f32 %v5192_v60  ;;  %vm5206_vm8 = vmor %vm5204_vm4, %vm5205_vm14  ;;  %v5225_v12 = vand.u32 2147483648, %v5192_v60  ;;  %v5223_v20 = vand.u32 2147483647, %v5192_v60  ;;  %vm5219_vm11 = vweird.f32 %v5192_v60 }
0x10f8   : > { %v5201_v29 = vsub.f32 1.0, %v5200_v52  ;;  %v5050_v1 = vpop.f32.mrf.mxu2 }
0x10f9   : > { %v5145_v8 = vsel %vm11176_vm13, %v5050_v1, %v5038_v23  ;;  %v5226_v21 = vor.u32 1.1754944e-38, %v5225_v12  ;;  %vm5224_vm13 = vcmp.eq.f32.partialorder %v5223_v20, 8.507059e+37 }
0x10fa   : > { %v5202_v7 = vmul.f32 %v6687_v39, %v5201_v29  ;;  %v5162_v0 = vadd.f32 %v5145_v8, %v890_v33 }
0x10fc   : > { %v6689_v62 = vpop.eup %6688  ;;  %v6135_v45 = vmul.f32 -1.442695, %v5162_v0  ;;  %v5203_v4 = vadd.f32 %v6687_v39, %v5202_v7 }
0x10fd   : > { %v6691_v53 = vpop.eup %6690  ;;  %v5193_v13 = vadd.f32 1.0, %v6689_v62 }
0x10fe   : > { %6692 = vpow2.f32 %v6135_v45  ;;  %v5207_v31 = vsel %vm5206_vm8, %v6687_v39, %v5203_v4  ;;  %v5215_v35 = vmul.f32 %v6691_v53, %v5192_v60  ;;  %vm5220_vm10 = vweird.f32 %v6691_v53 }
0x10ff   : > { %6694 = vrcp.f32 %v5193_v13  ;;  %v5212_v55 = vsel %vm5209_vm9, %v5211_v38, %v5207_v31  ;;  %vm5221_vm12 = vmor %vm5219_vm11, %vm5220_vm10  ;;  %v5240_v29 = vand.u32 2147483648, %v5193_v13  ;;  %v5238_v1 = vand.u32 2147483647, %v5193_v13 }
0x1100   : > { %v5053_v23 = vpop.f32.mrf.mxu2  ;;  %v5496_v51 = vmul.f32 %v5212_v55, %v10491_v44  ;;  %v5216_v5 = vsub.f32 1.0, %v5215_v35  ;;  %vm5234_vm4 = vweird.f32 %v5193_v13  ;;  %v742_v35 = vrot.slane %v11153_v47, 3 }
0x1101   : > { %v5241_v24 = vor.u32 1.1754944e-38, %v5240_v29  ;;  %vm5239_vm9 = vcmp.eq.f32.partialorder %v5238_v1, 8.507059e+37 }
0x1102   : > { %5520 = vmatmul.f32.vlgmr.msrb.gmra.mxu3 %v5496_v51  ;;  %v5217_v17 = vmul.f32 %v6691_v53, %v5216_v5  ;;  %v782_v12 = vperm.slane %v742_v35, 0 }
0x1104   : > { %v6693_v10 = vpop.eup %6692  ;;  %v5218_v34 = vadd.f32 %v6691_v53, %v5217_v17  ;;  %v842_v18 = vmul.f32 %v10732_v58, %v782_v12 }
0x1105   : > { %v6695_v61 = vpop.eup %6694  ;;  %v5194_v40 = vadd.f32 1.0, %v6693_v10  ;;  %v839_v10 = vmul.f32 %v10684_v28, %v782_v12 }
0x1106   : > { %v5222_v50 = vsel %vm5221_vm12, %v6691_v53, %v5218_v34  ;;  %v5230_v48 = vmul.f32 %v6695_v61, %v5193_v13  ;;  %vm5235_vm14 = vweird.f32 %v6695_v61 }
0x1107   : > { %6696 = vrcp.f32 %v5194_v40  ;;  %v5227_v37 = vsel %vm5224_vm13, %v5226_v21, %v5222_v50  ;;  %vm5236_vm8 = vmor %vm5234_vm4, %vm5235_vm14  ;;  %v5255_v53 = vand.u32 2147483648, %v5194_v40  ;;  %v5253_v31 = vand.u32 2147483647, %v5194_v40 }
0x1108   : > { %v5056_v42 = vpop.f32.mrf.mxu2  ;;  %v5497_v39 = vmul.f32 %v5227_v37, %v10511_v19  ;;  %v5231_v52 = vsub.f32 1.0, %v5230_v48  ;;  %vm5249_vm11 = vweird.f32 %v5194_v40  ;;  %v891_v34 = vadd.f32 %v10692_v2, %v839_v10 }
0x1109   : > { %v5256_v13 = vor.u32 1.1754944e-38, %v5255_v53  ;;  %vm5254_vm13 = vcmp.eq.f32.partialorder %v5253_v31, 8.507059e+37  ;;  %v840_v50 = vmul.f32 %v10700_v3, %v782_v12  ;;  %v841_v2 = vmul.f32 %v10716_v30, %v782_v12 }
0x110a   : > { %5523 = vmatmul.f32.gmra.mxu3 %v5497_v39  ;;  %v5232_v33 = vmul.f32 %v6695_v61, %v5231_v52  ;;  %v894_v30 = vadd.f32 %v10735_v26, %v842_v18 }
0x110b   : > { %v892_v48 = vadd.f32 %v10708_v9, %v840_v50  ;;  %v893_v11 = vadd.f32 %v10724_v6, %v841_v2 }
0x110c   : > { %v5233_v8 = vadd.f32 %v6695_v61, %v5232_v33 }
0x110d   : > { %v6697_v60 = vpop.eup %6696 }
0x110e   : > { %v5237_v7 = vsel %vm5236_vm8, %v6695_v61, %v5233_v8  ;;  %v5245_v0 = vmul.f32 %v6697_v60, %v5194_v40  ;;  %vm5250_vm10 = vweird.f32 %v6697_v60 }
0x110f   : > { %v5242_v25 = vsel %vm5239_vm9, %v5241_v24, %v5237_v7  ;;  %vm5251_vm12 = vmor %vm5249_vm11, %vm5250_vm10 }
0x1110   : > { %v5059_v62 = vpop.f32.mrf.mxu2  ;;  %v5498_v45 = vmul.f32 %v5242_v25, %v10531_v43  ;;  %v5246_v4 = vsub.f32 1.0, %v5245_v0 }
0x1112   : > { %5526 = vmatmul.f32.gmra.mxu3 %v5498_v45  ;;  %v5247_v38 = vmul.f32 %v6697_v60, %v5246_v4 }
0x1114   : > { %v5248_v55 = vadd.f32 %v6697_v60, %v5247_v38 }
0x1116   : > { %v5252_v51 = vsel %vm5251_vm12, %v6697_v60, %v5248_v55 }
0x1117   : > { %v5257_v5 = vsel %vm5254_vm13, %v5256_v13, %v5252_v51 }
0x1118   : > { %v5062_v17 = vpop.f32.mrf.mxu2  ;;  %v5499_v20 = vmul.f32 %v5257_v5, %v10551_v56 }
0x111a   : > { %5529 = vmatmul.f32.gmra.mxu3 %v5499_v20 }
0x1120   : > { %v5065_v61 = vpop.f32.mrf.mxu2 }
0x1121   : > { %v5146_v47 = vsel %vm632_vm1, %v5065_v61, %v5053_v23  ;;  %vm11177_vm1 = vcmp.gt.f32.partialorder %v8296_v57, 0.5 }
0x1122   : > { %v5163_v21 = vadd.f32 %v5146_v47, %v891_v34 }
0x1124   : > { %v6136_v40 = vmul.f32 -1.442695, %v5163_v21 }
0x1126   : > { %6698 = vpow2.f32 %v6136_v40 }
0x1128   : > { %v5068_v37 = vpop.f32.mrf.mxu2 }
0x1129   : > { %v5147_v39 = vsel %vm633_vm2, %v5068_v37, %v5056_v42 }
0x112a   : > { %v5164_v52 = vadd.f32 %v5147_v39, %v892_v48 }
0x112c   : > { %v6699_v29 = vpop.eup %6698  ;;  %v6137_v28 = vmul.f32 -1.442695, %v5164_v52 }
0x112d   : > { %v5195_v33 = vadd.f32 1.0, %v6699_v29 }
0x112e   : > { %6700 = vpow2.f32 %v6137_v28 }
0x112f   : > { %6702 = vrcp.f32 %v5195_v33  ;;  %v5270_v25 = vand.u32 2147483648, %v5195_v33  ;;  %v5268_v45 = vand.u32 2147483647, %v5195_v33 }
0x1130   : > { %v5071_v23 = vpop.f32.mrf.mxu2 }
0x1131   : > { %v5148_v3 = vsel %vm634_vm3, %v5071_v23, %v5059_v62  ;;  %vm5264_vm3 = vweird.f32 %v5195_v33  ;;  %v5271_v35 = vor.u32 1.1754944e-38, %v5270_v25  ;;  %vm5269_vm4 = vcmp.eq.f32.partialorder %v5268_v45, 8.507059e+37 }
0x1132   : > { %v5165_v1 = vadd.f32 %v5148_v3, %v893_v11 }
0x1134   : > { %v6701_v9 = vpop.eup %6700  ;;  %v6138_v8 = vmul.f32 -1.442695, %v5165_v1 }
0x1135   : > { %v6703_v42 = vpop.eup %6702  ;;  %v5196_v60 = vadd.f32 1.0, %v6701_v9 }
0x1136   : > { %6704 = vpow2.f32 %v6138_v8  ;;  %v5260_v24 = vmul.f32 %v6703_v42, %v5195_v33  ;;  %vm5265_vm2 = vweird.f32 %v6703_v42 }
0x1137   : > { %6706 = vrcp.f32 %v5196_v60  ;;  %vm5266_vm14 = vmor %vm5264_vm3, %vm5265_vm2  ;;  %v5285_v5 = vand.u32 2147483648, %v5196_v60  ;;  %vm5279_vm9 = vweird.f32 %v5196_v60 }
0x1138   : > { %v5074_v7 = vpop.f32.mrf.mxu2  ;;  %v5261_v0 = vsub.f32 1.0, %v5260_v24 }
0x1139   : > { %v5149_v6 = vsel %vm11177_vm1, %v5074_v7, %v5062_v17  ;;  %v5283_v17 = vand.u32 2147483647, %v5196_v60  ;;  %v5286_v47 = vor.u32 1.1754944e-38, %v5285_v5  ;;  %v5118_v5 = vpop.f32.mrf.mxu0 }
0x113a   : > { %v5166_v15 = vadd.f32 %v5149_v6, %v894_v30  ;;  %v5262_v62 = vmul.f32 %v6703_v42, %v5261_v0 }
0x113b   : > { %vm5284_vm11 = vcmp.eq.f32.partialorder %v5283_v17, 8.507059e+37 }
0x113c   : > { %v6705_v4 = vpop.eup %6704  ;;  %v6139_v53 = vmul.f32 -1.442695, %v5166_v15  ;;  %v5263_v58 = vadd.f32 %v6703_v42, %v5262_v62 }
0x113d   : > { %v6707_v38 = vpop.eup %6706  ;;  %v5197_v31 = vadd.f32 1.0, %v6705_v4 }
0x113e   : > { %6708 = vpow2.f32 %v6139_v53  ;;  %v5267_v26 = vsel %vm5266_vm14, %v6703_v42, %v5263_v58  ;;  %v5275_v55 = vmul.f32 %v6707_v38, %v5196_v60  ;;  %vm5280_vm8 = vweird.f32 %v6707_v38 }
0x113f   : > { %6710 = vrcp.f32 %v5197_v31  ;;  %v5272_v57 = vsel %vm5269_vm4, %v5271_v35, %v5267_v26  ;;  %vm5281_vm10 = vmor %vm5279_vm9, %vm5280_vm8  ;;  %v5300_v39 = vand.u32 2147483648, %v5197_v31  ;;  %v5298_v29 = vand.u32 2147483647, %v5197_v31  ;;  %v7116_v35 = vld [vmem:[%s10974_s4 + $0x10] sm:$0xff]  ;;  %v7117_v26 = vld [vmem:[%s10974_s4 + $0x18] sm:$0xff] }
0x1140   : > { %v5500_v13 = vmul.f32 %v5272_v57, %v10565_v46  ;;  %v5276_v51 = vsub.f32 1.0, %v5275_v55  ;;  %vm5294_vm13 = vweird.f32 %v5197_v31  ;;  %v7118_v55 = vld [vmem:[%s10974_s4 + $0x20] sm:$0xff]  ;;  %v7119_v57 = vld [vmem:[%s10974_s4 + $0x28] sm:$0xff] }
0x1141   : > { %v5301_v33 = vor.u32 1.1754944e-38, %v5300_v39  ;;  %vm5299_vm2 = vcmp.eq.f32.partialorder %v5298_v29, 8.507059e+37  ;;  %v6143_v39 = vmul.f32 -1.442695, %v10722_v41 }
0x1142   : > { %5532 = vmatmul.f32.gmra.mxu3 %v5500_v13  ;;  %v5277_v12 = vmul.f32 %v6707_v38, %v5276_v51  ;;  %v7120_v13 = vld [vmem:[%s10974_s4 + $0x30] sm:$0xff]  ;;  %v7121_v51 = vld [vmem:[%s10974_s4 + $0x38] sm:$0xff] }
0x1144   : > { %v6709_v20 = vpop.eup %6708  ;;  %v5278_v10 = vadd.f32 %v6707_v38, %v5277_v12  ;;  %v5121_v12 = vpop.f32.mrf.mxu0 }
0x1145   : > { %v6711_v34 = vpop.eup %6710  ;;  %v5198_v61 = vadd.f32 1.0, %v6709_v20  ;;  %v6140_v20 = vmul.f32 -1.442695, %v10679_v36 }
0x1146   : > { %v5282_v21 = vsel %vm5281_vm10, %v6707_v38, %v5278_v10  ;;  %v5290_v40 = vmul.f32 %v6711_v34, %v5197_v31  ;;  %vm5295_vm12 = vweird.f32 %v6711_v34  ;;  %v7114_v38 = vld [vmem:[%s10974_s4] sm:$0xff]  ;;  %v7115_v31 = vld [vmem:[%s10974_s4 + $0x8] sm:$0xff] }
0x1147   : > { %6712 = vrcp.f32 %v5198_v61  ;;  %v5287_v50 = vsel %vm5284_vm11, %v5286_v47, %v5282_v21  ;;  %vm5296_vm1 = vmor %vm5294_vm13, %vm5295_vm12  ;;  %v5315_v8 = vand.u32 2147483648, %v5198_v61  ;;  %v5313_v42 = vand.u32 2147483647, %v5198_v61 }
0x1148   : > { %v5501_v48 = vmul.f32 %v5287_v50, %v10577_v54  ;;  %v5291_v37 = vsub.f32 1.0, %v5290_v40  ;;  %vm5309_vm14 = vweird.f32 %v5198_v61  ;;  %6714 = vpow2.f32 %v6140_v20 }
0x1149   : > { %v5316_v24 = vor.u32 1.1754944e-38, %v5315_v8  ;;  %vm5314_vm8 = vcmp.eq.f32.partialorder %v5313_v42, 8.507059e+37  ;;  %v6142_v21 = vmul.f32 -1.442695, %v10706_v22 }
0x114a   : > { %5535 = vmatmul.f32.gmra.mxu3 %v5501_v48  ;;  %v5292_v52 = vmul.f32 %v6711_v34, %v5291_v37 }
0x114c   : > { %v5293_v28 = vadd.f32 %v6711_v34, %v5292_v52  ;;  %v5124_v17 = vpop.f32.mrf.mxu0 }
0x114d   : > { %v6713_v2 = vpop.eup %6712 }
0x114e   : > { %v5297_v11 = vsel %vm5296_vm1, %v6711_v34, %v5293_v28  ;;  %v5305_v23 = vmul.f32 %v6713_v2, %v5198_v61  ;;  %vm5310_vm3 = vweird.f32 %v6713_v2  ;;  %v6141_v34 = vmul.f32 -1.442695, %v10690_v49  ;;  %v6715_v61 = vpop.eup %6714  ;;  %v11178_v28 = vld [vmem:[#allocation58_spill] sm:$0xff] }
0x114f   : > { %v5302_v3 = vsel %vm5299_vm2, %v5301_v33, %v5297_v11  ;;  %vm5311_vm4 = vmor %vm5309_vm14, %vm5310_vm3  ;;  %v5368_v47 = vadd.f32 1.0, %v6715_v61 }
0x1150   : > { %v5502_v1 = vmul.f32 %v5302_v3, %v10586_v32  ;;  %v5306_v9 = vsub.f32 1.0, %v5305_v23  ;;  %6716 = vpow2.f32 %v6141_v34 }
0x1151   : > { %6718 = vrcp.f32 %v5368_v47  ;;  %v5385_v14 = vand.u32 2147483647, %v5368_v47 }
0x1152   : > { %5538 = vmatmul.f32.gmra.mxu3 %v5502_v1  ;;  %v5307_v18 = vmul.f32 %v6713_v2, %v5306_v9  ;;  %6720 = vpow2.f32 %v6142_v21  ;;  %v11179_v9 = vld [vmem:[#allocation59_spill] sm:$0xff] }
0x1153   : > { %vm5386_vm9 = vcmp.eq.f32.partialorder %v5385_v14, 8.507059e+37 }
0x1154   : > { %v5308_v60 = vadd.f32 %v6713_v2, %v5307_v18  ;;  %v10798_v10 = vpop.f32.mrf.mxu0 }
0x1156   : > { %v5312_v30 = vsel %vm5311_vm4, %v6713_v2, %v5308_v60  ;;  %v6717_v50 = vpop.eup %6716 }
0x1157   : > { %v5317_v7 = vsel %vm5314_vm8, %v5316_v24, %v5312_v30  ;;  %v10802_v48 = vadd.f32 1.0, %v6717_v50  ;;  %v6719_v37 = vpop.eup %6718 }
0x1158   : > { %v5503_v0 = vmul.f32 %v5317_v7, %v10591_v16  ;;  %v6721_v49 = vpop.eup %6720  ;;  %v5377_v52 = vmul.f32 %v6719_v37, %v5368_v47  ;;  %v5387_v7 = vand.u32 2147483648, %v5368_v47 }
0x1159   : > { %6722 = vrcp.f32 %v10802_v48  ;;  %v10809_v2 = vadd.f32 1.0, %v6721_v49  ;;  %vm5396_vm10 = vweird.f32 %v10802_v48  ;;  %v5400_v20 = vand.u32 2147483647, %v10802_v48 }
0x115a   : > { %5541 = vmatmul.f32.gmra.mxu3 %v5503_v0  ;;  %6724 = vpow2.f32 %v6143_v39  ;;  %v5378_v33 = vsub.f32 1.0, %v5377_v52 }
0x115b   : > { %6726 = vrcp.f32 %v10809_v2  ;;  %vm5411_vm13 = vweird.f32 %v10809_v2 }
0x115c   : > { %v5130_v40 = vpop.f32.mrf.mxu0  ;;  %v5379_v1 = vmul.f32 %v6719_v37, %v5378_v33 }
0x115d   : > { %v5323_v36 = vsel %vm648_vm15, %v5130_v40, %v5118_v5  ;;  %vm5381_vm15 = vweird.f32 %v5368_v47  ;;  %v5402_v5 = vand.u32 2147483648, %v10802_v48  ;;  %v11182_v40 = vld [vmem:[#allocation90_spill] sm:$0xff] }
0x115e   : > { %v5340_v22 = vadd.f32 %v5323_v36, %v11178_v28  ;;  %v5380_v24 = vadd.f32 %v6719_v37, %v5379_v1 }
0x115f   : > { %v10811_v11 = vpop.eup %6722  ;;  %v5403_v52 = vor.u32 1.1754944e-38, %v5402_v5 }
0x1160   : > { %v6144_v23 = vmul.f32 -1.442695, %v5340_v22  ;;  %v6725_v3 = vpop.eup %6724  ;;  %v5392_v27 = vmul.f32 %v10811_v11, %v10802_v48 }
0x1161   : > { %v10819_v42 = vadd.f32 1.0, %v6725_v3  ;;  %v10821_v30 = vpop.eup %6726 }
0x1162   : > { %6728 = vpow2.f32 %v6144_v23  ;;  %v5393_v60 = vsub.f32 1.0, %v5392_v27  ;;  %vm5412_vm12 = vweird.f32 %v10821_v30  ;;  %v5417_v23 = vand.u32 2147483648, %v10809_v2 }
0x1163   : > { %6730 = vrcp.f32 %v10819_v42  ;;  %v5415_v27 = vand.u32 2147483647, %v10809_v2  ;;  %vm5413_vm1 = vmor %vm5411_vm13, %vm5412_vm12  ;;  %vm5426_vm14 = vweird.f32 %v10819_v42 }
0x1164   : > { %v5133_v29 = vpop.f32.mrf.mxu0 }
0x1165   : > { %v5324_v41 = vsel %vm649_vm5, %v5133_v29, %v5121_v12  ;;  %v11183_v29 = vld [vmem:[#allocation61_spill] sm:$0xff]  ;;  %vm5416_vm2 = vcmp.eq.f32.partialorder %v5415_v27, 8.507059e+37 }
0x1166   : > { %v5341_v8 = vadd.f32 %v5324_v41, %v11179_v9 }
0x1168   : > { %v6145_v0 = vmul.f32 -1.442695, %v5341_v8 }
0x116c   : > { %v5136_v18 = vpop.f32.mrf.mxu0 }
0x1185   : > { %v5521_v6 = vpop.f32.mrf.mxu3 }
0x118d   : > { %v5524_v25 = vpop.f32.mrf.mxu3 }
0x1195   : > { %v5527_v15 = vpop.f32.mrf.mxu3 }
0x119d   : > { %v5530_v62 = vpop.f32.mrf.mxu3 }
0x11c5   : > { %v5533_v45 = vpop.f32.mrf.mxu3 }
0x11cd   : > { %v5536_v4 = vpop.f32.mrf.mxu3 }
0x11d5   : > { %v5539_v53 = vpop.f32.mrf.mxu3 }
0x11dd   : > { %v5542_v58 = vpop.f32.mrf.mxu3 }
0x11de   : > { %5553 = vmatpush.msrb.mxu1 %v5542_v58  ;;  %v5394_v58 = vmul.f32 %v10811_v11, %v5393_v60 }
0x11e0   : > { %5554 = vmatpush.msrb.mxu1 %v5539_v53 }
0x11e2   : > { %5555 = vmatpush.msrb.mxu1 %v5536_v4  ;;  %v5407_v4 = vmul.f32 %v10821_v30, %v10809_v2  ;;  %v5418_v2 = vor.u32 1.1754944e-38, %v5417_v23 }
0x11e4   : > { %5556 = vmatpush.msrb.mxu1 %v5533_v45  ;;  %v6729_v45 = vpop.eup %6728 }
0x11e6   : > { %5557 = vmatpush.msrb.mxu1 %v5530_v62 }
0x11e8   : > { %5558 = vmatpush.msrb.mxu1 %v5527_v15  ;;  %v11180_v15 = vld [vmem:[#allocation89_spill] sm:$0xff] }
0x11ea   : > { %5559 = vmatpush.msrb.mxu1 %v5524_v25  ;;  %v5325_v25 = vsel %vm650_vm6, %v5136_v18, %v5124_v17  ;;  %vm5397_vm6 = vweird.f32 %v10811_v11  ;;  %v11184_v18 = vld [vmem:[#allocation91_spill] sm:$0xff] }
0x11eb   : > { %vm5398_vm11 = vmor %vm5396_vm10, %vm5397_vm6 }
0x11ec   : > { %5560 = vmatpush.msrb.mxu1 %v5521_v6 }
0x11ed   : > { %6148 = vmatmul.msk.f32.vlgmr.msrb.gmra.mxu1 %vm1377_vm0, %v7114_v38  ;;  %v5388_v38 = vor.u32 1.1754944e-38, %v5387_v7 }
0x11f5   : > { %6149 = vmatmul.msk.f32.gmra.mxu1 %vm1377_vm0, %v7115_v31  ;;  %v11181_v31 = vld [vmem:[#allocation60_spill] sm:$0xff] }
0x11fd   : > { %6150 = vmatmul.msk.f32.gmra.mxu1 %vm1377_vm0, %v7116_v35  ;;  %v5342_v35 = vadd.f32 %v5325_v25, %v11181_v31 }
0x11ff   : > { %v6146_v12 = vmul.f32 -1.442695, %v5342_v35 }
0x1205   : > { %6151 = vmatmul.msk.f32.gmra.mxu1 %vm1377_vm0, %v7117_v26  ;;  %v10831_v26 = vadd.f32 1.0, %v6729_v45 }
0x120d   : > { %6152 = vmatmul.msk.f32.gmra.mxu1 %vm1377_vm0, %v7118_v55  ;;  %v5408_v55 = vsub.f32 1.0, %v5407_v4 }
0x120f   : > { %v5409_v49 = vmul.f32 %v10821_v30, %v5408_v55 }
0x1211   : > { %v5410_v33 = vadd.f32 %v10821_v30, %v5409_v49 }
0x1213   : > { %v5414_v14 = vsel %vm5413_vm1, %v10821_v30, %v5410_v33  ;;  %v5432_v30 = vand.u32 2147483648, %v10819_v42 }
0x1215   : > { %6153 = vmatmul.msk.f32.gmra.mxu1 %vm1377_vm0, %v7119_v57  ;;  %v5139_v57 = vpop.f32.mrf.mxu0 }
0x1216   : > { %v5326_v47 = vsel %vm651_vm7, %v5139_v57, %v10798_v10  ;;  %vm5401_vm7 = vcmp.eq.f32.partialorder %v5400_v20, 8.507059e+37 }
0x1217   : > { %v5343_v63 = vadd.f32 %v5326_v47, %v11183_v29 }
0x1219   : > { %v6147_v41 = vmul.f32 -1.442695, %v5343_v63 }
0x121d   : > { %6154 = vmatmul.msk.f32.gmra.mxu1 %vm1377_vm0, %v7120_v13  ;;  %v5395_v13 = vadd.f32 %v10811_v11, %v5394_v58  ;;  %v5430_v58 = vand.u32 2147483647, %v10819_v42 }
0x121f   : > { %v5399_v48 = vsel %vm5398_vm11, %v10811_v11, %v5395_v13  ;;  %vm5431_vm8 = vcmp.eq.f32.partialorder %v5430_v58, 8.507059e+37 }
0x1220   : > { %v5404_v28 = vsel %vm5401_vm7, %v5403_v52, %v5399_v48  ;;  %v11186_v48 = vld [vmem:[#allocation93_spill] sm:$0xff] }
0x1221   : > { %v5620_v3 = vsub.f32 1.0, %v5404_v28  ;;  %v5612_v8 = vmul.f32 %v5404_v28, %v10511_v19  ;;  %v5419_v19 = vsel %vm5416_vm2, %v5418_v2, %v5414_v14 }
0x1222   : > { %v5613_v35 = vmul.f32 %v5419_v19, %v10531_v43 }
0x1225   : > { %6155 = vmatmul.msk.f32.gmra.mxu1 %vm1377_vm0, %v7121_v51  ;;  %vm5382_vm0 = vweird.f32 %v6719_v37  ;;  %v10836_v51 = vpop.eup %6730 }
0x1226   : > { %vm5383_vm5 = vmor %vm5381_vm15, %vm5382_vm0  ;;  %v5422_v39 = vmul.f32 %v10836_v51, %v10819_v42  ;;  %vm5427_vm3 = vweird.f32 %v10836_v51  ;;  %v5433_v42 = vor.u32 1.1754944e-38, %v5432_v30  ;;  %vm5441_vm15 = vweird.f32 %v10831_v26  ;;  %v11188_v30 = vld [vmem:[#allocation95_spill] sm:$0xff] }
0x1227   : > { %v5384_v53 = vsel %vm5383_vm5, %v6719_v37, %v5380_v24  ;;  %vm5428_vm4 = vmor %vm5426_vm14, %vm5427_vm3 }
0x1228   : > { %v5389_v59 = vsel %vm5386_vm9, %v5388_v38, %v5384_v53  ;;  %v5423_v22 = vsub.f32 1.0, %v5422_v39  ;;  %v5621_v53 = vsub.f32 1.0, %v5419_v19 }
0x1229   : > { %v5619_v17 = vsub.f32 1.0, %v5389_v59  ;;  %v5611_v21 = vmul.f32 %v5389_v59, %v10491_v44  ;;  %v11185_v59 = vld [vmem:[#allocation92_spill] sm:$0xff] }
0x126a   : > { %v5562_v6 = vpop.f32.mrf.mxu1 }
0x126b   : > { %v5595_v62 = vadd.f32 %v5562_v6, %v11180_v15  ;;  %v5424_v6 = vmul.f32 %v10836_v51, %v5423_v22 }
0x126d   : > { %6732 = vtanh.f32 %v5595_v62  ;;  %v5425_v45 = vadd.f32 %v10836_v51, %v5424_v6 }
0x126e   : > { %6734 = vpow2.f32 %v6145_v0 }
0x126f   : > { %6736 = vrcp.f32 %v10831_v26 }
0x1272   : > { %v5565_v34 = vpop.f32.mrf.mxu1 }
0x1273   : > { %v6733_v61 = vpop.eup %6732  ;;  %v5596_v50 = vadd.f32 %v5565_v34, %v11182_v40  ;;  %v5447_v40 = vand.u32 2147483648, %v10831_v26 }
0x1274   : > { %v6735_v37 = vpop.eup %6734  ;;  %v5627_v36 = vmul.f32 %v6733_v61, %v5619_v17 }
0x1275   : > { %6738 = vtanh.f32 %v5596_v50  ;;  %v10854_v44 = vadd.f32 1.0, %v6735_v37  ;;  %v10861_v11 = vpop.eup %6736  ;;  %v5445_v50 = vand.u32 2147483647, %v10831_v26  ;;  %v5448_v28 = vor.u32 1.1754944e-38, %v5447_v40 }
0x1276   : > { %6740 = vpow2.f32 %v6146_v12  ;;  %v5635_v10 = vadd.f32 %v5627_v36, %v5611_v21  ;;  %v5437_v7 = vmul.f32 %v10861_v11, %v10831_v26  ;;  %v5429_v12 = vsel %vm5428_vm4, %v10836_v51, %v5425_v45 }
0x1277   : > { %6742 = vrcp.f32 %v10854_v44  ;;  %v5434_v61 = vsel %vm5431_vm8, %v5433_v42, %v5429_v12  ;;  %vm5442_vm0 = vweird.f32 %v10861_v11  ;;  %vm5446_vm9 = vcmp.eq.f32.partialorder %v5445_v50, 8.507059e+37  ;;  %v11189_v42 = vld [vmem:[#allocation96_spill] sm:$0xff] }
0x1278   : > { %5643 = vst [vmem:[%s10856_s30] sm:$0xff] %v5635_v10  ;;  %v5438_v62 = vsub.f32 1.0, %v5437_v7  ;;  %v5622_v51 = vsub.f32 1.0, %v5434_v61  ;;  %v5614_v36 = vmul.f32 %v5434_v61, %v10551_v56  ;;  %vm5443_vm5 = vmor %vm5441_vm15, %vm5442_vm0  ;;  %vm5456_vm10 = vweird.f32 %v10854_v44 }
0x127a   : > { %v5568_v1 = vpop.f32.mrf.mxu1  ;;  %v5439_v17 = vmul.f32 %v10861_v11, %v5438_v62 }
0x127b   : > { %v6739_v9 = vpop.eup %6738  ;;  %v5597_v60 = vadd.f32 %v5568_v1, %v11184_v18 }
0x127c   : > { %v6741_v24 = vpop.eup %6740  ;;  %v5628_v0 = vmul.f32 %v6739_v9, %v5620_v3  ;;  %v5440_v47 = vadd.f32 %v10861_v11, %v5439_v17 }
0x127d   : > { %6744 = vtanh.f32 %v5597_v60  ;;  %v10873_v15 = vadd.f32 1.0, %v6741_v24  ;;  %v10878_v4 = vpop.eup %6742 }
0x127e   : > { %6746 = vpow2.f32 %v6147_v41  ;;  %v5636_v25 = vadd.f32 %v5628_v0, %v5612_v8  ;;  %v5452_v13 = vmul.f32 %v10878_v4, %v10854_v44  ;;  %v5444_v63 = vsel %vm5443_vm5, %v10861_v11, %v5440_v47  ;;  %v11187_v8 = vld [vmem:[#allocation94_spill] sm:$0xff] }
0x127f   : > { %6748 = vrcp.f32 %v10873_v15  ;;  %v5449_v22 = vsel %vm5446_vm9, %v5448_v28, %v5444_v63  ;;  %vm5457_vm6 = vweird.f32 %v10878_v4  ;;  %v5462_v41 = vand.u32 2147483648, %v10854_v44 }
0x1280   : > { %5644 = vst [vmem:[%s10856_s30 + $0x8] sm:$0xff] %v5636_v25  ;;  %v5453_v43 = vsub.f32 1.0, %v5452_v13  ;;  %v5623_v3 = vsub.f32 1.0, %v5449_v22  ;;  %v5460_v11 = vand.u32 2147483647, %v10854_v44  ;;  %v5615_v9 = vmul.f32 %v5449_v22, %v10565_v46  ;;  %vm5458_vm11 = vmor %vm5456_vm10, %vm5457_vm6 }
0x1281   : > { %v5463_v14 = vor.u32 1.1754944e-38, %v5462_v41  ;;  %v5477_v46 = vand.u32 2147483648, %v10873_v15  ;;  %vm5471_vm13 = vweird.f32 %v10873_v15  ;;  %v5475_v62 = vand.u32 2147483647, %v10873_v15 }
0x1282   : > { %v5571_v38 = vpop.f32.mrf.mxu1  ;;  %v5454_v10 = vmul.f32 %v10878_v4, %v5453_v43  ;;  %vm5461_vm7 = vcmp.eq.f32.partialorder %v5460_v11, 8.507059e+37 }
0x1283   : > { %v6745_v31 = vpop.eup %6744  ;;  %v5598_v55 = vadd.f32 %v5571_v38, %v11185_v59  ;;  %v5478_v59 = vor.u32 1.1754944e-38, %v5477_v46  ;;  %vm5476_vm2 = vcmp.eq.f32.partialorder %v5475_v62, 8.507059e+37 }
0x1284   : > { %v6747_v57 = vpop.eup %6746  ;;  %v5629_v5 = vmul.f32 %v6745_v31, %v5621_v53  ;;  %v5455_v56 = vadd.f32 %v10878_v4, %v5454_v10 }
0x1285   : > { %6750 = vtanh.f32 %v5598_v55  ;;  %v10890_v34 = vadd.f32 1.0, %v6747_v57  ;;  %v10895_v21 = vpop.eup %6748 }
0x1286   : > { %v5637_v20 = vadd.f32 %v5629_v5, %v5613_v35  ;;  %v5467_v52 = vmul.f32 %v10895_v21, %v10873_v15  ;;  %v5459_v7 = vsel %vm5458_vm11, %v10878_v4, %v5455_v56  ;;  %vm5472_vm12 = vweird.f32 %v10895_v21 }
0x1287   : > { %6752 = vrcp.f32 %v10890_v34  ;;  %v5464_v44 = vsel %vm5461_vm7, %v5463_v14, %v5459_v7  ;;  %vm5473_vm1 = vmor %vm5471_vm13, %vm5472_vm12  ;;  %v5492_v15 = vand.u32 2147483648, %v10890_v34  ;;  %vm5486_vm14 = vweird.f32 %v10890_v34 }
0x1288   : > { %5645 = vst [vmem:[%s10856_s30 + $0x10] sm:$0xff] %v5637_v20  ;;  %v5468_v33 = vsub.f32 1.0, %v5467_v52  ;;  %v5624_v19 = vsub.f32 1.0, %v5464_v44  ;;  %v5616_v58 = vmul.f32 %v5464_v44, %v10577_v54  ;;  %v5490_v54 = vand.u32 2147483647, %v10890_v34 }
0x128a   : > { %v5574_v37 = vpop.f32.mrf.mxu1  ;;  %v5469_v0 = vmul.f32 %v10895_v21, %v5468_v33  ;;  %vm5491_vm8 = vcmp.eq.f32.partialorder %v5490_v54, 8.507059e+37 }
0x128b   : > { %v6751_v39 = vpop.eup %6750  ;;  %v5599_v49 = vadd.f32 %v5574_v37, %v11186_v48 }
0x128c   : > { %v5630_v29 = vmul.f32 %v6751_v39, %v5622_v51  ;;  %v5470_v25 = vadd.f32 %v10895_v21, %v5469_v0 }
0x128d   : > { %6754 = vtanh.f32 %v5599_v49  ;;  %v6753_v23 = vpop.eup %6752 }
0x128e   : > { %v5638_v26 = vadd.f32 %v5630_v29, %v5614_v36  ;;  %v5482_v60 = vmul.f32 %v6753_v23, %v10890_v34  ;;  %v5474_v31 = vsel %vm5473_vm1, %v10895_v21, %v5470_v25  ;;  %vm5487_vm3 = vweird.f32 %v6753_v23 }
0x128f   : > { %v5479_v57 = vsel %vm5476_vm2, %v5478_v59, %v5474_v31  ;;  %vm5488_vm4 = vmor %vm5486_vm14, %vm5487_vm3  ;;  %v5493_v21 = vor.u32 1.1754944e-38, %v5492_v15 }
0x1290   : > { %5646 = vst [vmem:[%s10856_s30 + $0x18] sm:$0xff] %v5638_v26  ;;  %v5483_v2 = vsub.f32 1.0, %v5482_v60  ;;  %v5625_v5 = vsub.f32 1.0, %v5479_v57  ;;  %v5617_v61 = vmul.f32 %v5479_v57, %v10586_v32 }
0x1292   : > { %v5577_v27 = vpop.f32.mrf.mxu1  ;;  %v5484_v35 = vmul.f32 %v6753_v23, %v5483_v2 }
0x1293   : > { %v6755_v1 = vpop.eup %6754  ;;  %v5600_v18 = vadd.f32 %v5577_v27, %v11187_v8 }
0x1294   : > { %v5631_v24 = vmul.f32 %v6755_v1, %v5623_v3  ;;  %v5485_v13 = vadd.f32 %v6753_v23, %v5484_v35 }
0x1295   : > { %6756 = vtanh.f32 %v5600_v18 }
0x1296   : > { %v5639_v6 = vadd.f32 %v5631_v24, %v5615_v9  ;;  %v5489_v47 = vsel %vm5488_vm4, %v6753_v23, %v5485_v13 }
0x1297   : > { %v5494_v51 = vsel %vm5491_vm8, %v5493_v21, %v5489_v47 }
0x1298   : > { %5647 = vst [vmem:[%s10856_s30 + $0x20] sm:$0xff] %v5639_v6  ;;  %v5626_v34 = vsub.f32 1.0, %v5494_v51  ;;  %v5618_v32 = vmul.f32 %v5494_v51, %v10591_v16 }
0x129a   : > { %v5580_v45 = vpop.f32.mrf.mxu1 }
0x129b   : > { %v6757_v4 = vpop.eup %6756  ;;  %v5601_v53 = vadd.f32 %v5580_v45, %v11188_v30 }
0x129c   : > { %v5632_v38 = vmul.f32 %v6757_v4, %v5624_v19 }
0x129d   : > { %6758 = vtanh.f32 %v5601_v53 }
0x129e   : > { %v5640_v55 = vadd.f32 %v5632_v38, %v5616_v58 }
0x12a0   : > { %5648 = vst [vmem:[%s10856_s30 + $0x28] sm:$0xff] %v5640_v55 }
0x12a2   : > { %v5583_v12 = vpop.f32.mrf.mxu1 }
0x12a3   : > { %v6759_v17 = vpop.eup %6758  ;;  %v5602_v20 = vadd.f32 %v5583_v12, %v11189_v42 }
0x12a4   : > { %v5633_v43 = vmul.f32 %v6759_v17, %v5625_v5 }
0x12a5   : > { %6760 = vtanh.f32 %v5602_v20 }
0x12a6   : > { %v5641_v40 = vadd.f32 %v5633_v43, %v5617_v61 }
0x12a8   : > { %5649 = vst [vmem:[%s10856_s30 + $0x30] sm:$0xff] %v5641_v40 }
0x12ab   : > { %v6761_v50 = vpop.eup %6760 }
0x12ac   : > { %v5634_v37 = vmul.f32 %v6761_v50, %v5626_v34 }
0x12ae   : > { %v5642_v39 = vadd.f32 %v5634_v37, %v5618_v32 }
0x12b0   : > { %5650 = vst [vmem:[%s10856_s30 + $0x38] sm:$0xff] %v5642_v39 }
0x12b1   : > { %7359 = shalt.err (!%p7356_p8)
}
0x12b2   : > { %s7424_s8 = smov 128   ;;  %s7425_s23 = smov 8  }
0x12b3   : > { %6193 = dma.vmem_to_hbm [thread:$0]  (%p7534_p5), %s5666_s21, 1024, %s5668_s22, %s5652_s29, %s7424_s8, %s7424_s8, %s7425_s23  }
0x12b4 PF: > { %s11190_s14 = sld [smem:[#allocation25_spill]] }
0x12b5   : > { %s11191_s19 = sld [smem:[#allocation23_spill]] }
0x12ba   : > { %p6235_p9 = scmp.ge.s32.totalorder %s11190_s14, 2 }
0x12bb   : > { %s5682_s1 = sand.u32 1, %s11191_s19  }
0x12bc   : > { %p6218_p10 = pnand %p6235_p9, %p7538_p6  ;;  %s5683_s11 = scalar_lea.sflag [#allocation7], %s5682_s1 }
0x12be   : > { %p6219_p11 = pneg %p6218_p10 }
0x12c0   : > { %7393 = dma.done.wait (%p6219_p11), %s5683_s11, 1024  }
0x12c1   : > { %7395 = vsyncadd (%p6219_p11), %s5683_s11, 4294966272  ;;  %s11193_s28 = sld [smem:[#allocation26_spill]]  ;;  %s11196_s25 = smov %s7402_s26 }
0x12c2   : > { %s11194_s20 = sld [smem:[#allocation24_spill]] }
0x12c3   : > { %s11195_s27 = sld [smem:[#allocation27_spill]] }
0x12c7   : > { %p27_p12 = scmp.ge.s32.totalorder %s11193_s28, 4  }
0x12c8   : > { %s11197_s26 = smov %s11194_s20 }
0x12c9   :  { %29 = sbr.rel (!%p27_p12) target bundleno = 12 (0xc), region = 151 }
0x12ce   :  { %5689 = vsyncpa [#allocation6], 1 }
0x12cf   :  { %5691 = vsyncpa [#allocation6 + $0x1], 1 }
0x12d0   :  { %5692 = vsyncpa [#allocation9], 1 }
0x12d1   :  { %5693 = vsyncpa [#allocation12], 1 }
0x12d2   :  { %5694 = vsyncpa [#allocation15], 1 }
0x12d3   :  { %5695 = vsyncpa [#allocation7], 1 }
0x12d4   :  { %5697 = vsyncpa [#allocation7 + $0x1], 1 }

</bundles_post_ra>
